<compile_context>
chip_gen: v7x
topology: tpu7x:2x2x1
jax: 0.10.0
libtpu: 0.0.40
codegen_flags: <defaults>
</compile_context>

<pallas_src>
import functools

import jax
import jax.numpy as jnp
from jax import lax
from jax.experimental import pallas as pl
from jax.experimental.pallas import tpu as pltpu


# ----------------------------------------------------------------------------
# Fused Pallas kernel: 2-layer bi-GRU + mean pool + fc1 + fc2
# ----------------------------------------------------------------------------
def _fused_gru_model_kernel(*refs, T, B, H, num_layers, acc_precision):
    """All refs live in VMEM.  Argument layout:
      refs[0]            lengths   (B, 1)      f32
      refs[1]            x         (T*B, D0)   mm_dtype   (time-major, flat)
      refs[2 : 2+8L]     per layer l, per direction (fwd then rev):
                           w_ih    (D_l, 3H)   mm_dtype
                           w_hh    (H, 3H)     mm_dtype
                           bias_gi (1, 3H)     f32  (= b_ih + [b_hh_r, b_hh_z, 0])
                           b_hn    (1, H)      f32
      next 5             w1_f (H,H), w1_b (H,H), b1 (1,H), w2 (H,1), b2 (1,1)
      next 1             out (B, 1) f32                                 [output]
      last 4             gi_f (T*B,3H) f32, gi_b (T*B,3H) f32,
                         f_out (T*B,H) mm, b_out (T*B,H) mm             [scratch]
    """
    n_w = 8 * num_layers
    len_ref, x_ref = refs[0], refs[1]
    w_refs = refs[2:2 + n_w]
    w1f_ref, w1b_ref, b1_ref, w2_ref, b2_ref = refs[2 + n_w:2 + n_w + 5]
    out_ref = refs[2 + n_w + 5]
    gi_f_scr, gi_b_scr, f_scr, b_scr = refs[2 + n_w + 6:]

    f32 = jnp.float32

    def mm(a, b):
        return jnp.dot(a, b, precision=acc_precision,
                       preferred_element_type=f32)

    lengths = len_ref[...]                                    # (B, 1) f32
    # Hoisted once; per-step masks are then a single compare + vselect.
    len_b = jnp.broadcast_to(lengths, (B, H))                 # (B, H) f32

    def gru_step(gi_t, h, whh_ref, bhn_ref):
        # Ref-resident weights, loaded adjacent to their use (review item).
        # TODO(synk): hold W_hh in MXU staging registers across the T steps
        #             via pltpu.matmul_push_rhs / matmul_acc_lhs / matmul_pop.
        gh = mm(h.astype(whh_ref.dtype), whh_ref[...])        # (B, 3H)
        r = jax.nn.sigmoid(gi_t[:, 0:H] + gh[:, 0:H])
        z = jax.nn.sigmoid(gi_t[:, H:2 * H] + gh[:, H:2 * H])
        # b_hn must stay inside r * (...); b_hr / b_hz are folded into gi.
        n = jnp.tanh(gi_t[:, 2 * H:3 * H] + r * (gh[:, 2 * H:3 * H] + bhn_ref[...]))
        return (1.0 - z) * n + z * h

    pool_f = pool_b = None

    for l in range(num_layers):
        base = 8 * l
        wif_ref, whf_ref, bgf_ref, bnf_ref = w_refs[base:base + 4]
        wib_ref, whb_ref, bgb_ref, bnb_ref = w_refs[base + 4:base + 8]

        # ---- hoisted input projection (one big MXU matmul per direction) ----
        if l == 0:
            xin = x_ref[...]                                  # (T*B, D0)
            gi_f_scr[...] = mm(xin, wif_ref[...]) + bgf_ref[...]
            gi_b_scr[...] = mm(xin, wib_ref[...]) + bgb_ref[...]
        else:
            pf = f_scr[...]                                   # (T*B, H) fwd half
            pb = b_scr[...]                                   # (T*B, H) bwd half
            gi_f_scr[...] = (mm(pf, wif_ref[pl.ds(0, H), :])
                             + mm(pb, wif_ref[pl.ds(H, H), :]) + bgf_ref[...])
            gi_b_scr[...] = (mm(pf, wib_ref[pl.ds(0, H), :])
                             + mm(pb, wib_ref[pl.ds(H, H), :]) + bgb_ref[...])

        is_last = l == num_layers - 1
        h_f = jnp.zeros((B, H), f32)
        h_b = jnp.zeros((B, H), f32)
        if is_last:
            pool_f = jnp.zeros((B, H), f32)
            pool_b = jnp.zeros((B, H), f32)

        # ---- fused fwd/bwd recurrence, fully unrolled over static T --------
        # TODO(synk): lax.fori_loop(..., unroll=4) once T grows beyond ~16.
        for i in range(T):
            tf, tb = i, T - 1 - i
            valid_f = len_b > float(tf)                       # (B, H) bool
            valid_b = len_b > float(tb)

            # slabs start at statically-known, 8-sublane-aligned offsets
            gif_t = gi_f_scr[pl.ds(tf * B, B), :]             # (B, 3H)
            gib_t = gi_b_scr[pl.ds(tb * B, B), :]             # (B, 3H)

            hf_new = gru_step(gif_t, h_f, whf_ref, bnf_ref)
            hb_new = gru_step(gib_t, h_b, whb_ref, bnb_ref)

            # packed-sequence semantics: freeze h and zero the output at
            # padded positions (single vselect each).
            h_f = jnp.where(valid_f, hf_new, h_f)
            h_b = jnp.where(valid_b, hb_new, h_b)
            of = jnp.where(valid_f, h_f, 0.0)
            ob = jnp.where(valid_b, h_b, 0.0)

            if is_last:
                # temporal mean-pool fused into the recurrence; the (T,B,2H)
                # last-layer output is never materialized.
                pool_f = pool_f + of
                pool_b = pool_b + ob
            else:
                f_scr[pl.ds(tf * B, B), :] = of.astype(f_scr.dtype)
                b_scr[pl.ds(tb * B, B), :] = ob.astype(b_scr.dtype)

    # ---- head: mean over max(lengths), fc1, (dropout = id), fc2 ------------
    inv_t = 1.0 / jnp.maximum(jnp.max(lengths), 1.0)
    pf = pool_f * inv_t
    pb = pool_b * inv_t
    h1 = (mm(pf.astype(w1f_ref.dtype), w1f_ref[...])
          + mm(pb.astype(w1b_ref.dtype), w1b_ref[...])
          + b1_ref[...])
    # TODO(synk): nn.Dropout is identity in eval mode; no op emitted here.
    out = mm(h1.astype(w2_ref.dtype), w2_ref[...]) + b2_ref[...]
    out_ref[...] = out.astype(out_ref.dtype)


# ----------------------------------------------------------------------------
# Wrapper
# ----------------------------------------------------------------------------
def gru_model_forward(x, lengths, params, hidden, num_layers, *,
                      mm_dtype=jnp.bfloat16):
    """x: (B, T, D_in) f32, lengths: (B,) int -> (B, 1) f32.

    mm_dtype: dtype of the MXU matmul operands (weights / activations); gate
    math and accumulation are always f32.  The f32 path uses Precision.HIGHEST
    so it can be compared tightly against the pure-JAX reference.
    """
    B, T, D_in = x.shape
    H = hidden
    f32 = jnp.float32
    mm_dtype = jnp.dtype(mm_dtype)
    acc_precision = (lax.Precision.HIGHEST
                     if mm_dtype == jnp.dtype(jnp.float32) else None)

    # sublane-align the batch so every per-timestep slab of the scratch
    # buffers starts on an 8-sublane boundary (review alignment item).
    B_pad = max(8, -(-B // 8) * 8)

    # time-major, batch-padded, flattened to (T*B_pad, D_in) so the hoisted
    # input projection is a single 2-D matmul inside the kernel.
    x_tm = jnp.transpose(x, (1, 0, 2)).astype(f32)
    x_tm = jnp.pad(x_tm, ((0, 0), (0, B_pad - B), (0, 0)))
    x2d = x_tm.reshape(T * B_pad, D_in).astype(mm_dtype)

    # padded batch rows get length 0 -> always masked -> contribute nothing.
    len2d = jnp.pad(lengths.astype(f32), (0, B_pad - B)).reshape(B_pad, 1)

    args = [len2d, x2d]
    for l in range(num_layers):
        for sfx in ('', '_rev'):
            w_ih = params[f'w_ih_l{l}{sfx}']                    # (3H, D_l)
            w_hh = params[f'w_hh_l{l}{sfx}']                    # (3H, H)
            b_ih = params[f'b_ih_l{l}{sfx}'].astype(f32)        # (3H,)
            b_hh = params[f'b_hh_l{l}{sfx}'].astype(f32)        # (3H,)
            # fold the r/z components of b_hh into the hoisted projection bias;
            # the n component must stay inside  r * (W_hn h + b_hn).
            bias_gi = b_ih + jnp.concatenate(
                [b_hh[:2 * H], jnp.zeros((H,), f32)])
            args.append(w_ih.T.astype(mm_dtype))                # (D_l, 3H)
            args.append(w_hh.T.astype(mm_dtype))                # (H, 3H)
            args.append(bias_gi.reshape(1, 3 * H))              # (1, 3H) f32
            args.append(b_hh[2 * H:].reshape(1, H))             # (1, H)  f32
    w_fc1 = params['w_fc1']                                     # (H, 2H)
    args += [
        w_fc1[:, :H].T.astype(mm_dtype),                        # (H, H) fwd half
        w_fc1[:, H:].T.astype(mm_dtype),                        # (H, H) bwd half
        params['b_fc1'].reshape(1, H).astype(f32),              # (1, H)
        params['w_fc2'].T.astype(mm_dtype),                     # (H, 1)
        params['b_fc2'].reshape(1, 1).astype(f32),              # (1, 1)
    ]

    scratch_shapes = [
        pltpu.VMEM((T * B_pad, 3 * H), f32),        # gi fwd (reused per layer)
        pltpu.VMEM((T * B_pad, 3 * H), f32),        # gi bwd (reused per layer)
        pltpu.VMEM((T * B_pad, H), mm_dtype),       # layer output, fwd half
        pltpu.VMEM((T * B_pad, H), mm_dtype),       # layer output, bwd half
    ]

    # Explicit VMEM budget (review item): everything is resident once (no
    # grid), footprint = inputs + output + scratch (~32*T*B*H bytes in f32).
    total_bytes = sum(int(a.size) * a.dtype.itemsize for a in args) + B_pad * 4
    total_bytes += 2 * T * B_pad * 3 * H * 4
    total_bytes += 2 * T * B_pad * H * mm_dtype.itemsize
    vmem_limit = max(32 << 20, min(2 * total_bytes + (4 << 20), 96 << 20))

    kernel = functools.partial(
        _fused_gru_model_kernel, T=T, B=B_pad, H=H,
        num_layers=num_layers, acc_precision=acc_precision)
    vmem = pl.BlockSpec(memory_space=pltpu.MemorySpace.VMEM)
    out = pl.pallas_call(
        kernel,
        out_shape=jax.ShapeDtypeStruct((B_pad, 1), f32),
        in_specs=[vmem] * len(args),
        out_specs=vmem,
        scratch_shapes=scratch_shapes,
        compiler_params=pltpu.CompilerParams(vmem_limit_bytes=vmem_limit),
    )(*args)
    return out[:B]


# ----------------------------------------------------------------------------
# Pure-JAX reference (same math, HIGHEST-precision matmuls, no Pallas)
# ----------------------------------------------------------------------------
def _gru_dir_ref(x_tbd, mask, w_ih, w_hh, b_ih, b_hh, H, reverse):
    P = lax.Precision.HIGHEST
    T, B, _ = x_tbd.shape
    h = jnp.zeros((B, H), jnp.float32)
    outs = [None] * T
    order = range(T - 1, -1, -1) if reverse else range(T)
    for t in order:
        xt, m = x_tbd[t], mask[t]
        gi = jnp.dot(xt, w_ih.T, precision=P) + b_ih
        gh = jnp.dot(h, w_hh.T, precision=P) + b_hh
        r = jax.nn.sigmoid(gi[:, :H] + gh[:, :H])
        z = jax.nn.sigmoid(gi[:, H:2 * H] + gh[:, H:2 * H])
        n = jnp.tanh(gi[:, 2 * H:] + r * gh[:, 2 * H:])
        h_new = (1.0 - z) * n + z * h
        h = m * h_new + (1.0 - m) * h
        outs[t] = m * h
    return jnp.stack(outs, axis=0)


def gru_model_ref(x, lengths, params, hidden, num_layers):
    P = lax.Precision.HIGHEST
    B, T, _ = x.shape
    x_t = jnp.transpose(x, (1, 0, 2)).astype(jnp.float32)
    mask = (jnp.arange(T)[:, None] < lengths[None, :]).astype(jnp.float32)[:, :, None]
    layer_in = x_t
    for layer in range(num_layers):
        fwd = _gru_dir_ref(layer_in, mask, params[f'w_ih_l{layer}'],
                           params[f'w_hh_l{layer}'], params[f'b_ih_l{layer}'],
                           params[f'b_hh_l{layer}'], hidden, False)
        bwd = _gru_dir_ref(layer_in, mask, params[f'w_ih_l{layer}_rev'],
                           params[f'w_hh_l{layer}_rev'], params[f'b_ih_l{layer}_rev'],
                           params[f'b_hh_l{layer}_rev'], hidden, True)
        layer_in = jnp.concatenate([fwd, bwd], axis=-1)
    denom = jnp.maximum(jnp.max(lengths).astype(jnp.float32), 1.0)
    pooled = jnp.sum(layer_in, axis=0) / denom
    h1 = jnp.dot(pooled, params['w_fc1'].T, precision=P) + params['b_fc1']
    return jnp.dot(h1, params['w_fc2'].T, precision=P) + params['b_fc2']


# ----------------------------------------------------------------------------
# Deterministic parameter init (PyTorch-style uniform ranges)
# ----------------------------------------------------------------------------
def init_params(key, input_size, hidden, num_layers):
    params = {}
    keys = iter(jax.random.split(key, 64))
    k_gru = 1.0 / float(hidden) ** 0.5

    def u(shape, k):
        return jax.random.uniform(next(keys), shape, jnp.float32, -k, k)

    for layer in range(num_layers):
        d_in = input_size if layer == 0 else 2 * hidden
        for suffix in ('', '_rev'):
            params[f'w_ih_l{layer}{suffix}'] = u((3 * hidden, d_in), k_gru)
            params[f'w_hh_l{layer}{suffix}'] = u((3 * hidden, hidden), k_gru)
            params[f'b_ih_l{layer}{suffix}'] = u((3 * hidden,), k_gru)
            params[f'b_hh_l{layer}{suffix}'] = u((3 * hidden,), k_gru)

    k1 = 1.0 / float(2 * hidden) ** 0.5
    params['w_fc1'] = u((hidden, 2 * hidden), k1)
    params['b_fc1'] = u((hidden,), k1)
    k2 = 1.0 / float(hidden) ** 0.5
    params['w_fc2'] = u((1, hidden), k2)
    params['b_fc2'] = u((1,), k2)
    return params


# ----------------------------------------------------------------------------
if __name__ == "__main__":
    B, T, D_IN, HIDDEN, NUM_LAYERS = 2, 8, 4, 32, 2

    key = jax.random.PRNGKey(0)
    k_x, k_p = jax.random.split(key)
    x = jax.random.normal(k_x, (B, T, D_IN), jnp.float32)
    lengths = jnp.array([8, 5], dtype=jnp.int32)   # max(lengths) == T

    params = init_params(k_p, D_IN, HIDDEN, NUM_LAYERS)

    ref = jax.block_until_ready(gru_model_ref(x, lengths, params, HIDDEN, NUM_LAYERS))

    # Exactness check (review concern): f32 matmul path at HIGHEST precision
    # vs the pure-JAX reference, at a tight tolerance.
    out_f32 = jax.block_until_ready(
        gru_model_forward(x, lengths, params, HIDDEN, NUM_LAYERS,
                          mm_dtype=jnp.float32))
    assert out_f32.shape == (B, 1)
    assert jnp.allclose(out_f32, ref, rtol=1e-4, atol=1e-4), (out_f32, ref)

    # Performance configuration (review item): bf16 matmul operands,
    # f32 gate math / accumulation.
    out_bf16 = jax.block_until_ready(
        gru_model_forward(x, lengths, params, HIDDEN, NUM_LAYERS,
                          mm_dtype=jnp.bfloat16))
    assert out_bf16.shape == (B, 1)
    assert jnp.allclose(out_bf16, ref, rtol=2e-2, atol=2e-2), (out_bf16, ref)

    print("KERNEL_OK")
</pallas_src>

<mosaic_0001>
module attributes {stable_mosaic.version = 11 : i64} {
  func.func @_fused_gru_model_kernel(%arg0: memref<8x1xf32, #tpu.memory_space<vmem>>, %arg1: memref<64x4xf32, #tpu.memory_space<vmem>>, %arg2: memref<4x96xf32, #tpu.memory_space<vmem>>, %arg3: memref<32x96xf32, #tpu.memory_space<vmem>>, %arg4: memref<1x96xf32, #tpu.memory_space<vmem>>, %arg5: memref<1x32xf32, #tpu.memory_space<vmem>>, %arg6: memref<4x96xf32, #tpu.memory_space<vmem>>, %arg7: memref<32x96xf32, #tpu.memory_space<vmem>>, %arg8: memref<1x96xf32, #tpu.memory_space<vmem>>, %arg9: memref<1x32xf32, #tpu.memory_space<vmem>>, %arg10: memref<64x96xf32, #tpu.memory_space<vmem>>, %arg11: memref<32x96xf32, #tpu.memory_space<vmem>>, %arg12: memref<1x96xf32, #tpu.memory_space<vmem>>, %arg13: memref<1x32xf32, #tpu.memory_space<vmem>>, %arg14: memref<64x96xf32, #tpu.memory_space<vmem>>, %arg15: memref<32x96xf32, #tpu.memory_space<vmem>>, %arg16: memref<1x96xf32, #tpu.memory_space<vmem>>, %arg17: memref<1x32xf32, #tpu.memory_space<vmem>>, %arg18: memref<32x32xf32, #tpu.memory_space<vmem>>, %arg19: memref<32x32xf32, #tpu.memory_space<vmem>>, %arg20: memref<1x32xf32, #tpu.memory_space<vmem>>, %arg21: memref<32x1xf32, #tpu.memory_space<vmem>>, %arg22: memref<1x1xf32, #tpu.memory_space<vmem>>, %arg23: memref<8x1xf32, #tpu.memory_space<vmem>>, %arg24: memref<64x96xf32, #tpu.memory_space<vmem>>, %arg25: memref<64x96xf32, #tpu.memory_space<vmem>>, %arg26: memref<64x32xf32, #tpu.memory_space<vmem>>, %arg27: memref<64x32xf32, #tpu.memory_space<vmem>>) attributes {dimension_semantics = [], scalar_prefetch = 0 : i64, scratch_operands = 4 : i64, tpu.core_type = #tpu.core_type<tc>} {
    %c0 = arith.constant 0 : index
    %c0_0 = arith.constant 0 : index
    %0 = vector.load %arg0[%c0, %c0_0] : memref<8x1xf32, #tpu.memory_space<vmem>>, vector<8x1xf32>
    %1 = vector.shape_cast %0 : vector<8x1xf32> to vector<8x1xf32>
    %2 = vector.broadcast %1 : vector<8x1xf32> to vector<8x32xf32>
    %c0_1 = arith.constant 0 : index
    %c0_2 = arith.constant 0 : index
    %3 = vector.load %arg1[%c0_1, %c0_2] : memref<64x4xf32, #tpu.memory_space<vmem>>, vector<64x4xf32>
    %c0_3 = arith.constant 0 : index
    %c0_4 = arith.constant 0 : index
    %4 = vector.load %arg2[%c0_3, %c0_4] : memref<4x96xf32, #tpu.memory_space<vmem>>, vector<4x96xf32>
    %cst = arith.constant dense<0.000000e+00> : vector<64x96xf32>
    %5 = tpu.matmul %3, %4, %cst {dimension_numbers = #tpu.dot_dimension_numbers<[1], [0], [0], [1], [0, 0, 1, 1], [], []>, precision = #tpu.contract_precision<fp32>} : vector<64x4xf32>, vector<4x96xf32>, vector<64x96xf32> -> vector<64x96xf32>
    %c0_5 = arith.constant 0 : index
    %c0_6 = arith.constant 0 : index
    %6 = vector.load %arg4[%c0_5, %c0_6] : memref<1x96xf32, #tpu.memory_space<vmem>>, vector<1x96xf32>
    %7 = vector.broadcast %6 : vector<1x96xf32> to vector<64x96xf32>
    %8 = arith.addf %5, %7 : vector<64x96xf32>
    %c0_7 = arith.constant 0 : index
    %c0_8 = arith.constant 0 : index
    %9 = vector.load %arg24[%c0_7, %c0_8] : memref<64x96xf32, #tpu.memory_space<vmem>>, vector<64x96xf32>
    tpu.vector_store %arg24[%c0_7, %c0_8], %8 {strides = array<i32>} : memref<64x96xf32, #tpu.memory_space<vmem>>, vector<64x96xf32>,
    %c0_9 = arith.constant 0 : index
    %c0_10 = arith.constant 0 : index
    %10 = vector.load %arg6[%c0_9, %c0_10] : memref<4x96xf32, #tpu.memory_space<vmem>>, vector<4x96xf32>
    %cst_11 = arith.constant dense<0.000000e+00> : vector<64x96xf32>
    %11 = tpu.matmul %3, %10, %cst_11 {dimension_numbers = #tpu.dot_dimension_numbers<[1], [0], [0], [1], [0, 0, 1, 1], [], []>, precision = #tpu.contract_precision<fp32>} : vector<64x4xf32>, vector<4x96xf32>, vector<64x96xf32> -> vector<64x96xf32>
    %c0_12 = arith.constant 0 : index
    %c0_13 = arith.constant 0 : index
    %12 = vector.load %arg8[%c0_12, %c0_13] : memref<1x96xf32, #tpu.memory_space<vmem>>, vector<1x96xf32>
    %13 = vector.broadcast %12 : vector<1x96xf32> to vector<64x96xf32>
    %14 = arith.addf %11, %13 : vector<64x96xf32>
    %c0_14 = arith.constant 0 : index
    %c0_15 = arith.constant 0 : index
    %15 = vector.load %arg25[%c0_14, %c0_15] : memref<64x96xf32, #tpu.memory_space<vmem>>, vector<64x96xf32>
    tpu.vector_store %arg25[%c0_14, %c0_15], %14 {strides = array<i32>} : memref<64x96xf32, #tpu.memory_space<vmem>>, vector<64x96xf32>,
    %cst_16 = arith.constant 0.000000e+00 : f32
    %16 = vector.broadcast %cst_16 : f32 to vector<8x32xf32>
    %cst_17 = arith.constant 0.000000e+00 : f32
    %17 = vector.broadcast %cst_17 : f32 to vector<8x32xf32>
    %cst_18 = arith.constant 0.000000e+00 : f32
    %18 = vector.broadcast %cst_18 : f32 to vector<8x32xf32>
    %19 = arith.cmpf ogt, %2, %18 : vector<8x32xf32>
    %cst_19 = arith.constant 7.000000e+00 : f32
    %20 = vector.broadcast %cst_19 : f32 to vector<8x32xf32>
    %21 = arith.cmpf ogt, %2, %20 : vector<8x32xf32>
    %c0_20 = arith.constant 0 : index
    %c0_21 = arith.constant 0 : index
    %22 = vector.load %arg24[%c0_20, %c0_21] : memref<64x96xf32, #tpu.memory_space<vmem>>, vector<8x96xf32>
    %c56 = arith.constant 56 : index
    %c0_22 = arith.constant 0 : index
    %23 = vector.load %arg25[%c56, %c0_22] : memref<64x96xf32, #tpu.memory_space<vmem>>, vector<8x96xf32>
    %c0_23 = arith.constant 0 : index
    %c0_24 = arith.constant 0 : index
    %24 = vector.load %arg3[%c0_23, %c0_24] : memref<32x96xf32, #tpu.memory_space<vmem>>, vector<32x96xf32>
    %cst_25 = arith.constant dense<0.000000e+00> : vector<8x96xf32>
    %25 = tpu.matmul %16, %24, %cst_25 {dimension_numbers = #tpu.dot_dimension_numbers<[1], [0], [0], [1], [0, 0, 1, 1], [], []>, precision = #tpu.contract_precision<fp32>} : vector<8x32xf32>, vector<32x96xf32>, vector<8x96xf32> -> vector<8x96xf32>
    %26 = vector.extract_strided_slice %22 {offsets = [0, 0], sizes = [8, 32], strides = [1, 1]} : vector<8x96xf32> to vector<8x32xf32>
    %27 = vector.extract_strided_slice %25 {offsets = [0, 0], sizes = [8, 32], strides = [1, 1]} : vector<8x96xf32> to vector<8x32xf32>
    %28 = arith.addf %26, %27 : vector<8x32xf32>
    %29 = arith.negf %28 : vector<8x32xf32>
    %30 = math.exp %29 : vector<8x32xf32>
    %cst_26 = arith.constant 1.000000e+00 : f32
    %31 = vector.broadcast %cst_26 : f32 to vector<8x32xf32>
    %32 = arith.addf %31, %30 : vector<8x32xf32>
    %33 = arith.divf %31, %32 : vector<8x32xf32>
    %34 = vector.extract_strided_slice %22 {offsets = [0, 32], sizes = [8, 32], strides = [1, 1]} : vector<8x96xf32> to vector<8x32xf32>
    %35 = vector.extract_strided_slice %25 {offsets = [0, 32], sizes = [8, 32], strides = [1, 1]} : vector<8x96xf32> to vector<8x32xf32>
    %36 = arith.addf %34, %35 : vector<8x32xf32>
    %37 = arith.negf %36 : vector<8x32xf32>
    %38 = math.exp %37 : vector<8x32xf32>
    %cst_27 = arith.constant 1.000000e+00 : f32
    %39 = vector.broadcast %cst_27 : f32 to vector<8x32xf32>
    %40 = arith.addf %39, %38 : vector<8x32xf32>
    %41 = arith.divf %39, %40 : vector<8x32xf32>
    %42 = vector.extract_strided_slice %22 {offsets = [0, 64], sizes = [8, 32], strides = [1, 1]} : vector<8x96xf32> to vector<8x32xf32>
    %43 = vector.extract_strided_slice %25 {offsets = [0, 64], sizes = [8, 32], strides = [1, 1]} : vector<8x96xf32> to vector<8x32xf32>
    %c0_28 = arith.constant 0 : index
    %c0_29 = arith.constant 0 : index
    %44 = vector.load %arg5[%c0_28, %c0_29] : memref<1x32xf32, #tpu.memory_space<vmem>>, vector<1x32xf32>
    %45 = vector.broadcast %44 : vector<1x32xf32> to vector<8x32xf32>
    %46 = arith.addf %43, %45 : vector<8x32xf32>
    %47 = arith.mulf %33, %46 : vector<8x32xf32>
    %48 = arith.addf %42, %47 : vector<8x32xf32>
    %49 = math.tanh %48 : vector<8x32xf32>
    %cst_30 = arith.constant 1.000000e+00 : f32
    %50 = vector.broadcast %cst_30 : f32 to vector<8x32xf32>
    %51 = arith.subf %50, %41 : vector<8x32xf32>
    %52 = arith.mulf %51, %49 : vector<8x32xf32>
    %53 = arith.mulf %41, %16 : vector<8x32xf32>
    %54 = arith.addf %52, %53 : vector<8x32xf32>
    %c0_31 = arith.constant 0 : index
    %c0_32 = arith.constant 0 : index
    %55 = vector.load %arg7[%c0_31, %c0_32] : memref<32x96xf32, #tpu.memory_space<vmem>>, vector<32x96xf32>
    %cst_33 = arith.constant dense<0.000000e+00> : vector<8x96xf32>
    %56 = tpu.matmul %17, %55, %cst_33 {dimension_numbers = #tpu.dot_dimension_numbers<[1], [0], [0], [1], [0, 0, 1, 1], [], []>, precision = #tpu.contract_precision<fp32>} : vector<8x32xf32>, vector<32x96xf32>, vector<8x96xf32> -> vector<8x96xf32>
    %57 = vector.extract_strided_slice %23 {offsets = [0, 0], sizes = [8, 32], strides = [1, 1]} : vector<8x96xf32> to vector<8x32xf32>
    %58 = vector.extract_strided_slice %56 {offsets = [0, 0], sizes = [8, 32], strides = [1, 1]} : vector<8x96xf32> to vector<8x32xf32>
    %59 = arith.addf %57, %58 : vector<8x32xf32>
    %60 = arith.negf %59 : vector<8x32xf32>
    %61 = math.exp %60 : vector<8x32xf32>
    %cst_34 = arith.constant 1.000000e+00 : f32
    %62 = vector.broadcast %cst_34 : f32 to vector<8x32xf32>
    %63 = arith.addf %62, %61 : vector<8x32xf32>
    %64 = arith.divf %62, %63 : vector<8x32xf32>
    %65 = vector.extract_strided_slice %23 {offsets = [0, 32], sizes = [8, 32], strides = [1, 1]} : vector<8x96xf32> to vector<8x32xf32>
    %66 = vector.extract_strided_slice %56 {offsets = [0, 32], sizes = [8, 32], strides = [1, 1]} : vector<8x96xf32> to vector<8x32xf32>
    %67 = arith.addf %65, %66 : vector<8x32xf32>
    %68 = arith.negf %67 : vector<8x32xf32>
    %69 = math.exp %68 : vector<8x32xf32>
    %cst_35 = arith.constant 1.000000e+00 : f32
    %70 = vector.broadcast %cst_35 : f32 to vector<8x32xf32>
    %71 = arith.addf %70, %69 : vector<8x32xf32>
    %72 = arith.divf %70, %71 : vector<8x32xf32>
    %73 = vector.extract_strided_slice %23 {offsets = [0, 64], sizes = [8, 32], strides = [1, 1]} : vector<8x96xf32> to vector<8x32xf32>
    %74 = vector.extract_strided_slice %56 {offsets = [0, 64], sizes = [8, 32], strides = [1, 1]} : vector<8x96xf32> to vector<8x32xf32>
    %c0_36 = arith.constant 0 : index
    %c0_37 = arith.constant 0 : index
    %75 = vector.load %arg9[%c0_36, %c0_37] : memref<1x32xf32, #tpu.memory_space<vmem>>, vector<1x32xf32>
    %76 = vector.broadcast %75 : vector<1x32xf32> to vector<8x32xf32>
    %77 = arith.addf %74, %76 : vector<8x32xf32>
    %78 = arith.mulf %64, %77 : vector<8x32xf32>
    %79 = arith.addf %73, %78 : vector<8x32xf32>
    %80 = math.tanh %79 : vector<8x32xf32>
    %cst_38 = arith.constant 1.000000e+00 : f32
    %81 = vector.broadcast %cst_38 : f32 to vector<8x32xf32>
    %82 = arith.subf %81, %72 : vector<8x32xf32>
    %83 = arith.mulf %82, %80 : vector<8x32xf32>
    %84 = arith.mulf %72, %17 : vector<8x32xf32>
    %85 = arith.addf %83, %84 : vector<8x32xf32>
    %86 = arith.select %19, %54, %16 : vector<8x32xi1>, vector<8x32xf32>
    %87 = arith.select %21, %85, %17 : vector<8x32xi1>, vector<8x32xf32>
    %cst_39 = arith.constant 0.000000e+00 : f32
    %88 = vector.broadcast %cst_39 : f32 to vector<8x32xf32>
    %89 = arith.select %19, %86, %88 : vector<8x32xi1>, vector<8x32xf32>
    %cst_40 = arith.constant 0.000000e+00 : f32
    %90 = vector.broadcast %cst_40 : f32 to vector<8x32xf32>
    %91 = arith.select %21, %87, %90 : vector<8x32xi1>, vector<8x32xf32>
    %c0_41 = arith.constant 0 : index
    %c0_42 = arith.constant 0 : index
    %92 = vector.load %arg26[%c0_41, %c0_42] : memref<64x32xf32, #tpu.memory_space<vmem>>, vector<8x32xf32>
    tpu.vector_store %arg26[%c0_41, %c0_42], %89 {strides = array<i32>} : memref<64x32xf32, #tpu.memory_space<vmem>>, vector<8x32xf32>,
    %c56_43 = arith.constant 56 : index
    %c0_44 = arith.constant 0 : index
    %93 = vector.load %arg27[%c56_43, %c0_44] : memref<64x32xf32, #tpu.memory_space<vmem>>, vector<8x32xf32>
    tpu.vector_store %arg27[%c56_43, %c0_44], %91 {strides = array<i32>} : memref<64x32xf32, #tpu.memory_space<vmem>>, vector<8x32xf32>,
    %cst_45 = arith.constant 1.000000e+00 : f32
    %94 = vector.broadcast %cst_45 : f32 to vector<8x32xf32>
    %95 = arith.cmpf ogt, %2, %94 : vector<8x32xf32>
    %cst_46 = arith.constant 6.000000e+00 : f32
    %96 = vector.broadcast %cst_46 : f32 to vector<8x32xf32>
    %97 = arith.cmpf ogt, %2, %96 : vector<8x32xf32>
    %c8 = arith.constant 8 : index
    %c0_47 = arith.constant 0 : index
    %98 = vector.load %arg24[%c8, %c0_47] : memref<64x96xf32, #tpu.memory_space<vmem>>, vector<8x96xf32>
    %c48 = arith.constant 48 : index
    %c0_48 = arith.constant 0 : index
    %99 = vector.load %arg25[%c48, %c0_48] : memref<64x96xf32, #tpu.memory_space<vmem>>, vector<8x96xf32>
    %c0_49 = arith.constant 0 : index
    %c0_50 = arith.constant 0 : index
    %100 = vector.load %arg3[%c0_49, %c0_50] : memref<32x96xf32, #tpu.memory_space<vmem>>, vector<32x96xf32>
    %cst_51 = arith.constant dense<0.000000e+00> : vector<8x96xf32>
    %101 = tpu.matmul %86, %100, %cst_51 {dimension_numbers = #tpu.dot_dimension_numbers<[1], [0], [0], [1], [0, 0, 1, 1], [], []>, precision = #tpu.contract_precision<fp32>} : vector<8x32xf32>, vector<32x96xf32>, vector<8x96xf32> -> vector<8x96xf32>
    %102 = vector.extract_strided_slice %98 {offsets = [0, 0], sizes = [8, 32], strides = [1, 1]} : vector<8x96xf32> to vector<8x32xf32>
    %103 = vector.extract_strided_slice %101 {offsets = [0, 0], sizes = [8, 32], strides = [1, 1]} : vector<8x96xf32> to vector<8x32xf32>
    %104 = arith.addf %102, %103 : vector<8x32xf32>
    %105 = arith.negf %104 : vector<8x32xf32>
    %106 = math.exp %105 : vector<8x32xf32>
    %cst_52 = arith.constant 1.000000e+00 : f32
    %107 = vector.broadcast %cst_52 : f32 to vector<8x32xf32>
    %108 = arith.addf %107, %106 : vector<8x32xf32>
    %109 = arith.divf %107, %108 : vector<8x32xf32>
    %110 = vector.extract_strided_slice %98 {offsets = [0, 32], sizes = [8, 32], strides = [1, 1]} : vector<8x96xf32> to vector<8x32xf32>
    %111 = vector.extract_strided_slice %101 {offsets = [0, 32], sizes = [8, 32], strides = [1, 1]} : vector<8x96xf32> to vector<8x32xf32>
    %112 = arith.addf %110, %111 : vector<8x32xf32>
    %113 = arith.negf %112 : vector<8x32xf32>
    %114 = math.exp %113 : vector<8x32xf32>
    %cst_53 = arith.constant 1.000000e+00 : f32
    %115 = vector.broadcast %cst_53 : f32 to vector<8x32xf32>
    %116 = arith.addf %115, %114 : vector<8x32xf32>
    %117 = arith.divf %115, %116 : vector<8x32xf32>
    %118 = vector.extract_strided_slice %98 {offsets = [0, 64], sizes = [8, 32], strides = [1, 1]} : vector<8x96xf32> to vector<8x32xf32>
    %119 = vector.extract_strided_slice %101 {offsets = [0, 64], sizes = [8, 32], strides = [1, 1]} : vector<8x96xf32> to vector<8x32xf32>
    %c0_54 = arith.constant 0 : index
    %c0_55 = arith.constant 0 : index
    %120 = vector.load %arg5[%c0_54, %c0_55] : memref<1x32xf32, #tpu.memory_space<vmem>>, vector<1x32xf32>
    %121 = vector.broadcast %120 : vector<1x32xf32> to vector<8x32xf32>
    %122 = arith.addf %119, %121 : vector<8x32xf32>
    %123 = arith.mulf %109, %122 : vector<8x32xf32>
    %124 = arith.addf %118, %123 : vector<8x32xf32>
    %125 = math.tanh %124 : vector<8x32xf32>
    %cst_56 = arith.constant 1.000000e+00 : f32
    %126 = vector.broadcast %cst_56 : f32 to vector<8x32xf32>
    %127 = arith.subf %126, %117 : vector<8x32xf32>
    %128 = arith.mulf %127, %125 : vector<8x32xf32>
    %129 = arith.mulf %117, %86 : vector<8x32xf32>
    %130 = arith.addf %128, %129 : vector<8x32xf32>
    %c0_57 = arith.constant 0 : index
    %c0_58 = arith.constant 0 : index
    %131 = vector.load %arg7[%c0_57, %c0_58] : memref<32x96xf32, #tpu.memory_space<vmem>>, vector<32x96xf32>
    %cst_59 = arith.constant dense<0.000000e+00> : vector<8x96xf32>
    %132 = tpu.matmul %87, %131, %cst_59 {dimension_numbers = #tpu.dot_dimension_numbers<[1], [0], [0], [1], [0, 0, 1, 1], [], []>, precision = #tpu.contract_precision<fp32>} : vector<8x32xf32>, vector<32x96xf32>, vector<8x96xf32> -> vector<8x96xf32>
    %133 = vector.extract_strided_slice %99 {offsets = [0, 0], sizes = [8, 32], strides = [1, 1]} : vector<8x96xf32> to vector<8x32xf32>
    %134 = vector.extract_strided_slice %132 {offsets = [0, 0], sizes = [8, 32], strides = [1, 1]} : vector<8x96xf32> to vector<8x32xf32>
    %135 = arith.addf %133, %134 : vector<8x32xf32>
    %136 = arith.negf %135 : vector<8x32xf32>
    %137 = math.exp %136 : vector<8x32xf32>
    %cst_60 = arith.constant 1.000000e+00 : f32
    %138 = vector.broadcast %cst_60 : f32 to vector<8x32xf32>
    %139 = arith.addf %138, %137 : vector<8x32xf32>
    %140 = arith.divf %138, %139 : vector<8x32xf32>
    %141 = vector.extract_strided_slice %99 {offsets = [0, 32], sizes = [8, 32], strides = [1, 1]} : vector<8x96xf32> to vector<8x32xf32>
    %142 = vector.extract_strided_slice %132 {offsets = [0, 32], sizes = [8, 32], strides = [1, 1]} : vector<8x96xf32> to vector<8x32xf32>
    %143 = arith.addf %141, %142 : vector<8x32xf32>
    %144 = arith.negf %143 : vector<8x32xf32>
    %145 = math.exp %144 : vector<8x32xf32>
    %cst_61 = arith.constant 1.000000e+00 : f32
    %146 = vector.broadcast %cst_61 : f32 to vector<8x32xf32>
    %147 = arith.addf %146, %145 : vector<8x32xf32>
    %148 = arith.divf %146, %147 : vector<8x32xf32>
    %149 = vector.extract_strided_slice %99 {offsets = [0, 64], sizes = [8, 32], strides = [1, 1]} : vector<8x96xf32> to vector<8x32xf32>
    %150 = vector.extract_strided_slice %132 {offsets = [0, 64], sizes = [8, 32], strides = [1, 1]} : vector<8x96xf32> to vector<8x32xf32>
    %c0_62 = arith.constant 0 : index
    %c0_63 = arith.constant 0 : index
    %151 = vector.load %arg9[%c0_62, %c0_63] : memref<1x32xf32, #tpu.memory_space<vmem>>, vector<1x32xf32>
    %152 = vector.broadcast %151 : vector<1x32xf32> to vector<8x32xf32>
    %153 = arith.addf %150, %152 : vector<8x32xf32>
    %154 = arith.mulf %140, %153 : vector<8x32xf32>
    %155 = arith.addf %149, %154 : vector<8x32xf32>
    %156 = math.tanh %155 : vector<8x32xf32>
    %cst_64 = arith.constant 1.000000e+00 : f32
    %157 = vector.broadcast %cst_64 : f32 to vector<8x32xf32>
    %158 = arith.subf %157, %148 : vector<8x32xf32>
    %159 = arith.mulf %158, %156 : vector<8x32xf32>
    %160 = arith.mulf %148, %87 : vector<8x32xf32>
    %161 = arith.addf %159, %160 : vector<8x32xf32>
    %162 = arith.select %95, %130, %86 : vector<8x32xi1>, vector<8x32xf32>
    %163 = arith.select %97, %161, %87 : vector<8x32xi1>, vector<8x32xf32>
    %cst_65 = arith.constant 0.000000e+00 : f32
    %164 = vector.broadcast %cst_65 : f32 to vector<8x32xf32>
    %165 = arith.select %95, %162, %164 : vector<8x32xi1>, vector<8x32xf32>
    %cst_66 = arith.constant 0.000000e+00 : f32
    %166 = vector.broadcast %cst_66 : f32 to vector<8x32xf32>
    %167 = arith.select %97, %163, %166 : vector<8x32xi1>, vector<8x32xf32>
    %c8_67 = arith.constant 8 : index
    %c0_68 = arith.constant 0 : index
    %168 = vector.load %arg26[%c8_67, %c0_68] : memref<64x32xf32, #tpu.memory_space<vmem>>, vector<8x32xf32>
    tpu.vector_store %arg26[%c8_67, %c0_68], %165 {strides = array<i32>} : memref<64x32xf32, #tpu.memory_space<vmem>>, vector<8x32xf32>,
    %c48_69 = arith.constant 48 : index
    %c0_70 = arith.constant 0 : index
    %169 = vector.load %arg27[%c48_69, %c0_70] : memref<64x32xf32, #tpu.memory_space<vmem>>, vector<8x32xf32>
    tpu.vector_store %arg27[%c48_69, %c0_70], %167 {strides = array<i32>} : memref<64x32xf32, #tpu.memory_space<vmem>>, vector<8x32xf32>,
    %cst_71 = arith.constant 2.000000e+00 : f32
    %170 = vector.broadcast %cst_71 : f32 to vector<8x32xf32>
    %171 = arith.cmpf ogt, %2, %170 : vector<8x32xf32>
    %cst_72 = arith.constant 5.000000e+00 : f32
    %172 = vector.broadcast %cst_72 : f32 to vector<8x32xf32>
    %173 = arith.cmpf ogt, %2, %172 : vector<8x32xf32>
    %c16 = arith.constant 16 : index
    %c0_73 = arith.constant 0 : index
    %174 = vector.load %arg24[%c16, %c0_73] : memref<64x96xf32, #tpu.memory_space<vmem>>, vector<8x96xf32>
    %c40 = arith.constant 40 : index
    %c0_74 = arith.constant 0 : index
    %175 = vector.load %arg25[%c40, %c0_74] : memref<64x96xf32, #tpu.memory_space<vmem>>, vector<8x96xf32>
    %c0_75 = arith.constant 0 : index
    %c0_76 = arith.constant 0 : index
    %176 = vector.load %arg3[%c0_75, %c0_76] : memref<32x96xf32, #tpu.memory_space<vmem>>, vector<32x96xf32>
    %cst_77 = arith.constant dense<0.000000e+00> : vector<8x96xf32>
    %177 = tpu.matmul %162, %176, %cst_77 {dimension_numbers = #tpu.dot_dimension_numbers<[1], [0], [0], [1], [0, 0, 1, 1], [], []>, precision = #tpu.contract_precision<fp32>} : vector<8x32xf32>, vector<32x96xf32>, vector<8x96xf32> -> vector<8x96xf32>
    %178 = vector.extract_strided_slice %174 {offsets = [0, 0], sizes = [8, 32], strides = [1, 1]} : vector<8x96xf32> to vector<8x32xf32>
    %179 = vector.extract_strided_slice %177 {offsets = [0, 0], sizes = [8, 32], strides = [1, 1]} : vector<8x96xf32> to vector<8x32xf32>
    %180 = arith.addf %178, %179 : vector<8x32xf32>
    %181 = arith.negf %180 : vector<8x32xf32>
    %182 = math.exp %181 : vector<8x32xf32>
    %cst_78 = arith.constant 1.000000e+00 : f32
    %183 = vector.broadcast %cst_78 : f32 to vector<8x32xf32>
    %184 = arith.addf %183, %182 : vector<8x32xf32>
    %185 = arith.divf %183, %184 : vector<8x32xf32>
    %186 = vector.extract_strided_slice %174 {offsets = [0, 32], sizes = [8, 32], strides = [1, 1]} : vector<8x96xf32> to vector<8x32xf32>
    %187 = vector.extract_strided_slice %177 {offsets = [0, 32], sizes = [8, 32], strides = [1, 1]} : vector<8x96xf32> to vector<8x32xf32>
    %188 = arith.addf %186, %187 : vector<8x32xf32>
    %189 = arith.negf %188 : vector<8x32xf32>
    %190 = math.exp %189 : vector<8x32xf32>
    %cst_79 = arith.constant 1.000000e+00 : f32
    %191 = vector.broadcast %cst_79 : f32 to vector<8x32xf32>
    %192 = arith.addf %191, %190 : vector<8x32xf32>
    %193 = arith.divf %191, %192 : vector<8x32xf32>
    %194 = vector.extract_strided_slice %174 {offsets = [0, 64], sizes = [8, 32], strides = [1, 1]} : vector<8x96xf32> to vector<8x32xf32>
    %195 = vector.extract_strided_slice %177 {offsets = [0, 64], sizes = [8, 32], strides = [1, 1]} : vector<8x96xf32> to vector<8x32xf32>
    %c0_80 = arith.constant 0 : index
    %c0_81 = arith.constant 0 : index
    %196 = vector.load %arg5[%c0_80, %c0_81] : memref<1x32xf32, #tpu.memory_space<vmem>>, vector<1x32xf32>
    %197 = vector.broadcast %196 : vector<1x32xf32> to vector<8x32xf32>
    %198 = arith.addf %195, %197 : vector<8x32xf32>
    %199 = arith.mulf %185, %198 : vector<8x32xf32>
    %200 = arith.addf %194, %199 : vector<8x32xf32>
    %201 = math.tanh %200 : vector<8x32xf32>
    %cst_82 = arith.constant 1.000000e+00 : f32
    %202 = vector.broadcast %cst_82 : f32 to vector<8x32xf32>
    %203 = arith.subf %202, %193 : vector<8x32xf32>
    %204 = arith.mulf %203, %201 : vector<8x32xf32>
    %205 = arith.mulf %193, %162 : vector<8x32xf32>
    %206 = arith.addf %204, %205 : vector<8x32xf32>
    %c0_83 = arith.constant 0 : index
    %c0_84 = arith.constant 0 : index
    %207 = vector.load %arg7[%c0_83, %c0_84] : memref<32x96xf32, #tpu.memory_space<vmem>>, vector<32x96xf32>
    %cst_85 = arith.constant dense<0.000000e+00> : vector<8x96xf32>
    %208 = tpu.matmul %163, %207, %cst_85 {dimension_numbers = #tpu.dot_dimension_numbers<[1], [0], [0], [1], [0, 0, 1, 1], [], []>, precision = #tpu.contract_precision<fp32>} : vector<8x32xf32>, vector<32x96xf32>, vector<8x96xf32> -> vector<8x96xf32>
    %209 = vector.extract_strided_slice %175 {offsets = [0, 0], sizes = [8, 32], strides = [1, 1]} : vector<8x96xf32> to vector<8x32xf32>
    %210 = vector.extract_strided_slice %208 {offsets = [0, 0], sizes = [8, 32], strides = [1, 1]} : vector<8x96xf32> to vector<8x32xf32>
    %211 = arith.addf %209, %210 : vector<8x32xf32>
    %212 = arith.negf %211 : vector<8x32xf32>
    %213 = math.exp %212 : vector<8x32xf32>
    %cst_86 = arith.constant 1.000000e+00 : f32
    %214 = vector.broadcast %cst_86 : f32 to vector<8x32xf32>
    %215 = arith.addf %214, %213 : vector<8x32xf32>
    %216 = arith.divf %214, %215 : vector<8x32xf32>
    %217 = vector.extract_strided_slice %175 {offsets = [0, 32], sizes = [8, 32], strides = [1, 1]} : vector<8x96xf32> to vector<8x32xf32>
    %218 = vector.extract_strided_slice %208 {offsets = [0, 32], sizes = [8, 32], strides = [1, 1]} : vector<8x96xf32> to vector<8x32xf32>
    %219 = arith.addf %217, %218 : vector<8x32xf32>
    %220 = arith.negf %219 : vector<8x32xf32>
    %221 = math.exp %220 : vector<8x32xf32>
    %cst_87 = arith.constant 1.000000e+00 : f32
    %222 = vector.broadcast %cst_87 : f32 to vector<8x32xf32>
    %223 = arith.addf %222, %221 : vector<8x32xf32>
    %224 = arith.divf %222, %223 : vector<8x32xf32>
    %225 = vector.extract_strided_slice %175 {offsets = [0, 64], sizes = [8, 32], strides = [1, 1]} : vector<8x96xf32> to vector<8x32xf32>
    %226 = vector.extract_strided_slice %208 {offsets = [0, 64], sizes = [8, 32], strides = [1, 1]} : vector<8x96xf32> to vector<8x32xf32>
    %c0_88 = arith.constant 0 : index
    %c0_89 = arith.constant 0 : index
    %227 = vector.load %arg9[%c0_88, %c0_89] : memref<1x32xf32, #tpu.memory_space<vmem>>, vector<1x32xf32>
    %228 = vector.broadcast %227 : vector<1x32xf32> to vector<8x32xf32>
    %229 = arith.addf %226, %228 : vector<8x32xf32>
    %230 = arith.mulf %216, %229 : vector<8x32xf32>
    %231 = arith.addf %225, %230 : vector<8x32xf32>
    %232 = math.tanh %231 : vector<8x32xf32>
    %cst_90 = arith.constant 1.000000e+00 : f32
    %233 = vector.broadcast %cst_90 : f32 to vector<8x32xf32>
    %234 = arith.subf %233, %224 : vector<8x32xf32>
    %235 = arith.mulf %234, %232 : vector<8x32xf32>
    %236 = arith.mulf %224, %163 : vector<8x32xf32>
    %237 = arith.addf %235, %236 : vector<8x32xf32>
    %238 = arith.select %171, %206, %162 : vector<8x32xi1>, vector<8x32xf32>
    %239 = arith.select %173, %237, %163 : vector<8x32xi1>, vector<8x32xf32>
    %cst_91 = arith.constant 0.000000e+00 : f32
    %240 = vector.broadcast %cst_91 : f32 to vector<8x32xf32>
    %241 = arith.select %171, %238, %240 : vector<8x32xi1>, vector<8x32xf32>
    %cst_92 = arith.constant 0.000000e+00 : f32
    %242 = vector.broadcast %cst_92 : f32 to vector<8x32xf32>
    %243 = arith.select %173, %239, %242 : vector<8x32xi1>, vector<8x32xf32>
    %c16_93 = arith.constant 16 : index
    %c0_94 = arith.constant 0 : index
    %244 = vector.load %arg26[%c16_93, %c0_94] : memref<64x32xf32, #tpu.memory_space<vmem>>, vector<8x32xf32>
    tpu.vector_store %arg26[%c16_93, %c0_94], %241 {strides = array<i32>} : memref<64x32xf32, #tpu.memory_space<vmem>>, vector<8x32xf32>,
    %c40_95 = arith.constant 40 : index
    %c0_96 = arith.constant 0 : index
    %245 = vector.load %arg27[%c40_95, %c0_96] : memref<64x32xf32, #tpu.memory_space<vmem>>, vector<8x32xf32>
    tpu.vector_store %arg27[%c40_95, %c0_96], %243 {strides = array<i32>} : memref<64x32xf32, #tpu.memory_space<vmem>>, vector<8x32xf32>,
    %cst_97 = arith.constant 3.000000e+00 : f32
    %246 = vector.broadcast %cst_97 : f32 to vector<8x32xf32>
    %247 = arith.cmpf ogt, %2, %246 : vector<8x32xf32>
    %cst_98 = arith.constant 4.000000e+00 : f32
    %248 = vector.broadcast %cst_98 : f32 to vector<8x32xf32>
    %249 = arith.cmpf ogt, %2, %248 : vector<8x32xf32>
    %c24 = arith.constant 24 : index
    %c0_99 = arith.constant 0 : index
    %250 = vector.load %arg24[%c24, %c0_99] : memref<64x96xf32, #tpu.memory_space<vmem>>, vector<8x96xf32>
    %c32 = arith.constant 32 : index
    %c0_100 = arith.constant 0 : index
    %251 = vector.load %arg25[%c32, %c0_100] : memref<64x96xf32, #tpu.memory_space<vmem>>, vector<8x96xf32>
    %c0_101 = arith.constant 0 : index
    %c0_102 = arith.constant 0 : index
    %252 = vector.load %arg3[%c0_101, %c0_102] : memref<32x96xf32, #tpu.memory_space<vmem>>, vector<32x96xf32>
    %cst_103 = arith.constant dense<0.000000e+00> : vector<8x96xf32>
    %253 = tpu.matmul %238, %252, %cst_103 {dimension_numbers = #tpu.dot_dimension_numbers<[1], [0], [0], [1], [0, 0, 1, 1], [], []>, precision = #tpu.contract_precision<fp32>} : vector<8x32xf32>, vector<32x96xf32>, vector<8x96xf32> -> vector<8x96xf32>
    %254 = vector.extract_strided_slice %250 {offsets = [0, 0], sizes = [8, 32], strides = [1, 1]} : vector<8x96xf32> to vector<8x32xf32>
    %255 = vector.extract_strided_slice %253 {offsets = [0, 0], sizes = [8, 32], strides = [1, 1]} : vector<8x96xf32> to vector<8x32xf32>
    %256 = arith.addf %254, %255 : vector<8x32xf32>
    %257 = arith.negf %256 : vector<8x32xf32>
    %258 = math.exp %257 : vector<8x32xf32>
    %cst_104 = arith.constant 1.000000e+00 : f32
    %259 = vector.broadcast %cst_104 : f32 to vector<8x32xf32>
    %260 = arith.addf %259, %258 : vector<8x32xf32>
    %261 = arith.divf %259, %260 : vector<8x32xf32>
    %262 = vector.extract_strided_slice %250 {offsets = [0, 32], sizes = [8, 32], strides = [1, 1]} : vector<8x96xf32> to vector<8x32xf32>
    %263 = vector.extract_strided_slice %253 {offsets = [0, 32], sizes = [8, 32], strides = [1, 1]} : vector<8x96xf32> to vector<8x32xf32>
    %264 = arith.addf %262, %263 : vector<8x32xf32>
    %265 = arith.negf %264 : vector<8x32xf32>
    %266 = math.exp %265 : vector<8x32xf32>
    %cst_105 = arith.constant 1.000000e+00 : f32
    %267 = vector.broadcast %cst_105 : f32 to vector<8x32xf32>
    %268 = arith.addf %267, %266 : vector<8x32xf32>
    %269 = arith.divf %267, %268 : vector<8x32xf32>
    %270 = vector.extract_strided_slice %250 {offsets = [0, 64], sizes = [8, 32], strides = [1, 1]} : vector<8x96xf32> to vector<8x32xf32>
    %271 = vector.extract_strided_slice %253 {offsets = [0, 64], sizes = [8, 32], strides = [1, 1]} : vector<8x96xf32> to vector<8x32xf32>
    %c0_106 = arith.constant 0 : index
    %c0_107 = arith.constant 0 : index
    %272 = vector.load %arg5[%c0_106, %c0_107] : memref<1x32xf32, #tpu.memory_space<vmem>>, vector<1x32xf32>
    %273 = vector.broadcast %272 : vector<1x32xf32> to vector<8x32xf32>
    %274 = arith.addf %271, %273 : vector<8x32xf32>
    %275 = arith.mulf %261, %274 : vector<8x32xf32>
    %276 = arith.addf %270, %275 : vector<8x32xf32>
    %277 = math.tanh %276 : vector<8x32xf32>
    %cst_108 = arith.constant 1.000000e+00 : f32
    %278 = vector.broadcast %cst_108 : f32 to vector<8x32xf32>
    %279 = arith.subf %278, %269 : vector<8x32xf32>
    %280 = arith.mulf %279, %277 : vector<8x32xf32>
    %281 = arith.mulf %269, %238 : vector<8x32xf32>
    %282 = arith.addf %280, %281 : vector<8x32xf32>
    %c0_109 = arith.constant 0 : index
    %c0_110 = arith.constant 0 : index
    %283 = vector.load %arg7[%c0_109, %c0_110] : memref<32x96xf32, #tpu.memory_space<vmem>>, vector<32x96xf32>
    %cst_111 = arith.constant dense<0.000000e+00> : vector<8x96xf32>
    %284 = tpu.matmul %239, %283, %cst_111 {dimension_numbers = #tpu.dot_dimension_numbers<[1], [0], [0], [1], [0, 0, 1, 1], [], []>, precision = #tpu.contract_precision<fp32>} : vector<8x32xf32>, vector<32x96xf32>, vector<8x96xf32> -> vector<8x96xf32>
    %285 = vector.extract_strided_slice %251 {offsets = [0, 0], sizes = [8, 32], strides = [1, 1]} : vector<8x96xf32> to vector<8x32xf32>
    %286 = vector.extract_strided_slice %284 {offsets = [0, 0], sizes = [8, 32], strides = [1, 1]} : vector<8x96xf32> to vector<8x32xf32>
    %287 = arith.addf %285, %286 : vector<8x32xf32>
    %288 = arith.negf %287 : vector<8x32xf32>
    %289 = math.exp %288 : vector<8x32xf32>
    %cst_112 = arith.constant 1.000000e+00 : f32
    %290 = vector.broadcast %cst_112 : f32 to vector<8x32xf32>
    %291 = arith.addf %290, %289 : vector<8x32xf32>
    %292 = arith.divf %290, %291 : vector<8x32xf32>
    %293 = vector.extract_strided_slice %251 {offsets = [0, 32], sizes = [8, 32], strides = [1, 1]} : vector<8x96xf32> to vector<8x32xf32>
    %294 = vector.extract_strided_slice %284 {offsets = [0, 32], sizes = [8, 32], strides = [1, 1]} : vector<8x96xf32> to vector<8x32xf32>
    %295 = arith.addf %293, %294 : vector<8x32xf32>
    %296 = arith.negf %295 : vector<8x32xf32>
    %297 = math.exp %296 : vector<8x32xf32>
    %cst_113 = arith.constant 1.000000e+00 : f32
    %298 = vector.broadcast %cst_113 : f32 to vector<8x32xf32>
    %299 = arith.addf %298, %297 : vector<8x32xf32>
    %300 = arith.divf %298, %299 : vector<8x32xf32>
    %301 = vector.extract_strided_slice %251 {offsets = [0, 64], sizes = [8, 32], strides = [1, 1]} : vector<8x96xf32> to vector<8x32xf32>
    %302 = vector.extract_strided_slice %284 {offsets = [0, 64], sizes = [8, 32], strides = [1, 1]} : vector<8x96xf32> to vector<8x32xf32>
    %c0_114 = arith.constant 0 : index
    %c0_115 = arith.constant 0 : index
    %303 = vector.load %arg9[%c0_114, %c0_115] : memref<1x32xf32, #tpu.memory_space<vmem>>, vector<1x32xf32>
    %304 = vector.broadcast %303 : vector<1x32xf32> to vector<8x32xf32>
    %305 = arith.addf %302, %304 : vector<8x32xf32>
    %306 = arith.mulf %292, %305 : vector<8x32xf32>
    %307 = arith.addf %301, %306 : vector<8x32xf32>
    %308 = math.tanh %307 : vector<8x32xf32>
    %cst_116 = arith.constant 1.000000e+00 : f32
    %309 = vector.broadcast %cst_116 : f32 to vector<8x32xf32>
    %310 = arith.subf %309, %300 : vector<8x32xf32>
    %311 = arith.mulf %310, %308 : vector<8x32xf32>
    %312 = arith.mulf %300, %239 : vector<8x32xf32>
    %313 = arith.addf %311, %312 : vector<8x32xf32>
    %314 = arith.select %247, %282, %238 : vector<8x32xi1>, vector<8x32xf32>
    %315 = arith.select %249, %313, %239 : vector<8x32xi1>, vector<8x32xf32>
    %cst_117 = arith.constant 0.000000e+00 : f32
    %316 = vector.broadcast %cst_117 : f32 to vector<8x32xf32>
    %317 = arith.select %247, %314, %316 : vector<8x32xi1>, vector<8x32xf32>
    %cst_118 = arith.constant 0.000000e+00 : f32
    %318 = vector.broadcast %cst_118 : f32 to vector<8x32xf32>
    %319 = arith.select %249, %315, %318 : vector<8x32xi1>, vector<8x32xf32>
    %c24_119 = arith.constant 24 : index
    %c0_120 = arith.constant 0 : index
    %320 = vector.load %arg26[%c24_119, %c0_120] : memref<64x32xf32, #tpu.memory_space<vmem>>, vector<8x32xf32>
    tpu.vector_store %arg26[%c24_119, %c0_120], %317 {strides = array<i32>} : memref<64x32xf32, #tpu.memory_space<vmem>>, vector<8x32xf32>,
    %c32_121 = arith.constant 32 : index
    %c0_122 = arith.constant 0 : index
    %321 = vector.load %arg27[%c32_121, %c0_122] : memref<64x32xf32, #tpu.memory_space<vmem>>, vector<8x32xf32>
    tpu.vector_store %arg27[%c32_121, %c0_122], %319 {strides = array<i32>} : memref<64x32xf32, #tpu.memory_space<vmem>>, vector<8x32xf32>,
    %cst_123 = arith.constant 4.000000e+00 : f32
    %322 = vector.broadcast %cst_123 : f32 to vector<8x32xf32>
    %323 = arith.cmpf ogt, %2, %322 : vector<8x32xf32>
    %cst_124 = arith.constant 3.000000e+00 : f32
    %324 = vector.broadcast %cst_124 : f32 to vector<8x32xf32>
    %325 = arith.cmpf ogt, %2, %324 : vector<8x32xf32>
    %c32_125 = arith.constant 32 : index
    %c0_126 = arith.constant 0 : index
    %326 = vector.load %arg24[%c32_125, %c0_126] : memref<64x96xf32, #tpu.memory_space<vmem>>, vector<8x96xf32>
    %c24_127 = arith.constant 24 : index
    %c0_128 = arith.constant 0 : index
    %327 = vector.load %arg25[%c24_127, %c0_128] : memref<64x96xf32, #tpu.memory_space<vmem>>, vector<8x96xf32>
    %c0_129 = arith.constant 0 : index
    %c0_130 = arith.constant 0 : index
    %328 = vector.load %arg3[%c0_129, %c0_130] : memref<32x96xf32, #tpu.memory_space<vmem>>, vector<32x96xf32>
    %cst_131 = arith.constant dense<0.000000e+00> : vector<8x96xf32>
    %329 = tpu.matmul %314, %328, %cst_131 {dimension_numbers = #tpu.dot_dimension_numbers<[1], [0], [0], [1], [0, 0, 1, 1], [], []>, precision = #tpu.contract_precision<fp32>} : vector<8x32xf32>, vector<32x96xf32>, vector<8x96xf32> -> vector<8x96xf32>
    %330 = vector.extract_strided_slice %326 {offsets = [0, 0], sizes = [8, 32], strides = [1, 1]} : vector<8x96xf32> to vector<8x32xf32>
    %331 = vector.extract_strided_slice %329 {offsets = [0, 0], sizes = [8, 32], strides = [1, 1]} : vector<8x96xf32> to vector<8x32xf32>
    %332 = arith.addf %330, %331 : vector<8x32xf32>
    %333 = arith.negf %332 : vector<8x32xf32>
    %334 = math.exp %333 : vector<8x32xf32>
    %cst_132 = arith.constant 1.000000e+00 : f32
    %335 = vector.broadcast %cst_132 : f32 to vector<8x32xf32>
    %336 = arith.addf %335, %334 : vector<8x32xf32>
    %337 = arith.divf %335, %336 : vector<8x32xf32>
    %338 = vector.extract_strided_slice %326 {offsets = [0, 32], sizes = [8, 32], strides = [1, 1]} : vector<8x96xf32> to vector<8x32xf32>
    %339 = vector.extract_strided_slice %329 {offsets = [0, 32], sizes = [8, 32], strides = [1, 1]} : vector<8x96xf32> to vector<8x32xf32>
    %340 = arith.addf %338, %339 : vector<8x32xf32>
    %341 = arith.negf %340 : vector<8x32xf32>
    %342 = math.exp %341 : vector<8x32xf32>
    %cst_133 = arith.constant 1.000000e+00 : f32
    %343 = vector.broadcast %cst_133 : f32 to vector<8x32xf32>
    %344 = arith.addf %343, %342 : vector<8x32xf32>
    %345 = arith.divf %343, %344 : vector<8x32xf32>
    %346 = vector.extract_strided_slice %326 {offsets = [0, 64], sizes = [8, 32], strides = [1, 1]} : vector<8x96xf32> to vector<8x32xf32>
    %347 = vector.extract_strided_slice %329 {offsets = [0, 64], sizes = [8, 32], strides = [1, 1]} : vector<8x96xf32> to vector<8x32xf32>
    %c0_134 = arith.constant 0 : index
    %c0_135 = arith.constant 0 : index
    %348 = vector.load %arg5[%c0_134, %c0_135] : memref<1x32xf32, #tpu.memory_space<vmem>>, vector<1x32xf32>
    %349 = vector.broadcast %348 : vector<1x32xf32> to vector<8x32xf32>
    %350 = arith.addf %347, %349 : vector<8x32xf32>
    %351 = arith.mulf %337, %350 : vector<8x32xf32>
    %352 = arith.addf %346, %351 : vector<8x32xf32>
    %353 = math.tanh %352 : vector<8x32xf32>
    %cst_136 = arith.constant 1.000000e+00 : f32
    %354 = vector.broadcast %cst_136 : f32 to vector<8x32xf32>
    %355 = arith.subf %354, %345 : vector<8x32xf32>
    %356 = arith.mulf %355, %353 : vector<8x32xf32>
    %357 = arith.mulf %345, %314 : vector<8x32xf32>
    %358 = arith.addf %356, %357 : vector<8x32xf32>
    %c0_137 = arith.constant 0 : index
    %c0_138 = arith.constant 0 : index
    %359 = vector.load %arg7[%c0_137, %c0_138] : memref<32x96xf32, #tpu.memory_space<vmem>>, vector<32x96xf32>
    %cst_139 = arith.constant dense<0.000000e+00> : vector<8x96xf32>
    %360 = tpu.matmul %315, %359, %cst_139 {dimension_numbers = #tpu.dot_dimension_numbers<[1], [0], [0], [1], [0, 0, 1, 1], [], []>, precision = #tpu.contract_precision<fp32>} : vector<8x32xf32>, vector<32x96xf32>, vector<8x96xf32> -> vector<8x96xf32>
    %361 = vector.extract_strided_slice %327 {offsets = [0, 0], sizes = [8, 32], strides = [1, 1]} : vector<8x96xf32> to vector<8x32xf32>
    %362 = vector.extract_strided_slice %360 {offsets = [0, 0], sizes = [8, 32], strides = [1, 1]} : vector<8x96xf32> to vector<8x32xf32>
    %363 = arith.addf %361, %362 : vector<8x32xf32>
    %364 = arith.negf %363 : vector<8x32xf32>
    %365 = math.exp %364 : vector<8x32xf32>
    %cst_140 = arith.constant 1.000000e+00 : f32
    %366 = vector.broadcast %cst_140 : f32 to vector<8x32xf32>
    %367 = arith.addf %366, %365 : vector<8x32xf32>
    %368 = arith.divf %366, %367 : vector<8x32xf32>
    %369 = vector.extract_strided_slice %327 {offsets = [0, 32], sizes = [8, 32], strides = [1, 1]} : vector<8x96xf32> to vector<8x32xf32>
    %370 = vector.extract_strided_slice %360 {offsets = [0, 32], sizes = [8, 32], strides = [1, 1]} : vector<8x96xf32> to vector<8x32xf32>
    %371 = arith.addf %369, %370 : vector<8x32xf32>
    %372 = arith.negf %371 : vector<8x32xf32>
    %373 = math.exp %372 : vector<8x32xf32>
    %cst_141 = arith.constant 1.000000e+00 : f32
    %374 = vector.broadcast %cst_141 : f32 to vector<8x32xf32>
    %375 = arith.addf %374, %373 : vector<8x32xf32>
    %376 = arith.divf %374, %375 : vector<8x32xf32>
    %377 = vector.extract_strided_slice %327 {offsets = [0, 64], sizes = [8, 32], strides = [1, 1]} : vector<8x96xf32> to vector<8x32xf32>
    %378 = vector.extract_strided_slice %360 {offsets = [0, 64], sizes = [8, 32], strides = [1, 1]} : vector<8x96xf32> to vector<8x32xf32>
    %c0_142 = arith.constant 0 : index
    %c0_143 = arith.constant 0 : index
    %379 = vector.load %arg9[%c0_142, %c0_143] : memref<1x32xf32, #tpu.memory_space<vmem>>, vector<1x32xf32>
    %380 = vector.broadcast %379 : vector<1x32xf32> to vector<8x32xf32>
    %381 = arith.addf %378, %380 : vector<8x32xf32>
    %382 = arith.mulf %368, %381 : vector<8x32xf32>
    %383 = arith.addf %377, %382 : vector<8x32xf32>
    %384 = math.tanh %383 : vector<8x32xf32>
    %cst_144 = arith.constant 1.000000e+00 : f32
    %385 = vector.broadcast %cst_144 : f32 to vector<8x32xf32>
    %386 = arith.subf %385, %376 : vector<8x32xf32>
    %387 = arith.mulf %386, %384 : vector<8x32xf32>
    %388 = arith.mulf %376, %315 : vector<8x32xf32>
    %389 = arith.addf %387, %388 : vector<8x32xf32>
    %390 = arith.select %323, %358, %314 : vector<8x32xi1>, vector<8x32xf32>
    %391 = arith.select %325, %389, %315 : vector<8x32xi1>, vector<8x32xf32>
    %cst_145 = arith.constant 0.000000e+00 : f32
    %392 = vector.broadcast %cst_145 : f32 to vector<8x32xf32>
    %393 = arith.select %323, %390, %392 : vector<8x32xi1>, vector<8x32xf32>
    %cst_146 = arith.constant 0.000000e+00 : f32
    %394 = vector.broadcast %cst_146 : f32 to vector<8x32xf32>
    %395 = arith.select %325, %391, %394 : vector<8x32xi1>, vector<8x32xf32>
    %c32_147 = arith.constant 32 : index
    %c0_148 = arith.constant 0 : index
    %396 = vector.load %arg26[%c32_147, %c0_148] : memref<64x32xf32, #tpu.memory_space<vmem>>, vector<8x32xf32>
    tpu.vector_store %arg26[%c32_147, %c0_148], %393 {strides = array<i32>} : memref<64x32xf32, #tpu.memory_space<vmem>>, vector<8x32xf32>,
    %c24_149 = arith.constant 24 : index
    %c0_150 = arith.constant 0 : index
    %397 = vector.load %arg27[%c24_149, %c0_150] : memref<64x32xf32, #tpu.memory_space<vmem>>, vector<8x32xf32>
    tpu.vector_store %arg27[%c24_149, %c0_150], %395 {strides = array<i32>} : memref<64x32xf32, #tpu.memory_space<vmem>>, vector<8x32xf32>,
    %cst_151 = arith.constant 5.000000e+00 : f32
    %398 = vector.broadcast %cst_151 : f32 to vector<8x32xf32>
    %399 = arith.cmpf ogt, %2, %398 : vector<8x32xf32>
    %cst_152 = arith.constant 2.000000e+00 : f32
    %400 = vector.broadcast %cst_152 : f32 to vector<8x32xf32>
    %401 = arith.cmpf ogt, %2, %400 : vector<8x32xf32>
    %c40_153 = arith.constant 40 : index
    %c0_154 = arith.constant 0 : index
    %402 = vector.load %arg24[%c40_153, %c0_154] : memref<64x96xf32, #tpu.memory_space<vmem>>, vector<8x96xf32>
    %c16_155 = arith.constant 16 : index
    %c0_156 = arith.constant 0 : index
    %403 = vector.load %arg25[%c16_155, %c0_156] : memref<64x96xf32, #tpu.memory_space<vmem>>, vector<8x96xf32>
    %c0_157 = arith.constant 0 : index
    %c0_158 = arith.constant 0 : index
    %404 = vector.load %arg3[%c0_157, %c0_158] : memref<32x96xf32, #tpu.memory_space<vmem>>, vector<32x96xf32>
    %cst_159 = arith.constant dense<0.000000e+00> : vector<8x96xf32>
    %405 = tpu.matmul %390, %404, %cst_159 {dimension_numbers = #tpu.dot_dimension_numbers<[1], [0], [0], [1], [0, 0, 1, 1], [], []>, precision = #tpu.contract_precision<fp32>} : vector<8x32xf32>, vector<32x96xf32>, vector<8x96xf32> -> vector<8x96xf32>
    %406 = vector.extract_strided_slice %402 {offsets = [0, 0], sizes = [8, 32], strides = [1, 1]} : vector<8x96xf32> to vector<8x32xf32>
    %407 = vector.extract_strided_slice %405 {offsets = [0, 0], sizes = [8, 32], strides = [1, 1]} : vector<8x96xf32> to vector<8x32xf32>
    %408 = arith.addf %406, %407 : vector<8x32xf32>
    %409 = arith.negf %408 : vector<8x32xf32>
    %410 = math.exp %409 : vector<8x32xf32>
    %cst_160 = arith.constant 1.000000e+00 : f32
    %411 = vector.broadcast %cst_160 : f32 to vector<8x32xf32>
    %412 = arith.addf %411, %410 : vector<8x32xf32>
    %413 = arith.divf %411, %412 : vector<8x32xf32>
    %414 = vector.extract_strided_slice %402 {offsets = [0, 32], sizes = [8, 32], strides = [1, 1]} : vector<8x96xf32> to vector<8x32xf32>
    %415 = vector.extract_strided_slice %405 {offsets = [0, 32], sizes = [8, 32], strides = [1, 1]} : vector<8x96xf32> to vector<8x32xf32>
    %416 = arith.addf %414, %415 : vector<8x32xf32>
    %417 = arith.negf %416 : vector<8x32xf32>
    %418 = math.exp %417 : vector<8x32xf32>
    %cst_161 = arith.constant 1.000000e+00 : f32
    %419 = vector.broadcast %cst_161 : f32 to vector<8x32xf32>
    %420 = arith.addf %419, %418 : vector<8x32xf32>
    %421 = arith.divf %419, %420 : vector<8x32xf32>
    %422 = vector.extract_strided_slice %402 {offsets = [0, 64], sizes = [8, 32], strides = [1, 1]} : vector<8x96xf32> to vector<8x32xf32>
    %423 = vector.extract_strided_slice %405 {offsets = [0, 64], sizes = [8, 32], strides = [1, 1]} : vector<8x96xf32> to vector<8x32xf32>
    %c0_162 = arith.constant 0 : index
    %c0_163 = arith.constant 0 : index
    %424 = vector.load %arg5[%c0_162, %c0_163] : memref<1x32xf32, #tpu.memory_space<vmem>>, vector<1x32xf32>
    %425 = vector.broadcast %424 : vector<1x32xf32> to vector<8x32xf32>
    %426 = arith.addf %423, %425 : vector<8x32xf32>
    %427 = arith.mulf %413, %426 : vector<8x32xf32>
    %428 = arith.addf %422, %427 : vector<8x32xf32>
    %429 = math.tanh %428 : vector<8x32xf32>
    %cst_164 = arith.constant 1.000000e+00 : f32
    %430 = vector.broadcast %cst_164 : f32 to vector<8x32xf32>
    %431 = arith.subf %430, %421 : vector<8x32xf32>
    %432 = arith.mulf %431, %429 : vector<8x32xf32>
    %433 = arith.mulf %421, %390 : vector<8x32xf32>
    %434 = arith.addf %432, %433 : vector<8x32xf32>
    %c0_165 = arith.constant 0 : index
    %c0_166 = arith.constant 0 : index
    %435 = vector.load %arg7[%c0_165, %c0_166] : memref<32x96xf32, #tpu.memory_space<vmem>>, vector<32x96xf32>
    %cst_167 = arith.constant dense<0.000000e+00> : vector<8x96xf32>
    %436 = tpu.matmul %391, %435, %cst_167 {dimension_numbers = #tpu.dot_dimension_numbers<[1], [0], [0], [1], [0, 0, 1, 1], [], []>, precision = #tpu.contract_precision<fp32>} : vector<8x32xf32>, vector<32x96xf32>, vector<8x96xf32> -> vector<8x96xf32>
    %437 = vector.extract_strided_slice %403 {offsets = [0, 0], sizes = [8, 32], strides = [1, 1]} : vector<8x96xf32> to vector<8x32xf32>
    %438 = vector.extract_strided_slice %436 {offsets = [0, 0], sizes = [8, 32], strides = [1, 1]} : vector<8x96xf32> to vector<8x32xf32>
    %439 = arith.addf %437, %438 : vector<8x32xf32>
    %440 = arith.negf %439 : vector<8x32xf32>
    %441 = math.exp %440 : vector<8x32xf32>
    %cst_168 = arith.constant 1.000000e+00 : f32
    %442 = vector.broadcast %cst_168 : f32 to vector<8x32xf32>
    %443 = arith.addf %442, %441 : vector<8x32xf32>
    %444 = arith.divf %442, %443 : vector<8x32xf32>
    %445 = vector.extract_strided_slice %403 {offsets = [0, 32], sizes = [8, 32], strides = [1, 1]} : vector<8x96xf32> to vector<8x32xf32>
    %446 = vector.extract_strided_slice %436 {offsets = [0, 32], sizes = [8, 32], strides = [1, 1]} : vector<8x96xf32> to vector<8x32xf32>
    %447 = arith.addf %445, %446 : vector<8x32xf32>
    %448 = arith.negf %447 : vector<8x32xf32>
    %449 = math.exp %448 : vector<8x32xf32>
    %cst_169 = arith.constant 1.000000e+00 : f32
    %450 = vector.broadcast %cst_169 : f32 to vector<8x32xf32>
    %451 = arith.addf %450, %449 : vector<8x32xf32>
    %452 = arith.divf %450, %451 : vector<8x32xf32>
    %453 = vector.extract_strided_slice %403 {offsets = [0, 64], sizes = [8, 32], strides = [1, 1]} : vector<8x96xf32> to vector<8x32xf32>
    %454 = vector.extract_strided_slice %436 {offsets = [0, 64], sizes = [8, 32], strides = [1, 1]} : vector<8x96xf32> to vector<8x32xf32>
    %c0_170 = arith.constant 0 : index
    %c0_171 = arith.constant 0 : index
    %455 = vector.load %arg9[%c0_170, %c0_171] : memref<1x32xf32, #tpu.memory_space<vmem>>, vector<1x32xf32>
    %456 = vector.broadcast %455 : vector<1x32xf32> to vector<8x32xf32>
    %457 = arith.addf %454, %456 : vector<8x32xf32>
    %458 = arith.mulf %444, %457 : vector<8x32xf32>
    %459 = arith.addf %453, %458 : vector<8x32xf32>
    %460 = math.tanh %459 : vector<8x32xf32>
    %cst_172 = arith.constant 1.000000e+00 : f32
    %461 = vector.broadcast %cst_172 : f32 to vector<8x32xf32>
    %462 = arith.subf %461, %452 : vector<8x32xf32>
    %463 = arith.mulf %462, %460 : vector<8x32xf32>
    %464 = arith.mulf %452, %391 : vector<8x32xf32>
    %465 = arith.addf %463, %464 : vector<8x32xf32>
    %466 = arith.select %399, %434, %390 : vector<8x32xi1>, vector<8x32xf32>
    %467 = arith.select %401, %465, %391 : vector<8x32xi1>, vector<8x32xf32>
    %cst_173 = arith.constant 0.000000e+00 : f32
    %468 = vector.broadcast %cst_173 : f32 to vector<8x32xf32>
    %469 = arith.select %399, %466, %468 : vector<8x32xi1>, vector<8x32xf32>
    %cst_174 = arith.constant 0.000000e+00 : f32
    %470 = vector.broadcast %cst_174 : f32 to vector<8x32xf32>
    %471 = arith.select %401, %467, %470 : vector<8x32xi1>, vector<8x32xf32>
    %c40_175 = arith.constant 40 : index
    %c0_176 = arith.constant 0 : index
    %472 = vector.load %arg26[%c40_175, %c0_176] : memref<64x32xf32, #tpu.memory_space<vmem>>, vector<8x32xf32>
    tpu.vector_store %arg26[%c40_175, %c0_176], %469 {strides = array<i32>} : memref<64x32xf32, #tpu.memory_space<vmem>>, vector<8x32xf32>,
    %c16_177 = arith.constant 16 : index
    %c0_178 = arith.constant 0 : index
    %473 = vector.load %arg27[%c16_177, %c0_178] : memref<64x32xf32, #tpu.memory_space<vmem>>, vector<8x32xf32>
    tpu.vector_store %arg27[%c16_177, %c0_178], %471 {strides = array<i32>} : memref<64x32xf32, #tpu.memory_space<vmem>>, vector<8x32xf32>,
    %cst_179 = arith.constant 6.000000e+00 : f32
    %474 = vector.broadcast %cst_179 : f32 to vector<8x32xf32>
    %475 = arith.cmpf ogt, %2, %474 : vector<8x32xf32>
    %cst_180 = arith.constant 1.000000e+00 : f32
    %476 = vector.broadcast %cst_180 : f32 to vector<8x32xf32>
    %477 = arith.cmpf ogt, %2, %476 : vector<8x32xf32>
    %c48_181 = arith.constant 48 : index
    %c0_182 = arith.constant 0 : index
    %478 = vector.load %arg24[%c48_181, %c0_182] : memref<64x96xf32, #tpu.memory_space<vmem>>, vector<8x96xf32>
    %c8_183 = arith.constant 8 : index
    %c0_184 = arith.constant 0 : index
    %479 = vector.load %arg25[%c8_183, %c0_184] : memref<64x96xf32, #tpu.memory_space<vmem>>, vector<8x96xf32>
    %c0_185 = arith.constant 0 : index
    %c0_186 = arith.constant 0 : index
    %480 = vector.load %arg3[%c0_185, %c0_186] : memref<32x96xf32, #tpu.memory_space<vmem>>, vector<32x96xf32>
    %cst_187 = arith.constant dense<0.000000e+00> : vector<8x96xf32>
    %481 = tpu.matmul %466, %480, %cst_187 {dimension_numbers = #tpu.dot_dimension_numbers<[1], [0], [0], [1], [0, 0, 1, 1], [], []>, precision = #tpu.contract_precision<fp32>} : vector<8x32xf32>, vector<32x96xf32>, vector<8x96xf32> -> vector<8x96xf32>
    %482 = vector.extract_strided_slice %478 {offsets = [0, 0], sizes = [8, 32], strides = [1, 1]} : vector<8x96xf32> to vector<8x32xf32>
    %483 = vector.extract_strided_slice %481 {offsets = [0, 0], sizes = [8, 32], strides = [1, 1]} : vector<8x96xf32> to vector<8x32xf32>
    %484 = arith.addf %482, %483 : vector<8x32xf32>
    %485 = arith.negf %484 : vector<8x32xf32>
    %486 = math.exp %485 : vector<8x32xf32>
    %cst_188 = arith.constant 1.000000e+00 : f32
    %487 = vector.broadcast %cst_188 : f32 to vector<8x32xf32>
    %488 = arith.addf %487, %486 : vector<8x32xf32>
    %489 = arith.divf %487, %488 : vector<8x32xf32>
    %490 = vector.extract_strided_slice %478 {offsets = [0, 32], sizes = [8, 32], strides = [1, 1]} : vector<8x96xf32> to vector<8x32xf32>
    %491 = vector.extract_strided_slice %481 {offsets = [0, 32], sizes = [8, 32], strides = [1, 1]} : vector<8x96xf32> to vector<8x32xf32>
    %492 = arith.addf %490, %491 : vector<8x32xf32>
    %493 = arith.negf %492 : vector<8x32xf32>
    %494 = math.exp %493 : vector<8x32xf32>
    %cst_189 = arith.constant 1.000000e+00 : f32
    %495 = vector.broadcast %cst_189 : f32 to vector<8x32xf32>
    %496 = arith.addf %495, %494 : vector<8x32xf32>
    %497 = arith.divf %495, %496 : vector<8x32xf32>
    %498 = vector.extract_strided_slice %478 {offsets = [0, 64], sizes = [8, 32], strides = [1, 1]} : vector<8x96xf32> to vector<8x32xf32>
    %499 = vector.extract_strided_slice %481 {offsets = [0, 64], sizes = [8, 32], strides = [1, 1]} : vector<8x96xf32> to vector<8x32xf32>
    %c0_190 = arith.constant 0 : index
    %c0_191 = arith.constant 0 : index
    %500 = vector.load %arg5[%c0_190, %c0_191] : memref<1x32xf32, #tpu.memory_space<vmem>>, vector<1x32xf32>
    %501 = vector.broadcast %500 : vector<1x32xf32> to vector<8x32xf32>
    %502 = arith.addf %499, %501 : vector<8x32xf32>
    %503 = arith.mulf %489, %502 : vector<8x32xf32>
    %504 = arith.addf %498, %503 : vector<8x32xf32>
    %505 = math.tanh %504 : vector<8x32xf32>
    %cst_192 = arith.constant 1.000000e+00 : f32
    %506 = vector.broadcast %cst_192 : f32 to vector<8x32xf32>
    %507 = arith.subf %506, %497 : vector<8x32xf32>
    %508 = arith.mulf %507, %505 : vector<8x32xf32>
    %509 = arith.mulf %497, %466 : vector<8x32xf32>
    %510 = arith.addf %508, %509 : vector<8x32xf32>
    %c0_193 = arith.constant 0 : index
    %c0_194 = arith.constant 0 : index
    %511 = vector.load %arg7[%c0_193, %c0_194] : memref<32x96xf32, #tpu.memory_space<vmem>>, vector<32x96xf32>
    %cst_195 = arith.constant dense<0.000000e+00> : vector<8x96xf32>
    %512 = tpu.matmul %467, %511, %cst_195 {dimension_numbers = #tpu.dot_dimension_numbers<[1], [0], [0], [1], [0, 0, 1, 1], [], []>, precision = #tpu.contract_precision<fp32>} : vector<8x32xf32>, vector<32x96xf32>, vector<8x96xf32> -> vector<8x96xf32>
    %513 = vector.extract_strided_slice %479 {offsets = [0, 0], sizes = [8, 32], strides = [1, 1]} : vector<8x96xf32> to vector<8x32xf32>
    %514 = vector.extract_strided_slice %512 {offsets = [0, 0], sizes = [8, 32], strides = [1, 1]} : vector<8x96xf32> to vector<8x32xf32>
    %515 = arith.addf %513, %514 : vector<8x32xf32>
    %516 = arith.negf %515 : vector<8x32xf32>
    %517 = math.exp %516 : vector<8x32xf32>
    %cst_196 = arith.constant 1.000000e+00 : f32
    %518 = vector.broadcast %cst_196 : f32 to vector<8x32xf32>
    %519 = arith.addf %518, %517 : vector<8x32xf32>
    %520 = arith.divf %518, %519 : vector<8x32xf32>
    %521 = vector.extract_strided_slice %479 {offsets = [0, 32], sizes = [8, 32], strides = [1, 1]} : vector<8x96xf32> to vector<8x32xf32>
    %522 = vector.extract_strided_slice %512 {offsets = [0, 32], sizes = [8, 32], strides = [1, 1]} : vector<8x96xf32> to vector<8x32xf32>
    %523 = arith.addf %521, %522 : vector<8x32xf32>
    %524 = arith.negf %523 : vector<8x32xf32>
    %525 = math.exp %524 : vector<8x32xf32>
    %cst_197 = arith.constant 1.000000e+00 : f32
    %526 = vector.broadcast %cst_197 : f32 to vector<8x32xf32>
    %527 = arith.addf %526, %525 : vector<8x32xf32>
    %528 = arith.divf %526, %527 : vector<8x32xf32>
    %529 = vector.extract_strided_slice %479 {offsets = [0, 64], sizes = [8, 32], strides = [1, 1]} : vector<8x96xf32> to vector<8x32xf32>
    %530 = vector.extract_strided_slice %512 {offsets = [0, 64], sizes = [8, 32], strides = [1, 1]} : vector<8x96xf32> to vector<8x32xf32>
    %c0_198 = arith.constant 0 : index
    %c0_199 = arith.constant 0 : index
    %531 = vector.load %arg9[%c0_198, %c0_199] : memref<1x32xf32, #tpu.memory_space<vmem>>, vector<1x32xf32>
    %532 = vector.broadcast %531 : vector<1x32xf32> to vector<8x32xf32>
    %533 = arith.addf %530, %532 : vector<8x32xf32>
    %534 = arith.mulf %520, %533 : vector<8x32xf32>
    %535 = arith.addf %529, %534 : vector<8x32xf32>
    %536 = math.tanh %535 : vector<8x32xf32>
    %cst_200 = arith.constant 1.000000e+00 : f32
    %537 = vector.broadcast %cst_200 : f32 to vector<8x32xf32>
    %538 = arith.subf %537, %528 : vector<8x32xf32>
    %539 = arith.mulf %538, %536 : vector<8x32xf32>
    %540 = arith.mulf %528, %467 : vector<8x32xf32>
    %541 = arith.addf %539, %540 : vector<8x32xf32>
    %542 = arith.select %475, %510, %466 : vector<8x32xi1>, vector<8x32xf32>
    %543 = arith.select %477, %541, %467 : vector<8x32xi1>, vector<8x32xf32>
    %cst_201 = arith.constant 0.000000e+00 : f32
    %544 = vector.broadcast %cst_201 : f32 to vector<8x32xf32>
    %545 = arith.select %475, %542, %544 : vector<8x32xi1>, vector<8x32xf32>
    %cst_202 = arith.constant 0.000000e+00 : f32
    %546 = vector.broadcast %cst_202 : f32 to vector<8x32xf32>
    %547 = arith.select %477, %543, %546 : vector<8x32xi1>, vector<8x32xf32>
    %c48_203 = arith.constant 48 : index
    %c0_204 = arith.constant 0 : index
    %548 = vector.load %arg26[%c48_203, %c0_204] : memref<64x32xf32, #tpu.memory_space<vmem>>, vector<8x32xf32>
    tpu.vector_store %arg26[%c48_203, %c0_204], %545 {strides = array<i32>} : memref<64x32xf32, #tpu.memory_space<vmem>>, vector<8x32xf32>,
    %c8_205 = arith.constant 8 : index
    %c0_206 = arith.constant 0 : index
    %549 = vector.load %arg27[%c8_205, %c0_206] : memref<64x32xf32, #tpu.memory_space<vmem>>, vector<8x32xf32>
    tpu.vector_store %arg27[%c8_205, %c0_206], %547 {strides = array<i32>} : memref<64x32xf32, #tpu.memory_space<vmem>>, vector<8x32xf32>,
    %cst_207 = arith.constant 7.000000e+00 : f32
    %550 = vector.broadcast %cst_207 : f32 to vector<8x32xf32>
    %551 = arith.cmpf ogt, %2, %550 : vector<8x32xf32>
    %cst_208 = arith.constant 0.000000e+00 : f32
    %552 = vector.broadcast %cst_208 : f32 to vector<8x32xf32>
    %553 = arith.cmpf ogt, %2, %552 : vector<8x32xf32>
    %c56_209 = arith.constant 56 : index
    %c0_210 = arith.constant 0 : index
    %554 = vector.load %arg24[%c56_209, %c0_210] : memref<64x96xf32, #tpu.memory_space<vmem>>, vector<8x96xf32>
    %c0_211 = arith.constant 0 : index
    %c0_212 = arith.constant 0 : index
    %555 = vector.load %arg25[%c0_211, %c0_212] : memref<64x96xf32, #tpu.memory_space<vmem>>, vector<8x96xf32>
    %c0_213 = arith.constant 0 : index
    %c0_214 = arith.constant 0 : index
    %556 = vector.load %arg3[%c0_213, %c0_214] : memref<32x96xf32, #tpu.memory_space<vmem>>, vector<32x96xf32>
    %cst_215 = arith.constant dense<0.000000e+00> : vector<8x96xf32>
    %557 = tpu.matmul %542, %556, %cst_215 {dimension_numbers = #tpu.dot_dimension_numbers<[1], [0], [0], [1], [0, 0, 1, 1], [], []>, precision = #tpu.contract_precision<fp32>} : vector<8x32xf32>, vector<32x96xf32>, vector<8x96xf32> -> vector<8x96xf32>
    %558 = vector.extract_strided_slice %554 {offsets = [0, 0], sizes = [8, 32], strides = [1, 1]} : vector<8x96xf32> to vector<8x32xf32>
    %559 = vector.extract_strided_slice %557 {offsets = [0, 0], sizes = [8, 32], strides = [1, 1]} : vector<8x96xf32> to vector<8x32xf32>
    %560 = arith.addf %558, %559 : vector<8x32xf32>
    %561 = arith.negf %560 : vector<8x32xf32>
    %562 = math.exp %561 : vector<8x32xf32>
    %cst_216 = arith.constant 1.000000e+00 : f32
    %563 = vector.broadcast %cst_216 : f32 to vector<8x32xf32>
    %564 = arith.addf %563, %562 : vector<8x32xf32>
    %565 = arith.divf %563, %564 : vector<8x32xf32>
    %566 = vector.extract_strided_slice %554 {offsets = [0, 32], sizes = [8, 32], strides = [1, 1]} : vector<8x96xf32> to vector<8x32xf32>
    %567 = vector.extract_strided_slice %557 {offsets = [0, 32], sizes = [8, 32], strides = [1, 1]} : vector<8x96xf32> to vector<8x32xf32>
    %568 = arith.addf %566, %567 : vector<8x32xf32>
    %569 = arith.negf %568 : vector<8x32xf32>
    %570 = math.exp %569 : vector<8x32xf32>
    %cst_217 = arith.constant 1.000000e+00 : f32
    %571 = vector.broadcast %cst_217 : f32 to vector<8x32xf32>
    %572 = arith.addf %571, %570 : vector<8x32xf32>
    %573 = arith.divf %571, %572 : vector<8x32xf32>
    %574 = vector.extract_strided_slice %554 {offsets = [0, 64], sizes = [8, 32], strides = [1, 1]} : vector<8x96xf32> to vector<8x32xf32>
    %575 = vector.extract_strided_slice %557 {offsets = [0, 64], sizes = [8, 32], strides = [1, 1]} : vector<8x96xf32> to vector<8x32xf32>
    %c0_218 = arith.constant 0 : index
    %c0_219 = arith.constant 0 : index
    %576 = vector.load %arg5[%c0_218, %c0_219] : memref<1x32xf32, #tpu.memory_space<vmem>>, vector<1x32xf32>
    %577 = vector.broadcast %576 : vector<1x32xf32> to vector<8x32xf32>
    %578 = arith.addf %575, %577 : vector<8x32xf32>
    %579 = arith.mulf %565, %578 : vector<8x32xf32>
    %580 = arith.addf %574, %579 : vector<8x32xf32>
    %581 = math.tanh %580 : vector<8x32xf32>
    %cst_220 = arith.constant 1.000000e+00 : f32
    %582 = vector.broadcast %cst_220 : f32 to vector<8x32xf32>
    %583 = arith.subf %582, %573 : vector<8x32xf32>
    %584 = arith.mulf %583, %581 : vector<8x32xf32>
    %585 = arith.mulf %573, %542 : vector<8x32xf32>
    %586 = arith.addf %584, %585 : vector<8x32xf32>
    %c0_221 = arith.constant 0 : index
    %c0_222 = arith.constant 0 : index
    %587 = vector.load %arg7[%c0_221, %c0_222] : memref<32x96xf32, #tpu.memory_space<vmem>>, vector<32x96xf32>
    %cst_223 = arith.constant dense<0.000000e+00> : vector<8x96xf32>
    %588 = tpu.matmul %543, %587, %cst_223 {dimension_numbers = #tpu.dot_dimension_numbers<[1], [0], [0], [1], [0, 0, 1, 1], [], []>, precision = #tpu.contract_precision<fp32>} : vector<8x32xf32>, vector<32x96xf32>, vector<8x96xf32> -> vector<8x96xf32>
    %589 = vector.extract_strided_slice %555 {offsets = [0, 0], sizes = [8, 32], strides = [1, 1]} : vector<8x96xf32> to vector<8x32xf32>
    %590 = vector.extract_strided_slice %588 {offsets = [0, 0], sizes = [8, 32], strides = [1, 1]} : vector<8x96xf32> to vector<8x32xf32>
    %591 = arith.addf %589, %590 : vector<8x32xf32>
    %592 = arith.negf %591 : vector<8x32xf32>
    %593 = math.exp %592 : vector<8x32xf32>
    %cst_224 = arith.constant 1.000000e+00 : f32
    %594 = vector.broadcast %cst_224 : f32 to vector<8x32xf32>
    %595 = arith.addf %594, %593 : vector<8x32xf32>
    %596 = arith.divf %594, %595 : vector<8x32xf32>
    %597 = vector.extract_strided_slice %555 {offsets = [0, 32], sizes = [8, 32], strides = [1, 1]} : vector<8x96xf32> to vector<8x32xf32>
    %598 = vector.extract_strided_slice %588 {offsets = [0, 32], sizes = [8, 32], strides = [1, 1]} : vector<8x96xf32> to vector<8x32xf32>
    %599 = arith.addf %597, %598 : vector<8x32xf32>
    %600 = arith.negf %599 : vector<8x32xf32>
    %601 = math.exp %600 : vector<8x32xf32>
    %cst_225 = arith.constant 1.000000e+00 : f32
    %602 = vector.broadcast %cst_225 : f32 to vector<8x32xf32>
    %603 = arith.addf %602, %601 : vector<8x32xf32>
    %604 = arith.divf %602, %603 : vector<8x32xf32>
    %605 = vector.extract_strided_slice %555 {offsets = [0, 64], sizes = [8, 32], strides = [1, 1]} : vector<8x96xf32> to vector<8x32xf32>
    %606 = vector.extract_strided_slice %588 {offsets = [0, 64], sizes = [8, 32], strides = [1, 1]} : vector<8x96xf32> to vector<8x32xf32>
    %c0_226 = arith.constant 0 : index
    %c0_227 = arith.constant 0 : index
    %607 = vector.load %arg9[%c0_226, %c0_227] : memref<1x32xf32, #tpu.memory_space<vmem>>, vector<1x32xf32>
    %608 = vector.broadcast %607 : vector<1x32xf32> to vector<8x32xf32>
    %609 = arith.addf %606, %608 : vector<8x32xf32>
    %610 = arith.mulf %596, %609 : vector<8x32xf32>
    %611 = arith.addf %605, %610 : vector<8x32xf32>
    %612 = math.tanh %611 : vector<8x32xf32>
    %cst_228 = arith.constant 1.000000e+00 : f32
    %613 = vector.broadcast %cst_228 : f32 to vector<8x32xf32>
    %614 = arith.subf %613, %604 : vector<8x32xf32>
    %615 = arith.mulf %614, %612 : vector<8x32xf32>
    %616 = arith.mulf %604, %543 : vector<8x32xf32>
    %617 = arith.addf %615, %616 : vector<8x32xf32>
    %618 = arith.select %551, %586, %542 : vector<8x32xi1>, vector<8x32xf32>
    %619 = arith.select %553, %617, %543 : vector<8x32xi1>, vector<8x32xf32>
    %cst_229 = arith.constant 0.000000e+00 : f32
    %620 = vector.broadcast %cst_229 : f32 to vector<8x32xf32>
    %621 = arith.select %551, %618, %620 : vector<8x32xi1>, vector<8x32xf32>
    %cst_230 = arith.constant 0.000000e+00 : f32
    %622 = vector.broadcast %cst_230 : f32 to vector<8x32xf32>
    %623 = arith.select %553, %619, %622 : vector<8x32xi1>, vector<8x32xf32>
    %c56_231 = arith.constant 56 : index
    %c0_232 = arith.constant 0 : index
    %624 = vector.load %arg26[%c56_231, %c0_232] : memref<64x32xf32, #tpu.memory_space<vmem>>, vector<8x32xf32>
    tpu.vector_store %arg26[%c56_231, %c0_232], %621 {strides = array<i32>} : memref<64x32xf32, #tpu.memory_space<vmem>>, vector<8x32xf32>,
    %c0_233 = arith.constant 0 : index
    %c0_234 = arith.constant 0 : index
    %625 = vector.load %arg27[%c0_233, %c0_234] : memref<64x32xf32, #tpu.memory_space<vmem>>, vector<8x32xf32>
    tpu.vector_store %arg27[%c0_233, %c0_234], %623 {strides = array<i32>} : memref<64x32xf32, #tpu.memory_space<vmem>>, vector<8x32xf32>,
    %c0_235 = arith.constant 0 : index
    %c0_236 = arith.constant 0 : index
    %626 = vector.load %arg26[%c0_235, %c0_236] : memref<64x32xf32, #tpu.memory_space<vmem>>, vector<64x32xf32>
    %c0_237 = arith.constant 0 : index
    %c0_238 = arith.constant 0 : index
    %627 = vector.load %arg27[%c0_237, %c0_238] : memref<64x32xf32, #tpu.memory_space<vmem>>, vector<64x32xf32>
    %c0_239 = arith.constant 0 : index
    %c0_240 = arith.constant 0 : index
    %628 = vector.load %arg10[%c0_239, %c0_240] : memref<64x96xf32, #tpu.memory_space<vmem>>, vector<32x96xf32>
    %cst_241 = arith.constant dense<0.000000e+00> : vector<64x96xf32>
    %629 = tpu.matmul %626, %628, %cst_241 {dimension_numbers = #tpu.dot_dimension_numbers<[1], [0], [0], [1], [0, 0, 1, 1], [], []>, precision = #tpu.contract_precision<fp32>} : vector<64x32xf32>, vector<32x96xf32>, vector<64x96xf32> -> vector<64x96xf32>
    %c32_242 = arith.constant 32 : index
    %c0_243 = arith.constant 0 : index
    %630 = vector.load %arg10[%c32_242, %c0_243] : memref<64x96xf32, #tpu.memory_space<vmem>>, vector<32x96xf32>
    %cst_244 = arith.constant dense<0.000000e+00> : vector<64x96xf32>
    %631 = tpu.matmul %627, %630, %cst_244 {dimension_numbers = #tpu.dot_dimension_numbers<[1], [0], [0], [1], [0, 0, 1, 1], [], []>, precision = #tpu.contract_precision<fp32>} : vector<64x32xf32>, vector<32x96xf32>, vector<64x96xf32> -> vector<64x96xf32>
    %632 = arith.addf %629, %631 : vector<64x96xf32>
    %c0_245 = arith.constant 0 : index
    %c0_246 = arith.constant 0 : index
    %633 = vector.load %arg12[%c0_245, %c0_246] : memref<1x96xf32, #tpu.memory_space<vmem>>, vector<1x96xf32>
    %634 = vector.broadcast %633 : vector<1x96xf32> to vector<64x96xf32>
    %635 = arith.addf %632, %634 : vector<64x96xf32>
    %c0_247 = arith.constant 0 : index
    %c0_248 = arith.constant 0 : index
    %636 = vector.load %arg24[%c0_247, %c0_248] : memref<64x96xf32, #tpu.memory_space<vmem>>, vector<64x96xf32>
    tpu.vector_store %arg24[%c0_247, %c0_248], %635 {strides = array<i32>} : memref<64x96xf32, #tpu.memory_space<vmem>>, vector<64x96xf32>,
    %c0_249 = arith.constant 0 : index
    %c0_250 = arith.constant 0 : index
    %637 = vector.load %arg14[%c0_249, %c0_250] : memref<64x96xf32, #tpu.memory_space<vmem>>, vector<32x96xf32>
    %cst_251 = arith.constant dense<0.000000e+00> : vector<64x96xf32>
    %638 = tpu.matmul %626, %637, %cst_251 {dimension_numbers = #tpu.dot_dimension_numbers<[1], [0], [0], [1], [0, 0, 1, 1], [], []>, precision = #tpu.contract_precision<fp32>} : vector<64x32xf32>, vector<32x96xf32>, vector<64x96xf32> -> vector<64x96xf32>
    %c32_252 = arith.constant 32 : index
    %c0_253 = arith.constant 0 : index
    %639 = vector.load %arg14[%c32_252, %c0_253] : memref<64x96xf32, #tpu.memory_space<vmem>>, vector<32x96xf32>
    %cst_254 = arith.constant dense<0.000000e+00> : vector<64x96xf32>
    %640 = tpu.matmul %627, %639, %cst_254 {dimension_numbers = #tpu.dot_dimension_numbers<[1], [0], [0], [1], [0, 0, 1, 1], [], []>, precision = #tpu.contract_precision<fp32>} : vector<64x32xf32>, vector<32x96xf32>, vector<64x96xf32> -> vector<64x96xf32>
    %641 = arith.addf %638, %640 : vector<64x96xf32>
    %c0_255 = arith.constant 0 : index
    %c0_256 = arith.constant 0 : index
    %642 = vector.load %arg16[%c0_255, %c0_256] : memref<1x96xf32, #tpu.memory_space<vmem>>, vector<1x96xf32>
    %643 = vector.broadcast %642 : vector<1x96xf32> to vector<64x96xf32>
    %644 = arith.addf %641, %643 : vector<64x96xf32>
    %c0_257 = arith.constant 0 : index
    %c0_258 = arith.constant 0 : index
    %645 = vector.load %arg25[%c0_257, %c0_258] : memref<64x96xf32, #tpu.memory_space<vmem>>, vector<64x96xf32>
    tpu.vector_store %arg25[%c0_257, %c0_258], %644 {strides = array<i32>} : memref<64x96xf32, #tpu.memory_space<vmem>>, vector<64x96xf32>,
    %cst_259 = arith.constant 0.000000e+00 : f32
    %646 = vector.broadcast %cst_259 : f32 to vector<8x32xf32>
    %cst_260 = arith.constant 0.000000e+00 : f32
    %647 = vector.broadcast %cst_260 : f32 to vector<8x32xf32>
    %cst_261 = arith.constant 0.000000e+00 : f32
    %648 = vector.broadcast %cst_261 : f32 to vector<8x32xf32>
    %cst_262 = arith.constant 0.000000e+00 : f32
    %649 = vector.broadcast %cst_262 : f32 to vector<8x32xf32>
    %cst_263 = arith.constant 0.000000e+00 : f32
    %650 = vector.broadcast %cst_263 : f32 to vector<8x32xf32>
    %651 = arith.cmpf ogt, %2, %650 : vector<8x32xf32>
    %cst_264 = arith.constant 7.000000e+00 : f32
    %652 = vector.broadcast %cst_264 : f32 to vector<8x32xf32>
    %653 = arith.cmpf ogt, %2, %652 : vector<8x32xf32>
    %c0_265 = arith.constant 0 : index
    %c0_266 = arith.constant 0 : index
    %654 = vector.load %arg24[%c0_265, %c0_266] : memref<64x96xf32, #tpu.memory_space<vmem>>, vector<8x96xf32>
    %c56_267 = arith.constant 56 : index
    %c0_268 = arith.constant 0 : index
    %655 = vector.load %arg25[%c56_267, %c0_268] : memref<64x96xf32, #tpu.memory_space<vmem>>, vector<8x96xf32>
    %c0_269 = arith.constant 0 : index
    %c0_270 = arith.constant 0 : index
    %656 = vector.load %arg11[%c0_269, %c0_270] : memref<32x96xf32, #tpu.memory_space<vmem>>, vector<32x96xf32>
    %cst_271 = arith.constant dense<0.000000e+00> : vector<8x96xf32>
    %657 = tpu.matmul %646, %656, %cst_271 {dimension_numbers = #tpu.dot_dimension_numbers<[1], [0], [0], [1], [0, 0, 1, 1], [], []>, precision = #tpu.contract_precision<fp32>} : vector<8x32xf32>, vector<32x96xf32>, vector<8x96xf32> -> vector<8x96xf32>
    %658 = vector.extract_strided_slice %654 {offsets = [0, 0], sizes = [8, 32], strides = [1, 1]} : vector<8x96xf32> to vector<8x32xf32>
    %659 = vector.extract_strided_slice %657 {offsets = [0, 0], sizes = [8, 32], strides = [1, 1]} : vector<8x96xf32> to vector<8x32xf32>
    %660 = arith.addf %658, %659 : vector<8x32xf32>
    %661 = arith.negf %660 : vector<8x32xf32>
    %662 = math.exp %661 : vector<8x32xf32>
    %cst_272 = arith.constant 1.000000e+00 : f32
    %663 = vector.broadcast %cst_272 : f32 to vector<8x32xf32>
    %664 = arith.addf %663, %662 : vector<8x32xf32>
    %665 = arith.divf %663, %664 : vector<8x32xf32>
    %666 = vector.extract_strided_slice %654 {offsets = [0, 32], sizes = [8, 32], strides = [1, 1]} : vector<8x96xf32> to vector<8x32xf32>
    %667 = vector.extract_strided_slice %657 {offsets = [0, 32], sizes = [8, 32], strides = [1, 1]} : vector<8x96xf32> to vector<8x32xf32>
    %668 = arith.addf %666, %667 : vector<8x32xf32>
    %669 = arith.negf %668 : vector<8x32xf32>
    %670 = math.exp %669 : vector<8x32xf32>
    %cst_273 = arith.constant 1.000000e+00 : f32
    %671 = vector.broadcast %cst_273 : f32 to vector<8x32xf32>
    %672 = arith.addf %671, %670 : vector<8x32xf32>
    %673 = arith.divf %671, %672 : vector<8x32xf32>
    %674 = vector.extract_strided_slice %654 {offsets = [0, 64], sizes = [8, 32], strides = [1, 1]} : vector<8x96xf32> to vector<8x32xf32>
    %675 = vector.extract_strided_slice %657 {offsets = [0, 64], sizes = [8, 32], strides = [1, 1]} : vector<8x96xf32> to vector<8x32xf32>
    %c0_274 = arith.constant 0 : index
    %c0_275 = arith.constant 0 : index
    %676 = vector.load %arg13[%c0_274, %c0_275] : memref<1x32xf32, #tpu.memory_space<vmem>>, vector<1x32xf32>
    %677 = vector.broadcast %676 : vector<1x32xf32> to vector<8x32xf32>
    %678 = arith.addf %675, %677 : vector<8x32xf32>
    %679 = arith.mulf %665, %678 : vector<8x32xf32>
    %680 = arith.addf %674, %679 : vector<8x32xf32>
    %681 = math.tanh %680 : vector<8x32xf32>
    %cst_276 = arith.constant 1.000000e+00 : f32
    %682 = vector.broadcast %cst_276 : f32 to vector<8x32xf32>
    %683 = arith.subf %682, %673 : vector<8x32xf32>
    %684 = arith.mulf %683, %681 : vector<8x32xf32>
    %685 = arith.mulf %673, %646 : vector<8x32xf32>
    %686 = arith.addf %684, %685 : vector<8x32xf32>
    %c0_277 = arith.constant 0 : index
    %c0_278 = arith.constant 0 : index
    %687 = vector.load %arg15[%c0_277, %c0_278] : memref<32x96xf32, #tpu.memory_space<vmem>>, vector<32x96xf32>
    %cst_279 = arith.constant dense<0.000000e+00> : vector<8x96xf32>
    %688 = tpu.matmul %647, %687, %cst_279 {dimension_numbers = #tpu.dot_dimension_numbers<[1], [0], [0], [1], [0, 0, 1, 1], [], []>, precision = #tpu.contract_precision<fp32>} : vector<8x32xf32>, vector<32x96xf32>, vector<8x96xf32> -> vector<8x96xf32>
    %689 = vector.extract_strided_slice %655 {offsets = [0, 0], sizes = [8, 32], strides = [1, 1]} : vector<8x96xf32> to vector<8x32xf32>
    %690 = vector.extract_strided_slice %688 {offsets = [0, 0], sizes = [8, 32], strides = [1, 1]} : vector<8x96xf32> to vector<8x32xf32>
    %691 = arith.addf %689, %690 : vector<8x32xf32>
    %692 = arith.negf %691 : vector<8x32xf32>
    %693 = math.exp %692 : vector<8x32xf32>
    %cst_280 = arith.constant 1.000000e+00 : f32
    %694 = vector.broadcast %cst_280 : f32 to vector<8x32xf32>
    %695 = arith.addf %694, %693 : vector<8x32xf32>
    %696 = arith.divf %694, %695 : vector<8x32xf32>
    %697 = vector.extract_strided_slice %655 {offsets = [0, 32], sizes = [8, 32], strides = [1, 1]} : vector<8x96xf32> to vector<8x32xf32>
    %698 = vector.extract_strided_slice %688 {offsets = [0, 32], sizes = [8, 32], strides = [1, 1]} : vector<8x96xf32> to vector<8x32xf32>
    %699 = arith.addf %697, %698 : vector<8x32xf32>
    %700 = arith.negf %699 : vector<8x32xf32>
    %701 = math.exp %700 : vector<8x32xf32>
    %cst_281 = arith.constant 1.000000e+00 : f32
    %702 = vector.broadcast %cst_281 : f32 to vector<8x32xf32>
    %703 = arith.addf %702, %701 : vector<8x32xf32>
    %704 = arith.divf %702, %703 : vector<8x32xf32>
    %705 = vector.extract_strided_slice %655 {offsets = [0, 64], sizes = [8, 32], strides = [1, 1]} : vector<8x96xf32> to vector<8x32xf32>
    %706 = vector.extract_strided_slice %688 {offsets = [0, 64], sizes = [8, 32], strides = [1, 1]} : vector<8x96xf32> to vector<8x32xf32>
    %c0_282 = arith.constant 0 : index
    %c0_283 = arith.constant 0 : index
    %707 = vector.load %arg17[%c0_282, %c0_283] : memref<1x32xf32, #tpu.memory_space<vmem>>, vector<1x32xf32>
    %708 = vector.broadcast %707 : vector<1x32xf32> to vector<8x32xf32>
    %709 = arith.addf %706, %708 : vector<8x32xf32>
    %710 = arith.mulf %696, %709 : vector<8x32xf32>
    %711 = arith.addf %705, %710 : vector<8x32xf32>
    %712 = math.tanh %711 : vector<8x32xf32>
    %cst_284 = arith.constant 1.000000e+00 : f32
    %713 = vector.broadcast %cst_284 : f32 to vector<8x32xf32>
    %714 = arith.subf %713, %704 : vector<8x32xf32>
    %715 = arith.mulf %714, %712 : vector<8x32xf32>
    %716 = arith.mulf %704, %647 : vector<8x32xf32>
    %717 = arith.addf %715, %716 : vector<8x32xf32>
    %718 = arith.select %651, %686, %646 : vector<8x32xi1>, vector<8x32xf32>
    %719 = arith.select %653, %717, %647 : vector<8x32xi1>, vector<8x32xf32>
    %cst_285 = arith.constant 0.000000e+00 : f32
    %720 = vector.broadcast %cst_285 : f32 to vector<8x32xf32>
    %721 = arith.select %651, %718, %720 : vector<8x32xi1>, vector<8x32xf32>
    %cst_286 = arith.constant 0.000000e+00 : f32
    %722 = vector.broadcast %cst_286 : f32 to vector<8x32xf32>
    %723 = arith.select %653, %719, %722 : vector<8x32xi1>, vector<8x32xf32>
    %724 = arith.addf %648, %721 : vector<8x32xf32>
    %725 = arith.addf %649, %723 : vector<8x32xf32>
    %cst_287 = arith.constant 1.000000e+00 : f32
    %726 = vector.broadcast %cst_287 : f32 to vector<8x32xf32>
    %727 = arith.cmpf ogt, %2, %726 : vector<8x32xf32>
    %cst_288 = arith.constant 6.000000e+00 : f32
    %728 = vector.broadcast %cst_288 : f32 to vector<8x32xf32>
    %729 = arith.cmpf ogt, %2, %728 : vector<8x32xf32>
    %c8_289 = arith.constant 8 : index
    %c0_290 = arith.constant 0 : index
    %730 = vector.load %arg24[%c8_289, %c0_290] : memref<64x96xf32, #tpu.memory_space<vmem>>, vector<8x96xf32>
    %c48_291 = arith.constant 48 : index
    %c0_292 = arith.constant 0 : index
    %731 = vector.load %arg25[%c48_291, %c0_292] : memref<64x96xf32, #tpu.memory_space<vmem>>, vector<8x96xf32>
    %c0_293 = arith.constant 0 : index
    %c0_294 = arith.constant 0 : index
    %732 = vector.load %arg11[%c0_293, %c0_294] : memref<32x96xf32, #tpu.memory_space<vmem>>, vector<32x96xf32>
    %cst_295 = arith.constant dense<0.000000e+00> : vector<8x96xf32>
    %733 = tpu.matmul %718, %732, %cst_295 {dimension_numbers = #tpu.dot_dimension_numbers<[1], [0], [0], [1], [0, 0, 1, 1], [], []>, precision = #tpu.contract_precision<fp32>} : vector<8x32xf32>, vector<32x96xf32>, vector<8x96xf32> -> vector<8x96xf32>
    %734 = vector.extract_strided_slice %730 {offsets = [0, 0], sizes = [8, 32], strides = [1, 1]} : vector<8x96xf32> to vector<8x32xf32>
    %735 = vector.extract_strided_slice %733 {offsets = [0, 0], sizes = [8, 32], strides = [1, 1]} : vector<8x96xf32> to vector<8x32xf32>
    %736 = arith.addf %734, %735 : vector<8x32xf32>
    %737 = arith.negf %736 : vector<8x32xf32>
    %738 = math.exp %737 : vector<8x32xf32>
    %cst_296 = arith.constant 1.000000e+00 : f32
    %739 = vector.broadcast %cst_296 : f32 to vector<8x32xf32>
    %740 = arith.addf %739, %738 : vector<8x32xf32>
    %741 = arith.divf %739, %740 : vector<8x32xf32>
    %742 = vector.extract_strided_slice %730 {offsets = [0, 32], sizes = [8, 32], strides = [1, 1]} : vector<8x96xf32> to vector<8x32xf32>
    %743 = vector.extract_strided_slice %733 {offsets = [0, 32], sizes = [8, 32], strides = [1, 1]} : vector<8x96xf32> to vector<8x32xf32>
    %744 = arith.addf %742, %743 : vector<8x32xf32>
    %745 = arith.negf %744 : vector<8x32xf32>
    %746 = math.exp %745 : vector<8x32xf32>
    %cst_297 = arith.constant 1.000000e+00 : f32
    %747 = vector.broadcast %cst_297 : f32 to vector<8x32xf32>
    %748 = arith.addf %747, %746 : vector<8x32xf32>
    %749 = arith.divf %747, %748 : vector<8x32xf32>
    %750 = vector.extract_strided_slice %730 {offsets = [0, 64], sizes = [8, 32], strides = [1, 1]} : vector<8x96xf32> to vector<8x32xf32>
    %751 = vector.extract_strided_slice %733 {offsets = [0, 64], sizes = [8, 32], strides = [1, 1]} : vector<8x96xf32> to vector<8x32xf32>
    %c0_298 = arith.constant 0 : index
    %c0_299 = arith.constant 0 : index
    %752 = vector.load %arg13[%c0_298, %c0_299] : memref<1x32xf32, #tpu.memory_space<vmem>>, vector<1x32xf32>
    %753 = vector.broadcast %752 : vector<1x32xf32> to vector<8x32xf32>
    %754 = arith.addf %751, %753 : vector<8x32xf32>
    %755 = arith.mulf %741, %754 : vector<8x32xf32>
    %756 = arith.addf %750, %755 : vector<8x32xf32>
    %757 = math.tanh %756 : vector<8x32xf32>
    %cst_300 = arith.constant 1.000000e+00 : f32
    %758 = vector.broadcast %cst_300 : f32 to vector<8x32xf32>
    %759 = arith.subf %758, %749 : vector<8x32xf32>
    %760 = arith.mulf %759, %757 : vector<8x32xf32>
    %761 = arith.mulf %749, %718 : vector<8x32xf32>
    %762 = arith.addf %760, %761 : vector<8x32xf32>
    %c0_301 = arith.constant 0 : index
    %c0_302 = arith.constant 0 : index
    %763 = vector.load %arg15[%c0_301, %c0_302] : memref<32x96xf32, #tpu.memory_space<vmem>>, vector<32x96xf32>
    %cst_303 = arith.constant dense<0.000000e+00> : vector<8x96xf32>
    %764 = tpu.matmul %719, %763, %cst_303 {dimension_numbers = #tpu.dot_dimension_numbers<[1], [0], [0], [1], [0, 0, 1, 1], [], []>, precision = #tpu.contract_precision<fp32>} : vector<8x32xf32>, vector<32x96xf32>, vector<8x96xf32> -> vector<8x96xf32>
    %765 = vector.extract_strided_slice %731 {offsets = [0, 0], sizes = [8, 32], strides = [1, 1]} : vector<8x96xf32> to vector<8x32xf32>
    %766 = vector.extract_strided_slice %764 {offsets = [0, 0], sizes = [8, 32], strides = [1, 1]} : vector<8x96xf32> to vector<8x32xf32>
    %767 = arith.addf %765, %766 : vector<8x32xf32>
    %768 = arith.negf %767 : vector<8x32xf32>
    %769 = math.exp %768 : vector<8x32xf32>
    %cst_304 = arith.constant 1.000000e+00 : f32
    %770 = vector.broadcast %cst_304 : f32 to vector<8x32xf32>
    %771 = arith.addf %770, %769 : vector<8x32xf32>
    %772 = arith.divf %770, %771 : vector<8x32xf32>
    %773 = vector.extract_strided_slice %731 {offsets = [0, 32], sizes = [8, 32], strides = [1, 1]} : vector<8x96xf32> to vector<8x32xf32>
    %774 = vector.extract_strided_slice %764 {offsets = [0, 32], sizes = [8, 32], strides = [1, 1]} : vector<8x96xf32> to vector<8x32xf32>
    %775 = arith.addf %773, %774 : vector<8x32xf32>
    %776 = arith.negf %775 : vector<8x32xf32>
    %777 = math.exp %776 : vector<8x32xf32>
    %cst_305 = arith.constant 1.000000e+00 : f32
    %778 = vector.broadcast %cst_305 : f32 to vector<8x32xf32>
    %779 = arith.addf %778, %777 : vector<8x32xf32>
    %780 = arith.divf %778, %779 : vector<8x32xf32>
    %781 = vector.extract_strided_slice %731 {offsets = [0, 64], sizes = [8, 32], strides = [1, 1]} : vector<8x96xf32> to vector<8x32xf32>
    %782 = vector.extract_strided_slice %764 {offsets = [0, 64], sizes = [8, 32], strides = [1, 1]} : vector<8x96xf32> to vector<8x32xf32>
    %c0_306 = arith.constant 0 : index
    %c0_307 = arith.constant 0 : index
    %783 = vector.load %arg17[%c0_306, %c0_307] : memref<1x32xf32, #tpu.memory_space<vmem>>, vector<1x32xf32>
    %784 = vector.broadcast %783 : vector<1x32xf32> to vector<8x32xf32>
    %785 = arith.addf %782, %784 : vector<8x32xf32>
    %786 = arith.mulf %772, %785 : vector<8x32xf32>
    %787 = arith.addf %781, %786 : vector<8x32xf32>
    %788 = math.tanh %787 : vector<8x32xf32>
    %cst_308 = arith.constant 1.000000e+00 : f32
    %789 = vector.broadcast %cst_308 : f32 to vector<8x32xf32>
    %790 = arith.subf %789, %780 : vector<8x32xf32>
    %791 = arith.mulf %790, %788 : vector<8x32xf32>
    %792 = arith.mulf %780, %719 : vector<8x32xf32>
    %793 = arith.addf %791, %792 : vector<8x32xf32>
    %794 = arith.select %727, %762, %718 : vector<8x32xi1>, vector<8x32xf32>
    %795 = arith.select %729, %793, %719 : vector<8x32xi1>, vector<8x32xf32>
    %cst_309 = arith.constant 0.000000e+00 : f32
    %796 = vector.broadcast %cst_309 : f32 to vector<8x32xf32>
    %797 = arith.select %727, %794, %796 : vector<8x32xi1>, vector<8x32xf32>
    %cst_310 = arith.constant 0.000000e+00 : f32
    %798 = vector.broadcast %cst_310 : f32 to vector<8x32xf32>
    %799 = arith.select %729, %795, %798 : vector<8x32xi1>, vector<8x32xf32>
    %800 = arith.addf %724, %797 : vector<8x32xf32>
    %801 = arith.addf %725, %799 : vector<8x32xf32>
    %cst_311 = arith.constant 2.000000e+00 : f32
    %802 = vector.broadcast %cst_311 : f32 to vector<8x32xf32>
    %803 = arith.cmpf ogt, %2, %802 : vector<8x32xf32>
    %cst_312 = arith.constant 5.000000e+00 : f32
    %804 = vector.broadcast %cst_312 : f32 to vector<8x32xf32>
    %805 = arith.cmpf ogt, %2, %804 : vector<8x32xf32>
    %c16_313 = arith.constant 16 : index
    %c0_314 = arith.constant 0 : index
    %806 = vector.load %arg24[%c16_313, %c0_314] : memref<64x96xf32, #tpu.memory_space<vmem>>, vector<8x96xf32>
    %c40_315 = arith.constant 40 : index
    %c0_316 = arith.constant 0 : index
    %807 = vector.load %arg25[%c40_315, %c0_316] : memref<64x96xf32, #tpu.memory_space<vmem>>, vector<8x96xf32>
    %c0_317 = arith.constant 0 : index
    %c0_318 = arith.constant 0 : index
    %808 = vector.load %arg11[%c0_317, %c0_318] : memref<32x96xf32, #tpu.memory_space<vmem>>, vector<32x96xf32>
    %cst_319 = arith.constant dense<0.000000e+00> : vector<8x96xf32>
    %809 = tpu.matmul %794, %808, %cst_319 {dimension_numbers = #tpu.dot_dimension_numbers<[1], [0], [0], [1], [0, 0, 1, 1], [], []>, precision = #tpu.contract_precision<fp32>} : vector<8x32xf32>, vector<32x96xf32>, vector<8x96xf32> -> vector<8x96xf32>
    %810 = vector.extract_strided_slice %806 {offsets = [0, 0], sizes = [8, 32], strides = [1, 1]} : vector<8x96xf32> to vector<8x32xf32>
    %811 = vector.extract_strided_slice %809 {offsets = [0, 0], sizes = [8, 32], strides = [1, 1]} : vector<8x96xf32> to vector<8x32xf32>
    %812 = arith.addf %810, %811 : vector<8x32xf32>
    %813 = arith.negf %812 : vector<8x32xf32>
    %814 = math.exp %813 : vector<8x32xf32>
    %cst_320 = arith.constant 1.000000e+00 : f32
    %815 = vector.broadcast %cst_320 : f32 to vector<8x32xf32>
    %816 = arith.addf %815, %814 : vector<8x32xf32>
    %817 = arith.divf %815, %816 : vector<8x32xf32>
    %818 = vector.extract_strided_slice %806 {offsets = [0, 32], sizes = [8, 32], strides = [1, 1]} : vector<8x96xf32> to vector<8x32xf32>
    %819 = vector.extract_strided_slice %809 {offsets = [0, 32], sizes = [8, 32], strides = [1, 1]} : vector<8x96xf32> to vector<8x32xf32>
    %820 = arith.addf %818, %819 : vector<8x32xf32>
    %821 = arith.negf %820 : vector<8x32xf32>
    %822 = math.exp %821 : vector<8x32xf32>
    %cst_321 = arith.constant 1.000000e+00 : f32
    %823 = vector.broadcast %cst_321 : f32 to vector<8x32xf32>
    %824 = arith.addf %823, %822 : vector<8x32xf32>
    %825 = arith.divf %823, %824 : vector<8x32xf32>
    %826 = vector.extract_strided_slice %806 {offsets = [0, 64], sizes = [8, 32], strides = [1, 1]} : vector<8x96xf32> to vector<8x32xf32>
    %827 = vector.extract_strided_slice %809 {offsets = [0, 64], sizes = [8, 32], strides = [1, 1]} : vector<8x96xf32> to vector<8x32xf32>
    %c0_322 = arith.constant 0 : index
    %c0_323 = arith.constant 0 : index
    %828 = vector.load %arg13[%c0_322, %c0_323] : memref<1x32xf32, #tpu.memory_space<vmem>>, vector<1x32xf32>
    %829 = vector.broadcast %828 : vector<1x32xf32> to vector<8x32xf32>
    %830 = arith.addf %827, %829 : vector<8x32xf32>
    %831 = arith.mulf %817, %830 : vector<8x32xf32>
    %832 = arith.addf %826, %831 : vector<8x32xf32>
    %833 = math.tanh %832 : vector<8x32xf32>
    %cst_324 = arith.constant 1.000000e+00 : f32
    %834 = vector.broadcast %cst_324 : f32 to vector<8x32xf32>
    %835 = arith.subf %834, %825 : vector<8x32xf32>
    %836 = arith.mulf %835, %833 : vector<8x32xf32>
    %837 = arith.mulf %825, %794 : vector<8x32xf32>
    %838 = arith.addf %836, %837 : vector<8x32xf32>
    %c0_325 = arith.constant 0 : index
    %c0_326 = arith.constant 0 : index
    %839 = vector.load %arg15[%c0_325, %c0_326] : memref<32x96xf32, #tpu.memory_space<vmem>>, vector<32x96xf32>
    %cst_327 = arith.constant dense<0.000000e+00> : vector<8x96xf32>
    %840 = tpu.matmul %795, %839, %cst_327 {dimension_numbers = #tpu.dot_dimension_numbers<[1], [0], [0], [1], [0, 0, 1, 1], [], []>, precision = #tpu.contract_precision<fp32>} : vector<8x32xf32>, vector<32x96xf32>, vector<8x96xf32> -> vector<8x96xf32>
    %841 = vector.extract_strided_slice %807 {offsets = [0, 0], sizes = [8, 32], strides = [1, 1]} : vector<8x96xf32> to vector<8x32xf32>
    %842 = vector.extract_strided_slice %840 {offsets = [0, 0], sizes = [8, 32], strides = [1, 1]} : vector<8x96xf32> to vector<8x32xf32>
    %843 = arith.addf %841, %842 : vector<8x32xf32>
    %844 = arith.negf %843 : vector<8x32xf32>
    %845 = math.exp %844 : vector<8x32xf32>
    %cst_328 = arith.constant 1.000000e+00 : f32
    %846 = vector.broadcast %cst_328 : f32 to vector<8x32xf32>
    %847 = arith.addf %846, %845 : vector<8x32xf32>
    %848 = arith.divf %846, %847 : vector<8x32xf32>
    %849 = vector.extract_strided_slice %807 {offsets = [0, 32], sizes = [8, 32], strides = [1, 1]} : vector<8x96xf32> to vector<8x32xf32>
    %850 = vector.extract_strided_slice %840 {offsets = [0, 32], sizes = [8, 32], strides = [1, 1]} : vector<8x96xf32> to vector<8x32xf32>
    %851 = arith.addf %849, %850 : vector<8x32xf32>
    %852 = arith.negf %851 : vector<8x32xf32>
    %853 = math.exp %852 : vector<8x32xf32>
    %cst_329 = arith.constant 1.000000e+00 : f32
    %854 = vector.broadcast %cst_329 : f32 to vector<8x32xf32>
    %855 = arith.addf %854, %853 : vector<8x32xf32>
    %856 = arith.divf %854, %855 : vector<8x32xf32>
    %857 = vector.extract_strided_slice %807 {offsets = [0, 64], sizes = [8, 32], strides = [1, 1]} : vector<8x96xf32> to vector<8x32xf32>
    %858 = vector.extract_strided_slice %840 {offsets = [0, 64], sizes = [8, 32], strides = [1, 1]} : vector<8x96xf32> to vector<8x32xf32>
    %c0_330 = arith.constant 0 : index
    %c0_331 = arith.constant 0 : index
    %859 = vector.load %arg17[%c0_330, %c0_331] : memref<1x32xf32, #tpu.memory_space<vmem>>, vector<1x32xf32>
    %860 = vector.broadcast %859 : vector<1x32xf32> to vector<8x32xf32>
    %861 = arith.addf %858, %860 : vector<8x32xf32>
    %862 = arith.mulf %848, %861 : vector<8x32xf32>
    %863 = arith.addf %857, %862 : vector<8x32xf32>
    %864 = math.tanh %863 : vector<8x32xf32>
    %cst_332 = arith.constant 1.000000e+00 : f32
    %865 = vector.broadcast %cst_332 : f32 to vector<8x32xf32>
    %866 = arith.subf %865, %856 : vector<8x32xf32>
    %867 = arith.mulf %866, %864 : vector<8x32xf32>
    %868 = arith.mulf %856, %795 : vector<8x32xf32>
    %869 = arith.addf %867, %868 : vector<8x32xf32>
    %870 = arith.select %803, %838, %794 : vector<8x32xi1>, vector<8x32xf32>
    %871 = arith.select %805, %869, %795 : vector<8x32xi1>, vector<8x32xf32>
    %cst_333 = arith.constant 0.000000e+00 : f32
    %872 = vector.broadcast %cst_333 : f32 to vector<8x32xf32>
    %873 = arith.select %803, %870, %872 : vector<8x32xi1>, vector<8x32xf32>
    %cst_334 = arith.constant 0.000000e+00 : f32
    %874 = vector.broadcast %cst_334 : f32 to vector<8x32xf32>
    %875 = arith.select %805, %871, %874 : vector<8x32xi1>, vector<8x32xf32>
    %876 = arith.addf %800, %873 : vector<8x32xf32>
    %877 = arith.addf %801, %875 : vector<8x32xf32>
    %cst_335 = arith.constant 3.000000e+00 : f32
    %878 = vector.broadcast %cst_335 : f32 to vector<8x32xf32>
    %879 = arith.cmpf ogt, %2, %878 : vector<8x32xf32>
    %cst_336 = arith.constant 4.000000e+00 : f32
    %880 = vector.broadcast %cst_336 : f32 to vector<8x32xf32>
    %881 = arith.cmpf ogt, %2, %880 : vector<8x32xf32>
    %c24_337 = arith.constant 24 : index
    %c0_338 = arith.constant 0 : index
    %882 = vector.load %arg24[%c24_337, %c0_338] : memref<64x96xf32, #tpu.memory_space<vmem>>, vector<8x96xf32>
    %c32_339 = arith.constant 32 : index
    %c0_340 = arith.constant 0 : index
    %883 = vector.load %arg25[%c32_339, %c0_340] : memref<64x96xf32, #tpu.memory_space<vmem>>, vector<8x96xf32>
    %c0_341 = arith.constant 0 : index
    %c0_342 = arith.constant 0 : index
    %884 = vector.load %arg11[%c0_341, %c0_342] : memref<32x96xf32, #tpu.memory_space<vmem>>, vector<32x96xf32>
    %cst_343 = arith.constant dense<0.000000e+00> : vector<8x96xf32>
    %885 = tpu.matmul %870, %884, %cst_343 {dimension_numbers = #tpu.dot_dimension_numbers<[1], [0], [0], [1], [0, 0, 1, 1], [], []>, precision = #tpu.contract_precision<fp32>} : vector<8x32xf32>, vector<32x96xf32>, vector<8x96xf32> -> vector<8x96xf32>
    %886 = vector.extract_strided_slice %882 {offsets = [0, 0], sizes = [8, 32], strides = [1, 1]} : vector<8x96xf32> to vector<8x32xf32>
    %887 = vector.extract_strided_slice %885 {offsets = [0, 0], sizes = [8, 32], strides = [1, 1]} : vector<8x96xf32> to vector<8x32xf32>
    %888 = arith.addf %886, %887 : vector<8x32xf32>
    %889 = arith.negf %888 : vector<8x32xf32>
    %890 = math.exp %889 : vector<8x32xf32>
    %cst_344 = arith.constant 1.000000e+00 : f32
    %891 = vector.broadcast %cst_344 : f32 to vector<8x32xf32>
    %892 = arith.addf %891, %890 : vector<8x32xf32>
    %893 = arith.divf %891, %892 : vector<8x32xf32>
    %894 = vector.extract_strided_slice %882 {offsets = [0, 32], sizes = [8, 32], strides = [1, 1]} : vector<8x96xf32> to vector<8x32xf32>
    %895 = vector.extract_strided_slice %885 {offsets = [0, 32], sizes = [8, 32], strides = [1, 1]} : vector<8x96xf32> to vector<8x32xf32>
    %896 = arith.addf %894, %895 : vector<8x32xf32>
    %897 = arith.negf %896 : vector<8x32xf32>
    %898 = math.exp %897 : vector<8x32xf32>
    %cst_345 = arith.constant 1.000000e+00 : f32
    %899 = vector.broadcast %cst_345 : f32 to vector<8x32xf32>
    %900 = arith.addf %899, %898 : vector<8x32xf32>
    %901 = arith.divf %899, %900 : vector<8x32xf32>
    %902 = vector.extract_strided_slice %882 {offsets = [0, 64], sizes = [8, 32], strides = [1, 1]} : vector<8x96xf32> to vector<8x32xf32>
    %903 = vector.extract_strided_slice %885 {offsets = [0, 64], sizes = [8, 32], strides = [1, 1]} : vector<8x96xf32> to vector<8x32xf32>
    %c0_346 = arith.constant 0 : index
    %c0_347 = arith.constant 0 : index
    %904 = vector.load %arg13[%c0_346, %c0_347] : memref<1x32xf32, #tpu.memory_space<vmem>>, vector<1x32xf32>
    %905 = vector.broadcast %904 : vector<1x32xf32> to vector<8x32xf32>
    %906 = arith.addf %903, %905 : vector<8x32xf32>
    %907 = arith.mulf %893, %906 : vector<8x32xf32>
    %908 = arith.addf %902, %907 : vector<8x32xf32>
    %909 = math.tanh %908 : vector<8x32xf32>
    %cst_348 = arith.constant 1.000000e+00 : f32
    %910 = vector.broadcast %cst_348 : f32 to vector<8x32xf32>
    %911 = arith.subf %910, %901 : vector<8x32xf32>
    %912 = arith.mulf %911, %909 : vector<8x32xf32>
    %913 = arith.mulf %901, %870 : vector<8x32xf32>
    %914 = arith.addf %912, %913 : vector<8x32xf32>
    %c0_349 = arith.constant 0 : index
    %c0_350 = arith.constant 0 : index
    %915 = vector.load %arg15[%c0_349, %c0_350] : memref<32x96xf32, #tpu.memory_space<vmem>>, vector<32x96xf32>
    %cst_351 = arith.constant dense<0.000000e+00> : vector<8x96xf32>
    %916 = tpu.matmul %871, %915, %cst_351 {dimension_numbers = #tpu.dot_dimension_numbers<[1], [0], [0], [1], [0, 0, 1, 1], [], []>, precision = #tpu.contract_precision<fp32>} : vector<8x32xf32>, vector<32x96xf32>, vector<8x96xf32> -> vector<8x96xf32>
    %917 = vector.extract_strided_slice %883 {offsets = [0, 0], sizes = [8, 32], strides = [1, 1]} : vector<8x96xf32> to vector<8x32xf32>
    %918 = vector.extract_strided_slice %916 {offsets = [0, 0], sizes = [8, 32], strides = [1, 1]} : vector<8x96xf32> to vector<8x32xf32>
    %919 = arith.addf %917, %918 : vector<8x32xf32>
    %920 = arith.negf %919 : vector<8x32xf32>
    %921 = math.exp %920 : vector<8x32xf32>
    %cst_352 = arith.constant 1.000000e+00 : f32
    %922 = vector.broadcast %cst_352 : f32 to vector<8x32xf32>
    %923 = arith.addf %922, %921 : vector<8x32xf32>
    %924 = arith.divf %922, %923 : vector<8x32xf32>
    %925 = vector.extract_strided_slice %883 {offsets = [0, 32], sizes = [8, 32], strides = [1, 1]} : vector<8x96xf32> to vector<8x32xf32>
    %926 = vector.extract_strided_slice %916 {offsets = [0, 32], sizes = [8, 32], strides = [1, 1]} : vector<8x96xf32> to vector<8x32xf32>
    %927 = arith.addf %925, %926 : vector<8x32xf32>
    %928 = arith.negf %927 : vector<8x32xf32>
    %929 = math.exp %928 : vector<8x32xf32>
    %cst_353 = arith.constant 1.000000e+00 : f32
    %930 = vector.broadcast %cst_353 : f32 to vector<8x32xf32>
    %931 = arith.addf %930, %929 : vector<8x32xf32>
    %932 = arith.divf %930, %931 : vector<8x32xf32>
    %933 = vector.extract_strided_slice %883 {offsets = [0, 64], sizes = [8, 32], strides = [1, 1]} : vector<8x96xf32> to vector<8x32xf32>
    %934 = vector.extract_strided_slice %916 {offsets = [0, 64], sizes = [8, 32], strides = [1, 1]} : vector<8x96xf32> to vector<8x32xf32>
    %c0_354 = arith.constant 0 : index
    %c0_355 = arith.constant 0 : index
    %935 = vector.load %arg17[%c0_354, %c0_355] : memref<1x32xf32, #tpu.memory_space<vmem>>, vector<1x32xf32>
    %936 = vector.broadcast %935 : vector<1x32xf32> to vector<8x32xf32>
    %937 = arith.addf %934, %936 : vector<8x32xf32>
    %938 = arith.mulf %924, %937 : vector<8x32xf32>
    %939 = arith.addf %933, %938 : vector<8x32xf32>
    %940 = math.tanh %939 : vector<8x32xf32>
    %cst_356 = arith.constant 1.000000e+00 : f32
    %941 = vector.broadcast %cst_356 : f32 to vector<8x32xf32>
    %942 = arith.subf %941, %932 : vector<8x32xf32>
    %943 = arith.mulf %942, %940 : vector<8x32xf32>
    %944 = arith.mulf %932, %871 : vector<8x32xf32>
    %945 = arith.addf %943, %944 : vector<8x32xf32>
    %946 = arith.select %879, %914, %870 : vector<8x32xi1>, vector<8x32xf32>
    %947 = arith.select %881, %945, %871 : vector<8x32xi1>, vector<8x32xf32>
    %cst_357 = arith.constant 0.000000e+00 : f32
    %948 = vector.broadcast %cst_357 : f32 to vector<8x32xf32>
    %949 = arith.select %879, %946, %948 : vector<8x32xi1>, vector<8x32xf32>
    %cst_358 = arith.constant 0.000000e+00 : f32
    %950 = vector.broadcast %cst_358 : f32 to vector<8x32xf32>
    %951 = arith.select %881, %947, %950 : vector<8x32xi1>, vector<8x32xf32>
    %952 = arith.addf %876, %949 : vector<8x32xf32>
    %953 = arith.addf %877, %951 : vector<8x32xf32>
    %cst_359 = arith.constant 4.000000e+00 : f32
    %954 = vector.broadcast %cst_359 : f32 to vector<8x32xf32>
    %955 = arith.cmpf ogt, %2, %954 : vector<8x32xf32>
    %cst_360 = arith.constant 3.000000e+00 : f32
    %956 = vector.broadcast %cst_360 : f32 to vector<8x32xf32>
    %957 = arith.cmpf ogt, %2, %956 : vector<8x32xf32>
    %c32_361 = arith.constant 32 : index
    %c0_362 = arith.constant 0 : index
    %958 = vector.load %arg24[%c32_361, %c0_362] : memref<64x96xf32, #tpu.memory_space<vmem>>, vector<8x96xf32>
    %c24_363 = arith.constant 24 : index
    %c0_364 = arith.constant 0 : index
    %959 = vector.load %arg25[%c24_363, %c0_364] : memref<64x96xf32, #tpu.memory_space<vmem>>, vector<8x96xf32>
    %c0_365 = arith.constant 0 : index
    %c0_366 = arith.constant 0 : index
    %960 = vector.load %arg11[%c0_365, %c0_366] : memref<32x96xf32, #tpu.memory_space<vmem>>, vector<32x96xf32>
    %cst_367 = arith.constant dense<0.000000e+00> : vector<8x96xf32>
    %961 = tpu.matmul %946, %960, %cst_367 {dimension_numbers = #tpu.dot_dimension_numbers<[1], [0], [0], [1], [0, 0, 1, 1], [], []>, precision = #tpu.contract_precision<fp32>} : vector<8x32xf32>, vector<32x96xf32>, vector<8x96xf32> -> vector<8x96xf32>
    %962 = vector.extract_strided_slice %958 {offsets = [0, 0], sizes = [8, 32], strides = [1, 1]} : vector<8x96xf32> to vector<8x32xf32>
    %963 = vector.extract_strided_slice %961 {offsets = [0, 0], sizes = [8, 32], strides = [1, 1]} : vector<8x96xf32> to vector<8x32xf32>
    %964 = arith.addf %962, %963 : vector<8x32xf32>
    %965 = arith.negf %964 : vector<8x32xf32>
    %966 = math.exp %965 : vector<8x32xf32>
    %cst_368 = arith.constant 1.000000e+00 : f32
    %967 = vector.broadcast %cst_368 : f32 to vector<8x32xf32>
    %968 = arith.addf %967, %966 : vector<8x32xf32>
    %969 = arith.divf %967, %968 : vector<8x32xf32>
    %970 = vector.extract_strided_slice %958 {offsets = [0, 32], sizes = [8, 32], strides = [1, 1]} : vector<8x96xf32> to vector<8x32xf32>
    %971 = vector.extract_strided_slice %961 {offsets = [0, 32], sizes = [8, 32], strides = [1, 1]} : vector<8x96xf32> to vector<8x32xf32>
    %972 = arith.addf %970, %971 : vector<8x32xf32>
    %973 = arith.negf %972 : vector<8x32xf32>
    %974 = math.exp %973 : vector<8x32xf32>
    %cst_369 = arith.constant 1.000000e+00 : f32
    %975 = vector.broadcast %cst_369 : f32 to vector<8x32xf32>
    %976 = arith.addf %975, %974 : vector<8x32xf32>
    %977 = arith.divf %975, %976 : vector<8x32xf32>
    %978 = vector.extract_strided_slice %958 {offsets = [0, 64], sizes = [8, 32], strides = [1, 1]} : vector<8x96xf32> to vector<8x32xf32>
    %979 = vector.extract_strided_slice %961 {offsets = [0, 64], sizes = [8, 32], strides = [1, 1]} : vector<8x96xf32> to vector<8x32xf32>
    %c0_370 = arith.constant 0 : index
    %c0_371 = arith.constant 0 : index
    %980 = vector.load %arg13[%c0_370, %c0_371] : memref<1x32xf32, #tpu.memory_space<vmem>>, vector<1x32xf32>
    %981 = vector.broadcast %980 : vector<1x32xf32> to vector<8x32xf32>
    %982 = arith.addf %979, %981 : vector<8x32xf32>
    %983 = arith.mulf %969, %982 : vector<8x32xf32>
    %984 = arith.addf %978, %983 : vector<8x32xf32>
    %985 = math.tanh %984 : vector<8x32xf32>
    %cst_372 = arith.constant 1.000000e+00 : f32
    %986 = vector.broadcast %cst_372 : f32 to vector<8x32xf32>
    %987 = arith.subf %986, %977 : vector<8x32xf32>
    %988 = arith.mulf %987, %985 : vector<8x32xf32>
    %989 = arith.mulf %977, %946 : vector<8x32xf32>
    %990 = arith.addf %988, %989 : vector<8x32xf32>
    %c0_373 = arith.constant 0 : index
    %c0_374 = arith.constant 0 : index
    %991 = vector.load %arg15[%c0_373, %c0_374] : memref<32x96xf32, #tpu.memory_space<vmem>>, vector<32x96xf32>
    %cst_375 = arith.constant dense<0.000000e+00> : vector<8x96xf32>
    %992 = tpu.matmul %947, %991, %cst_375 {dimension_numbers = #tpu.dot_dimension_numbers<[1], [0], [0], [1], [0, 0, 1, 1], [], []>, precision = #tpu.contract_precision<fp32>} : vector<8x32xf32>, vector<32x96xf32>, vector<8x96xf32> -> vector<8x96xf32>
    %993 = vector.extract_strided_slice %959 {offsets = [0, 0], sizes = [8, 32], strides = [1, 1]} : vector<8x96xf32> to vector<8x32xf32>
    %994 = vector.extract_strided_slice %992 {offsets = [0, 0], sizes = [8, 32], strides = [1, 1]} : vector<8x96xf32> to vector<8x32xf32>
    %995 = arith.addf %993, %994 : vector<8x32xf32>
    %996 = arith.negf %995 : vector<8x32xf32>
    %997 = math.exp %996 : vector<8x32xf32>
    %cst_376 = arith.constant 1.000000e+00 : f32
    %998 = vector.broadcast %cst_376 : f32 to vector<8x32xf32>
    %999 = arith.addf %998, %997 : vector<8x32xf32>
    %1000 = arith.divf %998, %999 : vector<8x32xf32>
    %1001 = vector.extract_strided_slice %959 {offsets = [0, 32], sizes = [8, 32], strides = [1, 1]} : vector<8x96xf32> to vector<8x32xf32>
    %1002 = vector.extract_strided_slice %992 {offsets = [0, 32], sizes = [8, 32], strides = [1, 1]} : vector<8x96xf32> to vector<8x32xf32>
    %1003 = arith.addf %1001, %1002 : vector<8x32xf32>
    %1004 = arith.negf %1003 : vector<8x32xf32>
    %1005 = math.exp %1004 : vector<8x32xf32>
    %cst_377 = arith.constant 1.000000e+00 : f32
    %1006 = vector.broadcast %cst_377 : f32 to vector<8x32xf32>
    %1007 = arith.addf %1006, %1005 : vector<8x32xf32>
    %1008 = arith.divf %1006, %1007 : vector<8x32xf32>
    %1009 = vector.extract_strided_slice %959 {offsets = [0, 64], sizes = [8, 32], strides = [1, 1]} : vector<8x96xf32> to vector<8x32xf32>
    %1010 = vector.extract_strided_slice %992 {offsets = [0, 64], sizes = [8, 32], strides = [1, 1]} : vector<8x96xf32> to vector<8x32xf32>
    %c0_378 = arith.constant 0 : index
    %c0_379 = arith.constant 0 : index
    %1011 = vector.load %arg17[%c0_378, %c0_379] : memref<1x32xf32, #tpu.memory_space<vmem>>, vector<1x32xf32>
    %1012 = vector.broadcast %1011 : vector<1x32xf32> to vector<8x32xf32>
    %1013 = arith.addf %1010, %1012 : vector<8x32xf32>
    %1014 = arith.mulf %1000, %1013 : vector<8x32xf32>
    %1015 = arith.addf %1009, %1014 : vector<8x32xf32>
    %1016 = math.tanh %1015 : vector<8x32xf32>
    %cst_380 = arith.constant 1.000000e+00 : f32
    %1017 = vector.broadcast %cst_380 : f32 to vector<8x32xf32>
    %1018 = arith.subf %1017, %1008 : vector<8x32xf32>
    %1019 = arith.mulf %1018, %1016 : vector<8x32xf32>
    %1020 = arith.mulf %1008, %947 : vector<8x32xf32>
    %1021 = arith.addf %1019, %1020 : vector<8x32xf32>
    %1022 = arith.select %955, %990, %946 : vector<8x32xi1>, vector<8x32xf32>
    %1023 = arith.select %957, %1021, %947 : vector<8x32xi1>, vector<8x32xf32>
    %cst_381 = arith.constant 0.000000e+00 : f32
    %1024 = vector.broadcast %cst_381 : f32 to vector<8x32xf32>
    %1025 = arith.select %955, %1022, %1024 : vector<8x32xi1>, vector<8x32xf32>
    %cst_382 = arith.constant 0.000000e+00 : f32
    %1026 = vector.broadcast %cst_382 : f32 to vector<8x32xf32>
    %1027 = arith.select %957, %1023, %1026 : vector<8x32xi1>, vector<8x32xf32>
    %1028 = arith.addf %952, %1025 : vector<8x32xf32>
    %1029 = arith.addf %953, %1027 : vector<8x32xf32>
    %cst_383 = arith.constant 5.000000e+00 : f32
    %1030 = vector.broadcast %cst_383 : f32 to vector<8x32xf32>
    %1031 = arith.cmpf ogt, %2, %1030 : vector<8x32xf32>
    %cst_384 = arith.constant 2.000000e+00 : f32
    %1032 = vector.broadcast %cst_384 : f32 to vector<8x32xf32>
    %1033 = arith.cmpf ogt, %2, %1032 : vector<8x32xf32>
    %c40_385 = arith.constant 40 : index
    %c0_386 = arith.constant 0 : index
    %1034 = vector.load %arg24[%c40_385, %c0_386] : memref<64x96xf32, #tpu.memory_space<vmem>>, vector<8x96xf32>
    %c16_387 = arith.constant 16 : index
    %c0_388 = arith.constant 0 : index
    %1035 = vector.load %arg25[%c16_387, %c0_388] : memref<64x96xf32, #tpu.memory_space<vmem>>, vector<8x96xf32>
    %c0_389 = arith.constant 0 : index
    %c0_390 = arith.constant 0 : index
    %1036 = vector.load %arg11[%c0_389, %c0_390] : memref<32x96xf32, #tpu.memory_space<vmem>>, vector<32x96xf32>
    %cst_391 = arith.constant dense<0.000000e+00> : vector<8x96xf32>
    %1037 = tpu.matmul %1022, %1036, %cst_391 {dimension_numbers = #tpu.dot_dimension_numbers<[1], [0], [0], [1], [0, 0, 1, 1], [], []>, precision = #tpu.contract_precision<fp32>} : vector<8x32xf32>, vector<32x96xf32>, vector<8x96xf32> -> vector<8x96xf32>
    %1038 = vector.extract_strided_slice %1034 {offsets = [0, 0], sizes = [8, 32], strides = [1, 1]} : vector<8x96xf32> to vector<8x32xf32>
    %1039 = vector.extract_strided_slice %1037 {offsets = [0, 0], sizes = [8, 32], strides = [1, 1]} : vector<8x96xf32> to vector<8x32xf32>
    %1040 = arith.addf %1038, %1039 : vector<8x32xf32>
    %1041 = arith.negf %1040 : vector<8x32xf32>
    %1042 = math.exp %1041 : vector<8x32xf32>
    %cst_392 = arith.constant 1.000000e+00 : f32
    %1043 = vector.broadcast %cst_392 : f32 to vector<8x32xf32>
    %1044 = arith.addf %1043, %1042 : vector<8x32xf32>
    %1045 = arith.divf %1043, %1044 : vector<8x32xf32>
    %1046 = vector.extract_strided_slice %1034 {offsets = [0, 32], sizes = [8, 32], strides = [1, 1]} : vector<8x96xf32> to vector<8x32xf32>
    %1047 = vector.extract_strided_slice %1037 {offsets = [0, 32], sizes = [8, 32], strides = [1, 1]} : vector<8x96xf32> to vector<8x32xf32>
    %1048 = arith.addf %1046, %1047 : vector<8x32xf32>
    %1049 = arith.negf %1048 : vector<8x32xf32>
    %1050 = math.exp %1049 : vector<8x32xf32>
    %cst_393 = arith.constant 1.000000e+00 : f32
    %1051 = vector.broadcast %cst_393 : f32 to vector<8x32xf32>
    %1052 = arith.addf %1051, %1050 : vector<8x32xf32>
    %1053 = arith.divf %1051, %1052 : vector<8x32xf32>
    %1054 = vector.extract_strided_slice %1034 {offsets = [0, 64], sizes = [8, 32], strides = [1, 1]} : vector<8x96xf32> to vector<8x32xf32>
    %1055 = vector.extract_strided_slice %1037 {offsets = [0, 64], sizes = [8, 32], strides = [1, 1]} : vector<8x96xf32> to vector<8x32xf32>
    %c0_394 = arith.constant 0 : index
    %c0_395 = arith.constant 0 : index
    %1056 = vector.load %arg13[%c0_394, %c0_395] : memref<1x32xf32, #tpu.memory_space<vmem>>, vector<1x32xf32>
    %1057 = vector.broadcast %1056 : vector<1x32xf32> to vector<8x32xf32>
    %1058 = arith.addf %1055, %1057 : vector<8x32xf32>
    %1059 = arith.mulf %1045, %1058 : vector<8x32xf32>
    %1060 = arith.addf %1054, %1059 : vector<8x32xf32>
    %1061 = math.tanh %1060 : vector<8x32xf32>
    %cst_396 = arith.constant 1.000000e+00 : f32
    %1062 = vector.broadcast %cst_396 : f32 to vector<8x32xf32>
    %1063 = arith.subf %1062, %1053 : vector<8x32xf32>
    %1064 = arith.mulf %1063, %1061 : vector<8x32xf32>
    %1065 = arith.mulf %1053, %1022 : vector<8x32xf32>
    %1066 = arith.addf %1064, %1065 : vector<8x32xf32>
    %c0_397 = arith.constant 0 : index
    %c0_398 = arith.constant 0 : index
    %1067 = vector.load %arg15[%c0_397, %c0_398] : memref<32x96xf32, #tpu.memory_space<vmem>>, vector<32x96xf32>
    %cst_399 = arith.constant dense<0.000000e+00> : vector<8x96xf32>
    %1068 = tpu.matmul %1023, %1067, %cst_399 {dimension_numbers = #tpu.dot_dimension_numbers<[1], [0], [0], [1], [0, 0, 1, 1], [], []>, precision = #tpu.contract_precision<fp32>} : vector<8x32xf32>, vector<32x96xf32>, vector<8x96xf32> -> vector<8x96xf32>
    %1069 = vector.extract_strided_slice %1035 {offsets = [0, 0], sizes = [8, 32], strides = [1, 1]} : vector<8x96xf32> to vector<8x32xf32>
    %1070 = vector.extract_strided_slice %1068 {offsets = [0, 0], sizes = [8, 32], strides = [1, 1]} : vector<8x96xf32> to vector<8x32xf32>
    %1071 = arith.addf %1069, %1070 : vector<8x32xf32>
    %1072 = arith.negf %1071 : vector<8x32xf32>
    %1073 = math.exp %1072 : vector<8x32xf32>
    %cst_400 = arith.constant 1.000000e+00 : f32
    %1074 = vector.broadcast %cst_400 : f32 to vector<8x32xf32>
    %1075 = arith.addf %1074, %1073 : vector<8x32xf32>
    %1076 = arith.divf %1074, %1075 : vector<8x32xf32>
    %1077 = vector.extract_strided_slice %1035 {offsets = [0, 32], sizes = [8, 32], strides = [1, 1]} : vector<8x96xf32> to vector<8x32xf32>
    %1078 = vector.extract_strided_slice %1068 {offsets = [0, 32], sizes = [8, 32], strides = [1, 1]} : vector<8x96xf32> to vector<8x32xf32>
    %1079 = arith.addf %1077, %1078 : vector<8x32xf32>
    %1080 = arith.negf %1079 : vector<8x32xf32>
    %1081 = math.exp %1080 : vector<8x32xf32>
    %cst_401 = arith.constant 1.000000e+00 : f32
    %1082 = vector.broadcast %cst_401 : f32 to vector<8x32xf32>
    %1083 = arith.addf %1082, %1081 : vector<8x32xf32>
    %1084 = arith.divf %1082, %1083 : vector<8x32xf32>
    %1085 = vector.extract_strided_slice %1035 {offsets = [0, 64], sizes = [8, 32], strides = [1, 1]} : vector<8x96xf32> to vector<8x32xf32>
    %1086 = vector.extract_strided_slice %1068 {offsets = [0, 64], sizes = [8, 32], strides = [1, 1]} : vector<8x96xf32> to vector<8x32xf32>
    %c0_402 = arith.constant 0 : index
    %c0_403 = arith.constant 0 : index
    %1087 = vector.load %arg17[%c0_402, %c0_403] : memref<1x32xf32, #tpu.memory_space<vmem>>, vector<1x32xf32>
    %1088 = vector.broadcast %1087 : vector<1x32xf32> to vector<8x32xf32>
    %1089 = arith.addf %1086, %1088 : vector<8x32xf32>
    %1090 = arith.mulf %1076, %1089 : vector<8x32xf32>
    %1091 = arith.addf %1085, %1090 : vector<8x32xf32>
    %1092 = math.tanh %1091 : vector<8x32xf32>
    %cst_404 = arith.constant 1.000000e+00 : f32
    %1093 = vector.broadcast %cst_404 : f32 to vector<8x32xf32>
    %1094 = arith.subf %1093, %1084 : vector<8x32xf32>
    %1095 = arith.mulf %1094, %1092 : vector<8x32xf32>
    %1096 = arith.mulf %1084, %1023 : vector<8x32xf32>
    %1097 = arith.addf %1095, %1096 : vector<8x32xf32>
    %1098 = arith.select %1031, %1066, %1022 : vector<8x32xi1>, vector<8x32xf32>
    %1099 = arith.select %1033, %1097, %1023 : vector<8x32xi1>, vector<8x32xf32>
    %cst_405 = arith.constant 0.000000e+00 : f32
    %1100 = vector.broadcast %cst_405 : f32 to vector<8x32xf32>
    %1101 = arith.select %1031, %1098, %1100 : vector<8x32xi1>, vector<8x32xf32>
    %cst_406 = arith.constant 0.000000e+00 : f32
    %1102 = vector.broadcast %cst_406 : f32 to vector<8x32xf32>
    %1103 = arith.select %1033, %1099, %1102 : vector<8x32xi1>, vector<8x32xf32>
    %1104 = arith.addf %1028, %1101 : vector<8x32xf32>
    %1105 = arith.addf %1029, %1103 : vector<8x32xf32>
    %cst_407 = arith.constant 6.000000e+00 : f32
    %1106 = vector.broadcast %cst_407 : f32 to vector<8x32xf32>
    %1107 = arith.cmpf ogt, %2, %1106 : vector<8x32xf32>
    %cst_408 = arith.constant 1.000000e+00 : f32
    %1108 = vector.broadcast %cst_408 : f32 to vector<8x32xf32>
    %1109 = arith.cmpf ogt, %2, %1108 : vector<8x32xf32>
    %c48_409 = arith.constant 48 : index
    %c0_410 = arith.constant 0 : index
    %1110 = vector.load %arg24[%c48_409, %c0_410] : memref<64x96xf32, #tpu.memory_space<vmem>>, vector<8x96xf32>
    %c8_411 = arith.constant 8 : index
    %c0_412 = arith.constant 0 : index
    %1111 = vector.load %arg25[%c8_411, %c0_412] : memref<64x96xf32, #tpu.memory_space<vmem>>, vector<8x96xf32>
    %c0_413 = arith.constant 0 : index
    %c0_414 = arith.constant 0 : index
    %1112 = vector.load %arg11[%c0_413, %c0_414] : memref<32x96xf32, #tpu.memory_space<vmem>>, vector<32x96xf32>
    %cst_415 = arith.constant dense<0.000000e+00> : vector<8x96xf32>
    %1113 = tpu.matmul %1098, %1112, %cst_415 {dimension_numbers = #tpu.dot_dimension_numbers<[1], [0], [0], [1], [0, 0, 1, 1], [], []>, precision = #tpu.contract_precision<fp32>} : vector<8x32xf32>, vector<32x96xf32>, vector<8x96xf32> -> vector<8x96xf32>
    %1114 = vector.extract_strided_slice %1110 {offsets = [0, 0], sizes = [8, 32], strides = [1, 1]} : vector<8x96xf32> to vector<8x32xf32>
    %1115 = vector.extract_strided_slice %1113 {offsets = [0, 0], sizes = [8, 32], strides = [1, 1]} : vector<8x96xf32> to vector<8x32xf32>
    %1116 = arith.addf %1114, %1115 : vector<8x32xf32>
    %1117 = arith.negf %1116 : vector<8x32xf32>
    %1118 = math.exp %1117 : vector<8x32xf32>
    %cst_416 = arith.constant 1.000000e+00 : f32
    %1119 = vector.broadcast %cst_416 : f32 to vector<8x32xf32>
    %1120 = arith.addf %1119, %1118 : vector<8x32xf32>
    %1121 = arith.divf %1119, %1120 : vector<8x32xf32>
    %1122 = vector.extract_strided_slice %1110 {offsets = [0, 32], sizes = [8, 32], strides = [1, 1]} : vector<8x96xf32> to vector<8x32xf32>
    %1123 = vector.extract_strided_slice %1113 {offsets = [0, 32], sizes = [8, 32], strides = [1, 1]} : vector<8x96xf32> to vector<8x32xf32>
    %1124 = arith.addf %1122, %1123 : vector<8x32xf32>
    %1125 = arith.negf %1124 : vector<8x32xf32>
    %1126 = math.exp %1125 : vector<8x32xf32>
    %cst_417 = arith.constant 1.000000e+00 : f32
    %1127 = vector.broadcast %cst_417 : f32 to vector<8x32xf32>
    %1128 = arith.addf %1127, %1126 : vector<8x32xf32>
    %1129 = arith.divf %1127, %1128 : vector<8x32xf32>
    %1130 = vector.extract_strided_slice %1110 {offsets = [0, 64], sizes = [8, 32], strides = [1, 1]} : vector<8x96xf32> to vector<8x32xf32>
    %1131 = vector.extract_strided_slice %1113 {offsets = [0, 64], sizes = [8, 32], strides = [1, 1]} : vector<8x96xf32> to vector<8x32xf32>
    %c0_418 = arith.constant 0 : index
    %c0_419 = arith.constant 0 : index
    %1132 = vector.load %arg13[%c0_418, %c0_419] : memref<1x32xf32, #tpu.memory_space<vmem>>, vector<1x32xf32>
    %1133 = vector.broadcast %1132 : vector<1x32xf32> to vector<8x32xf32>
    %1134 = arith.addf %1131, %1133 : vector<8x32xf32>
    %1135 = arith.mulf %1121, %1134 : vector<8x32xf32>
    %1136 = arith.addf %1130, %1135 : vector<8x32xf32>
    %1137 = math.tanh %1136 : vector<8x32xf32>
    %cst_420 = arith.constant 1.000000e+00 : f32
    %1138 = vector.broadcast %cst_420 : f32 to vector<8x32xf32>
    %1139 = arith.subf %1138, %1129 : vector<8x32xf32>
    %1140 = arith.mulf %1139, %1137 : vector<8x32xf32>
    %1141 = arith.mulf %1129, %1098 : vector<8x32xf32>
    %1142 = arith.addf %1140, %1141 : vector<8x32xf32>
    %c0_421 = arith.constant 0 : index
    %c0_422 = arith.constant 0 : index
    %1143 = vector.load %arg15[%c0_421, %c0_422] : memref<32x96xf32, #tpu.memory_space<vmem>>, vector<32x96xf32>
    %cst_423 = arith.constant dense<0.000000e+00> : vector<8x96xf32>
    %1144 = tpu.matmul %1099, %1143, %cst_423 {dimension_numbers = #tpu.dot_dimension_numbers<[1], [0], [0], [1], [0, 0, 1, 1], [], []>, precision = #tpu.contract_precision<fp32>} : vector<8x32xf32>, vector<32x96xf32>, vector<8x96xf32> -> vector<8x96xf32>
    %1145 = vector.extract_strided_slice %1111 {offsets = [0, 0], sizes = [8, 32], strides = [1, 1]} : vector<8x96xf32> to vector<8x32xf32>
    %1146 = vector.extract_strided_slice %1144 {offsets = [0, 0], sizes = [8, 32], strides = [1, 1]} : vector<8x96xf32> to vector<8x32xf32>
    %1147 = arith.addf %1145, %1146 : vector<8x32xf32>
    %1148 = arith.negf %1147 : vector<8x32xf32>
    %1149 = math.exp %1148 : vector<8x32xf32>
    %cst_424 = arith.constant 1.000000e+00 : f32
    %1150 = vector.broadcast %cst_424 : f32 to vector<8x32xf32>
    %1151 = arith.addf %1150, %1149 : vector<8x32xf32>
    %1152 = arith.divf %1150, %1151 : vector<8x32xf32>
    %1153 = vector.extract_strided_slice %1111 {offsets = [0, 32], sizes = [8, 32], strides = [1, 1]} : vector<8x96xf32> to vector<8x32xf32>
    %1154 = vector.extract_strided_slice %1144 {offsets = [0, 32], sizes = [8, 32], strides = [1, 1]} : vector<8x96xf32> to vector<8x32xf32>
    %1155 = arith.addf %1153, %1154 : vector<8x32xf32>
    %1156 = arith.negf %1155 : vector<8x32xf32>
    %1157 = math.exp %1156 : vector<8x32xf32>
    %cst_425 = arith.constant 1.000000e+00 : f32
    %1158 = vector.broadcast %cst_425 : f32 to vector<8x32xf32>
    %1159 = arith.addf %1158, %1157 : vector<8x32xf32>
    %1160 = arith.divf %1158, %1159 : vector<8x32xf32>
    %1161 = vector.extract_strided_slice %1111 {offsets = [0, 64], sizes = [8, 32], strides = [1, 1]} : vector<8x96xf32> to vector<8x32xf32>
    %1162 = vector.extract_strided_slice %1144 {offsets = [0, 64], sizes = [8, 32], strides = [1, 1]} : vector<8x96xf32> to vector<8x32xf32>
    %c0_426 = arith.constant 0 : index
    %c0_427 = arith.constant 0 : index
    %1163 = vector.load %arg17[%c0_426, %c0_427] : memref<1x32xf32, #tpu.memory_space<vmem>>, vector<1x32xf32>
    %1164 = vector.broadcast %1163 : vector<1x32xf32> to vector<8x32xf32>
    %1165 = arith.addf %1162, %1164 : vector<8x32xf32>
    %1166 = arith.mulf %1152, %1165 : vector<8x32xf32>
    %1167 = arith.addf %1161, %1166 : vector<8x32xf32>
    %1168 = math.tanh %1167 : vector<8x32xf32>
    %cst_428 = arith.constant 1.000000e+00 : f32
    %1169 = vector.broadcast %cst_428 : f32 to vector<8x32xf32>
    %1170 = arith.subf %1169, %1160 : vector<8x32xf32>
    %1171 = arith.mulf %1170, %1168 : vector<8x32xf32>
    %1172 = arith.mulf %1160, %1099 : vector<8x32xf32>
    %1173 = arith.addf %1171, %1172 : vector<8x32xf32>
    %1174 = arith.select %1107, %1142, %1098 : vector<8x32xi1>, vector<8x32xf32>
    %1175 = arith.select %1109, %1173, %1099 : vector<8x32xi1>, vector<8x32xf32>
    %cst_429 = arith.constant 0.000000e+00 : f32
    %1176 = vector.broadcast %cst_429 : f32 to vector<8x32xf32>
    %1177 = arith.select %1107, %1174, %1176 : vector<8x32xi1>, vector<8x32xf32>
    %cst_430 = arith.constant 0.000000e+00 : f32
    %1178 = vector.broadcast %cst_430 : f32 to vector<8x32xf32>
    %1179 = arith.select %1109, %1175, %1178 : vector<8x32xi1>, vector<8x32xf32>
    %1180 = arith.addf %1104, %1177 : vector<8x32xf32>
    %1181 = arith.addf %1105, %1179 : vector<8x32xf32>
    %cst_431 = arith.constant 7.000000e+00 : f32
    %1182 = vector.broadcast %cst_431 : f32 to vector<8x32xf32>
    %1183 = arith.cmpf ogt, %2, %1182 : vector<8x32xf32>
    %cst_432 = arith.constant 0.000000e+00 : f32
    %1184 = vector.broadcast %cst_432 : f32 to vector<8x32xf32>
    %1185 = arith.cmpf ogt, %2, %1184 : vector<8x32xf32>
    %c56_433 = arith.constant 56 : index
    %c0_434 = arith.constant 0 : index
    %1186 = vector.load %arg24[%c56_433, %c0_434] : memref<64x96xf32, #tpu.memory_space<vmem>>, vector<8x96xf32>
    %c0_435 = arith.constant 0 : index
    %c0_436 = arith.constant 0 : index
    %1187 = vector.load %arg25[%c0_435, %c0_436] : memref<64x96xf32, #tpu.memory_space<vmem>>, vector<8x96xf32>
    %c0_437 = arith.constant 0 : index
    %c0_438 = arith.constant 0 : index
    %1188 = vector.load %arg11[%c0_437, %c0_438] : memref<32x96xf32, #tpu.memory_space<vmem>>, vector<32x96xf32>
    %cst_439 = arith.constant dense<0.000000e+00> : vector<8x96xf32>
    %1189 = tpu.matmul %1174, %1188, %cst_439 {dimension_numbers = #tpu.dot_dimension_numbers<[1], [0], [0], [1], [0, 0, 1, 1], [], []>, precision = #tpu.contract_precision<fp32>} : vector<8x32xf32>, vector<32x96xf32>, vector<8x96xf32> -> vector<8x96xf32>
    %1190 = vector.extract_strided_slice %1186 {offsets = [0, 0], sizes = [8, 32], strides = [1, 1]} : vector<8x96xf32> to vector<8x32xf32>
    %1191 = vector.extract_strided_slice %1189 {offsets = [0, 0], sizes = [8, 32], strides = [1, 1]} : vector<8x96xf32> to vector<8x32xf32>
    %1192 = arith.addf %1190, %1191 : vector<8x32xf32>
    %1193 = arith.negf %1192 : vector<8x32xf32>
    %1194 = math.exp %1193 : vector<8x32xf32>
    %cst_440 = arith.constant 1.000000e+00 : f32
    %1195 = vector.broadcast %cst_440 : f32 to vector<8x32xf32>
    %1196 = arith.addf %1195, %1194 : vector<8x32xf32>
    %1197 = arith.divf %1195, %1196 : vector<8x32xf32>
    %1198 = vector.extract_strided_slice %1186 {offsets = [0, 32], sizes = [8, 32], strides = [1, 1]} : vector<8x96xf32> to vector<8x32xf32>
    %1199 = vector.extract_strided_slice %1189 {offsets = [0, 32], sizes = [8, 32], strides = [1, 1]} : vector<8x96xf32> to vector<8x32xf32>
    %1200 = arith.addf %1198, %1199 : vector<8x32xf32>
    %1201 = arith.negf %1200 : vector<8x32xf32>
    %1202 = math.exp %1201 : vector<8x32xf32>
    %cst_441 = arith.constant 1.000000e+00 : f32
    %1203 = vector.broadcast %cst_441 : f32 to vector<8x32xf32>
    %1204 = arith.addf %1203, %1202 : vector<8x32xf32>
    %1205 = arith.divf %1203, %1204 : vector<8x32xf32>
    %1206 = vector.extract_strided_slice %1186 {offsets = [0, 64], sizes = [8, 32], strides = [1, 1]} : vector<8x96xf32> to vector<8x32xf32>
    %1207 = vector.extract_strided_slice %1189 {offsets = [0, 64], sizes = [8, 32], strides = [1, 1]} : vector<8x96xf32> to vector<8x32xf32>
    %c0_442 = arith.constant 0 : index
    %c0_443 = arith.constant 0 : index
    %1208 = vector.load %arg13[%c0_442, %c0_443] : memref<1x32xf32, #tpu.memory_space<vmem>>, vector<1x32xf32>
    %1209 = vector.broadcast %1208 : vector<1x32xf32> to vector<8x32xf32>
    %1210 = arith.addf %1207, %1209 : vector<8x32xf32>
    %1211 = arith.mulf %1197, %1210 : vector<8x32xf32>
    %1212 = arith.addf %1206, %1211 : vector<8x32xf32>
    %1213 = math.tanh %1212 : vector<8x32xf32>
    %cst_444 = arith.constant 1.000000e+00 : f32
    %1214 = vector.broadcast %cst_444 : f32 to vector<8x32xf32>
    %1215 = arith.subf %1214, %1205 : vector<8x32xf32>
    %1216 = arith.mulf %1215, %1213 : vector<8x32xf32>
    %1217 = arith.mulf %1205, %1174 : vector<8x32xf32>
    %1218 = arith.addf %1216, %1217 : vector<8x32xf32>
    %c0_445 = arith.constant 0 : index
    %c0_446 = arith.constant 0 : index
    %1219 = vector.load %arg15[%c0_445, %c0_446] : memref<32x96xf32, #tpu.memory_space<vmem>>, vector<32x96xf32>
    %cst_447 = arith.constant dense<0.000000e+00> : vector<8x96xf32>
    %1220 = tpu.matmul %1175, %1219, %cst_447 {dimension_numbers = #tpu.dot_dimension_numbers<[1], [0], [0], [1], [0, 0, 1, 1], [], []>, precision = #tpu.contract_precision<fp32>} : vector<8x32xf32>, vector<32x96xf32>, vector<8x96xf32> -> vector<8x96xf32>
    %1221 = vector.extract_strided_slice %1187 {offsets = [0, 0], sizes = [8, 32], strides = [1, 1]} : vector<8x96xf32> to vector<8x32xf32>
    %1222 = vector.extract_strided_slice %1220 {offsets = [0, 0], sizes = [8, 32], strides = [1, 1]} : vector<8x96xf32> to vector<8x32xf32>
    %1223 = arith.addf %1221, %1222 : vector<8x32xf32>
    %1224 = arith.negf %1223 : vector<8x32xf32>
    %1225 = math.exp %1224 : vector<8x32xf32>
    %cst_448 = arith.constant 1.000000e+00 : f32
    %1226 = vector.broadcast %cst_448 : f32 to vector<8x32xf32>
    %1227 = arith.addf %1226, %1225 : vector<8x32xf32>
    %1228 = arith.divf %1226, %1227 : vector<8x32xf32>
    %1229 = vector.extract_strided_slice %1187 {offsets = [0, 32], sizes = [8, 32], strides = [1, 1]} : vector<8x96xf32> to vector<8x32xf32>
    %1230 = vector.extract_strided_slice %1220 {offsets = [0, 32], sizes = [8, 32], strides = [1, 1]} : vector<8x96xf32> to vector<8x32xf32>
    %1231 = arith.addf %1229, %1230 : vector<8x32xf32>
    %1232 = arith.negf %1231 : vector<8x32xf32>
    %1233 = math.exp %1232 : vector<8x32xf32>
    %cst_449 = arith.constant 1.000000e+00 : f32
    %1234 = vector.broadcast %cst_449 : f32 to vector<8x32xf32>
    %1235 = arith.addf %1234, %1233 : vector<8x32xf32>
    %1236 = arith.divf %1234, %1235 : vector<8x32xf32>
    %1237 = vector.extract_strided_slice %1187 {offsets = [0, 64], sizes = [8, 32], strides = [1, 1]} : vector<8x96xf32> to vector<8x32xf32>
    %1238 = vector.extract_strided_slice %1220 {offsets = [0, 64], sizes = [8, 32], strides = [1, 1]} : vector<8x96xf32> to vector<8x32xf32>
    %c0_450 = arith.constant 0 : index
    %c0_451 = arith.constant 0 : index
    %1239 = vector.load %arg17[%c0_450, %c0_451] : memref<1x32xf32, #tpu.memory_space<vmem>>, vector<1x32xf32>
    %1240 = vector.broadcast %1239 : vector<1x32xf32> to vector<8x32xf32>
    %1241 = arith.addf %1238, %1240 : vector<8x32xf32>
    %1242 = arith.mulf %1228, %1241 : vector<8x32xf32>
    %1243 = arith.addf %1237, %1242 : vector<8x32xf32>
    %1244 = math.tanh %1243 : vector<8x32xf32>
    %cst_452 = arith.constant 1.000000e+00 : f32
    %1245 = vector.broadcast %cst_452 : f32 to vector<8x32xf32>
    %1246 = arith.subf %1245, %1236 : vector<8x32xf32>
    %1247 = arith.mulf %1246, %1244 : vector<8x32xf32>
    %1248 = arith.mulf %1236, %1175 : vector<8x32xf32>
    %1249 = arith.addf %1247, %1248 : vector<8x32xf32>
    %1250 = arith.select %1183, %1218, %1174 : vector<8x32xi1>, vector<8x32xf32>
    %1251 = arith.select %1185, %1249, %1175 : vector<8x32xi1>, vector<8x32xf32>
    %cst_453 = arith.constant 0.000000e+00 : f32
    %1252 = vector.broadcast %cst_453 : f32 to vector<8x32xf32>
    %1253 = arith.select %1183, %1250, %1252 : vector<8x32xi1>, vector<8x32xf32>
    %cst_454 = arith.constant 0.000000e+00 : f32
    %1254 = vector.broadcast %cst_454 : f32 to vector<8x32xf32>
    %1255 = arith.select %1185, %1251, %1254 : vector<8x32xi1>, vector<8x32xf32>
    %1256 = arith.addf %1180, %1253 : vector<8x32xf32>
    %1257 = arith.addf %1181, %1255 : vector<8x32xf32>
    %1258 = vector.shape_cast %0 : vector<8x1xf32> to vector<1x8x1xf32>
    %cst_455 = arith.constant dense<0xFF800000> : vector<1xf32>
    %1259 = vector.multi_reduction <maximumf>, %1258, %cst_455 [1, 2] : vector<1x8x1xf32> to vector<1xf32>
    %1260 = vector.shape_cast %1259 : vector<1xf32> to vector<1x1x1xf32>
    %1261 = vector.extract %1260[0, 0, 0] : f32 from vector<1x1x1xf32>
    %cst_456 = arith.constant 1.000000e+00 : f32
    %1262 = arith.maximumf %1261, %cst_456 : f32
    %cst_457 = arith.constant 1.000000e+00 : f32
    %1263 = arith.divf %cst_457, %1262 : f32
    %1264 = vector.broadcast %1263 : f32 to vector<8x32xf32>
    %1265 = arith.mulf %1256, %1264 : vector<8x32xf32>
    %1266 = vector.broadcast %1263 : f32 to vector<8x32xf32>
    %1267 = arith.mulf %1257, %1266 : vector<8x32xf32>
    %c0_458 = arith.constant 0 : index
    %c0_459 = arith.constant 0 : index
    %1268 = vector.load %arg18[%c0_458, %c0_459] : memref<32x32xf32, #tpu.memory_space<vmem>>, vector<32x32xf32>
    %cst_460 = arith.constant dense<0.000000e+00> : vector<8x32xf32>
    %1269 = tpu.matmul %1265, %1268, %cst_460 {dimension_numbers = #tpu.dot_dimension_numbers<[1], [0], [0], [1], [0, 0, 1, 1], [], []>, precision = #tpu.contract_precision<fp32>} : vector<8x32xf32>, vector<32x32xf32>, vector<8x32xf32> -> vector<8x32xf32>
    %c0_461 = arith.constant 0 : index
    %c0_462 = arith.constant 0 : index
    %1270 = vector.load %arg19[%c0_461, %c0_462] : memref<32x32xf32, #tpu.memory_space<vmem>>, vector<32x32xf32>
    %cst_463 = arith.constant dense<0.000000e+00> : vector<8x32xf32>
    %1271 = tpu.matmul %1267, %1270, %cst_463 {dimension_numbers = #tpu.dot_dimension_numbers<[1], [0], [0], [1], [0, 0, 1, 1], [], []>, precision = #tpu.contract_precision<fp32>} : vector<8x32xf32>, vector<32x32xf32>, vector<8x32xf32> -> vector<8x32xf32>
    %1272 = arith.addf %1269, %1271 : vector<8x32xf32>
    %c0_464 = arith.constant 0 : index
    %c0_465 = arith.constant 0 : index
    %1273 = vector.load %arg20[%c0_464, %c0_465] : memref<1x32xf32, #tpu.memory_space<vmem>>, vector<1x32xf32>
    %1274 = vector.broadcast %1273 : vector<1x32xf32> to vector<8x32xf32>
    %1275 = arith.addf %1272, %1274 : vector<8x32xf32>
    %c0_466 = arith.constant 0 : index
    %c0_467 = arith.constant 0 : index
    %1276 = vector.load %arg21[%c0_466, %c0_467] : memref<32x1xf32, #tpu.memory_space<vmem>>, vector<32x1xf32>
    %cst_468 = arith.constant dense<0.000000e+00> : vector<8x1xf32>
    %1277 = tpu.matmul %1275, %1276, %cst_468 {dimension_numbers = #tpu.dot_dimension_numbers<[1], [0], [0], [1], [0, 0, 1, 1], [], []>, precision = #tpu.contract_precision<fp32>} : vector<8x32xf32>, vector<32x1xf32>, vector<8x1xf32> -> vector<8x1xf32>
    %c0_469 = arith.constant 0 : index
    %c0_470 = arith.constant 0 : index
    %1278 = vector.load %arg22[%c0_469, %c0_470] : memref<1x1xf32, #tpu.memory_space<vmem>>, vector<1x1xf32>
    %1279 = vector.broadcast %1278 : vector<1x1xf32> to vector<8x1xf32>
    %1280 = arith.addf %1277, %1279 : vector<8x1xf32>
    %c0_471 = arith.constant 0 : index
    %c0_472 = arith.constant 0 : index
    %1281 = vector.load %arg23[%c0_471, %c0_472] : memref<8x1xf32, #tpu.memory_space<vmem>>, vector<8x1xf32>
    tpu.vector_store %arg23[%c0_471, %c0_472], %1280 {strides = array<i32>} : memref<8x1xf32, #tpu.memory_space<vmem>>, vector<8x1xf32>,
    return
  }
}

</mosaic_0001>

<bundles_post_ra>
// kernel: tpu_custom_call.1
= control target key start
LH: loop header
LB: loop body
LE: loop exit
PB: predicated region body
PF: predicated region fallthrough
CT: control target
= control target key end

     0   :  { %s34059_s0 = inlined_call_operand.vmem [shape: f32[8,1], index: 0, kind: input, shape index: {}]   ;;  %s34060_s1 = inlined_call_operand.vmem [shape: f32[64,4], index: 1, kind: input, shape index: {}]   ;;  %s34061_s2 = inlined_call_operand.hbm [shape: f32[4,96], index: 2, kind: input, shape index: {}]   ;;  %s34062_s3 = inlined_call_operand.hbm [shape: f32[32,96], index: 3, kind: input, shape index: {}]   ;;  %s34063_s4 = inlined_call_operand.hbm [shape: f32[1,96], index: 4, kind: input, shape index: {}]   ;;  %s34064_s5 = inlined_call_operand.vmem [shape: f32[1,32], index: 5, kind: input, shape index: {}]   ;;  %s34065_s6 = inlined_call_operand.hbm [shape: f32[4,96], index: 6, kind: input, shape index: {}]   ;;  %s34066_s7 = inlined_call_operand.hbm [shape: f32[32,96], index: 7, kind: input, shape index: {}]   ;;  %s34067_s8 = inlined_call_operand.vmem [shape: f32[1,96], index: 8, kind: input, shape index: {}]   ;;  %s34068_s9 = inlined_call_operand.hbm [shape: f32[1,32], index: 9, kind: input, shape index: {}]   ;;  %s34069_s10 = inlined_call_operand.vmem [shape: f32[64,96], index: 10, kind: input, shape index: {}]   ;;  %s34070_s11 = inlined_call_operand.hbm [shape: f32[32,96], index: 11, kind: input, shape index: {}]   ;;  %s34071_s12 = inlined_call_operand.hbm [shape: f32[1,96], index: 12, kind: input, shape index: {}]   ;;  %s34072_s13 = inlined_call_operand.hbm [shape: f32[1,32], index: 13, kind: input, shape index: {}]   ;;  %s34073_s14 = inlined_call_operand.vmem [shape: f32[64,96], index: 14, kind: input, shape index: {}]   ;;  %s34074_s15 = inlined_call_operand.vmem [shape: f32[32,96], index: 15, kind: input, shape index: {}]   ;;  %s34075_s16 = inlined_call_operand.vmem [shape: f32[1,96], index: 16, kind: input, shape index: {}]   ;;  %s34076_s17 = inlined_call_operand.vmem [shape: f32[1,32], index: 17, kind: input, shape index: {}]   ;;  %s34077_s18 = inlined_call_operand.hbm [shape: f32[32,32], index: 18, kind: input, shape index: {}]   ;;  %s34078_s19 = inlined_call_operand.hbm [shape: f32[32,32], index: 19, kind: input, shape index: {}]   ;;  %s34079_s20 = inlined_call_operand.vmem [shape: f32[1,32], index: 20, kind: input, shape index: {}]   ;;  %s34080_s21 = inlined_call_operand.vmem [shape: f32[32,1], index: 21, kind: input, shape index: {}]   ;;  %s34081_s22 = inlined_call_operand.<no memory space> [shape: f32[1,1], index: 22, kind: input, shape index: {}]   ;;  %s34082_s23 = inlined_call_operand.vmem [shape: f32[8,1], index: 23, kind: output, shape index: {}]  }
   0x1   :  { %34091 = sst [smem:[#allocation30_spill]] %s34059_s0  ;;  %v28_v0 = vstv %s34081_s22 }
   0x2   :  { %34092 = sst [smem:[#allocation31_spill]] %s34060_s1  ;;  %29 = vst [vmem:[#allocation6] sm:$0x1] %v28_v0 }
   0x3   :  { %34093 = sst [smem:[#allocation32_spill]] %s34061_s2 }
   0x4   :  { %34094 = sst [smem:[#allocation33_spill]] %s34062_s3 }
   0x5   :  { %34095 = sst [smem:[#allocation34_spill]] %s34063_s4 }
   0x6   :  { %34096 = sst [smem:[#allocation35_spill]] %s34064_s5 }
   0x7   :  { %34097 = sst [smem:[#allocation36_spill]] %s34065_s6 }
   0x8   :  { %34098 = sst [smem:[#allocation37_spill]] %s34066_s7 }
   0x9   :  { %34099 = sst [smem:[#allocation38_spill]] %s34079_s20 }
   0xa   :  { %34100 = sst [smem:[#allocation39_spill]] %s34082_s23 }
   0xb   :  { %30 = vsyncpa [#allocation8], 0 }
   0xc   :  { %31 = vsyncpa [#allocation10], 0 }
   0xd   :  { %32 = vsyncpa [#allocation13], 0 }
   0xe   :  { %33 = vsyncpa [#allocation16], 0 }
   0xf   :  { %34 = vsyncpa [#allocation19], 0 }
  0x10   :  { %35 = vsyncpa [#allocation22], 0  ;;  %s30520_s24 = smov [#allocation9]   ;;  %s34101_s26 = sld [smem:[#allocation33_spill]] }
  0x11   :  { %s55_s25 = sshll.u32 %s30520_s24, 4  ;;  %s56_s25 = int_to_ptr.vmem [resolvable:$true] %s55_s25 }
  0x16   :  { %s30266_s2 = scalar_lea.hbm %s34101_s26, 512 }
  0x17   :  { %p30267_p0 = scmp.ne.s32.totalorder %s34101_s26, %s30266_s2  ;;  %p30270_p1 = scmp.lt.u32.totalorder %s30266_s2, %s34101_s26 }
  0x19   :  { %p30272_p2 = pnand %p30270_p1, %p30267_p0 }
  0x1b   :  { %30275 = shalt.err (!%p30272_p2)
}
  0x1c   :  { %s30276_s28 = scalar_lea.vmem %s56_s25, 512  ;;  %p30281_p4 = scmp.lt.s32.totalorder %s56_s25, %s56_s25 }
  0x1d   :  { %p30277_p3 = scmp.ne.s32.totalorder %s56_s25, %s30276_s28  ;;  %p30282_p5 = scmp.lt.s32.totalorder %s30276_s28, %s30276_s28 }
  0x1f   :  { %p30283_p6 = por %p30282_p5, %p30281_p4 }
  0x21   :  { %p30284_p7 = pnand %p30283_p6, %p30277_p3 }
  0x23   :  { %30287 = shalt.err (!%p30284_p7)
}
  0x24   :  { %s30521_s29 = smov 128   ;;  %s30522_s3 = smov 8  }
  0x25   :  { %61 = dma.hbm_to_vmem [thread:$0]  %s34101_s26, 512, %s56_s25, [#allocation10], %s30521_s29, %s30521_s29, %s30522_s3  }
  0x26   :  { %s30523_s30 = smov [#allocation12]   ;;  %s30524_s5 = smov [#allocation15]  }
  0x27   :  { %s80_s24 = sshll.u32 %s30523_s30, 4  ;;  %s104_s1 = sshll.u32 %s30524_s5, 4  ;;  %s81_s24 = int_to_ptr.vmem [resolvable:$true] %s80_s24  ;;  %s105_s1 = int_to_ptr.vmem [resolvable:$true] %s104_s1 }
  0x28   :  { %s34102_s27 = sld [smem:[#allocation36_spill]] }
  0x2e   :  { %s30288_s7 = scalar_lea.hbm %s34102_s27, 64 }
  0x2f   :  { %p30289_p8 = scmp.ne.s32.totalorder %s34102_s27, %s30288_s7  ;;  %p30292_p9 = scmp.lt.u32.totalorder %s30288_s7, %s34102_s27 }
  0x31   :  { %p30294_p10 = pnand %p30292_p9, %p30289_p8 }
  0x33   :  { %30297 = shalt.err (!%p30294_p10)
}
  0x34   :  { %s30298_s25 = scalar_lea.vmem %s81_s24, 64  ;;  %p30303_p12 = scmp.lt.s32.totalorder %s81_s24, %s81_s24 }
  0x35   :  { %p30299_p11 = scmp.ne.s32.totalorder %s81_s24, %s30298_s25  ;;  %p30304_p13 = scmp.lt.s32.totalorder %s30298_s25, %s30298_s25 }
  0x37   :  { %p30305_p0 = por %p30304_p13, %p30303_p12 }
  0x39   :  { %p30306_p1 = pnand %p30305_p0, %p30299_p11 }
  0x3b   :  { %30309 = shalt.err (!%p30306_p1)
}
  0x3c   :  { %83 = dma.hbm_to_vmem [thread:$0]  %s34102_s27, 64, %s81_s24, [#allocation13]  }
  0x3d   :  { %s30310_s5 = scalar_lea.hbm %s34068_s9, 16 }
  0x3e   :  { %p30311_p2 = scmp.ne.s32.totalorder %s34068_s9, %s30310_s5  ;;  %p30314_p3 = scmp.lt.u32.totalorder %s30310_s5, %s34068_s9 }
  0x40   :  { %p30316_p4 = pnand %p30314_p3, %p30311_p2 }
  0x42   :  { %30319 = shalt.err (!%p30316_p4)
}
  0x43   :  { %s30320_s7 = scalar_lea.vmem %s105_s1, 16  ;;  %s30324_s22 = scalar_lea.vmem %s105_s1, 32 }
  0x44   :  { %p30321_p5 = scmp.ne.s32.totalorder %s105_s1, %s30320_s7  ;;  %p30325_p6 = scmp.lt.s32.totalorder %s105_s1, %s105_s1 }
  0x45   :  { %p30326_p7 = scmp.lt.s32.totalorder %s30324_s22, %s30320_s7 }
  0x47   :  { %p30327_p8 = por %p30326_p7, %p30325_p6 }
  0x49   :  { %p30328_p9 = pnand %p30327_p8, %p30321_p5 }
  0x4b   :  { %30331 = shalt.err (!%p30328_p9)
}
  0x4c   :  { %107 = dma.hbm_to_vmem [thread:$0]  %s34068_s9, 16, %s105_s1, [#allocation16]  }
  0x4d   :  { %s30525_s28 = smov [#allocation18]   ;;  %s30526_s26 = smov [#allocation21]  }
  0x4e   :  { %s128_s25 = sshll.u32 %s30525_s28, 4  ;;  %s155_s0 = sshll.u32 %s30526_s26, 4  ;;  %s129_s25 = int_to_ptr.vmem [resolvable:$true] %s128_s25  ;;  %s156_s0 = int_to_ptr.vmem [resolvable:$true] %s155_s0 }
  0x4f   :  { %s30332_s5 = scalar_lea.hbm %s34071_s12, 16 }
  0x50   :  { %p30333_p10 = scmp.ne.s32.totalorder %s34071_s12, %s30332_s5  ;;  %p30336_p11 = scmp.lt.u32.totalorder %s30332_s5, %s34071_s12 }
  0x52   :  { %p30338_p12 = pnand %p30336_p11, %p30333_p10 }
  0x54   :  { %30341 = shalt.err (!%p30338_p12)
}
  0x55   :  { %s30342_s9 = scalar_lea.vmem %s129_s25, 16  ;;  %s30346_s1 = scalar_lea.vmem %s129_s25, 32 }
  0x56   :  { %p30343_p13 = scmp.ne.s32.totalorder %s129_s25, %s30342_s9  ;;  %p30347_p0 = scmp.lt.s32.totalorder %s129_s25, %s129_s25 }
  0x57   :  { %p30348_p1 = scmp.lt.s32.totalorder %s30346_s1, %s30342_s9 }
  0x59   :  { %p30349_p2 = por %p30348_p1, %p30347_p0 }
  0x5b   :  { %p30350_p3 = pnand %p30349_p2, %p30343_p13 }
  0x5d   :  { %30353 = shalt.err (!%p30350_p3)
}
  0x5e   :  { %131 = dma.hbm_to_vmem [thread:$0]  %s34071_s12, 16, %s129_s25, [#allocation19]  }
  0x5f   :  { %s30354_s28 = scalar_lea.hbm %s34077_s18, 512 }
  0x60   :  { %p30355_p4 = scmp.ne.s32.totalorder %s34077_s18, %s30354_s28  ;;  %p30358_p5 = scmp.lt.u32.totalorder %s30354_s28, %s34077_s18 }
  0x62   :  { %p30360_p6 = pnand %p30358_p5, %p30355_p4 }
  0x64   :  { %30363 = shalt.err (!%p30360_p6)
}
  0x65   :  { %s30364_s20 = scalar_lea.vmem %s156_s0, 512  ;;  %p30369_p8 = scmp.lt.s32.totalorder %s156_s0, %s156_s0 }
  0x66   :  { %p30365_p7 = scmp.ne.s32.totalorder %s156_s0, %s30364_s20  ;;  %p30370_p9 = scmp.lt.s32.totalorder %s30364_s20, %s30364_s20 }
  0x68   :  { %p30371_p10 = por %p30370_p9, %p30369_p8 }
  0x6a   :  { %p30372_p11 = pnand %p30371_p10, %p30365_p7 }
  0x6c   :  { %30375 = shalt.err (!%p30372_p11)
}
  0x6d   :  { %161 = dma.hbm_to_vmem [thread:$0]  %s34077_s18, 512, %s156_s0, [#allocation22], %s30521_s29, %s30521_s29, %s30522_s3  }
  0x6e   :  { %s30527_s23 = smov [#allocation7]   ;;  %s30528_s6 = smov [#allocation11]  }
  0x6f   :  { %s46_s2 = sshll.u32 %s30527_s23, 4  ;;  %s68_s9 = sshll.u32 %s30528_s6, 4  ;;  %s47_s2 = int_to_ptr.vmem [resolvable:$true] %s46_s2  ;;  %s69_s9 = int_to_ptr.vmem [resolvable:$true] %s68_s9 }
  0x70   :  { %s34103_s22 = sld [smem:[#allocation32_spill]] }
  0x76   :  { %s30376_s24 = scalar_lea.hbm %s34103_s22, 64 }
  0x77   :  { %p30377_p12 = scmp.ne.s32.totalorder %s34103_s22, %s30376_s24  ;;  %p30380_p13 = scmp.lt.u32.totalorder %s30376_s24, %s34103_s22 }
  0x79   :  { %p30382_p0 = pnand %p30380_p13, %p30377_p12 }
  0x7b   :  { %30385 = shalt.err (!%p30382_p0)
}
  0x7c   :  { %s30386_s18 = scalar_lea.vmem %s47_s2, 64  ;;  %p30391_p2 = scmp.lt.s32.totalorder %s47_s2, %s47_s2 }
  0x7d   :  { %p30387_p1 = scmp.ne.s32.totalorder %s47_s2, %s30386_s18  ;;  %p30392_p3 = scmp.lt.s32.totalorder %s30386_s18, %s30386_s18 }
  0x7f   :  { %p30393_p4 = por %p30392_p3, %p30391_p2 }
  0x81   :  { %p30394_p5 = pnand %p30393_p4, %p30387_p1 }
  0x83   :  { %30397 = shalt.err (!%p30394_p5)
}
  0x84   :  { %49 = dma.hbm_to_vmem [thread:$0]  %s34103_s22, 64, %s47_s2, [#allocation8]  }
  0x85   :  { %s34104_s12 = sld [smem:[#allocation34_spill]] }
  0x8b   :  { %s30398_s25 = scalar_lea.hbm %s34104_s12, 16 }
  0x8c   :  { %p30399_p6 = scmp.ne.s32.totalorder %s34104_s12, %s30398_s25  ;;  %p30402_p7 = scmp.lt.u32.totalorder %s30398_s25, %s34104_s12 }
  0x8e   :  { %p30404_p8 = pnand %p30402_p7, %p30399_p6 }
  0x90   :  { %30407 = shalt.err (!%p30404_p8)
}
  0x91   :  { %s30408_s24 = scalar_lea.vmem %s69_s9, 16  ;;  %s30412_s27 = scalar_lea.vmem %s69_s9, 32 }
  0x92   :  { %p30409_p9 = scmp.ne.s32.totalorder %s69_s9, %s30408_s24  ;;  %p30413_p10 = scmp.lt.s32.totalorder %s69_s9, %s69_s9 }
  0x93   :  { %p30414_p11 = scmp.lt.s32.totalorder %s30412_s27, %s30408_s24 }
  0x95   :  { %p30415_p12 = por %p30414_p11, %p30413_p10 }
  0x97   :  { %p30416_p13 = pnand %p30415_p12, %p30409_p9 }
  0x99   :  { %30419 = shalt.err (!%p30416_p13)
}
  0x9a   :  { %71 = dma.hbm_to_vmem [thread:$0]  %s34104_s12, 16, %s69_s9, [#allocation10]  }
  0x9b   :  { %s30529_s28 = smov [#allocation14]   ;;  %s30530_s4 = smov [#allocation17]  }
  0x9c   :  { %s89_s26 = sshll.u32 %s30529_s28, 4  ;;  %s115_s18 = sshll.u32 %s30530_s4, 4  ;;  %s90_s26 = int_to_ptr.vmem [resolvable:$true] %s89_s26  ;;  %s116_s18 = int_to_ptr.vmem [resolvable:$true] %s115_s18 }
  0x9d   :  { %s34105_s5 = sld [smem:[#allocation37_spill]] }
  0xa3   :  { %s30420_s20 = scalar_lea.hbm %s34105_s5, 512 }
  0xa4   :  { %p30421_p0 = scmp.ne.s32.totalorder %s34105_s5, %s30420_s20  ;;  %p30424_p1 = scmp.lt.u32.totalorder %s30420_s20, %s34105_s5 }
  0xa6   :  { %p30426_p2 = pnand %p30424_p1, %p30421_p0 }
  0xa8   :  { %30429 = shalt.err (!%p30426_p2)
}
  0xa9   :  { %s30430_s9 = scalar_lea.vmem %s90_s26, 512  ;;  %p30435_p4 = scmp.lt.s32.totalorder %s90_s26, %s90_s26 }
  0xaa   :  { %p30431_p3 = scmp.ne.s32.totalorder %s90_s26, %s30430_s9  ;;  %p30436_p5 = scmp.lt.s32.totalorder %s30430_s9, %s30430_s9 }
  0xac   :  { %p30437_p6 = por %p30436_p5, %p30435_p4 }
  0xae   :  { %p30438_p7 = pnand %p30437_p6, %p30431_p3 }
  0xb0   :  { %30441 = shalt.err (!%p30438_p7)
}
  0xb1   :  { %95 = dma.hbm_to_vmem [thread:$0]  %s34105_s5, 512, %s90_s26, [#allocation13], %s30521_s29, %s30521_s29, %s30522_s3  }
  0xb2   :  { %s30442_s2 = scalar_lea.hbm %s34070_s11, 512 }
  0xb3   :  { %p30443_p8 = scmp.ne.s32.totalorder %s34070_s11, %s30442_s2  ;;  %p30446_p9 = scmp.lt.u32.totalorder %s30442_s2, %s34070_s11 }
  0xb5   :  { %p30448_p10 = pnand %p30446_p9, %p30443_p8 }
  0xb7   :  { %30451 = shalt.err (!%p30448_p10)
}
  0xb8   :  { %s30452_s30 = scalar_lea.vmem %s116_s18, 512  ;;  %p30457_p12 = scmp.lt.s32.totalorder %s116_s18, %s116_s18 }
  0xb9   :  { %p30453_p11 = scmp.ne.s32.totalorder %s116_s18, %s30452_s30  ;;  %p30458_p13 = scmp.lt.s32.totalorder %s30452_s30, %s30452_s30 }
  0xbb   :  { %p30459_p0 = por %p30458_p13, %p30457_p12 }
  0xbd   :  { %p30460_p1 = pnand %p30459_p0, %p30453_p11 }
  0xbf   :  { %30463 = shalt.err (!%p30460_p1)
}
  0xc0   :  { %121 = dma.hbm_to_vmem [thread:$0]  %s34070_s11, 512, %s116_s18, [#allocation16], %s30521_s29, %s30521_s29, %s30522_s3  }
  0xc1   :  { %s30531_s20 = smov [#allocation20]   ;;  %s30532_s23 = smov [#allocation23]  }
  0xc2   :  { %s138_s25 = sshll.u32 %s30531_s20, 4  ;;  %s167_s6 = sshll.u32 %s30532_s23, 4  ;;  %s139_s25 = int_to_ptr.vmem [resolvable:$true] %s138_s25  ;;  %s168_s6 = int_to_ptr.vmem [resolvable:$true] %s167_s6 }
  0xc3   :  { %s30464_s12 = scalar_lea.hbm %s34072_s13, 16 }
  0xc4   :  { %p30465_p2 = scmp.ne.s32.totalorder %s34072_s13, %s30464_s12  ;;  %p30468_p3 = scmp.lt.u32.totalorder %s30464_s12, %s34072_s13 }
  0xc6   :  { %p30470_p4 = pnand %p30468_p3, %p30465_p2 }
  0xc8   :  { %30473 = shalt.err (!%p30470_p4)
}
  0xc9   :  { %s30474_s11 = scalar_lea.vmem %s139_s25, 16  ;;  %s30478_s18 = scalar_lea.vmem %s139_s25, 32 }
  0xca   :  { %p30475_p5 = scmp.ne.s32.totalorder %s139_s25, %s30474_s11  ;;  %p30479_p6 = scmp.lt.s32.totalorder %s139_s25, %s139_s25 }
  0xcb   :  { %p30480_p7 = scmp.lt.s32.totalorder %s30478_s18, %s30474_s11 }
  0xcd   :  { %p30481_p8 = por %p30480_p7, %p30479_p6 }
  0xcf   :  { %p30482_p9 = pnand %p30481_p8, %p30475_p5 }
  0xd1   :  { %30485 = shalt.err (!%p30482_p9)
}
  0xd2   :  { %141 = dma.hbm_to_vmem [thread:$0]  %s34072_s13, 16, %s139_s25, [#allocation19]  }
  0xd3   :  { %s30486_s30 = scalar_lea.hbm %s34078_s19, 512 }
  0xd4   :  { %p30487_p10 = scmp.ne.s32.totalorder %s34078_s19, %s30486_s30  ;;  %p30490_p11 = scmp.lt.u32.totalorder %s30486_s30, %s34078_s19 }
  0xd6   :  { %p30492_p12 = pnand %p30490_p11, %p30487_p10 }
  0xd8   :  { %30495 = shalt.err (!%p30492_p12)
}
  0xd9   :  { %s30496_s1 = scalar_lea.vmem %s168_s6, 512  ;;  %p30501_p0 = scmp.lt.s32.totalorder %s168_s6, %s168_s6 }
  0xda   :  { %p30497_p13 = scmp.ne.s32.totalorder %s168_s6, %s30496_s1  ;;  %p30502_p1 = scmp.lt.s32.totalorder %s30496_s1, %s30496_s1 }
  0xdc   :  { %p30503_p2 = por %p30502_p1, %p30501_p0 }
  0xde   :  { %p30504_p3 = pnand %p30503_p2, %p30497_p13 }
  0xe0   :  { %30507 = shalt.err (!%p30504_p3)
}
  0xe1   :  { %173 = dma.hbm_to_vmem [thread:$0]  %s34078_s19, 512, %s168_s6, [#allocation22], %s30521_s29, %s30521_s29, %s30522_s3  }
  0xe2   :  { %30508 = dma.done.wait [#allocation8], 64  }
  0xe3   :  { %30509 = vsyncadd [#allocation8], 4294967232 }
  0xe4   :  { %30510 = dma.done.wait [#allocation10], 528  }
  0xe5   :  { %30511 = vsyncadd [#allocation10], 4294966768 }
  0xe6   :  { %30512 = dma.done.wait [#allocation13], 576  }
  0xe7   :  { %30513 = vsyncadd [#allocation13], 4294966720 }
  0xe8   :  { %30514 = dma.done.wait [#allocation16], 528  }
  0xe9   :  { %30515 = vsyncadd [#allocation16], 4294966768 }
  0xea   :  { %30516 = dma.done.wait [#allocation19], 32  }
  0xeb   :  { %30517 = vsyncadd [#allocation19], 4294967264 }
  0xec   :  { %30518 = dma.done.wait [#allocation22], 1024  }
  0xed   :  { %30519 = vsyncadd [#allocation22], 4294966272  ;;  %vm260_vm0 = vcmask 1043456   ;;  %vm235_vm1 = vcmask 31744   ;;  %v227_v1 = vld [vmem:[#allocation7] sm:$0xf] }
  0xee   :  { %s34106_s7 = sld [smem:[#allocation31_spill]]  ;;  %v262_v4 = vsel %vm260_vm0, %v227_v1, 0  ;;  %v1020_v45 = vld [vmem:[#allocation12] sm:$0xf]  ;;  %vm30534_vm2 = vmmov 0   ;;  %s34107_s20 = sld [smem:[#allocation35_spill]] }
  0xef   :  { %v30828_v10 = vand.u32 4294901760, %v262_v4  ;;  %v1029_v54 = vsel %vm260_vm0, %v1020_v45, 0  ;;  %s30536_s23 = smov 64   ;;  %vm1011_vm3 = vcmask 785408   ;;  %s34108_s9 = sld [smem:[#allocation30_spill]]  ;;  %vm1794_vm6 = vcmask 261120  }
  0xf0   :  { %v30925_v60 = vand.u32 4294901760, %v1029_v54  ;;  %s30538_s12 = smov 96   ;;  %vm22004_vm13 = vcmask 7168   ;;  %s30539_s19 = smov 1.0  }
  0xf1   :  { %25030 = vmatprep.subr.mxu1 %v30828_v10  ;;  %v412_v21 = vsub.f32 %v262_v4, %v30828_v10  ;;  %s34109_s28 = sld [smem:[#allocation38_spill]] }
  0xf2   :  { %25031 = vmatpush3.msra.mxu1 %v30828_v10  ;;  %v1179_v62 = vsub.f32 %v1029_v54, %v30925_v60 }
  0xf3   :  { %v30869_v29 = vand.u32 4294901760, %v412_v21 }
  0xf4   :  { %v219_v2 = vld [vmem:[%s34106_s7] sm:$0xff]  ;;  %v220_v3 = vld [vmem:[%s34106_s7 + $0x8] sm:$0xff]  ;;  %v221_v7 = vld [vmem:[%s34106_s7 + $0x10] sm:$0xff] }
  0xf5   :  { %v237_v5 = vsel %vm235_vm1, %v219_v2, 0  ;;  %v240_v6 = vsel %vm235_vm1, %v220_v3, 0  ;;  %v222_v8 = vld [vmem:[%s34106_s7 + $0x18] sm:$0xff]  ;;  %v223_v9 = vld [vmem:[%s34106_s7 + $0x20] sm:$0xff]  ;;  %v243_v13 = vsel %vm235_vm1, %v221_v7, 0  ;;  %v224_v14 = vld [vmem:[%s34106_s7 + $0x28] sm:$0xff]  ;;  %v414_v37 = vsub.f32 %v412_v21, %v30869_v29 }
  0xf6   :  { %v30830_v11 = vand.u32 4294901760, %v237_v5  ;;  %v30832_v12 = vand.u32 4294901760, %v240_v6  ;;  %v225_v15 = vld [vmem:[%s34106_s7 + $0x30] sm:$0xff]  ;;  %v30841_v16 = vand.u32 4294901760, %v243_v13  ;;  %v246_v17 = vsel %vm235_vm1, %v222_v8, 0  ;;  %v226_v44 = vld [vmem:[%s34106_s7 + $0x38] sm:$0xff] }
  0xf7   :  { %v249_v18 = vsel %vm235_vm1, %v223_v9, 0  ;;  %v252_v19 = vsel %vm235_vm1, %v224_v14, 0  ;;  %v30855_v23 = vand.u32 4294901760, %v246_v17  ;;  %v255_v27 = vsel %vm235_vm1, %v225_v15, 0  ;;  %v1790_v8 = vld [vmem:[#allocation9] sm:$0xff]  ;;  %v1791_v9 = vld [vmem:[#allocation9 + $0x8] sm:$0xff] }
  0xf8   :  { %v30848_v20 = vsub.f32 %v237_v5, %v30830_v11  ;;  %v30852_v22 = vsub.f32 %v240_v6, %v30832_v12  ;;  %25046 = vmatprep.mubr.f32.mxu0 %v30830_v11  ;;  %v30859_v24 = vsub.f32 %v243_v13, %v30841_v16  ;;  %v30861_v25 = vand.u32 4294901760, %v249_v18  ;;  %v1792_v14 = vld [vmem:[#allocation9 + $0x10] sm:$0xff]  ;;  %v1793_v15 = vld [vmem:[#allocation9 + $0x18] sm:$0xff] }
  0xf9   :  { %v30863_v26 = vand.u32 4294901760, %v252_v19  ;;  %v30875_v31 = vsub.f32 %v246_v17, %v30855_v23  ;;  %v30886_v35 = vand.u32 4294901760, %v255_v27  ;;  %v415_v47 = vand.u32 4294901760, %v414_v37 }
  0xfa   :  { %v30867_v28 = vand.u32 4294901760, %v30848_v20  ;;  %v30872_v30 = vand.u32 4294901760, %v30852_v22  ;;  %v30878_v32 = vand.u32 4294901760, %v30859_v24  ;;  %v30881_v33 = vsub.f32 %v249_v18, %v30861_v25 }
  0xfb   :  { %v30884_v34 = vsub.f32 %v252_v19, %v30863_v26  ;;  %v30894_v39 = vand.u32 4294901760, %v30875_v31  ;;  %v30905_v43 = vsub.f32 %v255_v27, %v30886_v35  ;;  %25044 = vmatprep.subr.mxu0 %v415_v47  ;;  %v258_v53 = vsel %vm235_vm1, %v226_v44, 0  ;;  %29440 = vmatprep.subr.mxu1 %v415_v47 }
  0xfc   :  { %v333_v36 = vsub.f32 %v30848_v20, %v30867_v28  ;;  %v343_v38 = vsub.f32 %v30852_v22, %v30872_v30  ;;  %v353_v40 = vsub.f32 %v30859_v24, %v30878_v32  ;;  %v30899_v41 = vand.u32 4294901760, %v30881_v33  ;;  %25045 = vmatpush3.msra.mxu0 %v415_v47 }
  0xfd   :  { %v30902_v42 = vand.u32 4294901760, %v30884_v34  ;;  %v363_v49 = vsub.f32 %v30875_v31, %v30894_v39  ;;  %v30915_v52 = vand.u32 4294901760, %v30905_v43  ;;  %v30921_v57 = vand.u32 4294901760, %v258_v53  ;;  %25047 = vmatmul.mubr.f32.vlgmr.msra.gmra.mrb[0].mxu0 %v30832_v12  ;;  %25058 = vmatprep.subr.mxu0 %v412_v21 }
  0xfe   :  { %v334_v46 = vand.u32 4294901760, %v333_v36  ;;  %v344_v48 = vand.u32 4294901760, %v343_v38  ;;  %v354_v50 = vand.u32 4294901760, %v353_v40  ;;  %v373_v51 = vsub.f32 %v30881_v33, %v30899_v41  ;;  %25049 = vmatprep.mubr.f32.mxu0 %v30841_v16  ;;  %25059 = vmatpush3.msra.mxu0 %v412_v21 }
  0xff   :  { %v364_v55 = vand.u32 4294901760, %v363_v49  ;;  %v383_v56 = vsub.f32 %v30884_v34, %v30902_v42  ;;  %v393_v59 = vsub.f32 %v30905_v43, %v30915_v52  ;;  %v30929_v61 = vsub.f32 %v258_v53, %v30921_v57  ;;  %25072 = vmatprep.subr.mxu0 %v30828_v10 }
 0x100   :  { %25032 = vmatprep.mubr.f32.mxu1 %v334_v46  ;;  %v374_v58 = vand.u32 4294901760, %v373_v51  ;;  %v30941_v3 = vand.u32 4294901760, %v1179_v62  ;;  %v30533_v7 = vmov 0.0|0.0   ;;  %v1802_v13 = vand.u32 4294901760, %v1791_v9  ;;  %v2321_v51 = vld [vmem:[#allocation14 + $0x10] sm:$0xff] }
 0x101   :  { %25033 = vmatmul.mubr.f32.vlgmr.msra.gmra.mrb[0].mxu1 %v344_v48  ;;  %v384_v63 = vand.u32 4294901760, %v383_v56  ;;  %v30934_v0 = vand.u32 4294901760, %v30929_v61  ;;  %v394_v1 = vand.u32 4294901760, %v393_v59  ;;  %25050 = vmatmul.mubr.f32.gmra.mrb[2].mxu0 %v30855_v23  ;;  %v1805_v21 = vand.u32 4294901760, %v1792_v14 }
 0x102   :  { %29441 = vmatpush3.msra.mxu1 %v415_v47  ;;  %25035 = vmatprep.mubr.f32.mxu1 %v354_v50  ;;  %v1181_v5 = vsub.f32 %v1179_v62, %v30941_v3  ;;  %v30994_v19 = vsub.f32 %v1791_v9, %v1802_v13  ;;  %v1808_v27 = vand.u32 4294901760, %v1793_v15 }
 0x103   :  { %25114 = vmatprep.subr.mxu1 %v30925_v60  ;;  %v403_v2 = vsub.f32 %v30929_v61, %v30934_v0  ;;  %25060 = vmatprep.mubr.f32.mxu0 %v30848_v20  ;;  %v31006_v36 = vsub.f32 %v1792_v14, %v1805_v21 }
 0x104   :  { %v1182_v6 = vand.u32 4294901760, %v1181_v5  ;;  %v31008_v37 = vsub.f32 %v1793_v15, %v1808_v27 }
 0x105   :  { %25036 = vmatmul.mubr.f32.gmra.mrb[2].mxu1 %v364_v55  ;;  %v404_v4 = vand.u32 4294901760, %v403_v2  ;;  %25061 = vmatmul.mubr.f32.vlgmr.msra.gmra.mrb[0].mxu0 %v30852_v22 }
 0x106   :  { %25038 = vmatprep.mubr.f32.mxu1 %v374_v58  ;;  %25063 = vmatprep.mubr.f32.mxu0 %v30859_v24  ;;  %v1901_v40 = vand.u32 4294901760, %v31008_v37 }
 0x107   :  { %25073 = vmatpush3.msra.mxu0 %v30828_v10 }
 0x108   :  { %25086 = vmatprep.subr.mxu0 %v30869_v29 }
 0x109   :  { %25039 = vmatmul.mubr.f32.gmra.mrb[4].mxu1 %v384_v63  ;;  %25064 = vmatmul.mubr.f32.gmra.mrb[2].mxu0 %v30875_v31 }
 0x10a   :  { %25041 = vmatprep.mubr.f32.mxu1 %v394_v1  ;;  %25066 = vmatprep.mubr.f32.mxu0 %v30881_v33 }
 0x10d   :  { %25042 = vmatmul.mubr.f32.gmra.mrb[6].mxu1 %v404_v4  ;;  %25067 = vmatmul.mubr.f32.gmra.mrb[4].mxu0 %v30884_v34 }
 0x10e   :  { %25052 = vmatprep.mubr.f32.mxu1 %v30861_v25  ;;  %25069 = vmatprep.mubr.f32.mxu0 %v30905_v43 }
 0x111   :  { %25053 = vmatmul.mubr.f32.vlgmr.msra.gmra.mrb[4].mxu1 %v30863_v26  ;;  %25070 = vmatmul.mubr.f32.gmra.mrb[6].mxu0 %v30929_v61 }
 0x112   :  { %25115 = vmatpush3.msra.mxu1 %v30925_v60  ;;  %25055 = vmatprep.mubr.f32.mxu1 %v30886_v35 }
 0x113   :  { %25128 = vmatprep.subr.mxu1 %v1182_v6  ;;  %25074 = vmatprep.mubr.f32.mxu0 %v30867_v28 }
 0x115   :  { %25056 = vmatmul.mubr.f32.gmra.mrb[6].mxu1 %v30921_v57  ;;  %25075 = vmatmul.mubr.f32.vlgmr.msra.gmra.mrb[0].mxu0 %v30872_v30 }
 0x116   :  { %25116 = vmatprep.mubr.f32.mxu1 %v334_v46  ;;  %25077 = vmatprep.mubr.f32.mxu0 %v30878_v32  ;;  %v1902_v46 = vsub.f32 %v31008_v37, %v1901_v40 }
 0x117   :  { %25087 = vmatpush3.msra.mxu0 %v30869_v29  ;;  %v31004_v29 = vpack.c.bf16 %v1808_v27, %v1805_v21 }
 0x118   :  { %25100 = vmatprep.subr.mxu0 %v30828_v10 }
 0x119   :  { %25117 = vmatmul.mubr.f32.vlgmr.msra.gmra.mrb[8].mxu1 %v344_v48  ;;  %25078 = vmatmul.mubr.f32.gmra.mrb[2].mxu0 %v30894_v39  ;;  %v1903_v48 = vand.u32 4294901760, %v1902_v46 }
 0x11a   :  { %25129 = vmatpush3.msra.mxu1 %v1182_v6  ;;  %25119 = vmatprep.mubr.f32.mxu1 %v354_v50 }
 0x11b   :  { %25142 = vmatprep.subr.mxu1 %v1179_v62  ;;  %25080 = vmatprep.mubr.f32.mxu0 %v30899_v41 }
 0x11d   :  { %25120 = vmatmul.mubr.f32.gmra.mrb[10].mxu1 %v364_v55  ;;  %25081 = vmatmul.mubr.f32.gmra.mrb[4].mxu0 %v30902_v42 }
 0x11e   :  { %25122 = vmatprep.mubr.f32.mxu1 %v374_v58  ;;  %25083 = vmatprep.mubr.f32.mxu0 %v30915_v52  ;;  %v2330_v58 = vand.u32 4294901760, %v2321_v51 }
 0x121   :  { %25123 = vmatmul.mubr.f32.gmra.mrb[12].mxu1 %v384_v63  ;;  %25084 = vmatmul.mubr.f32.gmra.mrb[6].mxu0 %v30934_v0 }
 0x122   :  { %25125 = vmatprep.mubr.f32.mxu1 %v394_v1  ;;  %25088 = vmatprep.mubr.f32.mxu0 %v30830_v11 }
 0x125   :  { %25126 = vmatmul.mubr.f32.gmra.mrb[14].mxu1 %v404_v4  ;;  %25089 = vmatmul.mubr.f32.vlgmr.msra.gmra.mrb[0].mxu0 %v30832_v12 }
 0x126   :  { %25130 = vmatprep.mubr.f32.mxu1 %v30830_v11  ;;  %25091 = vmatprep.mubr.f32.mxu0 %v30841_v16 }
 0x127   :  { %25101 = vmatpush3.msra.mxu0 %v30828_v10  ;;  %v1799_v10 = vand.u32 4294901760, %v1790_v8 }
 0x128   :  { %27988 = vmatprep.subr.bf16.mxu0 %v30533_v7 }
 0x129   :  { %25131 = vmatmul.mubr.f32.vlgmr.msra.gmra.mrb[8].mxu1 %v30832_v12  ;;  %25092 = vmatmul.mubr.f32.gmra.mrb[2].mxu0 %v30855_v23  ;;  %v30989_v17 = vsub.f32 %v1790_v8, %v1799_v10  ;;  %v30992_v18 = vpack.c.bf16 %v1802_v13, %v1799_v10 }
 0x12a   :  { %25143 = vmatpush3.msra.mxu1 %v1179_v62  ;;  %25133 = vmatprep.mubr.f32.mxu1 %v30841_v16 }
 0x12b   :  { %25156 = vmatprep.subr.mxu1 %v30925_v60  ;;  %25094 = vmatprep.mubr.f32.mxu0 %v30861_v25 }
 0x12d   :  { %25134 = vmatmul.mubr.f32.gmra.mrb[10].mxu1 %v30855_v23  ;;  %25095 = vmatmul.mubr.f32.gmra.mrb[4].mxu0 %v30863_v26 }
 0x12e   :  { %25136 = vmatprep.mubr.f32.mxu1 %v30861_v25  ;;  %25097 = vmatprep.mubr.f32.mxu0 %v30886_v35 }
 0x131   :  { %25137 = vmatmul.mubr.f32.gmra.mrb[12].mxu1 %v30863_v26  ;;  %25098 = vmatmul.mubr.f32.gmra.mrb[6].mxu0 %v30921_v57 }
 0x132   :  { %25139 = vmatprep.mubr.f32.mxu1 %v30886_v35  ;;  %25102 = vmatprep.mubr.f32.mxu0 %v30830_v11 }
 0x135   :  { %25140 = vmatmul.mubr.f32.gmra.mrb[14].mxu1 %v30921_v57  ;;  %25103 = vmatmul.mubr.f32.vlgmr.msra.gmra.mrb[0].mxu0 %v30832_v12 }
 0x136   :  { %25144 = vmatprep.mubr.f32.mxu1 %v30848_v20  ;;  %v1880_v20 = vand.u32 4294901760, %v30989_v17  ;;  %25105 = vmatprep.mubr.f32.mxu0 %v30841_v16 }
 0x137   :  { %27990 = vmatpush3.bf16.msra.mxu0 %v30992_v18 }
 0x138   :  { %27991 = vmatprep.subr.bf16.mxu0 %v30533_v7 }
 0x139   :  { %25145 = vmatmul.mubr.f32.vlgmr.msra.gmra.mrb[8].mxu1 %v30852_v22  ;;  %v1887_v22 = vand.u32 4294901760, %v30994_v19  ;;  %25106 = vmatmul.mubr.f32.gmra.mrb[2].mxu0 %v30855_v23 }
 0x13a   :  { %25157 = vmatpush3.msra.mxu1 %v30925_v60  ;;  %25147 = vmatprep.mubr.f32.mxu1 %v30859_v24  ;;  %v1881_v24 = vsub.f32 %v30989_v17, %v1880_v20 }
 0x13b   :  { %25170 = vmatprep.subr.mxu1 %v30941_v3  ;;  %25108 = vmatprep.mubr.f32.mxu0 %v30861_v25  ;;  %v1888_v38 = vsub.f32 %v30994_v19, %v1887_v22 }
 0x13c   :  { %27993 = vmatpush3.bf16.msra.mxu0 %v31004_v29 }
 0x13d   :  { %25148 = vmatmul.mubr.f32.gmra.mrb[10].mxu1 %v30875_v31  ;;  %v1894_v31 = vand.u32 4294901760, %v31006_v36  ;;  %27994 = vmatprep.subr.bf16.mxu0 %v30533_v7  ;;  %v1889_v44 = vand.u32 4294901760, %v1888_v38 }
 0x13e   :  { %25150 = vmatprep.mubr.f32.mxu1 %v30881_v33  ;;  %25109 = vmatmul.mubr.f32.gmra.mrb[4].mxu0 %v30863_v26  ;;  %v1882_v33 = vand.u32 4294901760, %v1881_v24 }
 0x13f   :  { %25111 = vmatprep.mubr.f32.mxu0 %v30886_v35  ;;  %v1895_v45 = vsub.f32 %v31006_v36, %v1894_v31  ;;  %v31104_v53 = vpack.c.bf16 %v1901_v40, %v1894_v31 }
 0x141   :  { %25151 = vmatmul.mubr.f32.gmra.mrb[12].mxu1 %v30884_v34  ;;  %v30535_v34 = vmov 0.0   ;;  %v1896_v47 = vand.u32 4294901760, %v1895_v45 }
 0x142   :  { %25153 = vmatprep.mubr.f32.mxu1 %v30905_v43  ;;  %25112 = vmatmul.mubr.f32.gmra.mrb[6].mxu0 %v30921_v57  ;;  %v31041_v43 = vpack.c.bf16 %v1889_v44, %v1882_v33 }
 0x143   :  { %25206 = vmatprep.mubr.msk.f32.mxu0 %vm30534_vm2, %v30535_v34 }
 0x145   :  { %25154 = vmatmul.mubr.f32.gmra.mrb[14].mxu1 %v30929_v61 }
 0x146   :  { %25158 = vmatprep.mubr.f32.mxu1 %v30867_v28  ;;  %25207 = vmatmul.mubr.f32.vlgmr.msra.gmra.mrb[8].mxu0 %v30535_v34  ;;  %v31049_v28 = vpack.c.bf16 %v1903_v48, %v1896_v47 }
 0x147   :  { %27996 = vmatpush3.bf16.msra.mxu0 %v31041_v43  ;;  %25217 = vmatprep.mubr.msk.f32.mxu0 %vm30534_vm2, %v30535_v34 }
 0x148   :  { %27997 = vmatprep.subr.bf16.mxu0 %v30533_v7 }
 0x149   :  { %25159 = vmatmul.mubr.f32.vlgmr.msra.gmra.mrb[8].mxu1 %v30872_v30  ;;  %v31059_v30 = vpack.c.bf16 %v30994_v19, %v30989_v17 }
 0x14a   :  { %25171 = vmatpush3.msra.mxu1 %v30941_v3  ;;  %25161 = vmatprep.mubr.f32.mxu1 %v30878_v32  ;;  %v31068_v32 = vpack.c.bf16 %v31008_v37, %v31006_v36  ;;  %v23528_v37 = vld [vmem:[#allocation11] ss:$0 sm:$0xff] }
 0x14b   :  { %25184 = vmatprep.subr.mxu1 %v30925_v60  ;;  %27999 = vmatpush3.bf16.msra.mxu0 %v31049_v28 }
 0x14c   :  { %28000 = vmatprep.subr.bf16.mxu0 %v30533_v7 }
 0x14d   :  { %25162 = vmatmul.mubr.f32.gmra.mrb[10].mxu1 %v30894_v39  ;;  %v2319_v39 = vld [vmem:[#allocation14] sm:$0xff] }
 0x14e   :  { %25164 = vmatprep.mubr.f32.mxu1 %v30899_v41  ;;  %25218 = vmatmul.mubr.f32.vlgmr.msra.gmra.mrb[8].mxu0 %v30535_v34  ;;  %v2320_v41 = vld [vmem:[#allocation14 + $0x8] sm:$0xff]  ;;  %v2324_v49 = vand.u32 4294901760, %v2319_v39 }
 0x14f   :  { %28002 = vmatpush3.bf16.msra.mxu0 %v31059_v30  ;;  %25228 = vmatprep.mubr.msk.f32.mxu0 %vm30534_vm2, %v30535_v34  ;;  %v2327_v50 = vand.u32 4294901760, %v2320_v41 }
 0x150   :  { %28003 = vmatprep.subr.bf16.mxu0 %v30533_v7  ;;  %v31110_v54 = vsub.f32 %v2319_v39, %v2324_v49 }
 0x151   :  { %25165 = vmatmul.mubr.f32.gmra.mrb[12].mxu1 %v30902_v42  ;;  %v31093_v42 = vpack.c.bf16 %v1887_v22, %v1880_v20  ;;  %v31113_v55 = vpack.c.bf16 %v2327_v50, %v2324_v49  ;;  %v31115_v56 = vsub.f32 %v2320_v41, %v2327_v50 }
 0x152   :  { %25167 = vmatprep.mubr.f32.mxu1 %v30915_v52  ;;  %v2322_v52 = vld [vmem:[#allocation14 + $0x18] sm:$0xff] }
 0x153   :  { %28005 = vmatpush3.bf16.msra.mxu0 %v31068_v32  ;;  %v2333_v59 = vand.u32 4294901760, %v2322_v52  ;;  %v2412_v63 = vand.u32 4294901760, %v31115_v56 }
 0x154   :  { %28006 = vmatprep.subr.bf16.mxu0 %v30533_v7 }
 0x155   :  { %25168 = vmatmul.mubr.f32.gmra.mrb[14].mxu1 %v30934_v0  ;;  %v31123_v61 = vpack.c.bf16 %v2333_v59, %v2330_v58  ;;  %v31127_v62 = vsub.f32 %v2322_v52, %v2333_v59  ;;  %v2413_v1 = vsub.f32 %v31115_v56, %v2412_v63 }
 0x156   :  { %25172 = vmatprep.mubr.f32.mxu1 %v30830_v11  ;;  %25229 = vmatmul.mubr.f32.vlgmr.msra.gmra.mrb[8].mxu0 %v30535_v34 }
 0x157   :  { %28008 = vmatpush3.bf16.msra.mxu0 %v30992_v18  ;;  %25239 = vmatprep.mubr.msk.f32.mxu0 %vm30534_vm2, %v30535_v34  ;;  %v2414_v3 = vand.u32 4294901760, %v2413_v1 }
 0x158   :  { %28009 = vmatprep.subr.bf16.mxu0 %v30533_v7 }
 0x159   :  { %25173 = vmatmul.mubr.f32.vlgmr.msra.gmra.mrb[8].mxu1 %v30832_v12 }
 0x15a   :  { %25185 = vmatpush3.msra.mxu1 %v30925_v60  ;;  %25175 = vmatprep.mubr.f32.mxu1 %v30841_v16  ;;  %v2405_v60 = vand.u32 4294901760, %v31110_v54 }
 0x15b   :  { %28024 = vmatprep.subr.bf16.mxu1 %v30533_v7  ;;  %28011 = vmatpush3.bf16.msra.mxu0 %v31004_v29 }
 0x15c   :  { %28012 = vmatprep.subr.bf16.mxu0 %v30533_v7  ;;  %v2406_v0 = vsub.f32 %v31110_v54, %v2405_v60  ;;  %v31207_v10 = vpack.c.bf16 %v2412_v63, %v2405_v60  ;;  %v23529_v63 = vld [vmem:[%s34067_s8] ss:$0 sm:$0xff] }
 0x15d   :  { %25176 = vmatmul.mubr.f32.gmra.mrb[10].mxu1 %v30855_v23 }
 0x15e   :  { %25178 = vmatprep.mubr.f32.mxu1 %v30861_v25  ;;  %25240 = vmatmul.mubr.f32.vlgmr.msra.gmra.mrb[8].mxu0 %v30535_v34 }
 0x15f   :  { %28014 = vmatpush3.bf16.msra.mxu0 %v31093_v42  ;;  %25250 = vmatprep.mubr.msk.f32.mxu0 %vm30534_vm2, %v30535_v34 }
 0x160   :  { %28015 = vmatprep.subr.bf16.mxu0 %v30533_v7 }
 0x161   :  { %25179 = vmatmul.mubr.f32.gmra.mrb[12].mxu1 %v30863_v26 }
 0x162   :  { %25181 = vmatprep.mubr.f32.mxu1 %v30886_v35 }
 0x163   :  { %28017 = vmatpush3.bf16.msra.mxu0 %v31104_v53 }
 0x164   :  { %28018 = vmatprep.subr.bf16.mxu0 %v30533_v7 }
 0x165   :  { %25182 = vmatmul.mubr.f32.gmra.mrb[14].mxu1 %v30921_v57 }
 0x166   :  { %25186 = vmatprep.mubr.f32.mxu1 %v30830_v11  ;;  %v31125_v11 = vsub.f32 %v2321_v51, %v2330_v58  ;;  %25251 = vmatmul.mubr.f32.vlgmr.msra.gmra.mrb[8].mxu0 %v30535_v34 }
 0x167   :  { %28020 = vmatpush3.bf16.msra.mxu0 %v30992_v18  ;;  %25261 = vmatprep.mubr.msk.f32.mxu0 %vm30534_vm2, %v30535_v34 }
 0x168   :  { %28021 = vmatprep.subr.bf16.mxu0 %v30533_v7  ;;  %v2419_v2 = vand.u32 4294901760, %v31125_v11  ;;  %v31192_v9 = vpack.c.bf16 %v31127_v62, %v31125_v11 }
 0x169   :  { %25187 = vmatmul.mubr.f32.vlgmr.msra.gmra.mrb[8].mxu1 %v30832_v12  ;;  %v31135_v12 = vld [vmem:[#allocation15] ss:$0 sm:$0xff] }
 0x16a   :  { %28026 = vmatpush3.bf16.msra.mxu1 %v31113_v55  ;;  %25189 = vmatprep.mubr.f32.mxu1 %v30841_v16  ;;  %v31142_v16 = vld [vmem:[%s34107_s20] ss:$0 sm:$0xff]  ;;  %v2420_v4 = vsub.f32 %v31125_v11, %v2419_v2 }
 0x16b   :  { %28027 = vmatprep.subr.bf16.mxu1 %v30533_v7  ;;  %2821 = vrot.lane.b32.xlu0 %v31135_v12, %s30536_s23 }
 0x16c   :  { %28023 = vmatpush3.bf16.msra.mxu0 %v31004_v29  ;;  %2296 = vrot.lane.b32.xlu1 %v31142_v16, %s30536_s23 }
 0x16d   :  { %25190 = vmatmul.mubr.f32.gmra.mrb[10].mxu1 %v30855_v23  ;;  %v2426_v23 = vand.u32 4294901760, %v31127_v62  ;;  %28060 = vmatprep.subr.bf16.mxu0 %v30533_v7 }
 0x16e   :  { %25192 = vmatprep.mubr.f32.mxu1 %v30861_v25  ;;  %28029 = vmatpush3.bf16.msra.mxu1 %v31123_v61  ;;  %v2407_v25 = vand.u32 4294901760, %v2406_v0 }
 0x16f   :  { %28030 = vmatprep.subr.bf16.mxu1 %v30533_v7  ;;  %v2427_v5 = vsub.f32 %v31127_v62, %v2426_v23  ;;  %25262 = vmatmul.mubr.f32.vlgmr.msra.gmra.mrb[8].mxu0 %v30535_v34  ;;  %v31212_v13 = vpack.c.bf16 %v2426_v23, %v2419_v2 }
 0x170   :  { %28062 = vmatpush3.bf16.msra.mxu0 %v30992_v18  ;;  %25338 = vmatprep.mubr.msk.f32.mxu0 %vm30534_vm2, %v30535_v34 }
 0x171   :  { %25193 = vmatmul.mubr.f32.gmra.mrb[12].mxu1 %v30863_v26  ;;  %28063 = vmatprep.subr.bf16.mxu0 %v30533_v7  ;;  %v31171_v26 = vpack.c.bf16 %v2414_v3, %v2407_v25  ;;  %v2428_v6 = vand.u32 4294901760, %v2427_v5 }
 0x172   :  { %25195 = vmatprep.mubr.f32.mxu1 %v30886_v35  ;;  %v2421_v35 = vand.u32 4294901760, %v2420_v4 }
 0x174   :  { %28065 = vmatpush3.bf16.msra.mxu0 %v31004_v29  ;;  %v31177_v8 = vpack.c.bf16 %v2428_v6, %v2421_v35 }
 0x175   :  { %25196 = vmatmul.mubr.f32.gmra.mrb[14].mxu1 %v30921_v57  ;;  %28066 = vmatprep.subr.bf16.mxu0 %v30533_v7  ;;  %v31185_v57 = vpack.c.bf16 %v31115_v56, %v31110_v54 }
 0x176   :  { %25272 = vmatprep.mubr.msk.f32.mxu1 %vm30534_vm2, %v30535_v34 }
 0x179   :  { %25273 = vmatmul.mubr.f32.vlgmr.msra.gmra.mrb[16].mxu1 %v30535_v34 }
 0x17a   :  { %28032 = vmatpush3.bf16.msra.mxu1 %v31171_v26  ;;  %25283 = vmatprep.mubr.msk.f32.mxu1 %vm30534_vm2, %v30535_v34 }
 0x17b   :  { %28033 = vmatprep.subr.bf16.mxu1 %v30533_v7 }
 0x17e   :  { %28035 = vmatpush3.bf16.msra.mxu1 %v31177_v8 }
 0x17f   :  { %28036 = vmatprep.subr.bf16.mxu1 %v30533_v7 }
 0x181   :  { %25284 = vmatmul.mubr.f32.vlgmr.msra.gmra.mrb[16].mxu1 %v30535_v34 }
 0x182   :  { %28038 = vmatpush3.bf16.msra.mxu1 %v31185_v57  ;;  %25294 = vmatprep.mubr.msk.f32.mxu1 %vm30534_vm2, %v30535_v34 }
 0x183   :  { %28039 = vmatprep.subr.bf16.mxu1 %v30533_v7 }
 0x186   :  { %28041 = vmatpush3.bf16.msra.mxu1 %v31192_v9 }
 0x187   :  { %28042 = vmatprep.subr.bf16.mxu1 %v30533_v7 }
 0x189   :  { %25295 = vmatmul.mubr.f32.vlgmr.msra.gmra.mrb[16].mxu1 %v30535_v34 }
 0x18a   :  { %28044 = vmatpush3.bf16.msra.mxu1 %v31113_v55  ;;  %25305 = vmatprep.mubr.msk.f32.mxu1 %vm30534_vm2, %v30535_v34 }
 0x18b   :  { %28045 = vmatprep.subr.bf16.mxu1 %v30533_v7 }
 0x18e   :  { %28047 = vmatpush3.bf16.msra.mxu1 %v31123_v61 }
 0x18f   :  { %28048 = vmatprep.subr.bf16.mxu1 %v30533_v7 }
 0x191   :  { %25306 = vmatmul.mubr.f32.vlgmr.msra.gmra.mrb[16].mxu1 %v30535_v34 }
 0x192   :  { %28050 = vmatpush3.bf16.msra.mxu1 %v31207_v10  ;;  %25316 = vmatprep.mubr.msk.f32.mxu1 %vm30534_vm2, %v30535_v34 }
 0x193   :  { %28051 = vmatprep.subr.bf16.mxu1 %v30533_v7 }
 0x196   :  { %28053 = vmatpush3.bf16.msra.mxu1 %v31212_v13 }
 0x197   :  { %28054 = vmatprep.subr.bf16.mxu1 %v30533_v7 }
 0x199   :  { %25317 = vmatmul.mubr.f32.vlgmr.msra.gmra.mrb[16].mxu1 %v30535_v34 }
 0x19a   :  { %28056 = vmatpush3.bf16.msra.mxu1 %v31113_v55  ;;  %25327 = vmatprep.mubr.msk.f32.mxu1 %vm30534_vm2, %v30535_v34 }
 0x19b   :  { %28057 = vmatprep.subr.bf16.mxu1 %v30533_v7 }
 0x19e   :  { %28059 = vmatpush3.bf16.msra.mxu1 %v31123_v61 }
 0x19f   :  { %28096 = vmatprep.subr.bf16.mxu1 %v30533_v7 }
 0x1a1   :  { %25328 = vmatmul.mubr.f32.vlgmr.msra.gmra.mrb[16].mxu1 %v30535_v34 }
 0x1a2   :  { %28098 = vmatpush3.bf16.msra.mxu1 %v31113_v55  ;;  %25404 = vmatprep.mubr.msk.f32.mxu1 %vm30534_vm2, %v30535_v34 }
 0x1a3   :  { %28099 = vmatprep.subr.bf16.mxu1 %v30533_v7 }
 0x1a6   :  { %28101 = vmatpush3.bf16.msra.mxu1 %v31123_v61 }
 0x1a7   :  { %28102 = vmatprep.subr.bf16.mxu1 %v30533_v7 }
 0x1d4   :  { %v25034_v14 = vpop.f32.mrb[0].mxu1 }
 0x1d5   :  { %v336_v15 = vpop.f32.mrb[1].mxu1  ;;  %v347_v22 = vadd.f32 %v25034_v14, %v23528_v37 }
 0x1d6   :  { %v337_v24 = vadd.f32 %v23528_v37, %v336_v15 }
 0x1d8   :  { %v25037_v17 = vpop.f32.mrb[2].mxu1 }
 0x1d9   :  { %v356_v19 = vpop.f32.mrb[3].mxu1  ;;  %v367_v44 = vadd.f32 %v25037_v17, %v23528_v37 }
 0x1da   :  { %v357_v45 = vadd.f32 %v23528_v37, %v356_v19 }
 0x1e4   :  { %v25054_v21 = vpop.f32.mrb[4].mxu1 }
 0x1e5   :  { %v506_v27 = vpop.f32.mrb[5].mxu1  ;;  %v29450_v41 = vadd.f32 %v25054_v21, %v23528_v37 }
 0x1e6   :  { %v29452_v49 = vadd.f32 %v23528_v37, %v506_v27 }
 0x1e8   :  { %v25057_v20 = vpop.f32.mrb[6].mxu1 }
 0x1e9   :  { %v518_v36 = vpop.f32.mrb[7].mxu1  ;;  %v29454_v56 = vadd.f32 %v25057_v20, %v23528_v37 }
 0x1ea   :  { %v29456_v58 = vadd.f32 %v23528_v37, %v518_v36  ;;  %v30537_v37 = vmov 0  }
 0x1eb   :  { %30069 = vset.pattern.permute.xlu1 %v30537_v37  ;;  %30070 = vset.pattern.permute.xlu0 %v30537_v37 }
 0x208   :  { %v25104_v38 = vpop.f32.mrb[0].mxu0 }
 0x209   :  { %v29443_v31 = vadd.f32 %v25104_v38, %v347_v22  ;;  %v965_v40 = vpop.f32.mrb[1].mxu0  ;;  %v2822_v22 = vpop.permute.xlu0 %2821 }
 0x20a   :  { %v29445_v33 = vadd.f32 %v965_v40, %v337_v24  ;;  %v2297_v38 = vpop.permute.xlu1 %2296 }
 0x20b   :  { %1013 = vst.msk [vmem:[#allocation2 + $0x8] sm:$0xff] %vm1011_vm3, %v29443_v31 }
 0x20c   :  { %1012 = vst.msk [vmem:[#allocation2] sm:$0xff] %vm1011_vm3, %v29445_v33  ;;  %v25107_v46 = vpop.f32.mrb[2].mxu0 }
 0x20d   :  { %v29447_v47 = vadd.f32 %v25107_v46, %v367_v44  ;;  %v977_v48 = vpop.f32.mrb[3].mxu0 }
 0x20e   :  { %v29449_v39 = vadd.f32 %v977_v48, %v357_v45 }
 0x20f   :  { %1015 = vst.msk [vmem:[#allocation2 + $0x18] sm:$0xff] %vm1011_vm3, %v29447_v47 }
 0x210   :  { %1014 = vst.msk [vmem:[#allocation2 + $0x10] sm:$0xff] %vm1011_vm3, %v29449_v39 }
 0x211   :  { %v25110_v50 = vpop.f32.mrb[4].mxu0 }
 0x212   :  { %v29451_v51 = vadd.f32 %v29450_v41, %v25110_v50  ;;  %v989_v52 = vpop.f32.mrb[5].mxu0 }
 0x213   :  { %v29453_v54 = vadd.f32 %v29452_v49, %v989_v52  ;;  %v1788_v47 = vld [vmem:[#allocation2] sm:$0xff] }
 0x214   :  { %1017 = vst.msk [vmem:[#allocation2 + $0x28] sm:$0xff] %vm1011_vm3, %v29451_v51 }
 0x215   :  { %1016 = vst.msk [vmem:[#allocation2 + $0x20] sm:$0xff] %vm1011_vm3, %v29453_v54  ;;  %v25113_v59 = vpop.f32.mrb[6].mxu0 }
 0x216   :  { %v29455_v60 = vadd.f32 %v29454_v56, %v25113_v59  ;;  %v1001_v11 = vpop.f32.mrb[7].mxu0 }
 0x217   :  { %v29457_v62 = vadd.f32 %v29456_v58, %v1001_v11  ;;  %v213_v58 = vld [vmem:[%s34108_s9] sm:$0xff] }
 0x218   :  { %1019 = vst.msk [vmem:[#allocation2 + $0x38] sm:$0xff] %vm1011_vm3, %v29455_v60 }
 0x219   :  { %1018 = vst.msk [vmem:[#allocation2 + $0x30] sm:$0xff] %vm1011_vm3, %v29457_v62 }
 0x23c   :  { %v25188_v0 = vpop.f32.mrb[8].mxu1 }
 0x23d   :  { %v29458_v1 = vadd.f32 %v25188_v0, %v23529_v63  ;;  %v1732_v2 = vpop.f32.mrb[9].mxu1 }
 0x23e   :  { %v29459_v23 = vadd.f32 %v23529_v63, %v1732_v2 }
 0x23f   :  { %1779 = vst.msk [vmem:[#allocation3 + $0x8] sm:$0xff] %vm1011_vm3, %v29458_v1 }
 0x240   :  { %1778 = vst.msk [vmem:[#allocation3] sm:$0xff] %vm1011_vm3, %v29459_v23  ;;  %v25191_v25 = vpop.f32.mrb[10].mxu1 }
 0x241   :  { %v29460_v3 = vadd.f32 %v25191_v25, %v23529_v63  ;;  %v1744_v4 = vpop.f32.mrb[11].mxu1 }
 0x242   :  { %v29461_v5 = vadd.f32 %v23529_v63, %v1744_v4  ;;  %v2279_v17 = vpop.f32.mrb[8].mxu0 }
 0x243   :  { %1781 = vst.msk [vmem:[#allocation3 + $0x18] sm:$0xff] %vm1011_vm3, %v29460_v3  ;;  %v25263_v19 = vpop.f32.mrb[9].mxu0  ;;  %v2299_v33 = vadd.f32 %v2297_v38, %v2279_v17  ;;  %v2283_v48 = vadd.f32 %v2279_v17, %v1788_v47 }
 0x244   :  { %1780 = vst.msk [vmem:[#allocation3 + $0x10] sm:$0xff] %vm1011_vm3, %v29461_v5  ;;  %v25194_v35 = vpop.f32.mrb[12].mxu1 }
 0x245   :  { %v29462_v6 = vadd.f32 %v25194_v35, %v23529_v63  ;;  %v1756_v14 = vpop.f32.mrb[13].mxu1  ;;  %v23530_v39 = vmul.f32 -1.442695, %v2283_v48 }
 0x246   :  { %v29463_v15 = vadd.f32 %v23529_v63, %v1756_v14 }
 0x247   :  { %1783 = vst.msk [vmem:[#allocation3 + $0x28] sm:$0xff] %vm1011_vm3, %v29462_v6 }
 0x248   :  { %1782 = vst.msk [vmem:[#allocation3 + $0x20] sm:$0xff] %vm1011_vm3, %v29463_v15  ;;  %v25197_v21 = vpop.f32.mrb[14].mxu1 }
 0x249   :  { %v29464_v27 = vadd.f32 %v25197_v21, %v23529_v63  ;;  %v1768_v20 = vpop.f32.mrb[15].mxu1 }
 0x24a   :  { %v29465_v36 = vadd.f32 %v23529_v63, %v1768_v20 }
 0x24b   :  { %1785 = vst.msk [vmem:[#allocation3 + $0x38] sm:$0xff] %vm1011_vm3, %v29464_v27 }
 0x24c   :  { %1784 = vst.msk [vmem:[#allocation3 + $0x30] sm:$0xff] %vm1011_vm3, %v29465_v36 }
 0x252   :  { %v1789_v44 = vld [vmem:[#allocation3 + $0x38] sm:$0xff] }
 0x274   :  { %v2804_v24 = vpop.f32.mrb[16].mxu1 }
 0x275   :  { %v2824_v31 = vadd.f32 %v2822_v22, %v2804_v24  ;;  %v25329_v40 = vpop.f32.mrb[17].mxu1  ;;  %v2808_v45 = vadd.f32 %v2804_v24, %v1789_v44 }
 0x277   :  { %2826 = vrot.lane.b32.xlu0 %v2824_v31, %s30536_s23  ;;  %v23532_v46 = vmul.f32 -1.442695, %v2808_v45 }
 0x279   :  { %30071 = vpow2.f32 %v23532_v46 }
 0x27a   :  { %30073 = vpow2.f32 %v23530_v39 }
 0x27b   :  { %2301 = vrot.lane.b32.xlu0 %v2299_v33, %s30536_s23 }
 0x283   :  { %v30072_v41 = vpop.eup %30071 }
 0x284   :  { %v2812_v49 = vadd.f32 1.0, %v30072_v41  ;;  %v30074_v50 = vpop.eup %30073 }
 0x285   :  { %v2287_v51 = vadd.f32 1.0, %v30074_v50 }
 0x286   :  { %30075 = vrcp.f32 %v2812_v49  ;;  %v2859_v49 = vld [vmem:[#allocation3 + $0x30] sm:$0xff] }
 0x287   :  { %30077 = vrcp.f32 %v2287_v51 }
 0x290   :  { %v30076_v52 = vpop.eup %30075 }
 0x291   :  { %v30078_v60 = vpop.eup %30077  ;;  %v2836_v3 = vsub.f32 1.0, %v30076_v52  ;;  %v2842_v35 = vmul.f32 0.0, %v30076_v52 }
 0x292   :  { %v2311_v15 = vsub.f32 1.0, %v30078_v60  ;;  %v2317_v21 = vmul.f32 0.0, %v30078_v60 }
 0x2e9   :  { %v2827_v54 = vpop.permute.xlu0 %2826 }
 0x2ea   :  { %v2829_v56 = vmul.f32 %v30076_v52, %v2827_v54  ;;  %v2858_v52 = vld [vmem:[#allocation2 + $0x8] sm:$0xff] }
 0x2ec   :  { %2831 = vrot.lane.b32.xlu1 %v2829_v56, %s30536_s23 }
 0x2ed   :  { %v2302_v59 = vpop.permute.xlu0 %2301 }
 0x2ee   :  { %v2304_v11 = vmul.f32 %v30078_v60, %v2302_v59 }
 0x2f0   :  { %216 = vperm.xlu1 %30069, %v213_v58  }
 0x2f4   :  { %2306 = vrot.lane.b32.xlu1 %v2304_v11, %s30536_s23 }
 0x35e   :  { %v2832_v62 = vpop.permute.xlu1 %2831 }
 0x35f   :  { %v2834_v63 = vadd.f32 %v2832_v62, %v1789_v44 }
 0x361   :  { %30079 = vtanh.f32 %v2834_v63 }
 0x36b   :  { %v30080_v0 = vpop.eup %30079 }
 0x36c   :  { %2838 = vrot.lane.b32.xlu0 %v30080_v0, %s30538_s12 }
 0x36f   :  { %v31260_v1 = vpop.permute.xlu1 %216 }
 0x370   :  { %vm1787_vm4 = vcmp.gt.f32.partialorder %v31260_v1, 7.0  ;;  %vm1786_vm5 = vcmp.gt.f32.partialorder %v31260_v1, 0.0  ;;  %vm2857_vm7 = vcmp.gt.f32.partialorder %v31260_v1, 6.0  ;;  %vm2856_vm8 = vcmp.gt.f32.partialorder %v31260_v1, 1.0 }
 0x371   :  { %vm3929_vm9 = vcmp.gt.f32.partialorder %v31260_v1, 5.0  ;;  %vm3928_vm10 = vcmp.gt.f32.partialorder %v31260_v1, 2.0  ;;  %vm5007_vm11 = vcmp.gt.f32.partialorder %v31260_v1, 4.0  ;;  %vm5006_vm12 = vcmp.gt.f32.partialorder %v31260_v1, 3.0 }
 0x373   :  { %v2307_v2 = vpop.permute.xlu1 %2306 }
 0x374   :  { %v2309_v23 = vadd.f32 %v2307_v2, %v1788_v47 }
 0x376   :  { %30081 = vtanh.f32 %v2309_v23 }
 0x380   :  { %v30082_v25 = vpop.eup %30081 }
 0x381   :  { %2313 = vrot.lane.b32.xlu1 %v30082_v25, %s30538_s12 }
 0x385   :  { %3891 = vrot.lane.b32.xlu1 %v31135_v12, %s30536_s23 }
 0x389   :  { %3364 = vrot.lane.b32.xlu1 %v31142_v16, %s30536_s23 }
 0x3de   :  { %v2839_v4 = vpop.permute.xlu0 %2838 }
 0x3df   :  { %v2841_v5 = vmul.f32 %v2839_v4, %v2836_v3 }
 0x3e1   :  { %v2843_v6 = vadd.f32 %v2842_v35, %v2841_v5 }
 0x3e3   :  { %v31270_v14 = vsel %vm1787_vm4, %v2843_v6, 0.0 }
 0x3e4   :  { %2852 = vrot.lane.b32.xlu0 %v31270_v14, %s30538_s12 }
 0x3f3   :  { %v2314_v17 = vpop.permute.xlu1 %2313 }
 0x3f4   :  { %v2316_v19 = vmul.f32 %v2314_v17, %v2311_v15 }
 0x3f6   :  { %v2318_v27 = vadd.f32 %v2317_v21, %v2316_v19 }
 0x3f8   :  { %v31277_v20 = vsel %vm1786_vm5, %v2318_v27, 0.0 }
 0x3f9   :  { %2847 = vrot.lane.b32.xlu0 %v31277_v20, %s30538_s12 }
 0x456   :  { %v2853_v36 = vpop.permute.xlu0 %2852 }
 0x457   :  { %2855 = vst.msk [vmem:[#allocation5 + $0x38] sm:$0xff] %vm1794_vm6, %v2853_v36  ;;  %v3391_v37 = vsel %vm1794_vm6, %v2853_v36, 0 }
 0x458   :  { %v3462_v22 = vand.u32 4294901760, %v3391_v37 }
 0x45a   :  { %v3463_v24 = vsub.f32 %v3391_v37, %v3462_v22 }
 0x45c   :  { %v3464_v38 = vand.u32 4294901760, %v3463_v24 }
 0x45e   :  { %v3465_v31 = vsub.f32 %v3463_v24, %v3464_v38 }
 0x460   :  { %v3466_v40 = vand.u32 4294901760, %v3465_v31 }
 0x462   :  { %25405 = vmatmul.mubr.f32.vlgmr.msra.gmra.mrb[18].mxu1 %v3466_v40  ;;  %v3934_v40 = vld [vmem:[#allocation9 + $0x10] sm:$0xff] }
 0x463   :  { %28104 = vmatpush3.bf16.msra.mxu1 %v31171_v26  ;;  %25415 = vmatprep.mubr.msk.f32.mxu1 %vm30534_vm2, %v30535_v34 }
 0x464   :  { %28105 = vmatprep.subr.bf16.mxu1 %v30533_v7 }
 0x467   :  { %28107 = vmatpush3.bf16.msra.mxu1 %v31177_v8 }
 0x468   :  { %28108 = vmatprep.subr.bf16.mxu1 %v30533_v7 }
 0x46a   :  { %25416 = vmatmul.mubr.f32.vlgmr.msra.gmra.mrb[18].mxu1 %v3462_v22 }
 0x46b   :  { %28110 = vmatpush3.bf16.msra.mxu1 %v31185_v57  ;;  %v2848_v33 = vpop.permute.xlu0 %2847  ;;  %25426 = vmatprep.mubr.msk.f32.mxu1 %vm30534_vm2, %v30535_v34 }
 0x46c   :  { %2850 = vst.msk [vmem:[#allocation4] sm:$0xff] %vm1794_vm6, %v2848_v33  ;;  %v2864_v44 = vsel %vm1794_vm6, %v2848_v33, 0  ;;  %28111 = vmatprep.subr.bf16.mxu1 %v30533_v7  ;;  %v3935_v33 = vld [vmem:[#allocation9 + $0x18] sm:$0xff] }
 0x46d   :  { %v2935_v45 = vand.u32 4294901760, %v2864_v44 }
 0x46f   :  { %v2936_v46 = vsub.f32 %v2864_v44, %v2935_v45  ;;  %28113 = vmatpush3.bf16.msra.mxu1 %v31192_v9  ;;  %v3948_v44 = vand.u32 4294901760, %v3934_v40 }
 0x470   :  { %28114 = vmatprep.subr.bf16.mxu1 %v30533_v7 }
 0x471   :  { %v2937_v47 = vand.u32 4294901760, %v2936_v46 }
 0x472   :  { %25427 = vmatmul.mubr.f32.vlgmr.msra.gmra.mrb[18].mxu1 %v3463_v24 }
 0x473   :  { %28116 = vmatpush3.bf16.msra.mxu1 %v31113_v55  ;;  %v2938_v48 = vsub.f32 %v2936_v46, %v2937_v47  ;;  %25437 = vmatprep.mubr.msk.f32.mxu1 %vm30534_vm2, %v30535_v34 }
 0x474   :  { %28117 = vmatprep.subr.bf16.mxu1 %v30533_v7 }
 0x475   :  { %v2939_v39 = vand.u32 4294901760, %v2938_v48 }
 0x477   :  { %28119 = vmatpush3.bf16.msra.mxu1 %v31123_v61  ;;  %25339 = vmatmul.mubr.f32.vlgmr.msra.gmra.mrb[10].mxu0 %v2939_v39 }
 0x478   :  { %28068 = vmatpush3.bf16.msra.mxu0 %v31041_v43  ;;  %28120 = vmatprep.subr.bf16.mxu1 %v30533_v7  ;;  %v3892_v43 = vpop.permute.xlu1 %3891 }
 0x479   :  { %28069 = vmatprep.subr.bf16.mxu0 %v30533_v7  ;;  %25349 = vmatprep.mubr.msk.f32.mxu0 %vm30534_vm2, %v30535_v34 }
 0x47a   :  { %25438 = vmatmul.mubr.f32.vlgmr.msra.gmra.mrb[18].mxu1 %v3464_v38 }
 0x47b   :  { %28122 = vmatpush3.bf16.msra.mxu1 %v31207_v10  ;;  %25448 = vmatprep.mubr.msk.f32.mxu1 %vm30534_vm2, %v30535_v34 }
 0x47c   :  { %28071 = vmatpush3.bf16.msra.mxu0 %v31049_v28  ;;  %28123 = vmatprep.subr.bf16.mxu1 %v30533_v7 }
 0x47d   :  { %28072 = vmatprep.subr.bf16.mxu0 %v30533_v7 }
 0x47f   :  { %28125 = vmatpush3.bf16.msra.mxu1 %v31212_v13  ;;  %25350 = vmatmul.mubr.f32.vlgmr.msra.gmra.mrb[10].mxu0 %v2935_v45 }
 0x480   :  { %28074 = vmatpush3.bf16.msra.mxu0 %v31059_v30  ;;  %28126 = vmatprep.subr.bf16.mxu1 %v30533_v7 }
 0x481   :  { %28075 = vmatprep.subr.bf16.mxu0 %v30533_v7  ;;  %25360 = vmatprep.mubr.msk.f32.mxu0 %vm30534_vm2, %v30535_v34 }
 0x482   :  { %25449 = vmatmul.mubr.f32.vlgmr.msra.gmra.mrb[18].mxu1 %v3462_v22 }
 0x483   :  { %28128 = vmatpush3.bf16.msra.mxu1 %v31113_v55  ;;  %25459 = vmatprep.mubr.msk.f32.mxu1 %vm30534_vm2, %v30535_v34 }
 0x484   :  { %28077 = vmatpush3.bf16.msra.mxu0 %v31068_v32  ;;  %28129 = vmatprep.subr.bf16.mxu1 %v30533_v7 }
 0x485   :  { %28078 = vmatprep.subr.bf16.mxu0 %v30533_v7 }
 0x487   :  { %28131 = vmatpush3.bf16.msra.mxu1 %v31123_v61  ;;  %25361 = vmatmul.mubr.f32.vlgmr.msra.gmra.mrb[10].mxu0 %v2936_v46 }
 0x488   :  { %28080 = vmatpush3.bf16.msra.mxu0 %v30992_v18  ;;  %25371 = vmatprep.mubr.msk.f32.mxu0 %vm30534_vm2, %v30535_v34 }
 0x489   :  { %28081 = vmatprep.subr.bf16.mxu0 %v30533_v7  ;;  %28168 = vmatprep.subr.bf16.mxu1 %v30533_v7 }
 0x48a   :  { %25460 = vmatmul.mubr.f32.vlgmr.msra.gmra.mrb[18].mxu1 %v3462_v22 }
 0x48b   :  { %28170 = vmatpush3.bf16.msra.mxu1 %v31113_v55  ;;  %25536 = vmatprep.mubr.msk.f32.mxu1 %vm30534_vm2, %v30535_v34 }
 0x48c   :  { %28083 = vmatpush3.bf16.msra.mxu0 %v31004_v29  ;;  %28171 = vmatprep.subr.bf16.mxu1 %v30533_v7 }
 0x48d   :  { %28084 = vmatprep.subr.bf16.mxu0 %v30533_v7 }
 0x48f   :  { %25372 = vmatmul.mubr.f32.vlgmr.msra.gmra.mrb[10].mxu0 %v2937_v47  ;;  %28173 = vmatpush3.bf16.msra.mxu1 %v31123_v61 }
 0x490   :  { %28086 = vmatpush3.bf16.msra.mxu0 %v31093_v42  ;;  %25382 = vmatprep.mubr.msk.f32.mxu0 %vm30534_vm2, %v30535_v34 }
 0x491   :  { %28087 = vmatprep.subr.bf16.mxu0 %v30533_v7  ;;  %28174 = vmatprep.subr.bf16.mxu1 %v30533_v7 }
 0x494   :  { %28089 = vmatpush3.bf16.msra.mxu0 %v31104_v53 }
 0x495   :  { %28090 = vmatprep.subr.bf16.mxu0 %v30533_v7 }
 0x497   :  { %25383 = vmatmul.mubr.f32.vlgmr.msra.gmra.mrb[10].mxu0 %v2935_v45 }
 0x498   :  { %28092 = vmatpush3.bf16.msra.mxu0 %v30992_v18  ;;  %25393 = vmatprep.mubr.msk.f32.mxu0 %vm30534_vm2, %v30535_v34  ;;  %v3365_v18 = vpop.permute.xlu1 %3364 }
 0x499   :  { %28093 = vmatprep.subr.bf16.mxu0 %v30533_v7 }
 0x49c   :  { %28095 = vmatpush3.bf16.msra.mxu0 %v31004_v29 }
 0x49d   :  { %28132 = vmatprep.subr.bf16.mxu0 %v30533_v7 }
 0x49f   :  { %25394 = vmatmul.mubr.f32.vlgmr.msra.gmra.mrb[10].mxu0 %v2935_v45  ;;  %v3951_v45 = vand.u32 4294901760, %v3935_v33 }
 0x4a0   :  { %25470 = vmatprep.mubr.msk.f32.mxu0 %vm30534_vm2, %v30535_v34 }
 0x4a1   :  { %v31379_v39 = vpack.c.bf16 %v3951_v45, %v3948_v44 }
 0x55d   :  { %v3874_v28 = vpop.f32.mrb[18].mxu1 }
 0x55e   :  { %v3894_v30 = vadd.f32 %v3892_v43, %v3874_v28  ;;  %v25461_v32 = vpop.f32.mrb[19].mxu1  ;;  %v3878_v29 = vadd.f32 %v3874_v28, %v2859_v49  ;;  %v4036_v43 = vsub.f32 %v3934_v40, %v3948_v44  ;;  %v4043_v28 = vsub.f32 %v3935_v33, %v3951_v45 }
 0x560   :  { %3896 = vrot.lane.b32.xlu0 %v3894_v30, %s30536_s23  ;;  %v23536_v50 = vmul.f32 -1.442695, %v3878_v29 }
 0x562   :  { %30083 = vpow2.f32 %v23536_v50 }
 0x56c   :  { %v30084_v51 = vpop.eup %30083 }
 0x56d   :  { %v3882_v54 = vadd.f32 1.0, %v30084_v51 }
 0x56f   :  { %30085 = vrcp.f32 %v3882_v54 }
 0x572   :  { %v3347_v42 = vpop.f32.mrb[10].mxu0 }
 0x573   :  { %v3367_v53 = vadd.f32 %v3365_v18, %v3347_v42  ;;  %v25395_v41 = vpop.f32.mrb[11].mxu0  ;;  %v3351_v56 = vadd.f32 %v3347_v42, %v2858_v52 }
 0x574   :  { %v4037_v41 = vand.u32 4294901760, %v4036_v43 }
 0x575   :  { %3369 = vrot.lane.b32.xlu1 %v3367_v53, %s30536_s23  ;;  %v23534_v58 = vmul.f32 -1.442695, %v3351_v56 }
 0x576   :  { %v4038_v51 = vsub.f32 %v4036_v43, %v4037_v41 }
 0x577   :  { %30087 = vpow2.f32 %v23534_v58 }
 0x578   :  { %v4039_v58 = vand.u32 4294901760, %v4038_v51  ;;  %v5541_v51 = vld [vmem:[#allocation14 + $0x8] sm:$0xff] }
 0x579   :  { %v30086_v59 = vpop.eup %30085 }
 0x57a   :  { %v3906_v15 = vsub.f32 1.0, %v30086_v59  ;;  %v3912_v19 = vmul.f32 %v30086_v59, %v31270_v14 }
 0x581   :  { %v30088_v62 = vpop.eup %30087 }
 0x582   :  { %v3355_v63 = vadd.f32 1.0, %v30088_v62  ;;  %v31401_v62 = vpack.c.bf16 %v4043_v28, %v4036_v43 }
 0x584   :  { %30089 = vrcp.f32 %v3355_v63 }
 0x58e   :  { %v30090_v0 = vpop.eup %30089 }
 0x58f   :  { %v3379_v47 = vsub.f32 1.0, %v30090_v0  ;;  %v3385_v32 = vmul.f32 %v30090_v0, %v31277_v20 }
 0x5d2   :  { %v3897_v60 = vpop.permute.xlu0 %3896 }
 0x5d3   :  { %v3899_v11 = vmul.f32 %v30086_v59, %v3897_v60 }
 0x5d5   :  { %3901 = vrot.lane.b32.xlu0 %v3899_v11, %s30536_s23 }
 0x5e7   :  { %v3370_v2 = vpop.permute.xlu1 %3369 }
 0x5e8   :  { %v3372_v23 = vmul.f32 %v30090_v0, %v3370_v2 }
 0x5ea   :  { %3374 = vrot.lane.b32.xlu1 %v3372_v23, %s30536_s23 }
 0x647   :  { %v3902_v25 = vpop.permute.xlu0 %3901 }
 0x648   :  { %v3904_v3 = vadd.f32 %v3902_v25, %v2859_v49  ;;  %v4044_v49 = vand.u32 4294901760, %v4043_v28 }
 0x64a   :  { %30091 = vtanh.f32 %v3904_v3  ;;  %v31405_v0 = vpack.c.bf16 %v4044_v49, %v4037_v41 }
 0x654   :  { %v30092_v4 = vpop.eup %30091 }
 0x655   :  { %3908 = vrot.lane.b32.xlu0 %v30092_v4, %s30538_s12 }
 0x65c   :  { %v3375_v5 = vpop.permute.xlu1 %3374 }
 0x65d   :  { %v3377_v35 = vadd.f32 %v3375_v5, %v2858_v52  ;;  %v4045_v52 = vsub.f32 %v4043_v28, %v4044_v49 }
 0x65f   :  { %30093 = vtanh.f32 %v3377_v35  ;;  %v4046_v59 = vand.u32 4294901760, %v4045_v52 }
 0x661   :  { %v31397_v60 = vpack.c.bf16 %v4046_v59, %v4039_v58  ;;  %v5553_v58 = vand.u32 4294901760, %v5541_v51 }
 0x669   :  { %v30094_v6 = vpop.eup %30093 }
 0x66a   :  { %3381 = vrot.lane.b32.xlu1 %v30094_v6, %s30538_s12 }
 0x66e   :  { %4969 = vrot.lane.b32.xlu1 %v31135_v12, %s30536_s23  ;;  %v3932_v12 = vld [vmem:[#allocation9] sm:$0xff] }
 0x66f   :  { %v3942_v37 = vand.u32 4294901760, %v3932_v12 }
 0x671   :  { %v4022_v38 = vsub.f32 %v3932_v12, %v3942_v37 }
 0x672   :  { %4439 = vrot.lane.b32.xlu1 %v31142_v16, %s30536_s23  ;;  %v3933_v16 = vld [vmem:[#allocation9 + $0x8] sm:$0xff] }
 0x673   :  { %v3945_v22 = vand.u32 4294901760, %v3933_v16  ;;  %v4023_v46 = vand.u32 4294901760, %v4022_v38 }
 0x675   :  { %v31375_v24 = vpack.c.bf16 %v3945_v22, %v3942_v37  ;;  %v4029_v31 = vsub.f32 %v3933_v16, %v3945_v22  ;;  %v4024_v30 = vsub.f32 %v4022_v38, %v4023_v46  ;;  %v3931_v16 = vld [vmem:[#allocation3 + $0x28] sm:$0xff] }
 0x677   :  { %28134 = vmatpush3.bf16.msra.mxu0 %v31375_v24  ;;  %v4025_v53 = vand.u32 4294901760, %v4024_v30  ;;  %v31399_v11 = vpack.c.bf16 %v4029_v31, %v4022_v38 }
 0x678   :  { %28135 = vmatprep.subr.bf16.mxu0 %v30533_v7 }
 0x67b   :  { %28137 = vmatpush3.bf16.msra.mxu0 %v31379_v39 }
 0x67c   :  { %28138 = vmatprep.subr.bf16.mxu0 %v30533_v7 }
 0x6c7   :  { %v3909_v17 = vpop.permute.xlu0 %3908 }
 0x6c8   :  { %v3911_v21 = vmul.f32 %v3909_v17, %v3906_v15 }
 0x6ca   :  { %v31364_v27 = vadd.f32 %v3912_v19, %v3911_v21 }
 0x6cc   :  { %v31371_v36 = vsel %vm2857_vm7, %v31364_v27, %v31270_v14  ;;  %v4030_v14 = vand.u32 4294901760, %v4029_v31 }
 0x6cd   :  { %4467 = vrot.lane.b32.xlu0 %v31371_v36, %s30538_s12 }
 0x6ce   :  { %v4031_v42 = vsub.f32 %v4029_v31, %v4030_v14  ;;  %v31403_v63 = vpack.c.bf16 %v4030_v14, %v4023_v46  ;;  %v3930_v31 = vld [vmem:[#allocation2 + $0x10] sm:$0xff] }
 0x6d0   :  { %v4032_v50 = vand.u32 4294901760, %v4031_v42 }
 0x6d2   :  { %v31393_v56 = vpack.c.bf16 %v4032_v50, %v4025_v53  ;;  %v5540_v50 = vld [vmem:[#allocation14] sm:$0xff] }
 0x6d3   :  { %v5550_v52 = vand.u32 4294901760, %v5540_v50 }
 0x6d5   :  { %v31483_v59 = vpack.c.bf16 %v5553_v58, %v5550_v52 }
 0x6dc   :  { %v3382_v48 = vpop.permute.xlu1 %3381 }
 0x6dd   :  { %v3384_v18 = vmul.f32 %v3382_v48, %v3379_v47 }
 0x6df   :  { %v31383_v29 = vadd.f32 %v3385_v32, %v3384_v18 }
 0x6e1   :  { %v31391_v54 = vsel %vm2856_vm8, %v31383_v29, %v31277_v20 }
 0x6e2   :  { %3937 = vrot.lane.b32.xlu0 %v31391_v54, %s30538_s12 }
 0x73f   :  { %v4468_v2 = vpop.permute.xlu0 %4467 }
 0x740   :  { %v4469_v20 = vsel %vm1794_vm6, %v4468_v2, 0  ;;  %v5630_v2 = vsub.f32 %v5540_v50, %v5550_v52 }
 0x741   :  { %v4540_v23 = vand.u32 4294901760, %v4469_v20 }
 0x743   :  { %v4541_v25 = vsub.f32 %v4469_v20, %v4540_v23  ;;  %v5637_v20 = vsub.f32 %v5541_v51, %v5553_v58 }
 0x745   :  { %v4542_v3 = vand.u32 4294901760, %v4541_v25 }
 0x747   :  { %v4543_v4 = vsub.f32 %v4541_v25, %v4542_v3 }
 0x749   :  { %v4544_v5 = vand.u32 4294901760, %v4543_v4 }
 0x74b   :  { %25537 = vmatmul.mubr.f32.vlgmr.msra.gmra.mrb[20].mxu1 %v4544_v5  ;;  %v5631_v5 = vand.u32 4294901760, %v5630_v2 }
 0x74c   :  { %28176 = vmatpush3.bf16.msra.mxu1 %v31171_v26  ;;  %25547 = vmatprep.mubr.msk.f32.mxu1 %vm30534_vm2, %v30535_v34 }
 0x74d   :  { %28177 = vmatprep.subr.bf16.mxu1 %v30533_v7 }
 0x750   :  { %28179 = vmatpush3.bf16.msra.mxu1 %v31177_v8 }
 0x751   :  { %28180 = vmatprep.subr.bf16.mxu1 %v30533_v7 }
 0x753   :  { %25548 = vmatmul.mubr.f32.vlgmr.msra.gmra.mrb[20].mxu1 %v4540_v23 }
 0x754   :  { %28182 = vmatpush3.bf16.msra.mxu1 %v31185_v57  ;;  %v3938_v35 = vpop.permute.xlu0 %3937  ;;  %25558 = vmatprep.mubr.msk.f32.mxu1 %vm30534_vm2, %v30535_v34 }
 0x755   :  { %v3939_v6 = vsel %vm1794_vm6, %v3938_v35, 0  ;;  %28183 = vmatprep.subr.bf16.mxu1 %v30533_v7  ;;  %v5638_v35 = vand.u32 4294901760, %v5637_v20 }
 0x756   :  { %v4010_v26 = vand.u32 4294901760, %v3939_v6 }
 0x758   :  { %v4011_v15 = vsub.f32 %v3939_v6, %v4010_v26  ;;  %28185 = vmatpush3.bf16.msra.mxu1 %v31192_v9 }
 0x759   :  { %28186 = vmatprep.subr.bf16.mxu1 %v30533_v7 }
 0x75a   :  { %v4012_v8 = vand.u32 4294901760, %v4011_v15 }
 0x75b   :  { %25559 = vmatmul.mubr.f32.vlgmr.msra.gmra.mrb[20].mxu1 %v4541_v25  ;;  %v5543_v25 = vld [vmem:[#allocation14 + $0x18] sm:$0xff] }
 0x75c   :  { %v4013_v17 = vsub.f32 %v4011_v15, %v4012_v8  ;;  %28188 = vmatpush3.bf16.msra.mxu1 %v31113_v55  ;;  %25569 = vmatprep.mubr.msk.f32.mxu1 %vm30534_vm2, %v30535_v34  ;;  %v5559_v4 = vand.u32 4294901760, %v5543_v25 }
 0x75d   :  { %28189 = vmatprep.subr.bf16.mxu1 %v30533_v7 }
 0x75e   :  { %v4014_v57 = vand.u32 4294901760, %v4013_v17  ;;  %v5651_v17 = vsub.f32 %v5543_v25, %v5559_v4 }
 0x760   :  { %28191 = vmatpush3.bf16.msra.mxu1 %v31123_v61  ;;  %25471 = vmatmul.mubr.f32.vlgmr.msra.gmra.mrb[12].mxu0 %v4014_v57  ;;  %v5632_v57 = vsub.f32 %v5630_v2, %v5631_v5 }
 0x761   :  { %28140 = vmatpush3.bf16.msra.mxu0 %v31393_v56  ;;  %28192 = vmatprep.subr.bf16.mxu1 %v30533_v7 }
 0x762   :  { %28141 = vmatprep.subr.bf16.mxu0 %v30533_v7  ;;  %25481 = vmatprep.mubr.msk.f32.mxu0 %vm30534_vm2, %v30535_v34 }
 0x763   :  { %25570 = vmatmul.mubr.f32.vlgmr.msra.gmra.mrb[20].mxu1 %v4542_v3 }
 0x764   :  { %28194 = vmatpush3.bf16.msra.mxu1 %v31207_v10  ;;  %25580 = vmatprep.mubr.msk.f32.mxu1 %vm30534_vm2, %v30535_v34 }
 0x765   :  { %28143 = vmatpush3.bf16.msra.mxu0 %v31397_v60  ;;  %28195 = vmatprep.subr.bf16.mxu1 %v30533_v7 }
 0x766   :  { %28144 = vmatprep.subr.bf16.mxu0 %v30533_v7 }
 0x768   :  { %28197 = vmatpush3.bf16.msra.mxu1 %v31212_v13  ;;  %25482 = vmatmul.mubr.f32.vlgmr.msra.gmra.mrb[12].mxu0 %v4010_v26 }
 0x769   :  { %28146 = vmatpush3.bf16.msra.mxu0 %v31399_v11  ;;  %28198 = vmatprep.subr.bf16.mxu1 %v30533_v7 }
 0x76a   :  { %28147 = vmatprep.subr.bf16.mxu0 %v30533_v7  ;;  %25492 = vmatprep.mubr.msk.f32.mxu0 %vm30534_vm2, %v30535_v34 }
 0x76b   :  { %25581 = vmatmul.mubr.f32.vlgmr.msra.gmra.mrb[20].mxu1 %v4540_v23 }
 0x76c   :  { %28200 = vmatpush3.bf16.msra.mxu1 %v31113_v55  ;;  %25591 = vmatprep.mubr.msk.f32.mxu1 %vm30534_vm2, %v30535_v34  ;;  %v4970_v55 = vpop.permute.xlu1 %4969 }
 0x76d   :  { %28149 = vmatpush3.bf16.msra.mxu0 %v31401_v62  ;;  %28201 = vmatprep.subr.bf16.mxu1 %v30533_v7 }
 0x76e   :  { %28150 = vmatprep.subr.bf16.mxu0 %v30533_v7 }
 0x770   :  { %28203 = vmatpush3.bf16.msra.mxu1 %v31123_v61  ;;  %25493 = vmatmul.mubr.f32.vlgmr.msra.gmra.mrb[12].mxu0 %v4011_v15  ;;  %v4440_v13 = vpop.permute.xlu1 %4439 }
 0x771   :  { %28152 = vmatpush3.bf16.msra.mxu0 %v31375_v24  ;;  %25503 = vmatprep.mubr.msk.f32.mxu0 %vm30534_vm2, %v30535_v34 }
 0x772   :  { %28153 = vmatprep.subr.bf16.mxu0 %v30533_v7  ;;  %28240 = vmatprep.subr.bf16.mxu1 %v30533_v7 }
 0x773   :  { %25592 = vmatmul.mubr.f32.vlgmr.msra.gmra.mrb[20].mxu1 %v4540_v23  ;;  %v5542_v23 = vld [vmem:[#allocation14 + $0x10] sm:$0xff] }
 0x774   :  { %25668 = vmatprep.mubr.msk.f32.mxu1 %vm30534_vm2, %v30535_v34  ;;  %28242 = vmatpush3.bf16.msra.mxu1 %v31483_v59  ;;  %v5556_v3 = vand.u32 4294901760, %v5542_v23 }
 0x775   :  { %28155 = vmatpush3.bf16.msra.mxu0 %v31379_v39  ;;  %28243 = vmatprep.subr.bf16.mxu1 %v30533_v7 }
 0x776   :  { %28156 = vmatprep.subr.bf16.mxu0 %v30533_v7  ;;  %v31487_v15 = vpack.c.bf16 %v5559_v4, %v5556_v3 }
 0x778   :  { %25504 = vmatmul.mubr.f32.vlgmr.msra.gmra.mrb[12].mxu0 %v4012_v8  ;;  %v5644_v8 = vsub.f32 %v5542_v23, %v5556_v3  ;;  %28245 = vmatpush3.bf16.msra.mxu1 %v31487_v15 }
 0x779   :  { %28158 = vmatpush3.bf16.msra.mxu0 %v31403_v63  ;;  %25514 = vmatprep.mubr.msk.f32.mxu0 %vm30534_vm2, %v30535_v34 }
 0x77a   :  { %28159 = vmatprep.subr.bf16.mxu0 %v30533_v7  ;;  %28246 = vmatprep.subr.bf16.mxu1 %v30533_v7 }
 0x77d   :  { %28161 = vmatpush3.bf16.msra.mxu0 %v31405_v0 }
 0x77e   :  { %28162 = vmatprep.subr.bf16.mxu0 %v30533_v7 }
 0x780   :  { %25515 = vmatmul.mubr.f32.vlgmr.msra.gmra.mrb[12].mxu0 %v4010_v26 }
 0x781   :  { %28164 = vmatpush3.bf16.msra.mxu0 %v31375_v24  ;;  %25525 = vmatprep.mubr.msk.f32.mxu0 %vm30534_vm2, %v30535_v34 }
 0x782   :  { %28165 = vmatprep.subr.bf16.mxu0 %v30533_v7 }
 0x785   :  { %28167 = vmatpush3.bf16.msra.mxu0 %v31379_v39 }
 0x786   :  { %28204 = vmatprep.subr.bf16.mxu0 %v30533_v7 }
 0x788   :  { %25526 = vmatmul.mubr.f32.vlgmr.msra.gmra.mrb[12].mxu0 %v4010_v26 }
 0x789   :  { %28206 = vmatpush3.bf16.msra.mxu0 %v31375_v24  ;;  %25602 = vmatprep.mubr.msk.f32.mxu0 %vm30534_vm2, %v30535_v34 }
 0x78a   :  { %28207 = vmatprep.subr.bf16.mxu0 %v30533_v7 }
 0x78d   :  { %28209 = vmatpush3.bf16.msra.mxu0 %v31379_v39 }
 0x78e   :  { %28210 = vmatprep.subr.bf16.mxu0 %v30533_v7 }
 0x846   :  { %v4952_v61 = vpop.f32.mrb[20].mxu1 }
 0x847   :  { %v4972_v9 = vadd.f32 %v4970_v55, %v4952_v61  ;;  %v25593_v10 = vpop.f32.mrb[21].mxu1  ;;  %v4956_v37 = vadd.f32 %v4952_v61, %v3931_v16 }
 0x848   :  { %v5633_v10 = vand.u32 4294901760, %v5632_v57 }
 0x849   :  { %4974 = vrot.lane.b32.xlu0 %v4972_v9, %s30536_s23  ;;  %v23540_v22 = vmul.f32 -1.442695, %v4956_v37  ;;  %v5639_v9 = vsub.f32 %v5637_v20, %v5638_v35 }
 0x84b   :  { %30095 = vpow2.f32 %v23540_v22 }
 0x855   :  { %v30096_v38 = vpop.eup %30095 }
 0x856   :  { %v4960_v40 = vadd.f32 1.0, %v30096_v38 }
 0x858   :  { %30097 = vrcp.f32 %v4960_v40 }
 0x85b   :  { %v4422_v19 = vpop.f32.mrb[12].mxu0 }
 0x85c   :  { %v4442_v21 = vadd.f32 %v4440_v13, %v4422_v19  ;;  %v25527_v12 = vpop.f32.mrb[13].mxu0  ;;  %v4426_v33 = vadd.f32 %v4422_v19, %v3930_v31  ;;  %v5645_v13 = vand.u32 4294901760, %v5644_v8  ;;  %v5652_v19 = vand.u32 4294901760, %v5651_v17 }
 0x85d   :  { %v5640_v12 = vand.u32 4294901760, %v5639_v9 }
 0x85e   :  { %4444 = vrot.lane.b32.xlu1 %v4442_v21, %s30536_s23  ;;  %v23538_v44 = vmul.f32 -1.442695, %v4426_v33  ;;  %v5653_v37 = vsub.f32 %v5651_v17, %v5652_v19 }
 0x85f   :  { %v31501_v38 = vpack.c.bf16 %v5640_v12, %v5633_v10 }
 0x860   :  { %30099 = vpow2.f32 %v23538_v44  ;;  %v5654_v40 = vand.u32 4294901760, %v5653_v37  ;;  %v31507_v44 = vpack.c.bf16 %v5637_v20, %v5630_v2 }
 0x862   :  { %v30098_v45 = vpop.eup %30097 }
 0x863   :  { %v4984_v6 = vsub.f32 1.0, %v30098_v45  ;;  %v4990_v55 = vmul.f32 %v30098_v45, %v31371_v36 }
 0x86a   :  { %v30100_v47 = vpop.eup %30099 }
 0x86b   :  { %v4430_v48 = vadd.f32 1.0, %v30100_v47 }
 0x86d   :  { %30101 = vrcp.f32 %v4430_v48 }
 0x877   :  { %v30102_v43 = vpop.eup %30101 }
 0x878   :  { %v4460_v47 = vmul.f32 %v30102_v43, %v31391_v54 }
 0x8bb   :  { %v4975_v46 = vpop.permute.xlu0 %4974 }
 0x8bc   :  { %v4977_v14 = vmul.f32 %v30098_v45, %v4975_v46  ;;  %v31509_v45 = vpack.c.bf16 %v5651_v17, %v5644_v8  ;;  %v4454_v46 = vsub.f32 1.0, %v30102_v43 }
 0x8be   :  { %4979 = vrot.lane.b32.xlu0 %v4977_v14, %s30536_s23 }
 0x8d0   :  { %v4445_v28 = vpop.permute.xlu1 %4444 }
 0x8d1   :  { %v4447_v30 = vmul.f32 %v30102_v43, %v4445_v28  ;;  %v31534_v43 = vld [vmem:[%s34107_s20] ss:$0 sm:$0xff] }
 0x8d3   :  { %4449 = vrot.lane.b32.xlu1 %v4447_v30, %s30536_s23  ;;  %v31523_v30 = vpack.c.bf16 %v5638_v35, %v5631_v5 }
 0x930   :  { %v4980_v32 = vpop.permute.xlu0 %4979 }
 0x931   :  { %v4982_v18 = vadd.f32 %v4980_v32, %v3931_v16  ;;  %v5646_v16 = vsub.f32 %v5644_v8, %v5645_v13  ;;  %v31525_v32 = vpack.c.bf16 %v5652_v19, %v5645_v13  ;;  %v5008_v13 = vld [vmem:[#allocation2 + $0x18] sm:$0xff] }
 0x933   :  { %30103 = vtanh.f32 %v4982_v18  ;;  %v31527_v18 = vld [vmem:[#allocation15] ss:$0 sm:$0xff] }
 0x93d   :  { %v30104_v42 = vpop.eup %30103 }
 0x93e   :  { %4986 = vrot.lane.b32.xlu0 %v30104_v42, %s30538_s12 }
 0x945   :  { %v4450_v53 = vpop.permute.xlu1 %4449 }
 0x946   :  { %v4452_v41 = vadd.f32 %v4450_v53, %v3930_v31  ;;  %v5647_v31 = vand.u32 4294901760, %v5646_v16 }
 0x948   :  { %30105 = vtanh.f32 %v4452_v41  ;;  %v31505_v33 = vpack.c.bf16 %v5654_v40, %v5647_v31 }
 0x952   :  { %v30106_v49 = vpop.eup %30105 }
 0x953   :  { %4456 = vrot.lane.b32.xlu1 %v30106_v49, %s30538_s12 }
 0x957   :  { %6047 = vrot.lane.b32.xlu1 %v31527_v18, %s30536_s23 }
 0x95b   :  { %5517 = vrot.lane.b32.xlu1 %v31534_v43, %s30536_s23 }
 0x9b0   :  { %v4987_v26 = vpop.permute.xlu0 %4986 }
 0x9b1   :  { %v4989_v61 = vmul.f32 %v4987_v26, %v4984_v6 }
 0x9b3   :  { %v31491_v21 = vadd.f32 %v4990_v55, %v4989_v61  ;;  %v5009_v55 = vld [vmem:[#allocation3 + $0x20] sm:$0xff] }
 0x9b5   :  { %v31499_v22 = vsel %vm3929_vm9, %v31491_v21, %v31371_v36 }
 0x9b6   :  { %5545 = vrot.lane.b32.xlu0 %v31499_v22, %s30538_s12 }
 0x9c5   :  { %v4457_v14 = vpop.permute.xlu1 %4456 }
 0x9c6   :  { %v4459_v48 = vmul.f32 %v4457_v14, %v4454_v46 }
 0x9c8   :  { %v31512_v36 = vadd.f32 %v4460_v47, %v4459_v48 }
 0x9c9   :  { %v6048_v4 = vpop.permute.xlu1 %6047 }
 0x9ca   :  { %v31519_v28 = vsel %vm3928_vm10, %v31512_v36, %v31391_v54 }
 0x9cb   :  { %5015 = vrot.lane.b32.xlu0 %v31519_v28, %s30538_s12 }
 0x9cd   :  { %v5518_v26 = vpop.permute.xlu1 %5517 }
 0xa28   :  { %v5546_v54 = vpop.permute.xlu0 %5545 }
 0xa29   :  { %v5547_v42 = vsel %vm1794_vm6, %v5546_v54, 0 }
 0xa2a   :  { %v5618_v53 = vand.u32 4294901760, %v5547_v42 }
 0xa2c   :  { %v5619_v41 = vsub.f32 %v5547_v42, %v5618_v53 }
 0xa2e   :  { %v5620_v49 = vand.u32 4294901760, %v5619_v41 }
 0xa30   :  { %v5621_v50 = vsub.f32 %v5619_v41, %v5620_v49 }
 0xa32   :  { %v5622_v51 = vand.u32 4294901760, %v5621_v50 }
 0xa34   :  { %25669 = vmatmul.mubr.f32.vlgmr.msra.gmra.mrb[22].mxu1 %v5622_v51 }
 0xa35   :  { %28248 = vmatpush3.bf16.msra.mxu1 %v31501_v38  ;;  %25679 = vmatprep.mubr.msk.f32.mxu1 %vm30534_vm2, %v30535_v34 }
 0xa36   :  { %28249 = vmatprep.subr.bf16.mxu1 %v30533_v7 }
 0xa39   :  { %28251 = vmatpush3.bf16.msra.mxu1 %v31505_v33 }
 0xa3a   :  { %28252 = vmatprep.subr.bf16.mxu1 %v30533_v7 }
 0xa3c   :  { %25680 = vmatmul.mubr.f32.vlgmr.msra.gmra.mrb[22].mxu1 %v5618_v53 }
 0xa3d   :  { %28254 = vmatpush3.bf16.msra.mxu1 %v31507_v44  ;;  %v5016_v52 = vpop.permute.xlu0 %5015  ;;  %25690 = vmatprep.mubr.msk.f32.mxu1 %vm30534_vm2, %v30535_v34 }
 0xa3e   :  { %v5017_v58 = vsel %vm1794_vm6, %v5016_v52, 0  ;;  %28255 = vmatprep.subr.bf16.mxu1 %v30533_v7 }
 0xa3f   :  { %v5088_v2 = vand.u32 4294901760, %v5017_v58 }
 0xa41   :  { %v5089_v20 = vsub.f32 %v5017_v58, %v5088_v2  ;;  %28257 = vmatpush3.bf16.msra.mxu1 %v31509_v45 }
 0xa42   :  { %28258 = vmatprep.subr.bf16.mxu1 %v30533_v7 }
 0xa43   :  { %v5090_v23 = vand.u32 4294901760, %v5089_v20 }
 0xa44   :  { %25691 = vmatmul.mubr.f32.vlgmr.msra.gmra.mrb[22].mxu1 %v5619_v41 }
 0xa45   :  { %v5091_v25 = vsub.f32 %v5089_v20, %v5090_v23  ;;  %28260 = vmatpush3.bf16.msra.mxu1 %v31483_v59  ;;  %25701 = vmatprep.mubr.msk.f32.mxu1 %vm30534_vm2, %v30535_v34 }
 0xa46   :  { %28261 = vmatprep.subr.bf16.mxu1 %v30533_v7 }
 0xa47   :  { %v5092_v3 = vand.u32 4294901760, %v5091_v25 }
 0xa49   :  { %28263 = vmatpush3.bf16.msra.mxu1 %v31487_v15  ;;  %25603 = vmatmul.mubr.f32.vlgmr.msra.gmra.mrb[14].mxu0 %v5092_v3 }
 0xa4a   :  { %28212 = vmatpush3.bf16.msra.mxu0 %v31393_v56  ;;  %28264 = vmatprep.subr.bf16.mxu1 %v30533_v7 }
 0xa4b   :  { %28213 = vmatprep.subr.bf16.mxu0 %v30533_v7  ;;  %25613 = vmatprep.mubr.msk.f32.mxu0 %vm30534_vm2, %v30535_v34 }
 0xa4c   :  { %25702 = vmatmul.mubr.f32.vlgmr.msra.gmra.mrb[22].mxu1 %v5620_v49 }
 0xa4d   :  { %28266 = vmatpush3.bf16.msra.mxu1 %v31523_v30  ;;  %25712 = vmatprep.mubr.msk.f32.mxu1 %vm30534_vm2, %v30535_v34 }
 0xa4e   :  { %28215 = vmatpush3.bf16.msra.mxu0 %v31397_v60  ;;  %28267 = vmatprep.subr.bf16.mxu1 %v30533_v7 }
 0xa4f   :  { %28216 = vmatprep.subr.bf16.mxu0 %v30533_v7 }
 0xa51   :  { %28269 = vmatpush3.bf16.msra.mxu1 %v31525_v32  ;;  %25614 = vmatmul.mubr.f32.vlgmr.msra.gmra.mrb[14].mxu0 %v5088_v2 }
 0xa52   :  { %28218 = vmatpush3.bf16.msra.mxu0 %v31399_v11  ;;  %28270 = vmatprep.subr.bf16.mxu1 %v30533_v7 }
 0xa53   :  { %28219 = vmatprep.subr.bf16.mxu0 %v30533_v7  ;;  %25624 = vmatprep.mubr.msk.f32.mxu0 %vm30534_vm2, %v30535_v34 }
 0xa54   :  { %25713 = vmatmul.mubr.f32.vlgmr.msra.gmra.mrb[22].mxu1 %v5618_v53 }
 0xa55   :  { %28272 = vmatpush3.bf16.msra.mxu1 %v31483_v59  ;;  %25723 = vmatprep.mubr.msk.f32.mxu1 %vm30534_vm2, %v30535_v34 }
 0xa56   :  { %28221 = vmatpush3.bf16.msra.mxu0 %v31401_v62  ;;  %28273 = vmatprep.subr.bf16.mxu1 %v30533_v7 }
 0xa57   :  { %28222 = vmatprep.subr.bf16.mxu0 %v30533_v7 }
 0xa59   :  { %28275 = vmatpush3.bf16.msra.mxu1 %v31487_v15  ;;  %25625 = vmatmul.mubr.f32.vlgmr.msra.gmra.mrb[14].mxu0 %v5089_v20 }
 0xa5a   :  { %28224 = vmatpush3.bf16.msra.mxu0 %v31375_v24  ;;  %25635 = vmatprep.mubr.msk.f32.mxu0 %vm30534_vm2, %v30535_v34 }
 0xa5b   :  { %28225 = vmatprep.subr.bf16.mxu0 %v30533_v7  ;;  %28312 = vmatprep.subr.bf16.mxu1 %v30533_v7 }
 0xa5c   :  { %25724 = vmatmul.mubr.f32.vlgmr.msra.gmra.mrb[22].mxu1 %v5618_v53 }
 0xa5d   :  { %28314 = vmatpush3.bf16.msra.mxu1 %v31483_v59  ;;  %25800 = vmatprep.mubr.msk.f32.mxu1 %vm30534_vm2, %v30535_v34 }
 0xa5e   :  { %28227 = vmatpush3.bf16.msra.mxu0 %v31379_v39  ;;  %28315 = vmatprep.subr.bf16.mxu1 %v30533_v7 }
 0xa5f   :  { %28228 = vmatprep.subr.bf16.mxu0 %v30533_v7 }
 0xa61   :  { %25636 = vmatmul.mubr.f32.vlgmr.msra.gmra.mrb[14].mxu0 %v5090_v23  ;;  %28317 = vmatpush3.bf16.msra.mxu1 %v31487_v15 }
 0xa62   :  { %28230 = vmatpush3.bf16.msra.mxu0 %v31403_v63  ;;  %25646 = vmatprep.mubr.msk.f32.mxu0 %vm30534_vm2, %v30535_v34 }
 0xa63   :  { %28231 = vmatprep.subr.bf16.mxu0 %v30533_v7  ;;  %28318 = vmatprep.subr.bf16.mxu1 %v30533_v7 }
 0xa66   :  { %28233 = vmatpush3.bf16.msra.mxu0 %v31405_v0 }
 0xa67   :  { %28234 = vmatprep.subr.bf16.mxu0 %v30533_v7 }
 0xa69   :  { %25647 = vmatmul.mubr.f32.vlgmr.msra.gmra.mrb[14].mxu0 %v5088_v2 }
 0xa6a   :  { %28236 = vmatpush3.bf16.msra.mxu0 %v31375_v24  ;;  %25657 = vmatprep.mubr.msk.f32.mxu0 %vm30534_vm2, %v30535_v34 }
 0xa6b   :  { %28237 = vmatprep.subr.bf16.mxu0 %v30533_v7 }
 0xa6e   :  { %28239 = vmatpush3.bf16.msra.mxu0 %v31379_v39 }
 0xa6f   :  { %28276 = vmatprep.subr.bf16.mxu0 %v30533_v7 }
 0xa71   :  { %25658 = vmatmul.mubr.f32.vlgmr.msra.gmra.mrb[14].mxu0 %v5088_v2 }
 0xa72   :  { %28278 = vmatpush3.bf16.msra.mxu0 %v31375_v24  ;;  %25734 = vmatprep.mubr.msk.f32.mxu0 %vm30534_vm2, %v30535_v34 }
 0xa73   :  { %28279 = vmatprep.subr.bf16.mxu0 %v30533_v7 }
 0xa76   :  { %28281 = vmatpush3.bf16.msra.mxu0 %v31379_v39 }
 0xa77   :  { %28282 = vmatprep.subr.bf16.mxu0 %v30533_v7 }
 0xb2f   :  { %v6030_v5 = vpop.f32.mrb[22].mxu1 }
 0xb30   :  { %v6050_v35 = vadd.f32 %v6048_v4, %v6030_v5  ;;  %v25725_v6 = vpop.f32.mrb[23].mxu1  ;;  %v6034_v61 = vadd.f32 %v6030_v5, %v5009_v55 }
 0xb32   :  { %6052 = vrot.lane.b32.xlu0 %v6050_v35, %s30536_s23  ;;  %v23544_v9 = vmul.f32 -1.442695, %v6034_v61 }
 0xb34   :  { %30107 = vpow2.f32 %v23544_v9 }
 0xb3e   :  { %v30108_v10 = vpop.eup %30107 }
 0xb3f   :  { %v6038_v19 = vadd.f32 1.0, %v30108_v10 }
 0xb41   :  { %30109 = vrcp.f32 %v6038_v19 }
 0xb44   :  { %v5500_v8 = vpop.f32.mrb[14].mxu0 }
 0xb45   :  { %v5520_v17 = vadd.f32 %v5518_v26, %v5500_v8  ;;  %v25659_v57 = vpop.f32.mrb[15].mxu0  ;;  %v5504_v12 = vadd.f32 %v5500_v8, %v5008_v13 }
 0xb47   :  { %5522 = vrot.lane.b32.xlu1 %v5520_v17, %s30536_s23  ;;  %v23542_v16 = vmul.f32 -1.442695, %v5504_v12 }
 0xb49   :  { %30111 = vpow2.f32 %v23542_v16 }
 0xb4b   :  { %v30110_v37 = vpop.eup %30109 }
 0xb4c   :  { %v6062_v52 = vsub.f32 1.0, %v30110_v37  ;;  %v6068_v2 = vmul.f32 %v30110_v37, %v31499_v22 }
 0xb53   :  { %v30112_v46 = vpop.eup %30111 }
 0xb54   :  { %v5508_v14 = vadd.f32 1.0, %v30112_v46 }
 0xb56   :  { %30113 = vrcp.f32 %v5508_v14 }
 0xb60   :  { %v30114_v47 = vpop.eup %30113 }
 0xb61   :  { %v5532_v3 = vsub.f32 1.0, %v30114_v47  ;;  %v5538_v5 = vmul.f32 %v30114_v47, %v31519_v28 }
 0xba4   :  { %v6053_v31 = vpop.permute.xlu0 %6052 }
 0xba5   :  { %v6055_v40 = vmul.f32 %v30110_v37, %v6053_v31 }
 0xba7   :  { %6057 = vrot.lane.b32.xlu0 %v6055_v40, %s30536_s23  ;;  %v6085_v40 = vld [vmem:[#allocation3 + $0x18] sm:$0xff] }
 0xbb9   :  { %v5523_v48 = vpop.permute.xlu1 %5522 }
 0xbba   :  { %v5525_v54 = vmul.f32 %v30114_v47, %v5523_v48  ;;  %v6084_v47 = vld [vmem:[#allocation2 + $0x20] sm:$0xff] }
 0xbbc   :  { %5527 = vrot.lane.b32.xlu1 %v5525_v54, %s30536_s23 }
 0xc19   :  { %v6058_v42 = vpop.permute.xlu0 %6057 }
 0xc1a   :  { %v6060_v53 = vadd.f32 %v6058_v42, %v5009_v55 }
 0xc1c   :  { %30115 = vtanh.f32 %v6060_v53 }
 0xc26   :  { %v30116_v41 = vpop.eup %30115 }
 0xc27   :  { %6064 = vrot.lane.b32.xlu0 %v30116_v41, %s30538_s12 }
 0xc2e   :  { %v5528_v49 = vpop.permute.xlu1 %5527 }
 0xc2f   :  { %v5530_v50 = vadd.f32 %v5528_v49, %v5008_v13 }
 0xc31   :  { %30117 = vtanh.f32 %v5530_v50 }
 0xc3b   :  { %v30118_v51 = vpop.eup %30117 }
 0xc3c   :  { %5534 = vrot.lane.b32.xlu1 %v30118_v51, %s30538_s12 }
 0xc40   :  { %7123 = vrot.lane.b32.xlu1 %v31527_v18, %s30536_s23 }
 0xc44   :  { %6593 = vrot.lane.b32.xlu1 %v31534_v43, %s30536_s23 }
 0xc99   :  { %v6065_v58 = vpop.permute.xlu0 %6064 }
 0xc9a   :  { %v6067_v20 = vmul.f32 %v6065_v58, %v6062_v52 }
 0xc9c   :  { %v31623_v23 = vadd.f32 %v6068_v2, %v6067_v20 }
 0xc9e   :  { %v31630_v25 = vsel %vm5007_vm11, %v31623_v23, %v31499_v22 }
 0xc9f   :  { %6621 = vrot.lane.b32.xlu0 %v31630_v25, %s30538_s12 }
 0xcae   :  { %v5535_v4 = vpop.permute.xlu1 %5534 }
 0xcaf   :  { %v5537_v35 = vmul.f32 %v5535_v4, %v5532_v3 }
 0xcb1   :  { %v31635_v6 = vadd.f32 %v5538_v5, %v5537_v35 }
 0xcb3   :  { %v31642_v26 = vsel %vm5006_vm12, %v31635_v6, %v31519_v28 }
 0xcb4   :  { %6091 = vrot.lane.b32.xlu0 %v31642_v26, %s30538_s12 }
 0xd11   :  { %v6622_v22 = vpop.permute.xlu0 %6621 }
 0xd12   :  { %v6623_v8 = vsel %vm1794_vm6, %v6622_v22, 0 }
 0xd13   :  { %v6694_v17 = vand.u32 4294901760, %v6623_v8 }
 0xd15   :  { %v6695_v57 = vsub.f32 %v6623_v8, %v6694_v17 }
 0xd17   :  { %v6696_v55 = vand.u32 4294901760, %v6695_v57 }
 0xd19   :  { %v6697_v61 = vsub.f32 %v6695_v57, %v6696_v55 }
 0xd1b   :  { %v6698_v9 = vand.u32 4294901760, %v6697_v61 }
 0xd1d   :  { %25801 = vmatmul.mubr.f32.vlgmr.msra.gmra.mrb[24].mxu1 %v6698_v9 }
 0xd1e   :  { %28320 = vmatpush3.bf16.msra.mxu1 %v31501_v38  ;;  %25811 = vmatprep.mubr.msk.f32.mxu1 %vm30534_vm2, %v30535_v34 }
 0xd1f   :  { %28321 = vmatprep.subr.bf16.mxu1 %v30533_v7 }
 0xd22   :  { %28323 = vmatpush3.bf16.msra.mxu1 %v31505_v33 }
 0xd23   :  { %28324 = vmatprep.subr.bf16.mxu1 %v30533_v7 }
 0xd25   :  { %25812 = vmatmul.mubr.f32.vlgmr.msra.gmra.mrb[24].mxu1 %v6694_v17 }
 0xd26   :  { %28326 = vmatpush3.bf16.msra.mxu1 %v31507_v44  ;;  %v6092_v28 = vpop.permute.xlu0 %6091  ;;  %25822 = vmatprep.mubr.msk.f32.mxu1 %vm30534_vm2, %v30535_v34 }
 0xd27   :  { %v6093_v10 = vsel %vm1794_vm6, %v6092_v28, 0  ;;  %28327 = vmatprep.subr.bf16.mxu1 %v30533_v7  ;;  %v7163_v28 = vld [vmem:[#allocation9 + $0x8] sm:$0xff] }
 0xd28   :  { %v6164_v13 = vand.u32 4294901760, %v6093_v10 }
 0xd2a   :  { %v6165_v19 = vsub.f32 %v6093_v10, %v6164_v13  ;;  %28329 = vmatpush3.bf16.msra.mxu1 %v31509_v45 }
 0xd2b   :  { %28330 = vmatprep.subr.bf16.mxu1 %v30533_v7 }
 0xd2c   :  { %v6166_v12 = vand.u32 4294901760, %v6165_v19 }
 0xd2d   :  { %25823 = vmatmul.mubr.f32.vlgmr.msra.gmra.mrb[24].mxu1 %v6695_v57 }
 0xd2e   :  { %v6167_v16 = vsub.f32 %v6165_v19, %v6166_v12  ;;  %28332 = vmatpush3.bf16.msra.mxu1 %v31483_v59  ;;  %25833 = vmatprep.mubr.msk.f32.mxu1 %vm30534_vm2, %v30535_v34 }
 0xd2f   :  { %28333 = vmatprep.subr.bf16.mxu1 %v30533_v7 }
 0xd30   :  { %v6168_v37 = vand.u32 4294901760, %v6167_v16  ;;  %v7164_v16 = vld [vmem:[#allocation9 + $0x10] sm:$0xff] }
 0xd32   :  { %28335 = vmatpush3.bf16.msra.mxu1 %v31487_v15  ;;  %25735 = vmatmul.mubr.f32.vlgmr.msra.gmra.mrb[16].mxu0 %v6168_v37  ;;  %v7165_v37 = vld [vmem:[#allocation9 + $0x18] sm:$0xff] }
 0xd33   :  { %28284 = vmatpush3.bf16.msra.mxu0 %v31393_v56  ;;  %28336 = vmatprep.subr.bf16.mxu1 %v30533_v7  ;;  %v7124_v56 = vpop.permute.xlu1 %7123 }
 0xd34   :  { %28285 = vmatprep.subr.bf16.mxu0 %v30533_v7  ;;  %25745 = vmatprep.mubr.msk.f32.mxu0 %vm30534_vm2, %v30535_v34 }
 0xd35   :  { %25834 = vmatmul.mubr.f32.vlgmr.msra.gmra.mrb[24].mxu1 %v6696_v55 }
 0xd36   :  { %28338 = vmatpush3.bf16.msra.mxu1 %v31523_v30  ;;  %25844 = vmatprep.mubr.msk.f32.mxu1 %vm30534_vm2, %v30535_v34 }
 0xd37   :  { %28287 = vmatpush3.bf16.msra.mxu0 %v31397_v60  ;;  %28339 = vmatprep.subr.bf16.mxu1 %v30533_v7 }
 0xd38   :  { %28288 = vmatprep.subr.bf16.mxu0 %v30533_v7 }
 0xd3a   :  { %28341 = vmatpush3.bf16.msra.mxu1 %v31525_v32  ;;  %25746 = vmatmul.mubr.f32.vlgmr.msra.gmra.mrb[16].mxu0 %v6164_v13 }
 0xd3b   :  { %28290 = vmatpush3.bf16.msra.mxu0 %v31399_v11  ;;  %28342 = vmatprep.subr.bf16.mxu1 %v30533_v7 }
 0xd3c   :  { %28291 = vmatprep.subr.bf16.mxu0 %v30533_v7  ;;  %25756 = vmatprep.mubr.msk.f32.mxu0 %vm30534_vm2, %v30535_v34 }
 0xd3d   :  { %25845 = vmatmul.mubr.f32.vlgmr.msra.gmra.mrb[24].mxu1 %v6694_v17 }
 0xd3e   :  { %28344 = vmatpush3.bf16.msra.mxu1 %v31483_v59  ;;  %25855 = vmatprep.mubr.msk.f32.mxu1 %vm30534_vm2, %v30535_v34 }
 0xd3f   :  { %28293 = vmatpush3.bf16.msra.mxu0 %v31401_v62  ;;  %28345 = vmatprep.subr.bf16.mxu1 %v30533_v7 }
 0xd40   :  { %28294 = vmatprep.subr.bf16.mxu0 %v30533_v7 }
 0xd42   :  { %28347 = vmatpush3.bf16.msra.mxu1 %v31487_v15  ;;  %25757 = vmatmul.mubr.f32.vlgmr.msra.gmra.mrb[16].mxu0 %v6165_v19 }
 0xd43   :  { %28296 = vmatpush3.bf16.msra.mxu0 %v31375_v24  ;;  %25767 = vmatprep.mubr.msk.f32.mxu0 %vm30534_vm2, %v30535_v34 }
 0xd44   :  { %28297 = vmatprep.subr.bf16.mxu0 %v30533_v7  ;;  %28384 = vmatprep.subr.bf16.mxu1 %v30533_v7 }
 0xd45   :  { %25856 = vmatmul.mubr.f32.vlgmr.msra.gmra.mrb[24].mxu1 %v6694_v17 }
 0xd46   :  { %28386 = vmatpush3.bf16.msra.mxu1 %v31483_v59  ;;  %25932 = vmatprep.mubr.msk.f32.mxu1 %vm30534_vm2, %v30535_v34 }
 0xd47   :  { %28299 = vmatpush3.bf16.msra.mxu0 %v31379_v39  ;;  %28387 = vmatprep.subr.bf16.mxu1 %v30533_v7 }
 0xd48   :  { %28300 = vmatprep.subr.bf16.mxu0 %v30533_v7 }
 0xd4a   :  { %25768 = vmatmul.mubr.f32.vlgmr.msra.gmra.mrb[16].mxu0 %v6166_v12  ;;  %28389 = vmatpush3.bf16.msra.mxu1 %v31487_v15 }
 0xd4b   :  { %28302 = vmatpush3.bf16.msra.mxu0 %v31403_v63  ;;  %25778 = vmatprep.mubr.msk.f32.mxu0 %vm30534_vm2, %v30535_v34 }
 0xd4c   :  { %28303 = vmatprep.subr.bf16.mxu0 %v30533_v7  ;;  %28390 = vmatprep.subr.bf16.mxu1 %v30533_v7 }
 0xd4f   :  { %28305 = vmatpush3.bf16.msra.mxu0 %v31405_v0 }
 0xd50   :  { %28306 = vmatprep.subr.bf16.mxu0 %v30533_v7 }
 0xd52   :  { %25779 = vmatmul.mubr.f32.vlgmr.msra.gmra.mrb[16].mxu0 %v6164_v13 }
 0xd53   :  { %28308 = vmatpush3.bf16.msra.mxu0 %v31375_v24  ;;  %25789 = vmatprep.mubr.msk.f32.mxu0 %vm30534_vm2, %v30535_v34  ;;  %v6594_v24 = vpop.permute.xlu1 %6593 }
 0xd54   :  { %28309 = vmatprep.subr.bf16.mxu0 %v30533_v7 }
 0xd57   :  { %28311 = vmatpush3.bf16.msra.mxu0 %v31379_v39 }
 0xd58   :  { %28348 = vmatprep.subr.bf16.mxu0 %v30533_v7 }
 0xd5a   :  { %25790 = vmatmul.mubr.f32.vlgmr.msra.gmra.mrb[16].mxu0 %v6164_v13 }
 0xd5b   :  { %25866 = vmatprep.mubr.msk.f32.mxu0 %vm30534_vm2, %v30535_v34 }
 0xe18   :  { %v7106_v60 = vpop.f32.mrb[24].mxu1 }
 0xe19   :  { %v7126_v11 = vadd.f32 %v7124_v56, %v7106_v60  ;;  %v25857_v62 = vpop.f32.mrb[25].mxu1  ;;  %v7110_v39 = vadd.f32 %v7106_v60, %v6085_v40  ;;  %v7178_v56 = vand.u32 4294901760, %v7164_v16  ;;  %v7181_v60 = vand.u32 4294901760, %v7165_v37 }
 0xe1b   :  { %7128 = vrot.lane.b32.xlu0 %v7126_v11, %s30536_s23  ;;  %v23548_v46 = vmul.f32 -1.442695, %v7110_v39 }
 0xe1d   :  { %30119 = vpow2.f32 %v23548_v46 }
 0xe27   :  { %v30120_v14 = vpop.eup %30119 }
 0xe28   :  { %v7114_v48 = vadd.f32 1.0, %v30120_v14 }
 0xe2a   :  { %30121 = vrcp.f32 %v7114_v48 }
 0xe2d   :  { %v6576_v63 = vpop.f32.mrb[16].mxu0 }
 0xe2e   :  { %v6596_v0 = vadd.f32 %v6594_v24, %v6576_v63  ;;  %v25791_v31 = vpop.f32.mrb[17].mxu0  ;;  %v6580_v54 = vadd.f32 %v6576_v63, %v6084_v47  ;;  %v31741_v63 = vpack.c.bf16 %v7181_v60, %v7178_v56 }
 0xe2f   :  { %v7273_v31 = vsub.f32 %v7165_v37, %v7181_v60  ;;  %v7161_v37 = vld [vmem:[#allocation3 + $0x10] sm:$0xff] }
 0xe30   :  { %6598 = vrot.lane.b32.xlu1 %v6596_v0, %s30536_s23  ;;  %v23546_v42 = vmul.f32 -1.442695, %v6580_v54  ;;  %v7266_v0 = vsub.f32 %v7164_v16, %v7178_v56 }
 0xe31   :  { %v7274_v54 = vand.u32 4294901760, %v7273_v31 }
 0xe32   :  { %30123 = vpow2.f32 %v23546_v42  ;;  %v7267_v48 = vand.u32 4294901760, %v7266_v0 }
 0xe34   :  { %v30122_v53 = vpop.eup %30121 }
 0xe35   :  { %v7138_v8 = vsub.f32 1.0, %v30122_v53  ;;  %v7144_v57 = vmul.f32 %v30122_v53, %v31630_v25 }
 0xe3c   :  { %v30124_v50 = vpop.eup %30123 }
 0xe3d   :  { %v6584_v51 = vadd.f32 1.0, %v30124_v50 }
 0xe3f   :  { %30125 = vrcp.f32 %v6584_v51 }
 0xe49   :  { %v30126_v52 = vpop.eup %30125 }
 0xe4a   :  { %v6608_v62 = vsub.f32 1.0, %v30126_v52  ;;  %v6614_v39 = vmul.f32 %v30126_v52, %v31642_v26 }
 0xe8d   :  { %v7129_v41 = vpop.permute.xlu0 %7128 }
 0xe8e   :  { %v7131_v49 = vmul.f32 %v30122_v53, %v7129_v41  ;;  %v7268_v41 = vsub.f32 %v7266_v0, %v7267_v48 }
 0xe90   :  { %7133 = vrot.lane.b32.xlu0 %v7131_v49, %s30536_s23  ;;  %v7275_v49 = vsub.f32 %v7273_v31, %v7274_v54 }
 0xea2   :  { %v6599_v58 = vpop.permute.xlu1 %6598 }
 0xea3   :  { %v6601_v2 = vmul.f32 %v30126_v52, %v6599_v58  ;;  %v7269_v52 = vand.u32 4294901760, %v7268_v41  ;;  %v7276_v58 = vand.u32 4294901760, %v7275_v49 }
 0xea5   :  { %6603 = vrot.lane.b32.xlu1 %v6601_v2, %s30536_s23  ;;  %v31758_v2 = vpack.c.bf16 %v7276_v58, %v7269_v52 }
 0xf02   :  { %v7134_v20 = vpop.permute.xlu0 %7133 }
 0xf03   :  { %v7136_v3 = vadd.f32 %v7134_v20, %v6085_v40 }
 0xf05   :  { %30127 = vtanh.f32 %v7136_v3  ;;  %v31762_v3 = vpack.c.bf16 %v7273_v31, %v7266_v0 }
 0xf0f   :  { %v30128_v4 = vpop.eup %30127 }
 0xf10   :  { %7140 = vrot.lane.b32.xlu0 %v30128_v4, %s30538_s12 }
 0xf17   :  { %v6604_v5 = vpop.permute.xlu1 %6603 }
 0xf18   :  { %v6606_v35 = vadd.f32 %v6604_v5, %v6084_v47  ;;  %v31766_v5 = vpack.c.bf16 %v7274_v54, %v7267_v48 }
 0xf1a   :  { %30129 = vtanh.f32 %v6606_v35 }
 0xf24   :  { %v30130_v22 = vpop.eup %30129 }
 0xf25   :  { %6610 = vrot.lane.b32.xlu1 %v30130_v22, %s30538_s12 }
 0xf29   :  { %8199 = vrot.lane.b32.xlu1 %v31527_v18, %s30536_s23  ;;  %v7162_v18 = vld [vmem:[#allocation9] sm:$0xff] }
 0xf2a   :  { %v7172_v10 = vand.u32 4294901760, %v7162_v18 }
 0xf2c   :  { %v7252_v19 = vsub.f32 %v7162_v18, %v7172_v10 }
 0xf2d   :  { %7669 = vrot.lane.b32.xlu1 %v31534_v43, %s30536_s23  ;;  %v7175_v43 = vand.u32 4294901760, %v7163_v28 }
 0xf2e   :  { %v7253_v11 = vand.u32 4294901760, %v7252_v19 }
 0xf2f   :  { %v31737_v13 = vpack.c.bf16 %v7175_v43, %v7172_v10  ;;  %v7259_v12 = vsub.f32 %v7163_v28, %v7175_v43 }
 0xf30   :  { %v7254_v40 = vsub.f32 %v7252_v19, %v7253_v11 }
 0xf31   :  { %28350 = vmatpush3.bf16.msra.mxu0 %v31737_v13  ;;  %v31760_v20 = vpack.c.bf16 %v7259_v12, %v7252_v19 }
 0xf32   :  { %28351 = vmatprep.subr.bf16.mxu0 %v30533_v7  ;;  %v7255_v47 = vand.u32 4294901760, %v7254_v40 }
 0xf35   :  { %28353 = vmatpush3.bf16.msra.mxu0 %v31741_v63 }
 0xf36   :  { %28354 = vmatprep.subr.bf16.mxu0 %v30533_v7 }
 0xf82   :  { %v7141_v17 = vpop.permute.xlu0 %7140 }
 0xf83   :  { %v7143_v55 = vmul.f32 %v7141_v17, %v7138_v8 }
 0xf85   :  { %v31727_v61 = vadd.f32 %v7144_v57, %v7143_v55 }
 0xf87   :  { %v31733_v9 = vsel %vm5006_vm12, %v31727_v61, %v31630_v25  ;;  %v7260_v25 = vand.u32 4294901760, %v7259_v12 }
 0xf88   :  { %7697 = vrot.lane.b32.xlu0 %v31733_v9, %s30538_s12 }
 0xf89   :  { %v7261_v14 = vsub.f32 %v7259_v12, %v7260_v25  ;;  %v31764_v4 = vpack.c.bf16 %v7260_v25, %v7253_v11  ;;  %v7160_v25 = vld [vmem:[#allocation2 + $0x28] sm:$0xff] }
 0xf8b   :  { %v7262_v53 = vand.u32 4294901760, %v7261_v14 }
 0xf8d   :  { %v31754_v51 = vpack.c.bf16 %v7262_v53, %v7255_v47 }
 0xf97   :  { %v6611_v24 = vpop.permute.xlu1 %6610 }
 0xf98   :  { %v6613_v46 = vmul.f32 %v6611_v24, %v6608_v62 }
 0xf9a   :  { %v31745_v42 = vadd.f32 %v6614_v39, %v6613_v46 }
 0xf9c   :  { %v31752_v50 = vsel %vm5007_vm11, %v31745_v42, %v31642_v26 }
 0xf9d   :  { %7167 = vrot.lane.b32.xlu0 %v31752_v50, %s30538_s12 }
 0xffa   :  { %v7698_v35 = vpop.permute.xlu0 %7697 }
 0xffb   :  { %v7699_v26 = vsel %vm1794_vm6, %v7698_v35, 0 }
 0xffc   :  { %v7770_v22 = vand.u32 4294901760, %v7699_v26 }
 0xffe   :  { %v7771_v8 = vsub.f32 %v7699_v26, %v7770_v22  ;;  %v8768_v26 = vld [vmem:[#allocation14] sm:$0xff] }
0x1000   :  { %v7772_v17 = vand.u32 4294901760, %v7771_v8 }
0x1002   :  { %v7773_v57 = vsub.f32 %v7771_v8, %v7772_v17 }
0x1004   :  { %v7774_v55 = vand.u32 4294901760, %v7773_v57 }
0x1006   :  { %25933 = vmatmul.mubr.f32.vlgmr.msra.gmra.mrb[26].mxu1 %v7774_v55 }
0x1007   :  { %28392 = vmatpush3.bf16.msra.mxu1 %v31501_v38  ;;  %25943 = vmatprep.mubr.msk.f32.mxu1 %vm30534_vm2, %v30535_v34 }
0x1008   :  { %28393 = vmatprep.subr.bf16.mxu1 %v30533_v7 }
0x100b   :  { %28395 = vmatpush3.bf16.msra.mxu1 %v31505_v33 }
0x100c   :  { %28396 = vmatprep.subr.bf16.mxu1 %v30533_v7 }
0x100e   :  { %25944 = vmatmul.mubr.f32.vlgmr.msra.gmra.mrb[26].mxu1 %v7770_v22 }
0x100f   :  { %28398 = vmatpush3.bf16.msra.mxu1 %v31507_v44  ;;  %v7168_v18 = vpop.permute.xlu0 %7167  ;;  %25954 = vmatprep.mubr.msk.f32.mxu1 %vm30534_vm2, %v30535_v34 }
0x1010   :  { %v7169_v28 = vsel %vm1794_vm6, %v7168_v18, 0  ;;  %28399 = vmatprep.subr.bf16.mxu1 %v30533_v7 }
0x1011   :  { %v7240_v38 = vand.u32 4294901760, %v7169_v28 }
0x1013   :  { %v7241_v10 = vsub.f32 %v7169_v28, %v7240_v38  ;;  %28401 = vmatpush3.bf16.msra.mxu1 %v31509_v45  ;;  %v8770_v28 = vld [vmem:[#allocation14 + $0x10] sm:$0xff] }
0x1014   :  { %28402 = vmatprep.subr.bf16.mxu1 %v30533_v7 }
0x1015   :  { %v7242_v33 = vand.u32 4294901760, %v7241_v10 }
0x1016   :  { %25955 = vmatmul.mubr.f32.vlgmr.msra.gmra.mrb[26].mxu1 %v7771_v8  ;;  %v8778_v8 = vand.u32 4294901760, %v8768_v26 }
0x1017   :  { %v7243_v43 = vsub.f32 %v7241_v10, %v7242_v33  ;;  %28404 = vmatpush3.bf16.msra.mxu1 %v31483_v59  ;;  %25965 = vmatprep.mubr.msk.f32.mxu1 %vm30534_vm2, %v30535_v34 }
0x1018   :  { %28405 = vmatprep.subr.bf16.mxu1 %v30533_v7  ;;  %v8858_v55 = vsub.f32 %v8768_v26, %v8778_v8 }
0x1019   :  { %v7244_v44 = vand.u32 4294901760, %v7243_v43 }
0x101a   :  { %v8859_v43 = vand.u32 4294901760, %v8858_v55 }
0x101b   :  { %28407 = vmatpush3.bf16.msra.mxu1 %v31487_v15  ;;  %25867 = vmatmul.mubr.f32.vlgmr.msra.gmra.mrb[18].mxu0 %v7244_v44 }
0x101c   :  { %28356 = vmatpush3.bf16.msra.mxu0 %v31754_v51  ;;  %28408 = vmatprep.subr.bf16.mxu1 %v30533_v7 }
0x101d   :  { %28357 = vmatprep.subr.bf16.mxu0 %v30533_v7  ;;  %25877 = vmatprep.mubr.msk.f32.mxu0 %vm30534_vm2, %v30535_v34 }
0x101e   :  { %25966 = vmatmul.mubr.f32.vlgmr.msra.gmra.mrb[26].mxu1 %v7772_v17 }
0x101f   :  { %28410 = vmatpush3.bf16.msra.mxu1 %v31523_v30  ;;  %25976 = vmatprep.mubr.msk.f32.mxu1 %vm30534_vm2, %v30535_v34 }
0x1020   :  { %28359 = vmatpush3.bf16.msra.mxu0 %v31758_v2  ;;  %28411 = vmatprep.subr.bf16.mxu1 %v30533_v7 }
0x1021   :  { %28360 = vmatprep.subr.bf16.mxu0 %v30533_v7 }
0x1023   :  { %28413 = vmatpush3.bf16.msra.mxu1 %v31525_v32  ;;  %25878 = vmatmul.mubr.f32.vlgmr.msra.gmra.mrb[18].mxu0 %v7240_v38 }
0x1024   :  { %28362 = vmatpush3.bf16.msra.mxu0 %v31760_v20  ;;  %28414 = vmatprep.subr.bf16.mxu1 %v30533_v7 }
0x1025   :  { %28363 = vmatprep.subr.bf16.mxu0 %v30533_v7  ;;  %25888 = vmatprep.mubr.msk.f32.mxu0 %vm30534_vm2, %v30535_v34 }
0x1026   :  { %25977 = vmatmul.mubr.f32.vlgmr.msra.gmra.mrb[26].mxu1 %v7770_v22 }
0x1027   :  { %28416 = vmatpush3.bf16.msra.mxu1 %v31483_v59  ;;  %25987 = vmatprep.mubr.msk.f32.mxu1 %vm30534_vm2, %v30535_v34  ;;  %v8200_v59 = vpop.permute.xlu1 %8199 }
0x1028   :  { %28365 = vmatpush3.bf16.msra.mxu0 %v31762_v3  ;;  %28417 = vmatprep.subr.bf16.mxu1 %v30533_v7 }
0x1029   :  { %28366 = vmatprep.subr.bf16.mxu0 %v30533_v7 }
0x102b   :  { %28419 = vmatpush3.bf16.msra.mxu1 %v31487_v15  ;;  %25889 = vmatmul.mubr.f32.vlgmr.msra.gmra.mrb[18].mxu0 %v7241_v10  ;;  %v7670_v32 = vpop.permute.xlu1 %7669  ;;  %v8784_v10 = vand.u32 4294901760, %v8770_v28 }
0x102c   :  { %28368 = vmatpush3.bf16.msra.mxu0 %v31737_v13  ;;  %25899 = vmatprep.mubr.msk.f32.mxu0 %vm30534_vm2, %v30535_v34 }
0x102d   :  { %28369 = vmatprep.subr.bf16.mxu0 %v30533_v7  ;;  %28456 = vmatprep.subr.bf16.mxu1 %v30533_v7 }
0x102e   :  { %25988 = vmatmul.mubr.f32.vlgmr.msra.gmra.mrb[26].mxu1 %v7770_v22  ;;  %v8769_v22 = vld [vmem:[#allocation14 + $0x8] sm:$0xff] }
0x102f   :  { %26064 = vmatprep.mubr.msk.f32.mxu1 %vm30534_vm2, %v30535_v34  ;;  %v8781_v17 = vand.u32 4294901760, %v8769_v22 }
0x1030   :  { %28371 = vmatpush3.bf16.msra.mxu0 %v31741_v63 }
0x1031   :  { %28372 = vmatprep.subr.bf16.mxu0 %v30533_v7  ;;  %v31844_v57 = vpack.c.bf16 %v8781_v17, %v8778_v8  ;;  %v8865_v18 = vsub.f32 %v8769_v22, %v8781_v17  ;;  %v31886_v22 = vld [vmem:[#allocation15] ss:$0 sm:$0xff] }
0x1033   :  { %25900 = vmatmul.mubr.f32.vlgmr.msra.gmra.mrb[18].mxu0 %v7242_v33  ;;  %28458 = vmatpush3.bf16.msra.mxu1 %v31844_v57  ;;  %v8866_v44 = vand.u32 4294901760, %v8865_v18 }
0x1034   :  { %28374 = vmatpush3.bf16.msra.mxu0 %v31764_v4  ;;  %25910 = vmatprep.mubr.msk.f32.mxu0 %vm30534_vm2, %v30535_v34 }
0x1035   :  { %28375 = vmatprep.subr.bf16.mxu0 %v30533_v7  ;;  %28459 = vmatprep.subr.bf16.mxu1 %v30533_v7 }
0x1038   :  { %28377 = vmatpush3.bf16.msra.mxu0 %v31766_v5 }
0x1039   :  { %28378 = vmatprep.subr.bf16.mxu0 %v30533_v7 }
0x103b   :  { %25911 = vmatmul.mubr.f32.vlgmr.msra.gmra.mrb[18].mxu0 %v7240_v38 }
0x103c   :  { %28380 = vmatpush3.bf16.msra.mxu0 %v31737_v13  ;;  %25921 = vmatprep.mubr.msk.f32.mxu0 %vm30534_vm2, %v30535_v34 }
0x103d   :  { %28381 = vmatprep.subr.bf16.mxu0 %v30533_v7 }
0x1040   :  { %28383 = vmatpush3.bf16.msra.mxu0 %v31741_v63 }
0x1041   :  { %28420 = vmatprep.subr.bf16.mxu0 %v30533_v7 }
0x1043   :  { %25922 = vmatmul.mubr.f32.vlgmr.msra.gmra.mrb[18].mxu0 %v7240_v38  ;;  %v8771_v38 = vld [vmem:[#allocation14 + $0x18] sm:$0xff] }
0x1044   :  { %28422 = vmatpush3.bf16.msra.mxu0 %v31737_v13  ;;  %25998 = vmatprep.mubr.msk.f32.mxu0 %vm30534_vm2, %v30535_v34  ;;  %v8787_v33 = vand.u32 4294901760, %v8771_v38 }
0x1045   :  { %28423 = vmatprep.subr.bf16.mxu0 %v30533_v7 }
0x1048   :  { %28425 = vmatpush3.bf16.msra.mxu0 %v31741_v63 }
0x1049   :  { %28426 = vmatprep.subr.bf16.mxu0 %v30533_v7 }
0x1101   :  { %v8182_v15 = vpop.f32.mrb[26].mxu1 }
0x1102   :  { %v8202_v45 = vadd.f32 %v8200_v59, %v8182_v15  ;;  %v25989_v30 = vpop.f32.mrb[27].mxu1  ;;  %v8186_v56 = vadd.f32 %v8182_v15, %v7161_v37 }
0x1103   :  { %v8872_v30 = vsub.f32 %v8770_v28, %v8784_v10 }
0x1104   :  { %8204 = vrot.lane.b32.xlu0 %v8202_v45, %s30536_s23  ;;  %v23552_v60 = vmul.f32 -1.442695, %v8186_v56  ;;  %v31848_v45 = vpack.c.bf16 %v8787_v33, %v8784_v10 }
0x1106   :  { %30131 = vpow2.f32 %v23552_v60  ;;  %28461 = vmatpush3.bf16.msra.mxu1 %v31848_v45  ;;  %v8873_v60 = vand.u32 4294901760, %v8872_v30 }
0x1107   :  { %28462 = vmatprep.subr.bf16.mxu1 %v30533_v7 }
0x1110   :  { %v30132_v11 = vpop.eup %30131 }
0x1111   :  { %v8190_v62 = vadd.f32 1.0, %v30132_v11 }
0x1113   :  { %30133 = vrcp.f32 %v8190_v62 }
0x1116   :  { %v7652_v19 = vpop.f32.mrb[18].mxu0 }
0x1117   :  { %v7672_v12 = vadd.f32 %v7670_v32, %v7652_v19  ;;  %v25923_v16 = vpop.f32.mrb[19].mxu0  ;;  %v7656_v24 = vadd.f32 %v7652_v19, %v7160_v25  ;;  %v8879_v32 = vsub.f32 %v8771_v38, %v8787_v33  ;;  %v8860_v19 = vsub.f32 %v8858_v55, %v8859_v43 }
0x1119   :  { %7674 = vrot.lane.b32.xlu1 %v7672_v12, %s30536_s23  ;;  %v23550_v0 = vmul.f32 -1.442695, %v7656_v24  ;;  %v8861_v56 = vand.u32 4294901760, %v8860_v19  ;;  %v8880_v11 = vand.u32 4294901760, %v8879_v32  ;;  %v8874_v24 = vsub.f32 %v8872_v30, %v8873_v60 }
0x111b   :  { %30135 = vpow2.f32 %v23550_v0  ;;  %v8881_v0 = vsub.f32 %v8879_v32, %v8880_v11  ;;  %v31884_v26 = vpack.c.bf16 %v8880_v11, %v8873_v60 }
0x111d   :  { %v30134_v31 = vpop.eup %30133 }
0x111e   :  { %v8214_v59 = vsub.f32 1.0, %v30134_v31  ;;  %v8220_v12 = vmul.f32 %v30134_v31, %v31733_v9 }
0x1125   :  { %v30136_v46 = vpop.eup %30135 }
0x1126   :  { %v7660_v14 = vadd.f32 1.0, %v30136_v46  ;;  %v8882_v46 = vand.u32 4294901760, %v8881_v0 }
0x1128   :  { %30137 = vrcp.f32 %v7660_v14 }
0x1132   :  { %v30138_v47 = vpop.eup %30137 }
0x1176   :  { %v8205_v40 = vpop.permute.xlu0 %8204 }
0x1177   :  { %v8207_v39 = vmul.f32 %v30134_v31, %v8205_v40 }
0x1179   :  { %8209 = vrot.lane.b32.xlu0 %v8207_v39, %s30536_s23  ;;  %v8875_v39 = vand.u32 4294901760, %v8874_v24 }
0x117b   :  { %v31865_v14 = vpack.c.bf16 %v8882_v46, %v8875_v39  ;;  %v8236_v46 = vld [vmem:[#allocation2 + $0x30] sm:$0xff] }
0x118b   :  { %v7675_v48 = vpop.permute.xlu1 %7674 }
0x118c   :  { %v7677_v54 = vmul.f32 %v30138_v47, %v7675_v48  ;;  %v31867_v48 = vpack.c.bf16 %v8865_v18, %v8858_v55 }
0x118e   :  { %7679 = vrot.lane.b32.xlu1 %v7677_v54, %s30536_s23  ;;  %v31869_v54 = vpack.c.bf16 %v8879_v32, %v8872_v30 }
0x11eb   :  { %v8210_v53 = vpop.permute.xlu0 %8209 }
0x11ec   :  { %v8212_v41 = vadd.f32 %v8210_v53, %v7161_v37  ;;  %v8867_v37 = vsub.f32 %v8865_v18, %v8866_v44  ;;  %v7684_v53 = vsub.f32 1.0, %v30138_v47 }
0x11ee   :  { %30139 = vtanh.f32 %v8212_v41  ;;  %v8868_v62 = vand.u32 4294901760, %v8867_v37 }
0x11f0   :  { %v31861_v31 = vpack.c.bf16 %v8868_v62, %v8861_v56  ;;  %v8237_v62 = vld [vmem:[#allocation3 + $0x8] sm:$0xff] }
0x11f8   :  { %v30140_v49 = vpop.eup %30139 }
0x11f9   :  { %8216 = vrot.lane.b32.xlu0 %v30140_v49, %s30538_s12  ;;  %v7690_v49 = vmul.f32 %v30138_v47, %v31752_v50  ;;  %v31893_v47 = vld [vmem:[%s34107_s20] ss:$0 sm:$0xff] }
0x1200   :  { %v7680_v52 = vpop.permute.xlu1 %7679 }
0x1201   :  { %v7682_v58 = vadd.f32 %v7680_v52, %v7160_v25 }
0x1203   :  { %30141 = vtanh.f32 %v7682_v58 }
0x120d   :  { %v30142_v35 = vpop.eup %30141 }
0x120e   :  { %7686 = vrot.lane.b32.xlu1 %v30142_v35, %s30538_s12  ;;  %v31882_v35 = vpack.c.bf16 %v8866_v44, %v8859_v43 }
0x1212   :  { %9275 = vrot.lane.b32.xlu1 %v31886_v22, %s30536_s23 }
0x1216   :  { %8745 = vrot.lane.b32.xlu1 %v31893_v47, %s30536_s23 }
0x126b   :  { %v8217_v15 = vpop.permute.xlu0 %8216 }
0x126c   :  { %v8219_v16 = vmul.f32 %v8217_v15, %v8214_v59 }
0x126e   :  { %v31852_v25 = vadd.f32 %v8220_v12, %v8219_v16 }
0x1270   :  { %v31859_v40 = vsel %vm3928_vm10, %v31852_v25, %v31733_v9 }
0x1271   :  { %8773 = vrot.lane.b32.xlu0 %v31859_v40, %s30538_s12 }
0x1280   :  { %v7687_v41 = vpop.permute.xlu1 %7686 }
0x1281   :  { %v7689_v52 = vmul.f32 %v7687_v41, %v7684_v53 }
0x1283   :  { %v31872_v9 = vadd.f32 %v7690_v49, %v7689_v52 }
0x1284   :  { %v9276_v32 = vpop.permute.xlu1 %9275 }
0x1285   :  { %v31878_v58 = vsel %vm3929_vm9, %v31872_v9, %v31752_v50 }
0x1286   :  { %8243 = vrot.lane.b32.xlu0 %v31878_v58, %s30538_s12 }
0x1288   :  { %v8746_v37 = vpop.permute.xlu1 %8745 }
0x12e3   :  { %v8774_v50 = vpop.permute.xlu0 %8773 }
0x12e4   :  { %v8775_v8 = vsel %vm1794_vm6, %v8774_v50, 0 }
0x12e5   :  { %v8846_v17 = vand.u32 4294901760, %v8775_v8 }
0x12e7   :  { %v8847_v55 = vsub.f32 %v8775_v8, %v8846_v17 }
0x12e9   :  { %v8848_v18 = vand.u32 4294901760, %v8847_v55 }
0x12eb   :  { %v8849_v28 = vsub.f32 %v8847_v55, %v8848_v18 }
0x12ed   :  { %v8850_v38 = vand.u32 4294901760, %v8849_v28 }
0x12ef   :  { %26065 = vmatmul.mubr.f32.vlgmr.msra.gmra.mrb[28].mxu1 %v8850_v38 }
0x12f0   :  { %28464 = vmatpush3.bf16.msra.mxu1 %v31861_v31  ;;  %26075 = vmatprep.mubr.msk.f32.mxu1 %vm30534_vm2, %v30535_v34 }
0x12f1   :  { %28465 = vmatprep.subr.bf16.mxu1 %v30533_v7 }
0x12f4   :  { %28467 = vmatpush3.bf16.msra.mxu1 %v31865_v14 }
0x12f5   :  { %28468 = vmatprep.subr.bf16.mxu1 %v30533_v7 }
0x12f7   :  { %26076 = vmatmul.mubr.f32.vlgmr.msra.gmra.mrb[28].mxu1 %v8846_v17 }
0x12f8   :  { %28470 = vmatpush3.bf16.msra.mxu1 %v31867_v48  ;;  %v8244_v10 = vpop.permute.xlu0 %8243  ;;  %26086 = vmatprep.mubr.msk.f32.mxu1 %vm30534_vm2, %v30535_v34 }
0x12f9   :  { %v8245_v33 = vsel %vm1794_vm6, %v8244_v10, 0  ;;  %28471 = vmatprep.subr.bf16.mxu1 %v30533_v7 }
0x12fa   :  { %v8316_v43 = vand.u32 4294901760, %v8245_v33 }
0x12fc   :  { %v8317_v44 = vsub.f32 %v8245_v33, %v8316_v43  ;;  %28473 = vmatpush3.bf16.msra.mxu1 %v31869_v54 }
0x12fd   :  { %28474 = vmatprep.subr.bf16.mxu1 %v30533_v7 }
0x12fe   :  { %v8318_v59 = vand.u32 4294901760, %v8317_v44 }
0x12ff   :  { %26087 = vmatmul.mubr.f32.vlgmr.msra.gmra.mrb[28].mxu1 %v8847_v55 }
0x1300   :  { %v8319_v15 = vsub.f32 %v8317_v44, %v8318_v59  ;;  %28476 = vmatpush3.bf16.msra.mxu1 %v31844_v57  ;;  %26097 = vmatprep.mubr.msk.f32.mxu1 %vm30534_vm2, %v30535_v34 }
0x1301   :  { %28477 = vmatprep.subr.bf16.mxu1 %v30533_v7 }
0x1302   :  { %v8320_v30 = vand.u32 4294901760, %v8319_v15 }
0x1304   :  { %28479 = vmatpush3.bf16.msra.mxu1 %v31848_v45  ;;  %25999 = vmatmul.mubr.f32.vlgmr.msra.gmra.mrb[20].mxu0 %v8320_v30 }
0x1305   :  { %28428 = vmatpush3.bf16.msra.mxu0 %v31754_v51  ;;  %28480 = vmatprep.subr.bf16.mxu1 %v30533_v7 }
0x1306   :  { %28429 = vmatprep.subr.bf16.mxu0 %v30533_v7  ;;  %26009 = vmatprep.mubr.msk.f32.mxu0 %vm30534_vm2, %v30535_v34 }
0x1307   :  { %26098 = vmatmul.mubr.f32.vlgmr.msra.gmra.mrb[28].mxu1 %v8848_v18 }
0x1308   :  { %28482 = vmatpush3.bf16.msra.mxu1 %v31882_v35  ;;  %26108 = vmatprep.mubr.msk.f32.mxu1 %vm30534_vm2, %v30535_v34 }
0x1309   :  { %28431 = vmatpush3.bf16.msra.mxu0 %v31758_v2  ;;  %28483 = vmatprep.subr.bf16.mxu1 %v30533_v7 }
0x130a   :  { %28432 = vmatprep.subr.bf16.mxu0 %v30533_v7 }
0x130c   :  { %28485 = vmatpush3.bf16.msra.mxu1 %v31884_v26  ;;  %26010 = vmatmul.mubr.f32.vlgmr.msra.gmra.mrb[20].mxu0 %v8316_v43 }
0x130d   :  { %28434 = vmatpush3.bf16.msra.mxu0 %v31760_v20  ;;  %28486 = vmatprep.subr.bf16.mxu1 %v30533_v7 }
0x130e   :  { %28435 = vmatprep.subr.bf16.mxu0 %v30533_v7  ;;  %26020 = vmatprep.mubr.msk.f32.mxu0 %vm30534_vm2, %v30535_v34 }
0x130f   :  { %26109 = vmatmul.mubr.f32.vlgmr.msra.gmra.mrb[28].mxu1 %v8846_v17 }
0x1310   :  { %28488 = vmatpush3.bf16.msra.mxu1 %v31844_v57  ;;  %26119 = vmatprep.mubr.msk.f32.mxu1 %vm30534_vm2, %v30535_v34 }
0x1311   :  { %28437 = vmatpush3.bf16.msra.mxu0 %v31762_v3  ;;  %28489 = vmatprep.subr.bf16.mxu1 %v30533_v7 }
0x1312   :  { %28438 = vmatprep.subr.bf16.mxu0 %v30533_v7 }
0x1314   :  { %28491 = vmatpush3.bf16.msra.mxu1 %v31848_v45  ;;  %26021 = vmatmul.mubr.f32.vlgmr.msra.gmra.mrb[20].mxu0 %v8317_v44 }
0x1315   :  { %28440 = vmatpush3.bf16.msra.mxu0 %v31737_v13  ;;  %26031 = vmatprep.mubr.msk.f32.mxu0 %vm30534_vm2, %v30535_v34 }
0x1316   :  { %28441 = vmatprep.subr.bf16.mxu0 %v30533_v7  ;;  %28528 = vmatprep.subr.bf16.mxu1 %v30533_v7 }
0x1317   :  { %26120 = vmatmul.mubr.f32.vlgmr.msra.gmra.mrb[28].mxu1 %v8846_v17 }
0x1318   :  { %28530 = vmatpush3.bf16.msra.mxu1 %v31844_v57  ;;  %26196 = vmatprep.mubr.msk.f32.mxu1 %vm30534_vm2, %v30535_v34 }
0x1319   :  { %28443 = vmatpush3.bf16.msra.mxu0 %v31741_v63  ;;  %28531 = vmatprep.subr.bf16.mxu1 %v30533_v7 }
0x131a   :  { %28444 = vmatprep.subr.bf16.mxu0 %v30533_v7 }
0x131c   :  { %26032 = vmatmul.mubr.f32.vlgmr.msra.gmra.mrb[20].mxu0 %v8318_v59  ;;  %28533 = vmatpush3.bf16.msra.mxu1 %v31848_v45 }
0x131d   :  { %28446 = vmatpush3.bf16.msra.mxu0 %v31764_v4  ;;  %26042 = vmatprep.mubr.msk.f32.mxu0 %vm30534_vm2, %v30535_v34 }
0x131e   :  { %28447 = vmatprep.subr.bf16.mxu0 %v30533_v7  ;;  %28534 = vmatprep.subr.bf16.mxu1 %v30533_v7 }
0x1321   :  { %28449 = vmatpush3.bf16.msra.mxu0 %v31766_v5 }
0x1322   :  { %28450 = vmatprep.subr.bf16.mxu0 %v30533_v7 }
0x1324   :  { %26043 = vmatmul.mubr.f32.vlgmr.msra.gmra.mrb[20].mxu0 %v8316_v43 }
0x1325   :  { %28452 = vmatpush3.bf16.msra.mxu0 %v31737_v13  ;;  %26053 = vmatprep.mubr.msk.f32.mxu0 %vm30534_vm2, %v30535_v34 }
0x1326   :  { %28453 = vmatprep.subr.bf16.mxu0 %v30533_v7 }
0x1329   :  { %28455 = vmatpush3.bf16.msra.mxu0 %v31741_v63 }
0x132a   :  { %28492 = vmatprep.subr.bf16.mxu0 %v30533_v7 }
0x132c   :  { %26054 = vmatmul.mubr.f32.vlgmr.msra.gmra.mrb[20].mxu0 %v8316_v43 }
0x132d   :  { %28494 = vmatpush3.bf16.msra.mxu0 %v31737_v13  ;;  %26130 = vmatprep.mubr.msk.f32.mxu0 %vm30534_vm2, %v30535_v34 }
0x132e   :  { %28495 = vmatprep.subr.bf16.mxu0 %v30533_v7 }
0x1331   :  { %28497 = vmatpush3.bf16.msra.mxu0 %v31741_v63 }
0x1332   :  { %28498 = vmatprep.subr.bf16.mxu0 %v30533_v7 }
0x13ea   :  { %v9258_v19 = vpop.f32.mrb[28].mxu1 }
0x13eb   :  { %v9278_v12 = vadd.f32 %v9276_v32, %v9258_v19  ;;  %v26121_v16 = vpop.f32.mrb[29].mxu1  ;;  %v9262_v24 = vadd.f32 %v9258_v19, %v8237_v62 }
0x13ed   :  { %9280 = vrot.lane.b32.xlu0 %v9278_v12, %s30536_s23  ;;  %v23556_v0 = vmul.f32 -1.442695, %v9262_v24 }
0x13ef   :  { %30143 = vpow2.f32 %v23556_v0 }
0x13f9   :  { %v30144_v39 = vpop.eup %30143 }
0x13fa   :  { %v9266_v53 = vadd.f32 1.0, %v30144_v39 }
0x13fc   :  { %30145 = vrcp.f32 %v9266_v53 }
0x13ff   :  { %v8728_v56 = vpop.f32.mrb[20].mxu0 }
0x1400   :  { %v8748_v60 = vadd.f32 %v8746_v37, %v8728_v56  ;;  %v26055_v11 = vpop.f32.mrb[21].mxu0  ;;  %v8732_v41 = vadd.f32 %v8728_v56, %v8236_v46 }
0x1402   :  { %8750 = vrot.lane.b32.xlu1 %v8748_v60, %s30536_s23  ;;  %v23554_v49 = vmul.f32 -1.442695, %v8732_v41 }
0x1404   :  { %30147 = vpow2.f32 %v23554_v49 }
0x1406   :  { %v30146_v52 = vpop.eup %30145 }
0x1407   :  { %v9290_v30 = vsub.f32 1.0, %v30146_v52  ;;  %v9296_v19 = vmul.f32 %v30146_v52, %v31859_v40 }
0x140e   :  { %v30148_v17 = vpop.eup %30147 }
0x140f   :  { %v8736_v55 = vadd.f32 1.0, %v30148_v17 }
0x1411   :  { %30149 = vrcp.f32 %v8736_v55 }
0x141b   :  { %v30150_v18 = vpop.eup %30149 }
0x145f   :  { %v9281_v50 = vpop.permute.xlu0 %9280 }
0x1460   :  { %v9283_v8 = vmul.f32 %v30146_v52, %v9281_v50 }
0x1462   :  { %9285 = vrot.lane.b32.xlu0 %v9283_v8, %s30536_s23  ;;  %v9312_v8 = vld [vmem:[#allocation2 + $0x38] sm:$0xff] }
0x1474   :  { %v8751_v28 = vpop.permute.xlu1 %8750 }
0x1475   :  { %v8753_v38 = vmul.f32 %v30150_v18, %v8751_v28 }
0x1477   :  { %8755 = vrot.lane.b32.xlu1 %v8753_v38, %s30536_s23 }
0x14d4   :  { %v9286_v10 = vpop.permute.xlu0 %9285 }
0x14d5   :  { %v9288_v33 = vadd.f32 %v9286_v10, %v8237_v62 }
0x14d7   :  { %30151 = vtanh.f32 %v9288_v33 }
0x14e1   :  { %v30152_v43 = vpop.eup %30151 }
0x14e2   :  { %9292 = vrot.lane.b32.xlu0 %v30152_v43, %s30538_s12 }
0x14e9   :  { %v8756_v44 = vpop.permute.xlu1 %8755 }
0x14ea   :  { %v8758_v59 = vadd.f32 %v8756_v44, %v8236_v46 }
0x14ec   :  { %30153 = vtanh.f32 %v8758_v59 }
0x14f6   :  { %v30154_v15 = vpop.eup %30153 }
0x14f7   :  { %8762 = vrot.lane.b32.xlu1 %v30154_v15, %s30538_s12 }
0x14fb   :  { %10351 = vrot.lane.b32.xlu1 %v31886_v22, %s30536_s23  ;;  %v8760_v22 = vsub.f32 1.0, %v30150_v18 }
0x14ff   :  { %9821 = vrot.lane.b32.xlu1 %v31893_v47, %s30536_s23  ;;  %v8766_v47 = vmul.f32 %v30150_v18, %v31878_v58 }
0x1554   :  { %v9293_v32 = vpop.permute.xlu0 %9292 }
0x1555   :  { %v9295_v12 = vmul.f32 %v9293_v32, %v9290_v30  ;;  %v7149_v30 = vsel %vm5006_vm12, %v31727_v61, 0.0  ;;  %v4995_v32 = vsel %vm3929_vm9, %v31491_v21, 0.0  ;;  %v4994_v21 = vsel %vm3928_vm10, %v31512_v36, 0.0  ;;  %v12057_v36 = vld [vmem:[%s34073_s14 + $0x20] sm:$0xff] }
0x1557   :  { %v31982_v16 = vadd.f32 %v9296_v19, %v9295_v12 }
0x1559   :  { %v31988_v37 = vsel %vm2856_vm8, %v31982_v16, %v31859_v40  ;;  %v9301_v15 = vsel %vm2856_vm8, %v31982_v16, 0.0 }
0x155a   :  { %9849 = vrot.lane.b32.xlu0 %v31988_v37, %s30538_s12 }
0x1569   :  { %v8763_v56 = vpop.permute.xlu1 %8762 }
0x156a   :  { %v8765_v60 = vmul.f32 %v8763_v56, %v8760_v22 }
0x156c   :  { %v31993_v11 = vadd.f32 %v8766_v47, %v8765_v60 }
0x156e   :  { %v31999_v62 = vsel %vm2857_vm7, %v31993_v11, %v31878_v58 }
0x156f   :  { %9319 = vrot.lane.b32.xlu0 %v31999_v62, %s30538_s12 }
0x15cc   :  { %v9850_v40 = vpop.permute.xlu0 %9849 }
0x15cd   :  { %v9851_v24 = vsel %vm1794_vm6, %v9850_v40, 0 }
0x15ce   :  { %v9922_v0 = vand.u32 4294901760, %v9851_v24 }
0x15d0   :  { %v9923_v39 = vsub.f32 %v9851_v24, %v9922_v0  ;;  %v7148_v24 = vsel %vm5007_vm11, %v31745_v42, 0.0  ;;  %v12058_v42 = vld [vmem:[%s34073_s14 + $0x28] sm:$0xff] }
0x15d2   :  { %v9924_v46 = vand.u32 4294901760, %v9923_v39 }
0x15d4   :  { %v9925_v53 = vsub.f32 %v9923_v39, %v9924_v46 }
0x15d6   :  { %v9926_v41 = vand.u32 4294901760, %v9925_v53 }
0x15d8   :  { %26197 = vmatmul.mubr.f32.vlgmr.msra.gmra.mrb[30].mxu1 %v9926_v41 }
0x15d9   :  { %28536 = vmatpush3.bf16.msra.mxu1 %v31861_v31  ;;  %26207 = vmatprep.mubr.msk.f32.mxu1 %vm30534_vm2, %v30535_v34 }
0x15da   :  { %28537 = vmatprep.subr.bf16.mxu1 %v30533_v7 }
0x15dd   :  { %28539 = vmatpush3.bf16.msra.mxu1 %v31865_v14 }
0x15de   :  { %28540 = vmatprep.subr.bf16.mxu1 %v30533_v7 }
0x15e0   :  { %26208 = vmatmul.mubr.f32.vlgmr.msra.gmra.mrb[30].mxu1 %v9922_v0 }
0x15e1   :  { %28542 = vmatpush3.bf16.msra.mxu1 %v31867_v48  ;;  %v9320_v58 = vpop.permute.xlu0 %9319  ;;  %26218 = vmatprep.mubr.msk.f32.mxu1 %vm30534_vm2, %v30535_v34 }
0x15e2   :  { %v9321_v49 = vsel %vm1794_vm6, %v9320_v58, 0  ;;  %28543 = vmatprep.subr.bf16.mxu1 %v30533_v7  ;;  %v10406_v58 = vld [vmem:[%s34069_s10 + $0x20] sm:$0xff] }
0x15e3   :  { %v9392_v31 = vand.u32 4294901760, %v9321_v49 }
0x15e5   :  { %v9393_v52 = vsub.f32 %v9321_v49, %v9392_v31  ;;  %28545 = vmatpush3.bf16.msra.mxu1 %v31869_v54  ;;  %v12065_v49 = vand.u32 4294901760, %v12058_v42 }
0x15e6   :  { %28546 = vmatprep.subr.bf16.mxu1 %v30533_v7 }
0x15e7   :  { %v9394_v14 = vand.u32 4294901760, %v9393_v52 }
0x15e8   :  { %26219 = vmatmul.mubr.f32.vlgmr.msra.gmra.mrb[30].mxu1 %v9923_v39 }
0x15e9   :  { %v9395_v50 = vsub.f32 %v9393_v52, %v9394_v14  ;;  %28548 = vmatpush3.bf16.msra.mxu1 %v31844_v57  ;;  %26229 = vmatprep.mubr.msk.f32.mxu1 %vm30534_vm2, %v30535_v34 }
0x15ea   :  { %28549 = vmatprep.subr.bf16.mxu1 %v30533_v7 }
0x15eb   :  { %v9396_v48 = vand.u32 4294901760, %v9395_v50 }
0x15ed   :  { %28551 = vmatpush3.bf16.msra.mxu1 %v31848_v45  ;;  %26131 = vmatmul.mubr.f32.vlgmr.msra.gmra.mrb[22].mxu0 %v9396_v48 }
0x15ee   :  { %28500 = vmatpush3.bf16.msra.mxu0 %v31754_v51  ;;  %28552 = vmatprep.subr.bf16.mxu1 %v30533_v7  ;;  %v10352_v51 = vpop.permute.xlu1 %10351 }
0x15ef   :  { %28501 = vmatprep.subr.bf16.mxu0 %v30533_v7  ;;  %26141 = vmatprep.mubr.msk.f32.mxu0 %vm30534_vm2, %v30535_v34 }
0x15f0   :  { %26230 = vmatmul.mubr.f32.vlgmr.msra.gmra.mrb[30].mxu1 %v9924_v46 }
0x15f1   :  { %28554 = vmatpush3.bf16.msra.mxu1 %v31882_v35  ;;  %26240 = vmatprep.mubr.msk.f32.mxu1 %vm30534_vm2, %v30535_v34 }
0x15f2   :  { %28503 = vmatpush3.bf16.msra.mxu0 %v31758_v2  ;;  %28555 = vmatprep.subr.bf16.mxu1 %v30533_v7 }
0x15f3   :  { %28504 = vmatprep.subr.bf16.mxu0 %v30533_v7 }
0x15f5   :  { %28557 = vmatpush3.bf16.msra.mxu1 %v31884_v26  ;;  %26142 = vmatmul.mubr.f32.vlgmr.msra.gmra.mrb[22].mxu0 %v9392_v31 }
0x15f6   :  { %28506 = vmatpush3.bf16.msra.mxu0 %v31760_v20  ;;  %28558 = vmatprep.subr.bf16.mxu1 %v30533_v7 }
0x15f7   :  { %28507 = vmatprep.subr.bf16.mxu0 %v30533_v7  ;;  %26152 = vmatprep.mubr.msk.f32.mxu0 %vm30534_vm2, %v30535_v34 }
0x15f8   :  { %26241 = vmatmul.mubr.f32.vlgmr.msra.gmra.mrb[30].mxu1 %v9922_v0 }
0x15f9   :  { %28560 = vmatpush3.bf16.msra.mxu1 %v31844_v57  ;;  %26251 = vmatprep.mubr.msk.f32.mxu1 %vm30534_vm2, %v30535_v34 }
0x15fa   :  { %28509 = vmatpush3.bf16.msra.mxu0 %v31762_v3  ;;  %28561 = vmatprep.subr.bf16.mxu1 %v30533_v7 }
0x15fb   :  { %28510 = vmatprep.subr.bf16.mxu0 %v30533_v7 }
0x15fd   :  { %28563 = vmatpush3.bf16.msra.mxu1 %v31848_v45  ;;  %26153 = vmatmul.mubr.f32.vlgmr.msra.gmra.mrb[22].mxu0 %v9393_v52 }
0x15fe   :  { %28512 = vmatpush3.bf16.msra.mxu0 %v31737_v13  ;;  %26163 = vmatprep.mubr.msk.f32.mxu0 %vm30534_vm2, %v30535_v34 }
0x15ff   :  { %28513 = vmatprep.subr.bf16.mxu0 %v30533_v7 }
0x1600   :  { %26252 = vmatmul.mubr.f32.vlgmr.msra.gmra.mrb[30].mxu1 %v9922_v0  ;;  %v9300_v0 = vsel %vm2857_vm7, %v31993_v11, 0.0  ;;  %v12062_v11 = vand.u32 4294901760, %v12057_v36 }
0x1602   :  { %28515 = vmatpush3.bf16.msra.mxu0 %v31741_v63  ;;  %v32112_v50 = vpack.c.bf16 %v12065_v49, %v12062_v11 }
0x1603   :  { %28516 = vmatprep.subr.bf16.mxu0 %v30533_v7 }
0x1604   :  { %28661 = vmatprep.subr.bf16.mxu1 %v32112_v50 }
0x1605   :  { %26164 = vmatmul.mubr.f32.vlgmr.msra.gmra.mrb[22].mxu0 %v9394_v14  ;;  %28663 = vmatpush3.bf16.msra.mxu1 %v32112_v50 }
0x1606   :  { %28518 = vmatpush3.bf16.msra.mxu0 %v31764_v4  ;;  %26174 = vmatprep.mubr.msk.f32.mxu0 %vm30534_vm2, %v30535_v34  ;;  %v9822_v4 = vpop.permute.xlu1 %9821 }
0x1607   :  { %28519 = vmatprep.subr.bf16.mxu0 %v30533_v7 }
0x160a   :  { %28521 = vmatpush3.bf16.msra.mxu0 %v31766_v5 }
0x160b   :  { %28522 = vmatprep.subr.bf16.mxu0 %v30533_v7 }
0x160d   :  { %26175 = vmatmul.mubr.f32.vlgmr.msra.gmra.mrb[22].mxu0 %v9392_v31 }
0x160e   :  { %28524 = vmatpush3.bf16.msra.mxu0 %v31737_v13  ;;  %26185 = vmatprep.mubr.msk.f32.mxu0 %vm30534_vm2, %v30535_v34  ;;  %v9313_v13 = vld [vmem:[#allocation3] sm:$0xff] }
0x160f   :  { %28525 = vmatprep.subr.bf16.mxu0 %v30533_v7 }
0x1612   :  { %28527 = vmatpush3.bf16.msra.mxu0 %v31741_v63 }
0x1615   :  { %26186 = vmatmul.mubr.f32.vlgmr.msra.gmra.mrb[22].mxu0 %v9392_v31  ;;  %v10407_v31 = vld [vmem:[%s34069_s10 + $0x28] sm:$0xff] }
0x1616   :  { %v10438_v14 = vand.u32 4294901760, %v10407_v31 }
0x16d3   :  { %v10334_v2 = vpop.f32.mrb[30].mxu1 }
0x16d4   :  { %v10354_v20 = vadd.f32 %v10352_v51, %v10334_v2  ;;  %v26253_v3 = vpop.f32.mrb[31].mxu1  ;;  %v10338_v54 = vadd.f32 %v10334_v2, %v9313_v13  ;;  %v12059_v2 = vld [vmem:[%s34073_s14 + $0x30] sm:$0xff] }
0x16d5   :  { %v10408_v3 = vld [vmem:[%s34069_s10 + $0x30] sm:$0xff] }
0x16d6   :  { %10356 = vrot.lane.b32.xlu0 %v10354_v20, %s30536_s23  ;;  %v23560_v35 = vmul.f32 -1.442695, %v10338_v54  ;;  %v12060_v20 = vld [vmem:[%s34073_s14 + $0x38] sm:$0xff] }
0x16d8   :  { %30155 = vpow2.f32 %v23560_v35  ;;  %v8225_v35 = vsel %vm3928_vm10, %v31852_v25, 0.0  ;;  %v6073_v25 = vsel %vm5007_vm11, %v31623_v23, 0.0 }
0x16e2   :  { %v30156_v26 = vpop.eup %30155 }
0x16e3   :  { %v10342_v63 = vadd.f32 1.0, %v30156_v26 }
0x16e5   :  { %30157 = vrcp.f32 %v10342_v63  ;;  %v32149_v63 = vsub.f32 %v12058_v42, %v12065_v49 }
0x16e8   :  { %v9804_v5 = vpop.f32.mrb[22].mxu0 }
0x16e9   :  { %v9824_v57 = vadd.f32 %v9822_v4, %v9804_v5  ;;  %v26187_v45 = vpop.f32.mrb[23].mxu0  ;;  %v9808_v17 = vadd.f32 %v9804_v5, %v9312_v8  ;;  %v12068_v4 = vand.u32 4294901760, %v12059_v2  ;;  %v12071_v5 = vand.u32 4294901760, %v12060_v20 }
0x16ea   :  { %v10441_v45 = vand.u32 4294901760, %v10408_v3 }
0x16eb   :  { %9826 = vrot.lane.b32.xlu1 %v9824_v57, %s30536_s23  ;;  %v23558_v55 = vmul.f32 -1.442695, %v9808_v17  ;;  %v10409_v57 = vld [vmem:[%s34069_s10 + $0x38] sm:$0xff]  ;;  %v32135_v54 = vpack.c.bf16 %v12071_v5, %v12068_v4  ;;  %v12233_v23 = vsub.f32 %v12060_v20, %v12071_v5  ;;  %v8224_v5 = vsel %vm3929_vm9, %v31872_v9, 0.0 }
0x16ed   :  { %30159 = vpow2.f32 %v23558_v55  ;;  %28665 = vmatprep.subr.bf16.mxu1 %v32135_v54  ;;  %v32153_v55 = vsub.f32 %v10407_v31, %v10438_v14 }
0x16ee   :  { %28667 = vmatpush3.bf16.msra.mxu1 %v32135_v54 }
0x16ef   :  { %v30158_v18 = vpop.eup %30157 }
0x16f0   :  { %v10366_v39 = vsub.f32 1.0, %v30158_v18  ;;  %v10372_v53 = vmul.f32 %v30158_v18, %v31988_v37  ;;  %v10435_v37 = vand.u32 4294901760, %v10406_v58 }
0x16f2   :  { %v32116_v51 = vpack.c.bf16 %v10438_v14, %v10435_v37  ;;  %v32151_v17 = vsub.f32 %v10406_v58, %v10435_v37  ;;  %v6072_v14 = vsel %vm5006_vm12, %v31635_v6, 0.0 }
0x16f4   :  { %28565 = vmatprep.subr.bf16.mxu0 %v32116_v51 }
0x16f5   :  { %28567 = vmatpush3.bf16.msra.mxu0 %v32116_v51 }
0x16f7   :  { %v30160_v10 = vpop.eup %30159 }
0x16f8   :  { %v9812_v33 = vadd.f32 1.0, %v30160_v10  ;;  %v10593_v10 = vand.u32 4294901760, %v32153_v55 }
0x16fa   :  { %30161 = vrcp.f32 %v9812_v33  ;;  %v3917_v33 = vsel %vm2857_vm7, %v31364_v27, 0.0 }
0x1704   :  { %v32066_v43 = vpop.eup %30161 }
0x1705   :  { %v9842_v20 = vmul.f32 %v32066_v43, %v31999_v62  ;;  %v32210_v62 = vpack.c.bf16 %v32153_v55, %v32151_v17 }
0x1748   :  { %v10357_v28 = vpop.permute.xlu0 %10356 }
0x1749   :  { %v10359_v38 = vmul.f32 %v30158_v18, %v10357_v28  ;;  %v12220_v28 = vand.u32 4294901760, %v32149_v63 }
0x174b   :  { %10361 = vrot.lane.b32.xlu0 %v10359_v38, %s30536_s23  ;;  %v10586_v38 = vand.u32 4294901760, %v32151_v17 }
0x175d   :  { %v9827_v44 = vpop.permute.xlu1 %9826 }
0x175e   :  { %v9829_v59 = vmul.f32 %v32066_v43, %v9827_v44 }
0x1760   :  { %9831 = vrot.lane.b32.xlu1 %v9829_v59, %s30536_s23  ;;  %v12221_v59 = vsub.f32 %v32149_v63, %v12220_v28 }
0x1764   :  { %9308 = vrot.lane.b32.xlu1 %v9301_v15, %s30538_s12  ;;  %v12226_v15 = vsub.f32 %v12059_v2, %v12068_v4 }
0x1768   :  { %7156 = vrot.lane.b32.xlu1 %v7149_v30, %s30538_s12  ;;  %v10587_v30 = vsub.f32 %v32151_v17, %v10586_v38 }
0x176c   :  { %5002 = vrot.lane.b32.xlu1 %v4995_v32, %s30538_s12  ;;  %v10594_v32 = vsub.f32 %v32153_v55, %v10593_v10 }
0x176e   :  { %v10595_v27 = vand.u32 4294901760, %v10594_v32  ;;  %v10401_v32 = vld [vmem:[#allocation5 + $0x38] sm:$0xff] }
0x17bd   :  { %v10362_v19 = vpop.permute.xlu0 %10361 }
0x17be   :  { %v10364_v12 = vadd.f32 %v10362_v19, %v9313_v13  ;;  %v10444_v13 = vand.u32 4294901760, %v10409_v57  ;;  %v10599_v19 = vsub.f32 %v10408_v3, %v10441_v45 }
0x17c0   :  { %30163 = vtanh.f32 %v10364_v12  ;;  %v32140_v26 = vpack.c.bf16 %v10444_v13, %v10441_v45  ;;  %v10606_v12 = vsub.f32 %v10409_v57, %v10444_v13  ;;  %v32206_v45 = vpack.c.bf16 %v12233_v23, %v12226_v15 }
0x17c2   :  { %28569 = vmatprep.subr.bf16.mxu0 %v32140_v26 }
0x17c3   :  { %28571 = vmatpush3.bf16.msra.mxu0 %v32140_v26 }
0x17ca   :  { %v30164_v22 = vpop.eup %30163 }
0x17cb   :  { %10368 = vrot.lane.b32.xlu0 %v30164_v22, %s30538_s12 }
0x17d2   :  { %v9832_v16 = vpop.permute.xlu1 %9831 }
0x17d3   :  { %v9834_v56 = vadd.f32 %v9832_v16, %v9312_v8  ;;  %v32147_v8 = vsub.f32 %v12057_v36, %v12062_v11  ;;  %v12222_v16 = vand.u32 4294901760, %v12221_v59  ;;  %v9836_v11 = vsub.f32 1.0, %v32066_v43 }
0x17d4   :  { %v32212_v43 = vpack.c.bf16 %v10606_v12, %v10599_v19 }
0x17d5   :  { %30165 = vtanh.f32 %v9834_v56  ;;  %v12213_v18 = vand.u32 4294901760, %v32147_v8  ;;  %v12227_v56 = vand.u32 4294901760, %v12226_v15  ;;  %v32193_v2 = vpack.c.bf16 %v32149_v63, %v32147_v8 }
0x17d6   :  { %v9309_v47 = vpop.permute.xlu1 %9308 }
0x17d7   :  { %9311 = vst.msk [vmem:[#allocation5 + $0x8] sm:$0xff] %vm1794_vm6, %v9309_v47  ;;  %v12214_v44 = vsub.f32 %v32147_v8, %v12213_v18  ;;  %v12234_v47 = vand.u32 4294901760, %v12233_v23  ;;  %v32214_v9 = vpack.c.bf16 %v12220_v28, %v12213_v18 }
0x17d9   :  { %v12215_v22 = vand.u32 4294901760, %v12214_v44  ;;  %v32216_v13 = vpack.c.bf16 %v12234_v47, %v12227_v56 }
0x17da   :  { %v7157_v61 = vpop.permute.xlu1 %7156 }
0x17db   :  { %7159 = vst.msk [vmem:[#allocation5 + $0x18] sm:$0xff] %vm1794_vm6, %v7157_v61  ;;  %v10588_v61 = vand.u32 4294901760, %v10587_v30 }
0x17de   :  { %v5003_v60 = vpop.permute.xlu1 %5002  ;;  %v10395_v63 = vld [vmem:[#allocation5 + $0x8] sm:$0xff] }
0x17df   :  { %v30166_v40 = vpop.eup %30165  ;;  %5005 = vst.msk [vmem:[#allocation5 + $0x28] sm:$0xff] %vm1794_vm6, %v5003_v60  ;;  %v10600_v60 = vand.u32 4294901760, %v10599_v19 }
0x17e0   :  { %9838 = vrot.lane.b32.xlu1 %v30166_v40, %s30538_s12  ;;  %v10607_v40 = vand.u32 4294901760, %v10606_v12 }
0x17e2   :  { %v10608_v36 = vsub.f32 %v10606_v12, %v10607_v40  ;;  %v32220_v8 = vpack.c.bf16 %v10607_v40, %v10600_v60  ;;  %v10397_v44 = vld [vmem:[#allocation5 + $0x18] sm:$0xff] }
0x17e3   :  { %v10420_v55 = vsel %vm1794_vm6, %v10397_v44, 0 }
0x17e4   :  { %4997 = vrot.lane.b32.xlu1 %v4994_v21, %s30538_s12  ;;  %v32171_v21 = vpack.c.bf16 %v12222_v16, %v12215_v22  ;;  %v10609_v31 = vand.u32 4294901760, %v10608_v36 }
0x17e6   :  { %28669 = vmatprep.subr.bf16.mxu1 %v32171_v21  ;;  %v10399_v18 = vld [vmem:[#allocation5 + $0x28] sm:$0xff] }
0x17e8   :  { %7151 = vrot.lane.b32.xlu1 %v7148_v24, %s30538_s12  ;;  %v12228_v24 = vsub.f32 %v12226_v15, %v12227_v56 }
0x17ea   :  { %v12229_v42 = vand.u32 4294901760, %v12228_v24 }
0x17ec   :  { %9303 = vrot.lane.b32.xlu1 %v9300_v0, %s30538_s12  ;;  %v12235_v0 = vsub.f32 %v12233_v23, %v12234_v47  ;;  %v10426_v23 = vsel %vm1794_vm6, %v10399_v18, 0 }
0x17ed   :  { %v32244_v16 = vand.u32 4294901760, %v10426_v23 }
0x17ee   :  { %v12236_v58 = vand.u32 4294901760, %v12235_v0 }
0x17f0   :  { %v32182_v37 = vpack.c.bf16 %v12236_v58, %v12229_v42 }
0x183d   :  { %v10369_v46 = vpop.permute.xlu0 %10368 }
0x183e   :  { %v10371_v41 = vmul.f32 %v10369_v46, %v10366_v39  ;;  %v3916_v46 = vsel %vm2856_vm8, %v31383_v29, 0.0 }
0x1840   :  { %v10373_v52 = vadd.f32 %v10372_v53, %v10371_v41  ;;  %v32176_v53 = vpack.c.bf16 %v10595_v27, %v10588_v61  ;;  %v10601_v41 = vsub.f32 %v10599_v19, %v10600_v60  ;;  %v10432_v27 = vsel %vm1794_vm6, %v10401_v32, 0 }
0x1842   :  { %v10375_v48 = vsel %vm1786_vm5, %v10373_v52, 0.0  ;;  %28573 = vmatprep.subr.bf16.mxu0 %v32176_v53  ;;  %v10602_v49 = vand.u32 4294901760, %v10601_v41  ;;  %v32265_v41 = vand.u32 4294901760, %v10432_v27 }
0x1843   :  { %10382 = vrot.lane.b32.xlu0 %v10375_v48, %s30538_s12 }
0x1844   :  { %v32187_v48 = vpack.c.bf16 %v10609_v31, %v10602_v49 }
0x1847   :  { %8232 = vrot.lane.b32.xlu0 %v8225_v35, %s30538_s12  ;;  %v32218_v35 = vpack.c.bf16 %v10593_v10, %v10586_v38  ;;  %v32231_v38 = vand.u32 4294901760, %v10420_v55 }
0x1849   :  { %v32242_v22 = vsub.f32 %v10420_v55, %v32231_v38 }
0x184b   :  { %6080 = vrot.lane.b32.xlu0 %v6073_v25, %s30538_s12 }
0x184f   :  { %3924 = vrot.lane.b32.xlu0 %v3917_v33, %s30538_s12  ;;  %v10414_v33 = vsel %vm1794_vm6, %v10395_v63, 0 }
0x1850   :  { %v32224_v59 = vand.u32 4294901760, %v10414_v33 }
0x1852   :  { %v9839_v39 = vpop.permute.xlu1 %9838  ;;  %v32229_v28 = vsub.f32 %v10414_v33, %v32224_v59 }
0x1853   :  { %3919 = vrot.lane.b32.xlu0 %v3916_v46, %s30538_s12  ;;  %v9841_v52 = vmul.f32 %v9839_v39, %v9836_v11  ;;  %v32260_v39 = vand.u32 4294901760, %v32242_v22  ;;  %v32263_v46 = vsub.f32 %v10426_v23, %v32244_v16 }
0x1854   :  { %v32239_v12 = vand.u32 4294901760, %v32229_v28 }
0x1855   :  { %v9843_v3 = vadd.f32 %v9842_v20, %v9841_v52  ;;  %v10536_v20 = vsub.f32 %v32242_v22, %v32260_v39 }
0x1856   :  { %v4998_v29 = vpop.permute.xlu1 %4997  ;;  %v10516_v0 = vsub.f32 %v32229_v28, %v32239_v12 }
0x1857   :  { %5000 = vst.msk [vmem:[#allocation4 + $0x10] sm:$0xff] %vm1794_vm6, %v4998_v29  ;;  %6075 = vrot.lane.b32.xlu0 %v6072_v14, %s30538_s12  ;;  %v10374_v57 = vsel %vm1787_vm4, %v9843_v3, 0.0  ;;  %v32282_v3 = vand.u32 4294901760, %v32263_v46  ;;  %v10537_v55 = vand.u32 4294901760, %v10536_v20 }
0x1858   :  { %v10517_v14 = vand.u32 4294901760, %v10516_v0  ;;  %v12055_v0 = vld [vmem:[%s34073_s14 + $0x10] sm:$0xff] }
0x1859   :  { %v10556_v18 = vsub.f32 %v32263_v46, %v32282_v3 }
0x185a   :  { %v7152_v4 = vpop.permute.xlu1 %7151 }
0x185b   :  { %7154 = vst.msk [vmem:[#allocation4 + $0x20] sm:$0xff] %vm1794_vm6, %v7152_v4  ;;  %8227 = vrot.lane.b32.xlu0 %v8224_v5, %s30538_s12  ;;  %v32285_v4 = vsub.f32 %v10432_v27, %v32265_v41  ;;  %v10557_v32 = vand.u32 4294901760, %v10556_v18 }
0x185e   :  { %v9304_v6 = vpop.permute.xlu1 %9303 }
0x185f   :  { %9306 = vst.msk [vmem:[#allocation4 + $0x30] sm:$0xff] %vm1794_vm6, %v9304_v6  ;;  %10377 = vrot.lane.b32.xlu0 %v10374_v57, %s30538_s12 }
0x18b5   :  { %v10383_v25 = vpop.permute.xlu0 %10382 }
0x18b6   :  { %10385 = vst.msk [vmem:[#allocation5] sm:$0xff] %vm1794_vm6, %v10383_v25 }
0x18b9   :  { %v8233_v17 = vpop.permute.xlu0 %8232 }
0x18ba   :  { %8235 = vst.msk [vmem:[#allocation5 + $0x10] sm:$0xff] %vm1794_vm6, %v8233_v17 }
0x18bd   :  { %v6081_v10 = vpop.permute.xlu0 %6080  ;;  %v10394_v15 = vld [vmem:[#allocation5] sm:$0xff] }
0x18be   :  { %6083 = vst.msk [vmem:[#allocation5 + $0x20] sm:$0xff] %vm1794_vm6, %v6081_v10  ;;  %v10411_v30 = vsel %vm1794_vm6, %v10394_v15, 0  ;;  %v32305_v10 = vand.u32 4294901760, %v32285_v4 }
0x18bf   :  { %v32236_v19 = vand.u32 4294901760, %v10411_v30 }
0x18c1   :  { %v3925_v56 = vpop.permute.xlu0 %3924  ;;  %v32247_v47 = vsub.f32 %v10411_v30, %v32236_v19  ;;  %v10396_v61 = vld [vmem:[#allocation5 + $0x10] sm:$0xff] }
0x18c2   :  { %3927 = vst.msk [vmem:[#allocation5 + $0x30] sm:$0xff] %vm1794_vm6, %v3925_v56  ;;  %v10417_v60 = vsel %vm1794_vm6, %v10396_v61, 0  ;;  %v10576_v56 = vsub.f32 %v32285_v4, %v32305_v10 }
0x18c3   :  { %v32253_v40 = vand.u32 4294901760, %v32247_v47  ;;  %v32255_v24 = vand.u32 4294901760, %v10417_v60 }
0x18c5   :  { %v3920_v36 = vpop.permute.xlu0 %3919  ;;  %v10506_v42 = vsub.f32 %v32247_v47, %v32253_v40  ;;  %v32270_v58 = vsub.f32 %v10417_v60, %v32255_v24  ;;  %v10398_v11 = vld [vmem:[#allocation5 + $0x20] sm:$0xff] }
0x18c6   :  { %3922 = vst.msk [vmem:[#allocation4 + $0x8] sm:$0xff] %vm1794_vm6, %v3920_v36  ;;  %v10423_v49 = vsel %vm1794_vm6, %v10398_v11, 0  ;;  %v10388_v11 = vld [vmem:[#allocation4 + $0x10] sm:$0xff] }
0x18c7   :  { %v10507_v31 = vand.u32 4294901760, %v10506_v42  ;;  %v32275_v52 = vand.u32 4294901760, %v32270_v58  ;;  %v32277_v29 = vand.u32 4294901760, %v10423_v49  ;;  %v10404_v42 = vld [vmem:[%s34069_s10 + $0x10] sm:$0xff] }
0x18c9   :  { %26262 = vmatprep.mubr.f32.mxu0 %v10507_v31  ;;  %26502 = vmatprep.mubr.f32.mxu1 %v10507_v31  ;;  %v6076_v5 = vpop.permute.xlu0 %6075  ;;  %v10526_v6 = vsub.f32 %v32270_v58, %v32275_v52  ;;  %v32290_v57 = vsub.f32 %v10423_v49, %v32277_v29  ;;  %v10400_v63 = vld [vmem:[#allocation5 + $0x30] sm:$0xff]  ;;  %v12854_v49 = vand.u32 4294901760, %v12055_v0 }
0x18ca   :  { %6078 = vst.msk [vmem:[#allocation4 + $0x18] sm:$0xff] %vm1794_vm6, %v6076_v5  ;;  %26263 = vmatmul.mubr.f32.vlgmr.msra.gmra.mrb[24].mxu0 %v10517_v14  ;;  %26503 = vmatmul.mubr.f32.vlgmr.msra.gmra.mrb[32].mxu1 %v10517_v14  ;;  %v10429_v25 = vsel %vm1794_vm6, %v10400_v63, 0  ;;  %v11251_v5 = vand.u32 4294901760, %v10404_v42  ;;  %v11227_v63 = vsel %vm1794_vm6, %v10388_v11, 0 }
0x18cb   :  { %28671 = vmatpush3.bf16.msra.mxu1 %v32171_v21  ;;  %v10527_v33 = vand.u32 4294901760, %v10526_v6  ;;  %v32296_v44 = vand.u32 4294901760, %v32290_v57  ;;  %28575 = vmatpush3.bf16.msra.mxu0 %v32176_v53  ;;  %v32299_v17 = vand.u32 4294901760, %v10429_v25 }
0x18cc   :  { %28673 = vmatprep.subr.bf16.mxu1 %v32182_v37  ;;  %28577 = vmatprep.subr.bf16.mxu0 %v32187_v48 }
0x18cd   :  { %v8228_v21 = vpop.permute.xlu0 %8227  ;;  %26265 = vmatprep.mubr.f32.mxu0 %v10527_v33  ;;  %26505 = vmatprep.mubr.f32.mxu1 %v10527_v33  ;;  %v10546_v15 = vsub.f32 %v32290_v57, %v32296_v44  ;;  %v32311_v53 = vsub.f32 %v10429_v25, %v32299_v17  ;;  %v10390_v33 = vld [vmem:[#allocation4 + $0x20] sm:$0xff] }
0x18ce   :  { %8230 = vst.msk [vmem:[#allocation4 + $0x28] sm:$0xff] %vm1794_vm6, %v8228_v21  ;;  %26266 = vmatmul.mubr.f32.gmra.mrb[26].mxu0 %v10537_v55  ;;  %26506 = vmatmul.mubr.f32.gmra.mrb[34].mxu1 %v10537_v55 }
0x18cf   :  { %v10547_v23 = vand.u32 4294901760, %v10546_v15  ;;  %28675 = vmatpush3.bf16.msra.mxu1 %v32182_v37  ;;  %v32316_v30 = vand.u32 4294901760, %v32311_v53  ;;  %28579 = vmatpush3.bf16.msra.mxu0 %v32187_v48  ;;  %v10577_v48 = vand.u32 4294901760, %v10576_v56 }
0x18d0   :  { %28677 = vmatprep.subr.bf16.mxu1 %v32193_v2  ;;  %28581 = vmatprep.subr.bf16.mxu0 %v32210_v62 }
0x18d1   :  { %26268 = vmatprep.mubr.f32.mxu0 %v10547_v23  ;;  %26508 = vmatprep.mubr.f32.mxu1 %v10547_v23  ;;  %v10378_v61 = vpop.permute.xlu0 %10377  ;;  %v10566_v27 = vsub.f32 %v32311_v53, %v32316_v30  ;;  %v10389_v25 = vld [vmem:[#allocation4 + $0x18] sm:$0xff] }
0x18d2   :  { %10380 = vst.msk [vmem:[#allocation4 + $0x38] sm:$0xff] %vm1794_vm6, %v10378_v61  ;;  %26269 = vmatmul.mubr.f32.gmra.mrb[28].mxu0 %v10557_v32  ;;  %26509 = vmatmul.mubr.f32.gmra.mrb[36].mxu1 %v10557_v32  ;;  %v11233_v61 = vsel %vm1794_vm6, %v10390_v33, 0 }
0x18d3   :  { %v10567_v37 = vand.u32 4294901760, %v10566_v27 }
0x18d5   :  { %26271 = vmatprep.mubr.f32.mxu0 %v10567_v37  ;;  %26511 = vmatprep.mubr.f32.mxu1 %v10567_v37  ;;  %v10391_v27 = vld [vmem:[#allocation4 + $0x28] sm:$0xff] }
0x18d6   :  { %26272 = vmatmul.mubr.f32.gmra.mrb[30].mxu0 %v10577_v48  ;;  %26512 = vmatmul.mubr.f32.gmra.mrb[38].mxu1 %v10577_v48 }
0x18d7   :  { %26282 = vmatprep.mubr.f32.mxu0 %v32236_v19  ;;  %26522 = vmatprep.mubr.f32.mxu1 %v32236_v19 }
0x18da   :  { %26283 = vmatmul.mubr.f32.vlgmr.msra.gmra.mrb[24].mxu0 %v32224_v59  ;;  %26523 = vmatmul.mubr.f32.vlgmr.msra.gmra.mrb[32].mxu1 %v32224_v59 }
0x18db   :  { %28679 = vmatpush3.bf16.msra.mxu1 %v32193_v2  ;;  %26285 = vmatprep.mubr.f32.mxu0 %v32255_v24  ;;  %v12053_v2 = vld [vmem:[%s34073_s14] sm:$0xff] }
0x18dc   :  { %26525 = vmatprep.mubr.f32.mxu1 %v32255_v24  ;;  %28681 = vmatprep.subr.bf16.mxu1 %v32206_v45 }
0x18dd   :  { %28583 = vmatpush3.bf16.msra.mxu0 %v32210_v62  ;;  %v12848_v62 = vand.u32 4294901760, %v12053_v2 }
0x18de   :  { %26286 = vmatmul.mubr.f32.gmra.mrb[26].mxu0 %v32231_v38  ;;  %26526 = vmatmul.mubr.f32.gmra.mrb[34].mxu1 %v32231_v38 }
0x18df   :  { %26288 = vmatprep.mubr.f32.mxu0 %v32277_v29  ;;  %26528 = vmatprep.mubr.f32.mxu1 %v32277_v29 }
0x18e0   :  { %28683 = vmatpush3.bf16.msra.mxu1 %v32206_v45  ;;  %28585 = vmatprep.subr.bf16.mxu0 %v32212_v43  ;;  %v12054_v45 = vld [vmem:[%s34073_s14 + $0x8] sm:$0xff] }
0x18e1   :  { %28587 = vmatpush3.bf16.msra.mxu0 %v32212_v43  ;;  %28685 = vmatprep.subr.bf16.mxu1 %v32112_v50  ;;  %v12851_v43 = vand.u32 4294901760, %v12054_v45 }
0x18e2   :  { %26289 = vmatmul.mubr.f32.gmra.mrb[28].mxu0 %v32244_v16  ;;  %26529 = vmatmul.mubr.f32.gmra.mrb[36].mxu1 %v32244_v16 }
0x18e3   :  { %26291 = vmatprep.mubr.f32.mxu0 %v32299_v17  ;;  %26531 = vmatprep.mubr.f32.mxu1 %v32299_v17 }
0x18e4   :  { %28589 = vmatprep.subr.bf16.mxu0 %v32116_v51 }
0x18e6   :  { %26292 = vmatmul.mubr.f32.gmra.mrb[30].mxu0 %v32265_v41  ;;  %26532 = vmatmul.mubr.f32.gmra.mrb[38].mxu1 %v32265_v41 }
0x18e7   :  { %26302 = vmatprep.mubr.f32.mxu0 %v32247_v47  ;;  %26542 = vmatprep.mubr.f32.mxu1 %v32247_v47  ;;  %v32423_v47 = vsub.f32 %v12054_v45, %v12851_v43  ;;  %v32507_v45 = vsub.f32 %v10404_v42, %v11251_v5 }
0x18ea   :  { %26303 = vmatmul.mubr.f32.vlgmr.msra.gmra.mrb[24].mxu0 %v32229_v28  ;;  %26543 = vmatmul.mubr.f32.vlgmr.msra.gmra.mrb[32].mxu1 %v32229_v28  ;;  %v10386_v28 = vld [vmem:[#allocation4] sm:$0xff] }
0x18eb   :  { %28687 = vmatpush3.bf16.msra.mxu1 %v32112_v50  ;;  %26305 = vmatprep.mubr.f32.mxu0 %v32270_v58 }
0x18ec   :  { %26545 = vmatprep.mubr.f32.mxu1 %v32270_v58  ;;  %28689 = vmatprep.subr.bf16.mxu1 %v32135_v54  ;;  %v10405_v58 = vld [vmem:[%s34069_s10 + $0x18] sm:$0xff] }
0x18ed   :  { %28591 = vmatpush3.bf16.msra.mxu0 %v32116_v51  ;;  %v11254_v6 = vand.u32 4294901760, %v10405_v58 }
0x18ee   :  { %26306 = vmatmul.mubr.f32.gmra.mrb[26].mxu0 %v32242_v22  ;;  %26546 = vmatmul.mubr.f32.gmra.mrb[34].mxu1 %v32242_v22  ;;  %v32421_v22 = vsub.f32 %v12053_v2, %v12848_v62  ;;  %v10392_v2 = vld [vmem:[#allocation4 + $0x30] sm:$0xff] }
0x18ef   :  { %26308 = vmatprep.mubr.f32.mxu0 %v32290_v57  ;;  %26548 = vmatprep.mubr.f32.mxu1 %v32290_v57  ;;  %v32497_v32 = vpack.c.bf16 %v11254_v6, %v11251_v5 }
0x18f0   :  { %28691 = vmatpush3.bf16.msra.mxu1 %v32135_v54  ;;  %28593 = vmatprep.subr.bf16.mxu0 %v32140_v26 }
0x18f1   :  { %28595 = vmatpush3.bf16.msra.mxu0 %v32140_v26  ;;  %28693 = vmatprep.subr.bf16.mxu1 %v32214_v9 }
0x18f2   :  { %26309 = vmatmul.mubr.f32.gmra.mrb[28].mxu0 %v32263_v46  ;;  %26549 = vmatmul.mubr.f32.gmra.mrb[36].mxu1 %v32263_v46  ;;  %v13006_v46 = vand.u32 4294901760, %v32423_v47 }
0x18f3   :  { %26311 = vmatprep.mubr.f32.mxu0 %v32311_v53  ;;  %26551 = vmatprep.mubr.f32.mxu1 %v32311_v53 }
0x18f4   :  { %28597 = vmatprep.subr.bf16.mxu0 %v32218_v35 }
0x18f6   :  { %26312 = vmatmul.mubr.f32.gmra.mrb[30].mxu0 %v32285_v4  ;;  %26552 = vmatmul.mubr.f32.gmra.mrb[38].mxu1 %v32285_v4 }
0x18f7   :  { %26322 = vmatprep.mubr.f32.mxu0 %v32253_v40  ;;  %26562 = vmatprep.mubr.f32.mxu1 %v32253_v40 }
0x18fa   :  { %26323 = vmatmul.mubr.f32.vlgmr.msra.gmra.mrb[24].mxu0 %v32239_v12  ;;  %26563 = vmatmul.mubr.f32.vlgmr.msra.gmra.mrb[32].mxu1 %v32239_v12  ;;  %v32419_v12 = vpack.c.bf16 %v12851_v43, %v12848_v62 }
0x18fb   :  { %28695 = vmatpush3.bf16.msra.mxu1 %v32214_v9  ;;  %26325 = vmatprep.mubr.f32.mxu0 %v32275_v52  ;;  %v10402_v9 = vld [vmem:[%s34069_s10] sm:$0xff] }
0x18fc   :  { %26565 = vmatprep.mubr.f32.mxu1 %v32275_v52  ;;  %28697 = vmatprep.subr.bf16.mxu1 %v32216_v13 }
0x18fd   :  { %28599 = vmatpush3.bf16.msra.mxu0 %v32218_v35  ;;  %v11245_v35 = vand.u32 4294901760, %v10402_v9 }
0x18fe   :  { %26326 = vmatmul.mubr.f32.gmra.mrb[26].mxu0 %v32260_v39  ;;  %26566 = vmatmul.mubr.f32.gmra.mrb[34].mxu1 %v32260_v39  ;;  %v12999_v39 = vand.u32 4294901760, %v32421_v22 }
0x18ff   :  { %26328 = vmatprep.mubr.f32.mxu0 %v32296_v44  ;;  %26568 = vmatprep.mubr.f32.mxu1 %v32296_v44  ;;  %v32434_v60 = vsub.f32 %v10402_v9, %v11245_v35  ;;  %v32478_v44 = vsub.f32 %v12055_v0, %v12854_v49  ;;  %v11239_v0 = vsel %vm1794_vm6, %v10392_v2, 0 }
0x1900   :  { %28699 = vmatpush3.bf16.msra.mxu1 %v32216_v13  ;;  %28601 = vmatprep.subr.bf16.mxu0 %v32220_v8  ;;  %v10403_v13 = vld [vmem:[%s34069_s10 + $0x8] sm:$0xff]  ;;  %v13000_v20 = vsub.f32 %v32421_v22, %v12999_v39  ;;  %s34110_s10 = sld [smem:[#allocation39_spill]] }
0x1901   :  { %28603 = vmatpush3.bf16.msra.mxu0 %v32220_v8  ;;  %28701 = vmatprep.subr.bf16.mxu1 %v32112_v50  ;;  %v11248_v8 = vand.u32 4294901760, %v10403_v13  ;;  %v11396_v52 = vand.u32 4294901760, %v32434_v60  ;;  %v13013_v37 = vand.u32 4294901760, %v32478_v44 }
0x1902   :  { %26329 = vmatmul.mubr.f32.gmra.mrb[28].mxu0 %v32282_v3  ;;  %26569 = vmatmul.mubr.f32.gmra.mrb[36].mxu1 %v32282_v3  ;;  %v13007_v3 = vsub.f32 %v32423_v47, %v13006_v46  ;;  %v13001_v53 = vand.u32 4294901760, %v13000_v20 }
0x1903   :  { %26331 = vmatprep.mubr.f32.mxu0 %v32316_v30  ;;  %26571 = vmatprep.mubr.f32.mxu1 %v32316_v30  ;;  %v32436_v40 = vsub.f32 %v10403_v13, %v11248_v8  ;;  %v11397_v21 = vsub.f32 %v32434_v60, %v11396_v52  ;;  %v11230_v30 = vsel %vm1794_vm6, %v10389_v25, 0 }
0x1904   :  { %28605 = vmatprep.subr.bf16.mxu0 %v32116_v51  ;;  %v13008_v23 = vand.u32 4294901760, %v13007_v3  ;;  %v32516_v43 = vand.u32 4294901760, %v11230_v30 }
0x1905   :  { %v11403_v14 = vand.u32 4294901760, %v32436_v40  ;;  %v11398_v9 = vand.u32 4294901760, %v11397_v21 }
0x1906   :  { %26332 = vmatmul.mubr.f32.gmra.mrb[30].mxu0 %v32305_v10  ;;  %26572 = vmatmul.mubr.f32.gmra.mrb[38].mxu1 %v32305_v10 }
0x1907   :  { %26342 = vmatprep.mubr.f32.mxu0 %v32236_v19  ;;  %26582 = vmatprep.mubr.f32.mxu1 %v32236_v19  ;;  %v11404_v15 = vsub.f32 %v32436_v40, %v11403_v14 }
0x1909   :  { %v11405_v13 = vand.u32 4294901760, %v11404_v15 }
0x190a   :  { %26343 = vmatmul.mubr.f32.vlgmr.msra.gmra.mrb[24].mxu0 %v32224_v59  ;;  %26583 = vmatmul.mubr.f32.vlgmr.msra.gmra.mrb[32].mxu1 %v32224_v59 }
0x190b   :  { %28703 = vmatpush3.bf16.msra.mxu1 %v32112_v50  ;;  %26345 = vmatprep.mubr.f32.mxu0 %v32255_v24  ;;  %v11221_v50 = vsel %vm1794_vm6, %v10386_v28, 0  ;;  %v32522_v28 = vand.u32 4294901760, %v11233_v61 }
0x190c   :  { %26585 = vmatprep.mubr.f32.mxu1 %v32255_v24  ;;  %28705 = vmatprep.subr.bf16.mxu1 %v32135_v54  ;;  %v32450_v36 = vand.u32 4294901760, %v11221_v50 }
0x190d   :  { %28607 = vmatpush3.bf16.msra.mxu0 %v32116_v51  ;;  %v32432_v51 = vpack.c.bf16 %v11248_v8, %v11245_v35  ;;  %v28716_v35 = vpack.c.bf16 %v13008_v23, %v13001_v53  ;;  %v32555_v3 = vsub.f32 %v11233_v61, %v32522_v28 }
0x190e   :  { %26346 = vmatmul.mubr.f32.gmra.mrb[26].mxu0 %v32231_v38  ;;  %26586 = vmatmul.mubr.f32.gmra.mrb[34].mxu1 %v32231_v38  ;;  %v32473_v57 = vsub.f32 %v11221_v50, %v32450_v36  ;;  %v11236_v50 = vsel %vm1794_vm6, %v10391_v27, 0 }
0x190f   :  { %26348 = vmatprep.mubr.f32.mxu0 %v32277_v29  ;;  %26588 = vmatprep.mubr.f32.mxu1 %v32277_v29 }
0x1910   :  { %28707 = vmatpush3.bf16.msra.mxu1 %v32135_v54  ;;  %28609 = vmatprep.subr.bf16.mxu0 %v32140_v26  ;;  %v12056_v54 = vld [vmem:[%s34073_s14 + $0x18] sm:$0xff]  ;;  %v32500_v56 = vand.u32 4294901760, %v32473_v57 }
0x1911   :  { %28611 = vmatpush3.bf16.msra.mxu0 %v32140_v26  ;;  %28709 = vmatprep.subr.bf16.mxu1 %v32419_v12  ;;  %v10387_v26 = vld [vmem:[#allocation4 + $0x8] sm:$0xff]  ;;  %v12857_v31 = vand.u32 4294901760, %v12056_v54 }
0x1912   :  { %26349 = vmatmul.mubr.f32.gmra.mrb[28].mxu0 %v32244_v16  ;;  %26589 = vmatmul.mubr.f32.gmra.mrb[36].mxu1 %v32244_v16  ;;  %v11224_v4 = vsel %vm1794_vm6, %v10387_v26, 0  ;;  %v13014_v26 = vsub.f32 %v32478_v44, %v13013_v37 }
0x1913   :  { %26351 = vmatprep.mubr.f32.mxu0 %v32299_v17  ;;  %26591 = vmatprep.mubr.f32.mxu1 %v32299_v17  ;;  %v32480_v55 = vsub.f32 %v12056_v54, %v12857_v31  ;;  %v32482_v18 = vpack.c.bf16 %v12857_v31, %v12854_v49  ;;  %v32484_v10 = vand.u32 4294901760, %v11224_v4  ;;  %v10393_v54 = vld [vmem:[#allocation4 + $0x38] sm:$0xff]  ;;  %v32548_v49 = vand.u32 4294901760, %v11236_v50 }
0x1914   :  { %28613 = vmatprep.subr.bf16.mxu0 %v32432_v51  ;;  %v28620_v31 = vpack.c.bf16 %v11405_v13, %v11398_v9  ;;  %v11242_v5 = vsel %vm1794_vm6, %v10393_v54, 0 }
0x1915   :  { %v13020_v48 = vand.u32 4294901760, %v32480_v55  ;;  %v32514_v62 = vsub.f32 %v11224_v4, %v32484_v10  ;;  %v32557_v4 = vand.u32 4294901760, %v11239_v0 }
0x1916   :  { %26352 = vmatmul.mubr.f32.gmra.mrb[30].mxu0 %v32265_v41  ;;  %26592 = vmatmul.mubr.f32.gmra.mrb[38].mxu1 %v32265_v41 }
0x1917   :  { %26362 = vmatprep.mubr.f32.mxu0 %v32236_v19  ;;  %26602 = vmatprep.mubr.f32.mxu1 %v32236_v19  ;;  %v32492_v19 = vand.u32 4294901760, %v11227_v63  ;;  %v13021_v42 = vsub.f32 %v32480_v55, %v13020_v48  ;;  %v32543_v11 = vand.u32 4294901760, %v32514_v62  ;;  %v32586_v61 = vsub.f32 %v11239_v0, %v32557_v4 }
0x1919   :  { %v32520_v8 = vsub.f32 %v11227_v63, %v32492_v19  ;;  %v13022_v63 = vand.u32 4294901760, %v13021_v42  ;;  %v11326_v21 = vsub.f32 %v32514_v62, %v32543_v11 }
0x191a   :  { %26363 = vmatmul.mubr.f32.vlgmr.msra.gmra.mrb[24].mxu0 %v32224_v59  ;;  %26603 = vmatmul.mubr.f32.vlgmr.msra.gmra.mrb[32].mxu1 %v32224_v59  ;;  %v32509_v59 = vsub.f32 %v10405_v58, %v11254_v6  ;;  %v13015_v6 = vand.u32 4294901760, %v13014_v26 }
0x191b   :  { %28711 = vmatpush3.bf16.msra.mxu1 %v32419_v12  ;;  %26365 = vmatprep.mubr.f32.mxu0 %v32255_v24  ;;  %v32552_v20 = vand.u32 4294901760, %v32520_v8  ;;  %v11327_v13 = vand.u32 4294901760, %v11326_v21  ;;  %v28724_v21 = vpack.c.bf16 %v32423_v47, %v32421_v22  ;;  %v28644_v22 = vpack.c.bf16 %v11403_v14, %v11396_v52 }
0x191c   :  { %26605 = vmatprep.mubr.f32.mxu1 %v32255_v24  ;;  %28713 = vmatprep.subr.bf16.mxu1 %v32482_v18  ;;  %v11316_v24 = vsub.f32 %v32473_v57, %v32500_v56  ;;  %v11417_v58 = vand.u32 4294901760, %v32509_v59  ;;  %v28720_v27 = vpack.c.bf16 %v13022_v63, %v13015_v6  ;;  %v28744_v47 = vpack.c.bf16 %v13020_v48, %v13013_v37 }
0x191d   :  { %28615 = vmatpush3.bf16.msra.mxu0 %v32432_v51  ;;  %v11336_v23 = vsub.f32 %v32520_v8, %v32552_v20 }
0x191e   :  { %26366 = vmatmul.mubr.f32.gmra.mrb[26].mxu0 %v32231_v38  ;;  %26606 = vmatmul.mubr.f32.gmra.mrb[34].mxu1 %v32231_v38  ;;  %v11410_v38 = vand.u32 4294901760, %v32507_v45  ;;  %v11418_v33 = vsub.f32 %v32509_v59, %v11417_v58  ;;  %v11317_v53 = vand.u32 4294901760, %v11316_v24 }
0x191f   :  { %26368 = vmatprep.mubr.f32.mxu0 %v32277_v29  ;;  %26608 = vmatprep.mubr.f32.mxu1 %v32277_v29  ;;  %v32546_v29 = vsub.f32 %v11230_v30, %v32516_v43  ;;  %v32583_v30 = vand.u32 4294901760, %v32555_v3  ;;  %v11337_v0 = vand.u32 4294901760, %v11336_v23  ;;  %v28628_v23 = vpack.c.bf16 %v32436_v40, %v32434_v60  ;;  %v14183_v40 = vld [vmem:[%s34074_s15] sm:$0xff] }
0x1920   :  { %28715 = vmatpush3.bf16.msra.mxu1 %v32482_v18  ;;  %28617 = vmatprep.subr.bf16.mxu0 %v32497_v32  ;;  %v11411_v25 = vsub.f32 %v32507_v45, %v11410_v38  ;;  %v11419_v9 = vand.u32 4294901760, %v11418_v33  ;;  %v28648_v60 = vpack.c.bf16 %v11417_v58, %v11410_v38 }
0x1921   :  { %28619 = vmatpush3.bf16.msra.mxu0 %v32497_v32  ;;  %28717 = vmatprep.subr.bf16.mxu1 %v28716_v35  ;;  %v32573_v15 = vand.u32 4294901760, %v32546_v29  ;;  %v11356_v26 = vsub.f32 %v32555_v3, %v32583_v30 }
0x1922   :  { %26369 = vmatmul.mubr.f32.gmra.mrb[28].mxu0 %v32244_v16  ;;  %26609 = vmatmul.mubr.f32.gmra.mrb[36].mxu1 %v32244_v16  ;;  %v32576_v16 = vsub.f32 %v11236_v50, %v32548_v49  ;;  %v11412_v2 = vand.u32 4294901760, %v11411_v25 }
0x1923   :  { %26371 = vmatprep.mubr.f32.mxu0 %v32299_v17  ;;  %26611 = vmatprep.mubr.f32.mxu1 %v32299_v17  ;;  %v32578_v17 = vand.u32 4294901760, %v11242_v5  ;;  %v11346_v50 = vsub.f32 %v32546_v29, %v32573_v15  ;;  %v11357_v25 = vand.u32 4294901760, %v11356_v26 }
0x1924   :  { %28621 = vmatprep.subr.bf16.mxu0 %v28620_v31  ;;  %v32593_v24 = vand.u32 4294901760, %v32576_v16  ;;  %v28624_v63 = vpack.c.bf16 %v11419_v9, %v11412_v2  ;;  %v23565_v9 = vld [vmem:[#allocation20] ss:$0 sm:$0xff] }
0x1925   :  { %v32596_v54 = vsub.f32 %v11242_v5, %v32578_v17  ;;  %v11347_v42 = vand.u32 4294901760, %v11346_v50  ;;  %14160 = vrot.lane.b32.xlu0 %v23565_v9, %s30536_s23  ;;  %v28632_v50 = vpack.c.bf16 %v32509_v59, %v32507_v45 }
0x1926   :  { %26372 = vmatmul.mubr.f32.gmra.mrb[30].mxu0 %v32265_v41  ;;  %26612 = vmatmul.mubr.f32.gmra.mrb[38].mxu1 %v32265_v41  ;;  %v32601_v41 = vand.u32 4294901760, %v32586_v61  ;;  %v11366_v6 = vsub.f32 %v32576_v16, %v32593_v24 }
0x1927   :  { %26382 = vmatprep.mubr.f32.mxu0 %v11317_v53  ;;  %26622 = vmatprep.mubr.f32.mxu1 %v11317_v53  ;;  %v32606_v5 = vand.u32 4294901760, %v32596_v54 }
0x1928   :  { %v11376_v33 = vsub.f32 %v32586_v61, %v32601_v41 }
0x1929   :  { %v11386_v53 = vsub.f32 %v32596_v54, %v32606_v5 }
0x192a   :  { %26383 = vmatmul.mubr.f32.vlgmr.msra.gmra.mrb[24].mxu0 %v11327_v13  ;;  %26623 = vmatmul.mubr.f32.vlgmr.msra.gmra.mrb[32].mxu1 %v11327_v13  ;;  %v11377_v2 = vand.u32 4294901760, %v11376_v33  ;;  %v28728_v13 = vpack.c.bf16 %v32480_v55, %v32478_v44  ;;  %v14185_v44 = vld [vmem:[%s34074_s15 + $0x10] sm:$0xff]  ;;  %v14186_v55 = vld [vmem:[%s34074_s15 + $0x18] sm:$0xff] }
0x192b   :  { %28719 = vmatpush3.bf16.msra.mxu1 %v28716_v35  ;;  %26385 = vmatprep.mubr.f32.mxu0 %v11337_v0  ;;  %v11367_v35 = vand.u32 4294901760, %v11366_v6  ;;  %v14194_v37 = vand.u32 4294901760, %v14185_v44 }
0x192c   :  { %26625 = vmatprep.mubr.f32.mxu1 %v11337_v0  ;;  %28721 = vmatprep.subr.bf16.mxu1 %v28720_v27  ;;  %v28740_v0 = vpack.c.bf16 %v13006_v46, %v12999_v39  ;;  %v13658_v39 = vld [vmem:[#allocation17] sm:$0xff]  ;;  %v13659_v46 = vld [vmem:[#allocation17 + $0x8] sm:$0xff] }
0x192d   :  { %28623 = vmatpush3.bf16.msra.mxu0 %v28620_v31  ;;  %v23567_v31 = vld [vmem:[%s34076_s17] ss:$0 sm:$0xff]  ;;  %v13663_v14 = vand.u32 4294901760, %v13658_v39 }
0x192e   :  { %26386 = vmatmul.mubr.f32.gmra.mrb[26].mxu0 %v11347_v42  ;;  %26626 = vmatmul.mubr.f32.gmra.mrb[34].mxu1 %v11347_v42 }
0x192f   :  { %26388 = vmatprep.mubr.f32.mxu0 %v11357_v25  ;;  %26628 = vmatprep.mubr.f32.mxu1 %v11357_v25  ;;  %v32739_v45 = vsub.f32 %v13658_v39, %v13663_v14 }
0x1930   :  { %28723 = vmatpush3.bf16.msra.mxu1 %v28720_v27  ;;  %28625 = vmatprep.subr.bf16.mxu0 %v28624_v63  ;;  %v11387_v27 = vand.u32 4294901760, %v11386_v53 }
0x1931   :  { %28627 = vmatpush3.bf16.msra.mxu0 %v28624_v63  ;;  %28725 = vmatprep.subr.bf16.mxu1 %v28724_v21 }
0x1932   :  { %26389 = vmatmul.mubr.f32.gmra.mrb[28].mxu0 %v11367_v35  ;;  %26629 = vmatmul.mubr.f32.gmra.mrb[36].mxu1 %v11367_v35 }
0x1933   :  { %26391 = vmatprep.mubr.f32.mxu0 %v11377_v2  ;;  %26631 = vmatprep.mubr.f32.mxu1 %v11377_v2 }
0x1934   :  { %28629 = vmatprep.subr.bf16.mxu0 %v28628_v23  ;;  %14685 = vrot.lane.b32.xlu1 %v23567_v31, %s30536_s23 }
0x1936   :  { %26392 = vmatmul.mubr.f32.gmra.mrb[30].mxu0 %v11387_v27  ;;  %26632 = vmatmul.mubr.f32.gmra.mrb[38].mxu1 %v11387_v27 }
0x1937   :  { %26402 = vmatprep.mubr.f32.mxu0 %v32450_v36  ;;  %26642 = vmatprep.mubr.f32.mxu1 %v32450_v36 }
0x193a   :  { %26403 = vmatmul.mubr.f32.vlgmr.msra.gmra.mrb[24].mxu0 %v32484_v10  ;;  %26643 = vmatmul.mubr.f32.vlgmr.msra.gmra.mrb[32].mxu1 %v32484_v10 }
0x193b   :  { %28727 = vmatpush3.bf16.msra.mxu1 %v28724_v21  ;;  %26405 = vmatprep.mubr.f32.mxu0 %v32492_v19 }
0x193c   :  { %26645 = vmatprep.mubr.f32.mxu1 %v32492_v19  ;;  %28729 = vmatprep.subr.bf16.mxu1 %v28728_v13 }
0x193d   :  { %28631 = vmatpush3.bf16.msra.mxu0 %v28628_v23 }
0x193e   :  { %26406 = vmatmul.mubr.f32.gmra.mrb[26].mxu0 %v32516_v43  ;;  %26646 = vmatmul.mubr.f32.gmra.mrb[34].mxu1 %v32516_v43 }
0x193f   :  { %26408 = vmatprep.mubr.f32.mxu0 %v32522_v28  ;;  %26648 = vmatprep.mubr.f32.mxu1 %v32522_v28 }
0x1940   :  { %28731 = vmatpush3.bf16.msra.mxu1 %v28728_v13  ;;  %28633 = vmatprep.subr.bf16.mxu0 %v28632_v50 }
0x1941   :  { %28635 = vmatpush3.bf16.msra.mxu0 %v28632_v50  ;;  %28733 = vmatprep.subr.bf16.mxu1 %v32419_v12 }
0x1942   :  { %26409 = vmatmul.mubr.f32.gmra.mrb[28].mxu0 %v32548_v49  ;;  %26649 = vmatmul.mubr.f32.gmra.mrb[36].mxu1 %v32548_v49 }
0x1943   :  { %26411 = vmatprep.mubr.f32.mxu0 %v32557_v4  ;;  %26651 = vmatprep.mubr.f32.mxu1 %v32557_v4 }
0x1944   :  { %28637 = vmatprep.subr.bf16.mxu0 %v32432_v51 }
0x1946   :  { %26412 = vmatmul.mubr.f32.gmra.mrb[30].mxu0 %v32578_v17  ;;  %26652 = vmatmul.mubr.f32.gmra.mrb[38].mxu1 %v32578_v17 }
0x1947   :  { %26422 = vmatprep.mubr.f32.mxu0 %v32473_v57  ;;  %26662 = vmatprep.mubr.f32.mxu1 %v32473_v57  ;;  %v13666_v57 = vand.u32 4294901760, %v13659_v46 }
0x1949   :  { %v32741_v59 = vsub.f32 %v13659_v46, %v13666_v57  ;;  %v23562_v46 = vld [vmem:[#allocation18] ss:$0 sm:$0xff] }
0x194a   :  { %26423 = vmatmul.mubr.f32.vlgmr.msra.gmra.mrb[24].mxu0 %v32514_v62  ;;  %26663 = vmatmul.mubr.f32.vlgmr.msra.gmra.mrb[32].mxu1 %v32514_v62 }
0x194b   :  { %28735 = vmatpush3.bf16.msra.mxu1 %v32419_v12  ;;  %26425 = vmatprep.mubr.f32.mxu0 %v32520_v8 }
0x194c   :  { %26665 = vmatprep.mubr.f32.mxu1 %v32520_v8  ;;  %28737 = vmatprep.subr.bf16.mxu1 %v32482_v18  ;;  %v14197_v8 = vand.u32 4294901760, %v14186_v55 }
0x194d   :  { %28639 = vmatpush3.bf16.msra.mxu0 %v32432_v51 }
0x194e   :  { %26426 = vmatmul.mubr.f32.gmra.mrb[26].mxu0 %v32546_v29  ;;  %26666 = vmatmul.mubr.f32.gmra.mrb[34].mxu1 %v32546_v29 }
0x194f   :  { %26428 = vmatprep.mubr.f32.mxu0 %v32555_v3  ;;  %26668 = vmatprep.mubr.f32.mxu1 %v32555_v3  ;;  %v13744_v3 = vand.u32 4294901760, %v32739_v45 }
0x1950   :  { %28739 = vmatpush3.bf16.msra.mxu1 %v32482_v18  ;;  %28641 = vmatprep.subr.bf16.mxu0 %v32497_v32 }
0x1951   :  { %28643 = vmatpush3.bf16.msra.mxu0 %v32497_v32  ;;  %28741 = vmatprep.subr.bf16.mxu1 %v28740_v0  ;;  %v13745_v26 = vsub.f32 %v32739_v45, %v13744_v3 }
0x1952   :  { %26429 = vmatmul.mubr.f32.gmra.mrb[28].mxu0 %v32576_v16  ;;  %26669 = vmatmul.mubr.f32.gmra.mrb[36].mxu1 %v32576_v16  ;;  %v32759_v16 = vsub.f32 %v14186_v55, %v14197_v8 }
0x1953   :  { %26431 = vmatprep.mubr.f32.mxu0 %v32586_v61  ;;  %26671 = vmatprep.mubr.f32.mxu1 %v32586_v61  ;;  %v13746_v25 = vand.u32 4294901760, %v13745_v26 }
0x1954   :  { %28645 = vmatprep.subr.bf16.mxu0 %v28644_v22 }
0x1956   :  { %26432 = vmatmul.mubr.f32.gmra.mrb[30].mxu0 %v32596_v54  ;;  %26672 = vmatmul.mubr.f32.gmra.mrb[38].mxu1 %v32596_v54 }
0x1957   :  { %26442 = vmatprep.mubr.f32.mxu0 %v32500_v56  ;;  %26682 = vmatprep.mubr.f32.mxu1 %v32500_v56 }
0x195a   :  { %26443 = vmatmul.mubr.f32.vlgmr.msra.gmra.mrb[24].mxu0 %v32543_v11  ;;  %26683 = vmatmul.mubr.f32.vlgmr.msra.gmra.mrb[32].mxu1 %v32543_v11  ;;  %v32747_v11 = vpack.c.bf16 %v13666_v57, %v13663_v14 }
0x195b   :  { %28743 = vmatpush3.bf16.msra.mxu1 %v28740_v0  ;;  %26445 = vmatprep.mubr.f32.mxu0 %v32552_v20  ;;  %v32845_v0 = vpack.c.bf16 %v32741_v59, %v32739_v45 }
0x195c   :  { %26685 = vmatprep.mubr.f32.mxu1 %v32552_v20  ;;  %28745 = vmatprep.subr.bf16.mxu1 %v28744_v47 }
0x195d   :  { %28647 = vmatpush3.bf16.msra.mxu0 %v28644_v22 }
0x195e   :  { %26446 = vmatmul.mubr.f32.gmra.mrb[26].mxu0 %v32573_v15  ;;  %26686 = vmatmul.mubr.f32.gmra.mrb[34].mxu1 %v32573_v15  ;;  %v13751_v15 = vand.u32 4294901760, %v32741_v59 }
0x195f   :  { %26448 = vmatprep.mubr.f32.mxu0 %v32583_v30  ;;  %26688 = vmatprep.mubr.f32.mxu1 %v32583_v30 }
0x1960   :  { %28747 = vmatpush3.bf16.msra.mxu1 %v28744_v47  ;;  %28649 = vmatprep.subr.bf16.mxu0 %v28648_v60 }
0x1961   :  { %28651 = vmatpush3.bf16.msra.mxu0 %v28648_v60  ;;  %28749 = vmatprep.subr.bf16.mxu1 %v32419_v12 }
0x1962   :  { %26449 = vmatmul.mubr.f32.gmra.mrb[28].mxu0 %v32593_v24  ;;  %26689 = vmatmul.mubr.f32.gmra.mrb[36].mxu1 %v32593_v24 }
0x1963   :  { %26451 = vmatprep.mubr.f32.mxu0 %v32601_v41  ;;  %26691 = vmatprep.mubr.f32.mxu1 %v32601_v41  ;;  %v13752_v41 = vsub.f32 %v32741_v59, %v13751_v15 }
0x1964   :  { %28653 = vmatprep.subr.bf16.mxu0 %v32432_v51 }
0x1965   :  { %v13753_v33 = vand.u32 4294901760, %v13752_v41 }
0x1966   :  { %26452 = vmatmul.mubr.f32.gmra.mrb[30].mxu0 %v32606_v5  ;;  %26692 = vmatmul.mubr.f32.gmra.mrb[38].mxu1 %v32606_v5 }
0x1967   :  { %26462 = vmatprep.mubr.f32.mxu0 %v32450_v36  ;;  %26702 = vmatprep.mubr.f32.mxu1 %v32450_v36 }
0x196a   :  { %26463 = vmatmul.mubr.f32.vlgmr.msra.gmra.mrb[24].mxu0 %v32484_v10  ;;  %26703 = vmatmul.mubr.f32.vlgmr.msra.gmra.mrb[32].mxu1 %v32484_v10 }
0x196b   :  { %28751 = vmatpush3.bf16.msra.mxu1 %v32419_v12  ;;  %26465 = vmatprep.mubr.f32.mxu0 %v32492_v19  ;;  %v14184_v12 = vld [vmem:[%s34074_s15 + $0x8] sm:$0xff] }
0x196c   :  { %26705 = vmatprep.mubr.f32.mxu1 %v32492_v19  ;;  %28753 = vmatprep.subr.bf16.mxu1 %v32482_v18  ;;  %v14191_v52 = vand.u32 4294901760, %v14184_v12 }
0x196d   :  { %28655 = vmatpush3.bf16.msra.mxu0 %v32432_v51  ;;  %v14188_v51 = vand.u32 4294901760, %v14183_v40 }
0x196e   :  { %26466 = vmatmul.mubr.f32.gmra.mrb[26].mxu0 %v32516_v43  ;;  %26706 = vmatmul.mubr.f32.gmra.mrb[34].mxu1 %v32516_v43  ;;  %v32737_v48 = vsub.f32 %v14184_v12, %v14191_v52 }
0x196f   :  { %26468 = vmatprep.mubr.f32.mxu0 %v32522_v28  ;;  %26708 = vmatprep.mubr.f32.mxu1 %v32522_v28  ;;  %v32733_v56 = vsub.f32 %v14183_v40, %v14188_v51  ;;  %v32745_v62 = vpack.c.bf16 %v14191_v52, %v14188_v51  ;;  %v32893_v40 = vpack.c.bf16 %v13751_v15, %v13744_v3  ;;  %v23563_v51 = vld [vmem:[%s34075_s16] ss:$0 sm:$0xff] }
0x1970   :  { %28755 = vmatpush3.bf16.msra.mxu1 %v32482_v18  ;;  %28657 = vmatprep.subr.bf16.mxu0 %v32497_v32  ;;  %v13660_v18 = vld [vmem:[#allocation17 + $0x10] sm:$0xff]  ;;  %v14276_v20 = vand.u32 4294901760, %v32737_v48 }
0x1971   :  { %28659 = vmatpush3.bf16.msra.mxu0 %v32497_v32  ;;  %28792 = vmatprep.subr.bf16.mxu1 %v30533_v7  ;;  %v13661_v32 = vld [vmem:[#allocation17 + $0x18] sm:$0xff]  ;;  %v13669_v38 = vand.u32 4294901760, %v13660_v18  ;;  %v14269_v29 = vand.u32 4294901760, %v32733_v56  ;;  %v32841_v50 = vpack.c.bf16 %v32737_v48, %v32733_v56 }
0x1972   :  { %26469 = vmatmul.mubr.f32.gmra.mrb[28].mxu0 %v32548_v49  ;;  %26709 = vmatmul.mubr.f32.gmra.mrb[36].mxu1 %v32548_v49  ;;  %v13672_v58 = vand.u32 4294901760, %v13661_v32 }
0x1973   :  { %26471 = vmatprep.mubr.f32.mxu0 %v32557_v4  ;;  %26711 = vmatprep.mubr.f32.mxu1 %v32557_v4  ;;  %v32761_v30 = vsub.f32 %v13660_v18, %v13669_v38  ;;  %v14270_v54 = vsub.f32 %v32733_v56, %v14269_v29  ;;  %v32887_v60 = vpack.c.bf16 %v14276_v20, %v14269_v29 }
0x1974   :  { %28756 = vmatprep.subr.bf16.mxu0 %v30533_v7  ;;  %v32763_v61 = vsub.f32 %v13661_v32, %v13672_v58  ;;  %v32770_v24 = vpack.c.bf16 %v13672_v58, %v13669_v38 }
0x1975   :  { %v13758_v6 = vand.u32 4294901760, %v32761_v30  ;;  %v14271_v63 = vand.u32 4294901760, %v14270_v54 }
0x1976   :  { %26472 = vmatmul.mubr.f32.gmra.mrb[30].mxu0 %v32578_v17  ;;  %26712 = vmatmul.mubr.f32.gmra.mrb[38].mxu1 %v32578_v17  ;;  %v13765_v5 = vand.u32 4294901760, %v32763_v61  ;;  %v32859_v47 = vpack.c.bf16 %v32763_v61, %v32761_v30 }
0x1977   :  { %26482 = vmatprep.mubr.f32.mxu0 %v32450_v36  ;;  %26722 = vmatprep.mubr.f32.mxu1 %v32450_v36  ;;  %v32755_v36 = vsub.f32 %v14185_v44, %v14194_v37  ;;  %v13759_v53 = vsub.f32 %v32761_v30, %v13758_v6 }
0x1978   :  { %v32911_v39 = vpack.c.bf16 %v13765_v5, %v13758_v6 }
0x1979   :  { %v14283_v42 = vand.u32 4294901760, %v32755_v36  ;;  %v13760_v9 = vand.u32 4294901760, %v13759_v53  ;;  %v32855_v22 = vpack.c.bf16 %v32759_v16, %v32755_v36 }
0x197a   :  { %26483 = vmatmul.mubr.f32.vlgmr.msra.gmra.mrb[24].mxu0 %v32484_v10  ;;  %26723 = vmatmul.mubr.f32.vlgmr.msra.gmra.mrb[32].mxu1 %v32484_v10  ;;  %v32767_v10 = vpack.c.bf16 %v14197_v8, %v14194_v37 }
0x197b   :  { %28794 = vmatpush3.bf16.msra.mxu1 %v32745_v62  ;;  %26485 = vmatprep.mubr.f32.mxu0 %v32492_v19  ;;  %v14284_v21 = vsub.f32 %v32755_v36, %v14283_v42 }
0x197c   :  { %26725 = vmatprep.mubr.f32.mxu1 %v32492_v19  ;;  %28795 = vmatprep.subr.bf16.mxu1 %v30533_v7  ;;  %v14277_v19 = vsub.f32 %v32737_v48, %v14276_v20 }
0x197d   :  { %28758 = vmatpush3.bf16.msra.mxu0 %v32747_v11  ;;  %v14285_v2 = vand.u32 4294901760, %v14284_v21 }
0x197e   :  { %26486 = vmatmul.mubr.f32.gmra.mrb[26].mxu0 %v32516_v43  ;;  %26726 = vmatmul.mubr.f32.gmra.mrb[34].mxu1 %v32516_v43  ;;  %v14290_v43 = vand.u32 4294901760, %v32759_v16 }
0x197f   :  { %26488 = vmatprep.mubr.f32.mxu0 %v32522_v28  ;;  %26728 = vmatprep.mubr.f32.mxu1 %v32522_v28  ;;  %v14278_v28 = vand.u32 4294901760, %v14277_v19 }
0x1980   :  { %28797 = vmatpush3.bf16.msra.mxu1 %v32767_v10  ;;  %28759 = vmatprep.subr.bf16.mxu0 %v30533_v7  ;;  %v14291_v35 = vsub.f32 %v32759_v16, %v14290_v43  ;;  %v32905_v12 = vpack.c.bf16 %v14290_v43, %v14283_v42 }
0x1981   :  { %28761 = vmatpush3.bf16.msra.mxu0 %v32770_v24  ;;  %28798 = vmatprep.subr.bf16.mxu1 %v30533_v7  ;;  %v32815_v23 = vpack.c.bf16 %v14278_v28, %v14271_v63 }
0x1982   :  { %26489 = vmatmul.mubr.f32.gmra.mrb[28].mxu0 %v32548_v49  ;;  %26729 = vmatmul.mubr.f32.gmra.mrb[36].mxu1 %v32548_v49  ;;  %v13766_v49 = vsub.f32 %v32763_v61, %v13765_v5  ;;  %v14292_v31 = vand.u32 4294901760, %v14291_v35 }
0x1983   :  { %26491 = vmatprep.mubr.f32.mxu0 %v32557_v4  ;;  %26731 = vmatprep.mubr.f32.mxu1 %v32557_v4  ;;  %v32817_v4 = vpack.c.bf16 %v13753_v33, %v13746_v25 }
0x1984   :  { %28762 = vmatprep.subr.bf16.mxu0 %v30533_v7  ;;  %v13767_v27 = vand.u32 4294901760, %v13766_v49 }
0x1986   :  { %26492 = vmatmul.mubr.f32.gmra.mrb[30].mxu0 %v32578_v17  ;;  %26732 = vmatmul.mubr.f32.gmra.mrb[38].mxu1 %v32578_v17  ;;  %v32827_v17 = vpack.c.bf16 %v14292_v31, %v14285_v2  ;;  %v32829_v13 = vpack.c.bf16 %v13767_v27, %v13760_v9 }
0x1987   :  { %26742 = vmatprep.mubr.msk.f32.mxu0 %vm30534_vm2, %v30535_v34  ;;  %26808 = vmatprep.mubr.msk.f32.mxu1 %vm30534_vm2, %v30535_v34 }
0x198a   :  { %26743 = vmatmul.mubr.f32.vlgmr.msra.gmra.mrb[32].mxu0 %v30535_v34  ;;  %26809 = vmatmul.mubr.f32.vlgmr.msra.gmra.mrb[40].mxu1 %v30535_v34 }
0x198b   :  { %28800 = vmatpush3.bf16.msra.mxu1 %v32815_v23  ;;  %28764 = vmatpush3.bf16.msra.mxu0 %v32817_v4 }
0x198c   :  { %28801 = vmatprep.subr.bf16.mxu1 %v30533_v7  ;;  %28765 = vmatprep.subr.bf16.mxu0 %v30533_v7 }
0x198d   :  { %26753 = vmatprep.mubr.msk.f32.mxu0 %vm30534_vm2, %v30535_v34  ;;  %26819 = vmatprep.mubr.msk.f32.mxu1 %vm30534_vm2, %v30535_v34 }
0x198f   :  { %28803 = vmatpush3.bf16.msra.mxu1 %v32827_v17  ;;  %28767 = vmatpush3.bf16.msra.mxu0 %v32829_v13 }
0x1990   :  { %28804 = vmatprep.subr.bf16.mxu1 %v30533_v7  ;;  %28768 = vmatprep.subr.bf16.mxu0 %v30533_v7 }
0x1992   :  { %26754 = vmatmul.mubr.f32.vlgmr.msra.gmra.mrb[32].mxu0 %v30535_v34  ;;  %26820 = vmatmul.mubr.f32.vlgmr.msra.gmra.mrb[40].mxu1 %v30535_v34 }
0x1993   :  { %28806 = vmatpush3.bf16.msra.mxu1 %v32841_v50  ;;  %28770 = vmatpush3.bf16.msra.mxu0 %v32845_v0 }
0x1994   :  { %28807 = vmatprep.subr.bf16.mxu1 %v30533_v7  ;;  %28771 = vmatprep.subr.bf16.mxu0 %v30533_v7 }
0x1995   :  { %26764 = vmatprep.mubr.msk.f32.mxu0 %vm30534_vm2, %v30535_v34  ;;  %26830 = vmatprep.mubr.msk.f32.mxu1 %vm30534_vm2, %v30535_v34 }
0x1997   :  { %28809 = vmatpush3.bf16.msra.mxu1 %v32855_v22  ;;  %28773 = vmatpush3.bf16.msra.mxu0 %v32859_v47  ;;  %v32970_v28 = vpop.permute.xlu0 %14160 }
0x1998   :  { %28810 = vmatprep.subr.bf16.mxu1 %v30533_v7  ;;  %28774 = vmatprep.subr.bf16.mxu0 %v30533_v7 }
0x199a   :  { %26765 = vmatmul.mubr.f32.vlgmr.msra.gmra.mrb[32].mxu0 %v30535_v34  ;;  %26831 = vmatmul.mubr.f32.vlgmr.msra.gmra.mrb[40].mxu1 %v30535_v34 }
0x199b   :  { %28812 = vmatpush3.bf16.msra.mxu1 %v32745_v62  ;;  %28776 = vmatpush3.bf16.msra.mxu0 %v32747_v11 }
0x199c   :  { %28813 = vmatprep.subr.bf16.mxu1 %v30533_v7  ;;  %28777 = vmatprep.subr.bf16.mxu0 %v30533_v7 }
0x199d   :  { %26775 = vmatprep.mubr.msk.f32.mxu0 %vm30534_vm2, %v30535_v34  ;;  %26841 = vmatprep.mubr.msk.f32.mxu1 %vm30534_vm2, %v30535_v34 }
0x199f   :  { %28815 = vmatpush3.bf16.msra.mxu1 %v32767_v10  ;;  %28779 = vmatpush3.bf16.msra.mxu0 %v32770_v24 }
0x19a0   :  { %28816 = vmatprep.subr.bf16.mxu1 %v30533_v7  ;;  %28780 = vmatprep.subr.bf16.mxu0 %v30533_v7 }
0x19a2   :  { %26776 = vmatmul.mubr.f32.vlgmr.msra.gmra.mrb[32].mxu0 %v30535_v34  ;;  %26842 = vmatmul.mubr.f32.vlgmr.msra.gmra.mrb[40].mxu1 %v30535_v34 }
0x19a3   :  { %28818 = vmatpush3.bf16.msra.mxu1 %v32887_v60  ;;  %28782 = vmatpush3.bf16.msra.mxu0 %v32893_v40 }
0x19a4   :  { %28819 = vmatprep.subr.bf16.mxu1 %v30533_v7  ;;  %28783 = vmatprep.subr.bf16.mxu0 %v30533_v7 }
0x19a5   :  { %26786 = vmatprep.mubr.msk.f32.mxu0 %vm30534_vm2, %v30535_v34  ;;  %26852 = vmatprep.mubr.msk.f32.mxu1 %vm30534_vm2, %v30535_v34 }
0x19a6   :  { %v32972_v25 = vpop.permute.xlu1 %14685 }
0x19a7   :  { %28821 = vmatpush3.bf16.msra.mxu1 %v32905_v12  ;;  %28785 = vmatpush3.bf16.msra.mxu0 %v32911_v39 }
0x19a8   :  { %28822 = vmatprep.subr.bf16.mxu1 %v30533_v7  ;;  %28786 = vmatprep.subr.bf16.mxu0 %v30533_v7 }
0x19aa   :  { %26787 = vmatmul.mubr.f32.vlgmr.msra.gmra.mrb[32].mxu0 %v30535_v34  ;;  %26853 = vmatmul.mubr.f32.vlgmr.msra.gmra.mrb[40].mxu1 %v30535_v34 }
0x19ab   :  { %28824 = vmatpush3.bf16.msra.mxu1 %v32745_v62  ;;  %28788 = vmatpush3.bf16.msra.mxu0 %v32747_v11 }
0x19ac   :  { %28825 = vmatprep.subr.bf16.mxu1 %v30533_v7  ;;  %28789 = vmatprep.subr.bf16.mxu0 %v30533_v7 }
0x19ad   :  { %26797 = vmatprep.mubr.msk.f32.mxu0 %vm30534_vm2, %v30535_v34  ;;  %26863 = vmatprep.mubr.msk.f32.mxu1 %vm30534_vm2, %v30535_v34 }
0x19af   :  { %28827 = vmatpush3.bf16.msra.mxu1 %v32767_v10  ;;  %28791 = vmatpush3.bf16.msra.mxu0 %v32770_v24 }
0x19b0   :  { %28864 = vmatprep.subr.bf16.mxu1 %v30533_v7  ;;  %28828 = vmatprep.subr.bf16.mxu0 %v30533_v7 }
0x19b2   :  { %26798 = vmatmul.mubr.f32.vlgmr.msra.gmra.mrb[32].mxu0 %v30535_v34  ;;  %26864 = vmatmul.mubr.f32.vlgmr.msra.gmra.mrb[40].mxu1 %v30535_v34 }
0x19b3   :  { %28866 = vmatpush3.bf16.msra.mxu1 %v32745_v62  ;;  %28830 = vmatpush3.bf16.msra.mxu0 %v32747_v11 }
0x19b4   :  { %28867 = vmatprep.subr.bf16.mxu1 %v30533_v7  ;;  %28831 = vmatprep.subr.bf16.mxu0 %v30533_v7 }
0x19b5   :  { %26874 = vmatprep.mubr.msk.f32.mxu0 %vm30534_vm2, %v30535_v34  ;;  %26940 = vmatprep.mubr.msk.f32.mxu1 %vm30534_vm2, %v30535_v34 }
0x19b7   :  { %28869 = vmatpush3.bf16.msra.mxu1 %v32767_v10  ;;  %28833 = vmatpush3.bf16.msra.mxu0 %v32770_v24 }
0x19b8   :  { %28870 = vmatprep.subr.bf16.mxu1 %v30533_v7  ;;  %28834 = vmatprep.subr.bf16.mxu0 %v30533_v7 }
0x1a4d   :  { %v26484_v52 = vpop.f32.mrb[24].mxu0  ;;  %v26724_v14 = vpop.f32.mrb[32].mxu1 }
0x1a4e   :  { %v12038_v57 = vadd.f32 %v26484_v52, %v23562_v46  ;;  %v13641_v44 = vadd.f32 %v26724_v14, %v23563_v51  ;;  %v11984_v55 = vpop.f32.mrb[25].mxu0  ;;  %v13587_v18 = vpop.f32.mrb[33].mxu1 }
0x1a4f   :  { %v12037_v32 = vadd.f32 %v23562_v46, %v11984_v55  ;;  %v13640_v56 = vadd.f32 %v23563_v51, %v13587_v18 }
0x1a50   :  { %12046 = vst.msk [vmem:[#allocation2 + $0x8] sm:$0xff] %vm1011_vm3, %v12038_v57  ;;  %13649 = vst.msk [vmem:[#allocation3 + $0x8] sm:$0xff] %vm1011_vm3, %v13641_v44 }
0x1a51   :  { %12045 = vst.msk [vmem:[#allocation2] sm:$0xff] %vm1011_vm3, %v12037_v32  ;;  %13648 = vst.msk [vmem:[#allocation3] sm:$0xff] %vm1011_vm3, %v13640_v56  ;;  %v26487_v37 = vpop.f32.mrb[26].mxu0  ;;  %v26727_v48 = vpop.f32.mrb[34].mxu1 }
0x1a52   :  { %v12040_v45 = vadd.f32 %v26487_v37, %v23562_v46  ;;  %v13643_v59 = vadd.f32 %v26727_v48, %v23563_v51  ;;  %v11996_v8 = vpop.f32.mrb[27].mxu0  ;;  %v13599_v38 = vpop.f32.mrb[35].mxu1 }
0x1a53   :  { %v12039_v58 = vadd.f32 %v23562_v46, %v11996_v8  ;;  %v13642_v29 = vadd.f32 %v23563_v51, %v13599_v38 }
0x1a54   :  { %12048 = vst.msk [vmem:[#allocation2 + $0x18] sm:$0xff] %vm1011_vm3, %v12040_v45  ;;  %13651 = vst.msk [vmem:[#allocation3 + $0x18] sm:$0xff] %vm1011_vm3, %v13643_v59 }
0x1a55   :  { %12047 = vst.msk [vmem:[#allocation2 + $0x10] sm:$0xff] %vm1011_vm3, %v12039_v58  ;;  %13650 = vst.msk [vmem:[#allocation3 + $0x10] sm:$0xff] %vm1011_vm3, %v13642_v29  ;;  %v26490_v20 = vpop.f32.mrb[28].mxu0  ;;  %v26730_v3 = vpop.f32.mrb[36].mxu1 }
0x1a56   :  { %v12042_v15 = vadd.f32 %v26490_v20, %v23562_v46  ;;  %v13645_v36 = vadd.f32 %v26730_v3, %v23563_v51  ;;  %v12008_v16 = vpop.f32.mrb[29].mxu0  ;;  %v13611_v30 = vpop.f32.mrb[37].mxu1 }
0x1a57   :  { %v12041_v61 = vadd.f32 %v23562_v46, %v12008_v16  ;;  %v13644_v54 = vadd.f32 %v23563_v51, %v13611_v30 }
0x1a58   :  { %12050 = vst.msk [vmem:[#allocation2 + $0x28] sm:$0xff] %vm1011_vm3, %v12042_v15  ;;  %13653 = vst.msk [vmem:[#allocation3 + $0x28] sm:$0xff] %vm1011_vm3, %v13645_v36  ;;  %v13656_v31 = vld [vmem:[#allocation2] sm:$0xff] }
0x1a59   :  { %12049 = vst.msk [vmem:[#allocation2 + $0x20] sm:$0xff] %vm1011_vm3, %v12041_v61  ;;  %13652 = vst.msk [vmem:[#allocation3 + $0x20] sm:$0xff] %vm1011_vm3, %v13644_v54  ;;  %v26493_v19 = vpop.f32.mrb[30].mxu0  ;;  %v26733_v26 = vpop.f32.mrb[38].mxu1 }
0x1a5a   :  { %v12044_v41 = vadd.f32 %v26493_v19, %v23562_v46  ;;  %v13647_v42 = vadd.f32 %v26733_v26, %v23563_v51  ;;  %v12020_v43 = vpop.f32.mrb[31].mxu0  ;;  %v13623_v6 = vpop.f32.mrb[39].mxu1 }
0x1a5b   :  { %v12043_v5 = vadd.f32 %v23562_v46, %v12020_v43  ;;  %v13646_v63 = vadd.f32 %v23563_v51, %v13623_v6 }
0x1a5c   :  { %12052 = vst.msk [vmem:[#allocation2 + $0x38] sm:$0xff] %vm1011_vm3, %v12044_v41  ;;  %13655 = vst.msk [vmem:[#allocation3 + $0x38] sm:$0xff] %vm1011_vm3, %v13647_v42 }
0x1a5d   :  { %12051 = vst.msk [vmem:[#allocation2 + $0x30] sm:$0xff] %vm1011_vm3, %v12043_v5  ;;  %13654 = vst.msk [vmem:[#allocation3 + $0x30] sm:$0xff] %vm1011_vm3, %v13646_v63 }
0x1a63   :  { %v13657_v27 = vld [vmem:[#allocation3 + $0x38] sm:$0xff] }
0x1a85   :  { %v14143_v33 = vpop.f32.mrb[32].mxu0  ;;  %v14668_v21 = vpop.f32.mrb[40].mxu1 }
0x1a86   :  { %v14163_v35 = vadd.f32 %v32970_v28, %v14143_v33  ;;  %v26799_v53 = vpop.f32.mrb[33].mxu0  ;;  %v26865_v49 = vpop.f32.mrb[41].mxu1  ;;  %v14688_v2 = vadd.f32 %v32972_v25, %v14668_v21  ;;  %v14147_v9 = vadd.f32 %v14143_v33, %v13656_v31  ;;  %v14672_v46 = vadd.f32 %v14668_v21, %v13657_v27 }
0x1a88   :  { %14165 = vrot.lane.b32.xlu0 %v14163_v35, %s30536_s23  ;;  %14690 = vrot.lane.b32.xlu1 %v14688_v2, %s30536_s23  ;;  %v23564_v51 = vmul.f32 -1.442695, %v14147_v9  ;;  %v23566_v52 = vmul.f32 -1.442695, %v14672_v46 }
0x1a8a   :  { %30167 = vpow2.f32 %v23564_v51 }
0x1a8b   :  { %30169 = vpow2.f32 %v23566_v52 }
0x1a94   :  { %v30168_v14 = vpop.eup %30167 }
0x1a95   :  { %v30170_v57 = vpop.eup %30169  ;;  %v14151_v44 = vadd.f32 1.0, %v30168_v14 }
0x1a96   :  { %v14676_v55 = vadd.f32 1.0, %v30170_v57 }
0x1a97   :  { %30171 = vrcp.f32 %v14151_v44 }
0x1a98   :  { %30173 = vrcp.f32 %v14676_v55 }
0x1aa1   :  { %v30172_v18 = vpop.eup %30171 }
0x1aa2   :  { %v30174_v32 = vpop.eup %30173  ;;  %v14175_v3 = vsub.f32 1.0, %v30172_v18  ;;  %v14181_v16 = vmul.f32 0.0, %v30172_v18 }
0x1aa3   :  { %v14700_v36 = vsub.f32 1.0, %v30174_v32  ;;  %v14706_v54 = vmul.f32 0.0, %v30174_v32 }
0x1afa   :  { %v14166_v56 = vpop.permute.xlu0 %14165  ;;  %v14691_v37 = vpop.permute.xlu1 %14690 }
0x1afb   :  { %v14168_v48 = vmul.f32 %v30172_v18, %v14166_v56  ;;  %v14693_v45 = vmul.f32 %v30174_v32, %v14691_v37  ;;  %v14712_v32 = vld [vmem:[#allocation2 + $0x8] sm:$0xff]  ;;  %v14713_v37 = vld [vmem:[#allocation3 + $0x30] sm:$0xff] }
0x1afd   :  { %14170 = vrot.lane.b32.xlu0 %v14168_v48, %s30536_s23  ;;  %14695 = vrot.lane.b32.xlu1 %v14693_v45, %s30536_s23 }
0x1b6f   :  { %v14171_v59 = vpop.permute.xlu0 %14170  ;;  %v14696_v8 = vpop.permute.xlu1 %14695 }
0x1b70   :  { %v14173_v38 = vadd.f32 %v14171_v59, %v13656_v31  ;;  %v14698_v58 = vadd.f32 %v14696_v8, %v13657_v27 }
0x1b72   :  { %30175 = vtanh.f32 %v14173_v38 }
0x1b73   :  { %30177 = vtanh.f32 %v14698_v58 }
0x1b7c   :  { %v30176_v29 = vpop.eup %30175 }
0x1b7d   :  { %v30178_v20 = vpop.eup %30177  ;;  %14177 = vrot.lane.b32.xlu0 %v30176_v29, %s30538_s12 }
0x1b7e   :  { %14702 = vrot.lane.b32.xlu1 %v30178_v20, %s30538_s12 }
0x1bef   :  { %v14178_v15 = vpop.permute.xlu0 %14177 }
0x1bf0   :  { %v14180_v30 = vmul.f32 %v14178_v15, %v14175_v3  ;;  %v14703_v61 = vpop.permute.xlu1 %14702 }
0x1bf1   :  { %v14705_v19 = vmul.f32 %v14703_v61, %v14700_v36 }
0x1bf2   :  { %v14182_v26 = vadd.f32 %v14181_v16, %v14180_v30 }
0x1bf3   :  { %v14707_v41 = vadd.f32 %v14706_v54, %v14705_v19 }
0x1bf4   :  { %v32984_v42 = vsel %vm1786_vm5, %v14182_v26, 0.0 }
0x1bf5   :  { %14715 = vrot.lane.b32.xlu0 %v32984_v42, %s30538_s12  ;;  %v32990_v43 = vsel %vm1787_vm4, %v14707_v41, 0.0 }
0x1bf6   :  { %15232 = vrot.lane.b32.xlu1 %v32990_v43, %s30538_s12 }
0x1c67   :  { %v14716_v6 = vpop.permute.xlu0 %14715 }
0x1c68   :  { %v14717_v5 = vsel %vm1794_vm6, %v14716_v6, 0  ;;  %v15233_v63 = vpop.permute.xlu1 %15232 }
0x1c69   :  { %v32995_v33 = vand.u32 4294901760, %v14717_v5  ;;  %v15234_v21 = vsel %vm1794_vm6, %v15233_v63, 0 }
0x1c6a   :  { %v32998_v35 = vand.u32 4294901760, %v15234_v21 }
0x1c6b   :  { %v14789_v53 = vsub.f32 %v14717_v5, %v32995_v33 }
0x1c6c   :  { %v15306_v49 = vsub.f32 %v15234_v21, %v32998_v35 }
0x1c6d   :  { %v14790_v2 = vand.u32 4294901760, %v14789_v53 }
0x1c6e   :  { %v15307_v31 = vand.u32 4294901760, %v15306_v49 }
0x1c6f   :  { %v14791_v9 = vsub.f32 %v14789_v53, %v14790_v2 }
0x1c70   :  { %v15308_v27 = vsub.f32 %v15306_v49, %v15307_v31 }
0x1c71   :  { %v14792_v46 = vand.u32 4294901760, %v14791_v9 }
0x1c72   :  { %v15309_v51 = vand.u32 4294901760, %v15308_v27 }
0x1c73   :  { %26875 = vmatmul.mubr.f32.vlgmr.msra.gmra.mrb[34].mxu0 %v14792_v46 }
0x1c74   :  { %26941 = vmatmul.mubr.f32.vlgmr.msra.gmra.mrb[42].mxu1 %v15309_v51  ;;  %28836 = vmatpush3.bf16.msra.mxu0 %v32817_v4 }
0x1c75   :  { %28872 = vmatpush3.bf16.msra.mxu1 %v32815_v23  ;;  %28837 = vmatprep.subr.bf16.mxu0 %v30533_v7 }
0x1c76   :  { %28873 = vmatprep.subr.bf16.mxu1 %v30533_v7  ;;  %26885 = vmatprep.mubr.msk.f32.mxu0 %vm30534_vm2, %v30535_v34 }
0x1c77   :  { %26951 = vmatprep.mubr.msk.f32.mxu1 %vm30534_vm2, %v30535_v34 }
0x1c78   :  { %28839 = vmatpush3.bf16.msra.mxu0 %v32829_v13 }
0x1c79   :  { %28875 = vmatpush3.bf16.msra.mxu1 %v32827_v17  ;;  %28840 = vmatprep.subr.bf16.mxu0 %v30533_v7 }
0x1c7a   :  { %28876 = vmatprep.subr.bf16.mxu1 %v30533_v7 }
0x1c7b   :  { %26886 = vmatmul.mubr.f32.vlgmr.msra.gmra.mrb[34].mxu0 %v32995_v33 }
0x1c7c   :  { %26952 = vmatmul.mubr.f32.vlgmr.msra.gmra.mrb[42].mxu1 %v32998_v35  ;;  %28842 = vmatpush3.bf16.msra.mxu0 %v32845_v0 }
0x1c7d   :  { %28878 = vmatpush3.bf16.msra.mxu1 %v32841_v50  ;;  %28843 = vmatprep.subr.bf16.mxu0 %v30533_v7 }
0x1c7e   :  { %28879 = vmatprep.subr.bf16.mxu1 %v30533_v7  ;;  %26896 = vmatprep.mubr.msk.f32.mxu0 %vm30534_vm2, %v30535_v34 }
0x1c7f   :  { %26962 = vmatprep.mubr.msk.f32.mxu1 %vm30534_vm2, %v30535_v34 }
0x1c80   :  { %28845 = vmatpush3.bf16.msra.mxu0 %v32859_v47 }
0x1c81   :  { %28881 = vmatpush3.bf16.msra.mxu1 %v32855_v22  ;;  %28846 = vmatprep.subr.bf16.mxu0 %v30533_v7 }
0x1c82   :  { %28882 = vmatprep.subr.bf16.mxu1 %v30533_v7 }
0x1c83   :  { %26897 = vmatmul.mubr.f32.vlgmr.msra.gmra.mrb[34].mxu0 %v14789_v53 }
0x1c84   :  { %26963 = vmatmul.mubr.f32.vlgmr.msra.gmra.mrb[42].mxu1 %v15306_v49  ;;  %28848 = vmatpush3.bf16.msra.mxu0 %v32747_v11 }
0x1c85   :  { %28884 = vmatpush3.bf16.msra.mxu1 %v32745_v62  ;;  %28849 = vmatprep.subr.bf16.mxu0 %v30533_v7 }
0x1c86   :  { %28885 = vmatprep.subr.bf16.mxu1 %v30533_v7  ;;  %26907 = vmatprep.mubr.msk.f32.mxu0 %vm30534_vm2, %v30535_v34 }
0x1c87   :  { %26973 = vmatprep.mubr.msk.f32.mxu1 %vm30534_vm2, %v30535_v34 }
0x1c88   :  { %28851 = vmatpush3.bf16.msra.mxu0 %v32770_v24 }
0x1c89   :  { %28887 = vmatpush3.bf16.msra.mxu1 %v32767_v10  ;;  %28852 = vmatprep.subr.bf16.mxu0 %v30533_v7 }
0x1c8a   :  { %28888 = vmatprep.subr.bf16.mxu1 %v30533_v7 }
0x1c8b   :  { %26908 = vmatmul.mubr.f32.vlgmr.msra.gmra.mrb[34].mxu0 %v14790_v2 }
0x1c8c   :  { %26974 = vmatmul.mubr.f32.vlgmr.msra.gmra.mrb[42].mxu1 %v15307_v31  ;;  %28854 = vmatpush3.bf16.msra.mxu0 %v32893_v40 }
0x1c8d   :  { %28890 = vmatpush3.bf16.msra.mxu1 %v32887_v60  ;;  %28855 = vmatprep.subr.bf16.mxu0 %v30533_v7 }
0x1c8e   :  { %28891 = vmatprep.subr.bf16.mxu1 %v30533_v7  ;;  %26918 = vmatprep.mubr.msk.f32.mxu0 %vm30534_vm2, %v30535_v34 }
0x1c8f   :  { %26984 = vmatprep.mubr.msk.f32.mxu1 %vm30534_vm2, %v30535_v34 }
0x1c90   :  { %28857 = vmatpush3.bf16.msra.mxu0 %v32911_v39 }
0x1c91   :  { %28893 = vmatpush3.bf16.msra.mxu1 %v32905_v12  ;;  %28858 = vmatprep.subr.bf16.mxu0 %v30533_v7 }
0x1c92   :  { %28894 = vmatprep.subr.bf16.mxu1 %v30533_v7 }
0x1c93   :  { %26919 = vmatmul.mubr.f32.vlgmr.msra.gmra.mrb[34].mxu0 %v32995_v33 }
0x1c94   :  { %26985 = vmatmul.mubr.f32.vlgmr.msra.gmra.mrb[42].mxu1 %v32998_v35  ;;  %28860 = vmatpush3.bf16.msra.mxu0 %v32747_v11 }
0x1c95   :  { %28896 = vmatpush3.bf16.msra.mxu1 %v32745_v62  ;;  %28861 = vmatprep.subr.bf16.mxu0 %v30533_v7 }
0x1c96   :  { %28897 = vmatprep.subr.bf16.mxu1 %v30533_v7  ;;  %26929 = vmatprep.mubr.msk.f32.mxu0 %vm30534_vm2, %v30535_v34 }
0x1c97   :  { %26995 = vmatprep.mubr.msk.f32.mxu1 %vm30534_vm2, %v30535_v34 }
0x1c98   :  { %28863 = vmatpush3.bf16.msra.mxu0 %v32770_v24 }
0x1c99   :  { %28899 = vmatpush3.bf16.msra.mxu1 %v32767_v10  ;;  %28900 = vmatprep.subr.bf16.mxu0 %v30533_v7 }
0x1c9a   :  { %28936 = vmatprep.subr.bf16.mxu1 %v30533_v7 }
0x1c9b   :  { %26930 = vmatmul.mubr.f32.vlgmr.msra.gmra.mrb[34].mxu0 %v32995_v33 }
0x1c9c   :  { %26996 = vmatmul.mubr.f32.vlgmr.msra.gmra.mrb[42].mxu1 %v32998_v35  ;;  %28902 = vmatpush3.bf16.msra.mxu0 %v32747_v11 }
0x1c9d   :  { %28938 = vmatpush3.bf16.msra.mxu1 %v32745_v62  ;;  %28903 = vmatprep.subr.bf16.mxu0 %v30533_v7 }
0x1c9e   :  { %28939 = vmatprep.subr.bf16.mxu1 %v30533_v7  ;;  %27006 = vmatprep.mubr.msk.f32.mxu0 %vm30534_vm2, %v30535_v34 }
0x1c9f   :  { %27072 = vmatprep.mubr.msk.f32.mxu1 %vm30534_vm2, %v30535_v34 }
0x1ca0   :  { %28905 = vmatpush3.bf16.msra.mxu0 %v32770_v24 }
0x1ca1   :  { %28941 = vmatpush3.bf16.msra.mxu1 %v32767_v10  ;;  %28906 = vmatprep.subr.bf16.mxu0 %v30533_v7 }
0x1ca2   :  { %28942 = vmatprep.subr.bf16.mxu1 %v30533_v7 }
0x1d6e   :  { %v15200_v52 = vpop.f32.mrb[34].mxu0 }
0x1d6f   :  { %v15211_v14 = vadd.f32 %v15200_v52, %v32970_v28  ;;  %v15717_v57 = vpop.f32.mrb[42].mxu1  ;;  %v26931_v44 = vpop.f32.mrb[35].mxu0  ;;  %v15204_v56 = vadd.f32 %v15200_v52, %v14712_v32 }
0x1d70   :  { %v15728_v55 = vadd.f32 %v15717_v57, %v32972_v25  ;;  %v26997_v18 = vpop.f32.mrb[43].mxu1  ;;  %v15721_v48 = vadd.f32 %v15717_v57, %v14713_v37 }
0x1d71   :  { %15213 = vrot.lane.b32.xlu0 %v15211_v14, %s30536_s23  ;;  %v23568_v45 = vmul.f32 -1.442695, %v15204_v56 }
0x1d72   :  { %15730 = vrot.lane.b32.xlu1 %v15728_v55, %s30536_s23  ;;  %v23569_v59 = vmul.f32 -1.442695, %v15721_v48 }
0x1d73   :  { %30179 = vpow2.f32 %v23568_v45 }
0x1d74   :  { %30181 = vpow2.f32 %v23569_v59 }
0x1d7d   :  { %v30180_v8 = vpop.eup %30179 }
0x1d7e   :  { %v30182_v38 = vpop.eup %30181  ;;  %v15208_v58 = vadd.f32 1.0, %v30180_v8 }
0x1d7f   :  { %v15725_v29 = vadd.f32 1.0, %v30182_v38 }
0x1d80   :  { %30183 = vrcp.f32 %v15208_v58 }
0x1d81   :  { %30185 = vrcp.f32 %v15725_v29 }
0x1d8a   :  { %v30184_v20 = vpop.eup %30183 }
0x1d8b   :  { %v30186_v15 = vpop.eup %30185  ;;  %v15223_v5 = vsub.f32 1.0, %v30184_v20  ;;  %v15229_v21 = vmul.f32 %v30184_v20, %v32984_v42 }
0x1d8c   :  { %v15740_v33 = vsub.f32 1.0, %v30186_v15  ;;  %v15746_v49 = vmul.f32 %v30186_v15, %v32990_v43 }
0x1de3   :  { %v15214_v3 = vpop.permute.xlu0 %15213 }
0x1de4   :  { %v15216_v36 = vmul.f32 %v30184_v20, %v15214_v3  ;;  %v15731_v16 = vpop.permute.xlu1 %15730 }
0x1de5   :  { %v15733_v30 = vmul.f32 %v30186_v15, %v15731_v16 }
0x1de6   :  { %15218 = vrot.lane.b32.xlu0 %v15216_v36, %s30536_s23  ;;  %v15754_v36 = vld [vmem:[#allocation2 + $0x10] sm:$0xff] }
0x1de7   :  { %15735 = vrot.lane.b32.xlu1 %v15733_v30, %s30536_s23  ;;  %v15755_v30 = vld [vmem:[#allocation3 + $0x28] sm:$0xff] }
0x1e58   :  { %v15219_v61 = vpop.permute.xlu0 %15218 }
0x1e59   :  { %v15221_v54 = vadd.f32 %v15219_v61, %v14712_v32  ;;  %v15736_v19 = vpop.permute.xlu1 %15735 }
0x1e5a   :  { %v15738_v26 = vadd.f32 %v15736_v19, %v14713_v37 }
0x1e5b   :  { %30187 = vtanh.f32 %v15221_v54 }
0x1e5c   :  { %30189 = vtanh.f32 %v15738_v26 }
0x1e65   :  { %v30188_v41 = vpop.eup %30187 }
0x1e66   :  { %v30190_v6 = vpop.eup %30189  ;;  %15225 = vrot.lane.b32.xlu0 %v30188_v41, %s30538_s12 }
0x1e67   :  { %15742 = vrot.lane.b32.xlu1 %v30190_v6, %s30538_s12 }
0x1ed8   :  { %v15226_v63 = vpop.permute.xlu0 %15225 }
0x1ed9   :  { %v15228_v35 = vmul.f32 %v15226_v63, %v15223_v5  ;;  %v15743_v53 = vpop.permute.xlu1 %15742 }
0x1eda   :  { %v15745_v2 = vmul.f32 %v15743_v53, %v15740_v33 }
0x1edb   :  { %v33090_v31 = vadd.f32 %v15229_v21, %v15228_v35 }
0x1edc   :  { %v33092_v9 = vadd.f32 %v15746_v49, %v15745_v2 }
0x1edd   :  { %v33098_v27 = vsel %vm2856_vm8, %v33090_v31, %v32984_v42 }
0x1ede   :  { %15757 = vrot.lane.b32.xlu0 %v33098_v27, %s30538_s12  ;;  %v33106_v46 = vsel %vm2857_vm7, %v33092_v9, %v32990_v43 }
0x1edf   :  { %16274 = vrot.lane.b32.xlu1 %v33106_v46, %s30538_s12 }
0x1f50   :  { %v15758_v51 = vpop.permute.xlu0 %15757 }
0x1f51   :  { %v15759_v52 = vsel %vm1794_vm6, %v15758_v51, 0  ;;  %v16275_v14 = vpop.permute.xlu1 %16274 }
0x1f52   :  { %v33111_v57 = vand.u32 4294901760, %v15759_v52  ;;  %v16276_v44 = vsel %vm1794_vm6, %v16275_v14, 0 }
0x1f53   :  { %v33114_v55 = vand.u32 4294901760, %v16276_v44 }
0x1f54   :  { %v15831_v18 = vsub.f32 %v15759_v52, %v33111_v57 }
0x1f55   :  { %v16348_v32 = vsub.f32 %v16276_v44, %v33114_v55 }
0x1f56   :  { %v15832_v56 = vand.u32 4294901760, %v15831_v18 }
0x1f57   :  { %v16349_v37 = vand.u32 4294901760, %v16348_v32 }
0x1f58   :  { %v15833_v48 = vsub.f32 %v15831_v18, %v15832_v56 }
0x1f59   :  { %v16350_v45 = vsub.f32 %v16348_v32, %v16349_v37 }
0x1f5a   :  { %v15834_v59 = vand.u32 4294901760, %v15833_v48 }
0x1f5b   :  { %v16351_v8 = vand.u32 4294901760, %v16350_v45 }
0x1f5c   :  { %27007 = vmatmul.mubr.f32.vlgmr.msra.gmra.mrb[36].mxu0 %v15834_v59  ;;  %v15751_v59 = vsel %vm2857_vm7, %v33092_v9, 0.0 }
0x1f5d   :  { %27073 = vmatmul.mubr.f32.vlgmr.msra.gmra.mrb[44].mxu1 %v16351_v8  ;;  %28908 = vmatpush3.bf16.msra.mxu0 %v32817_v4 }
0x1f5e   :  { %28944 = vmatpush3.bf16.msra.mxu1 %v32815_v23  ;;  %28909 = vmatprep.subr.bf16.mxu0 %v30533_v7 }
0x1f5f   :  { %28945 = vmatprep.subr.bf16.mxu1 %v30533_v7  ;;  %27017 = vmatprep.mubr.msk.f32.mxu0 %vm30534_vm2, %v30535_v34 }
0x1f60   :  { %27083 = vmatprep.mubr.msk.f32.mxu1 %vm30534_vm2, %v30535_v34 }
0x1f61   :  { %28911 = vmatpush3.bf16.msra.mxu0 %v32829_v13 }
0x1f62   :  { %28947 = vmatpush3.bf16.msra.mxu1 %v32827_v17  ;;  %28912 = vmatprep.subr.bf16.mxu0 %v30533_v7 }
0x1f63   :  { %28948 = vmatprep.subr.bf16.mxu1 %v30533_v7 }
0x1f64   :  { %27018 = vmatmul.mubr.f32.vlgmr.msra.gmra.mrb[36].mxu0 %v33111_v57 }
0x1f65   :  { %27084 = vmatmul.mubr.f32.vlgmr.msra.gmra.mrb[44].mxu1 %v33114_v55  ;;  %28914 = vmatpush3.bf16.msra.mxu0 %v32845_v0 }
0x1f66   :  { %28950 = vmatpush3.bf16.msra.mxu1 %v32841_v50  ;;  %28915 = vmatprep.subr.bf16.mxu0 %v30533_v7 }
0x1f67   :  { %28951 = vmatprep.subr.bf16.mxu1 %v30533_v7  ;;  %27028 = vmatprep.mubr.msk.f32.mxu0 %vm30534_vm2, %v30535_v34 }
0x1f68   :  { %27094 = vmatprep.mubr.msk.f32.mxu1 %vm30534_vm2, %v30535_v34 }
0x1f69   :  { %28917 = vmatpush3.bf16.msra.mxu0 %v32859_v47 }
0x1f6a   :  { %28953 = vmatpush3.bf16.msra.mxu1 %v32855_v22  ;;  %28918 = vmatprep.subr.bf16.mxu0 %v30533_v7 }
0x1f6b   :  { %28954 = vmatprep.subr.bf16.mxu1 %v30533_v7 }
0x1f6c   :  { %27029 = vmatmul.mubr.f32.vlgmr.msra.gmra.mrb[36].mxu0 %v15831_v18 }
0x1f6d   :  { %27095 = vmatmul.mubr.f32.vlgmr.msra.gmra.mrb[44].mxu1 %v16348_v32  ;;  %28920 = vmatpush3.bf16.msra.mxu0 %v32747_v11 }
0x1f6e   :  { %28956 = vmatpush3.bf16.msra.mxu1 %v32745_v62  ;;  %28921 = vmatprep.subr.bf16.mxu0 %v30533_v7 }
0x1f6f   :  { %28957 = vmatprep.subr.bf16.mxu1 %v30533_v7  ;;  %27039 = vmatprep.mubr.msk.f32.mxu0 %vm30534_vm2, %v30535_v34 }
0x1f70   :  { %27105 = vmatprep.mubr.msk.f32.mxu1 %vm30534_vm2, %v30535_v34 }
0x1f71   :  { %28923 = vmatpush3.bf16.msra.mxu0 %v32770_v24 }
0x1f72   :  { %28959 = vmatpush3.bf16.msra.mxu1 %v32767_v10  ;;  %28924 = vmatprep.subr.bf16.mxu0 %v30533_v7 }
0x1f73   :  { %28960 = vmatprep.subr.bf16.mxu1 %v30533_v7 }
0x1f74   :  { %27040 = vmatmul.mubr.f32.vlgmr.msra.gmra.mrb[36].mxu0 %v15832_v56  ;;  %v15750_v56 = vsel %vm2856_vm8, %v33090_v31, 0.0 }
0x1f75   :  { %27106 = vmatmul.mubr.f32.vlgmr.msra.gmra.mrb[44].mxu1 %v16349_v37  ;;  %28926 = vmatpush3.bf16.msra.mxu0 %v32893_v40 }
0x1f76   :  { %28962 = vmatpush3.bf16.msra.mxu1 %v32887_v60  ;;  %28927 = vmatprep.subr.bf16.mxu0 %v30533_v7 }
0x1f77   :  { %28963 = vmatprep.subr.bf16.mxu1 %v30533_v7  ;;  %27050 = vmatprep.mubr.msk.f32.mxu0 %vm30534_vm2, %v30535_v34 }
0x1f78   :  { %27116 = vmatprep.mubr.msk.f32.mxu1 %vm30534_vm2, %v30535_v34 }
0x1f79   :  { %28929 = vmatpush3.bf16.msra.mxu0 %v32911_v39 }
0x1f7a   :  { %28965 = vmatpush3.bf16.msra.mxu1 %v32905_v12  ;;  %28930 = vmatprep.subr.bf16.mxu0 %v30533_v7 }
0x1f7b   :  { %28966 = vmatprep.subr.bf16.mxu1 %v30533_v7 }
0x1f7c   :  { %27051 = vmatmul.mubr.f32.vlgmr.msra.gmra.mrb[36].mxu0 %v33111_v57 }
0x1f7d   :  { %27117 = vmatmul.mubr.f32.vlgmr.msra.gmra.mrb[44].mxu1 %v33114_v55  ;;  %28932 = vmatpush3.bf16.msra.mxu0 %v32747_v11 }
0x1f7e   :  { %28968 = vmatpush3.bf16.msra.mxu1 %v32745_v62  ;;  %28933 = vmatprep.subr.bf16.mxu0 %v30533_v7 }
0x1f7f   :  { %28969 = vmatprep.subr.bf16.mxu1 %v30533_v7  ;;  %27061 = vmatprep.mubr.msk.f32.mxu0 %vm30534_vm2, %v30535_v34 }
0x1f80   :  { %27127 = vmatprep.mubr.msk.f32.mxu1 %vm30534_vm2, %v30535_v34 }
0x1f81   :  { %28935 = vmatpush3.bf16.msra.mxu0 %v32770_v24 }
0x1f82   :  { %28971 = vmatpush3.bf16.msra.mxu1 %v32767_v10  ;;  %28972 = vmatprep.subr.bf16.mxu0 %v30533_v7 }
0x1f83   :  { %29008 = vmatprep.subr.bf16.mxu1 %v30533_v7 }
0x1f84   :  { %27062 = vmatmul.mubr.f32.vlgmr.msra.gmra.mrb[36].mxu0 %v33111_v57 }
0x1f85   :  { %27128 = vmatmul.mubr.f32.vlgmr.msra.gmra.mrb[44].mxu1 %v33114_v55  ;;  %28974 = vmatpush3.bf16.msra.mxu0 %v32747_v11 }
0x1f86   :  { %29010 = vmatpush3.bf16.msra.mxu1 %v32745_v62  ;;  %28975 = vmatprep.subr.bf16.mxu0 %v30533_v7 }
0x1f87   :  { %29011 = vmatprep.subr.bf16.mxu1 %v30533_v7  ;;  %27138 = vmatprep.mubr.msk.f32.mxu0 %vm30534_vm2, %v30535_v34 }
0x1f88   :  { %27204 = vmatprep.mubr.msk.f32.mxu1 %vm30534_vm2, %v30535_v34 }
0x1f89   :  { %28977 = vmatpush3.bf16.msra.mxu0 %v32770_v24 }
0x1f8a   :  { %29013 = vmatpush3.bf16.msra.mxu1 %v32767_v10  ;;  %28978 = vmatprep.subr.bf16.mxu0 %v30533_v7 }
0x1f8b   :  { %29014 = vmatprep.subr.bf16.mxu1 %v30533_v7 }
0x2057   :  { %v16242_v38 = vpop.f32.mrb[36].mxu0 }
0x2058   :  { %v16253_v58 = vadd.f32 %v16242_v38, %v32970_v28  ;;  %v16759_v29 = vpop.f32.mrb[44].mxu1  ;;  %v27063_v20 = vpop.f32.mrb[37].mxu0  ;;  %v16246_v16 = vadd.f32 %v16242_v38, %v15754_v36 }
0x2059   :  { %v16770_v3 = vadd.f32 %v16759_v29, %v32972_v25  ;;  %v27129_v15 = vpop.f32.mrb[45].mxu1  ;;  %v16763_v61 = vadd.f32 %v16759_v29, %v15755_v30  ;;  %v15752_v29 = vadd.f32 %v15750_v56, %v32984_v42 }
0x205a   :  { %16255 = vrot.lane.b32.xlu0 %v16253_v58, %s30536_s23  ;;  %v23570_v54 = vmul.f32 -1.442695, %v16246_v16 }
0x205b   :  { %16772 = vrot.lane.b32.xlu1 %v16770_v3, %s30536_s23  ;;  %v23571_v19 = vmul.f32 -1.442695, %v16763_v61  ;;  %v15753_v3 = vadd.f32 %v15751_v59, %v32990_v43 }
0x205c   :  { %30191 = vpow2.f32 %v23570_v54 }
0x205d   :  { %30193 = vpow2.f32 %v23571_v19 }
0x2066   :  { %v30192_v26 = vpop.eup %30191 }
0x2067   :  { %v30194_v41 = vpop.eup %30193  ;;  %v16250_v6 = vadd.f32 1.0, %v30192_v26 }
0x2068   :  { %v16767_v5 = vadd.f32 1.0, %v30194_v41 }
0x2069   :  { %30195 = vrcp.f32 %v16250_v6 }
0x206a   :  { %30197 = vrcp.f32 %v16767_v5 }
0x2073   :  { %v30196_v63 = vpop.eup %30195 }
0x2074   :  { %v30198_v21 = vpop.eup %30197  ;;  %v16265_v55 = vsub.f32 1.0, %v30196_v63  ;;  %v16271_v37 = vmul.f32 %v30196_v63, %v33098_v27 }
0x2075   :  { %v16782_v32 = vsub.f32 1.0, %v30198_v21  ;;  %v16788_v8 = vmul.f32 %v30198_v21, %v33106_v46 }
0x20cc   :  { %v16256_v33 = vpop.permute.xlu0 %16255 }
0x20cd   :  { %v16258_v35 = vmul.f32 %v30196_v63, %v16256_v33  ;;  %v16773_v53 = vpop.permute.xlu1 %16772 }
0x20ce   :  { %v16775_v49 = vmul.f32 %v30198_v21, %v16773_v53 }
0x20cf   :  { %16260 = vrot.lane.b32.xlu0 %v16258_v35, %s30536_s23 }
0x20d0   :  { %16777 = vrot.lane.b32.xlu1 %v16775_v49, %s30536_s23 }
0x2141   :  { %v16261_v2 = vpop.permute.xlu0 %16260 }
0x2142   :  { %v16263_v51 = vadd.f32 %v16261_v2, %v15754_v36  ;;  %v16778_v52 = vpop.permute.xlu1 %16777 }
0x2143   :  { %v16780_v14 = vadd.f32 %v16778_v52, %v15755_v30 }
0x2144   :  { %30199 = vtanh.f32 %v16263_v51 }
0x2145   :  { %30201 = vtanh.f32 %v16780_v14  ;;  %v16796_v14 = vld [vmem:[#allocation2 + $0x18] sm:$0xff] }
0x214e   :  { %v30200_v57 = vpop.eup %30199 }
0x214f   :  { %v30202_v44 = vpop.eup %30201  ;;  %16267 = vrot.lane.b32.xlu0 %v30200_v57, %s30538_s12 }
0x2150   :  { %16784 = vrot.lane.b32.xlu1 %v30202_v44, %s30538_s12  ;;  %v16797_v44 = vld [vmem:[#allocation3 + $0x20] sm:$0xff] }
0x21c1   :  { %v16268_v18 = vpop.permute.xlu0 %16267 }
0x21c2   :  { %v16270_v48 = vmul.f32 %v16268_v18, %v16265_v55  ;;  %v16785_v45 = vpop.permute.xlu1 %16784 }
0x21c3   :  { %v16787_v38 = vmul.f32 %v16785_v45, %v16782_v32 }
0x21c4   :  { %v16272_v58 = vadd.f32 %v16271_v37, %v16270_v48 }
0x21c5   :  { %v16789_v20 = vadd.f32 %v16788_v8, %v16787_v38 }
0x21c6   :  { %v16792_v31 = vsel %vm3928_vm10, %v16272_v58, 0.0  ;;  %v33219_v15 = vsel %vm3928_vm10, %v16272_v58, %v33098_v27 }
0x21c7   :  { %v33221_v36 = vadd.f32 %v16792_v31, %v15752_v29  ;;  %v16793_v9 = vsel %vm3929_vm9, %v16789_v20, 0.0  ;;  %16799 = vrot.lane.b32.xlu0 %v33219_v15, %s30538_s12  ;;  %v33230_v42 = vsel %vm3929_vm9, %v16789_v20, %v33106_v46 }
0x21c8   :  { %v33232_v43 = vadd.f32 %v16793_v9, %v15753_v3  ;;  %17316 = vrot.lane.b32.xlu1 %v33230_v42, %s30538_s12 }
0x2239   :  { %v16800_v27 = vpop.permute.xlu0 %16799 }
0x223a   :  { %v16801_v16 = vsel %vm1794_vm6, %v16800_v27, 0  ;;  %v17317_v30 = vpop.permute.xlu1 %17316 }
0x223b   :  { %v33237_v61 = vand.u32 4294901760, %v16801_v16  ;;  %v17318_v54 = vsel %vm1794_vm6, %v17317_v30, 0 }
0x223c   :  { %v33240_v19 = vand.u32 4294901760, %v17318_v54 }
0x223d   :  { %v16873_v26 = vsub.f32 %v16801_v16, %v33237_v61 }
0x223e   :  { %v17390_v46 = vsub.f32 %v17318_v54, %v33240_v19 }
0x223f   :  { %v16874_v41 = vand.u32 4294901760, %v16873_v26 }
0x2240   :  { %v17391_v6 = vand.u32 4294901760, %v17390_v46 }
0x2241   :  { %v16875_v5 = vsub.f32 %v16873_v26, %v16874_v41 }
0x2242   :  { %v17392_v63 = vsub.f32 %v17390_v46, %v17391_v6 }
0x2243   :  { %v16876_v33 = vand.u32 4294901760, %v16875_v5 }
0x2244   :  { %v17393_v21 = vand.u32 4294901760, %v17392_v63 }
0x2245   :  { %27139 = vmatmul.mubr.f32.vlgmr.msra.gmra.mrb[38].mxu0 %v16876_v33 }
0x2246   :  { %27205 = vmatmul.mubr.f32.vlgmr.msra.gmra.mrb[46].mxu1 %v17393_v21  ;;  %28980 = vmatpush3.bf16.msra.mxu0 %v32817_v4 }
0x2247   :  { %29016 = vmatpush3.bf16.msra.mxu1 %v32815_v23  ;;  %28981 = vmatprep.subr.bf16.mxu0 %v30533_v7 }
0x2248   :  { %29017 = vmatprep.subr.bf16.mxu1 %v30533_v7  ;;  %27149 = vmatprep.mubr.msk.f32.mxu0 %vm30534_vm2, %v30535_v34 }
0x2249   :  { %27215 = vmatprep.mubr.msk.f32.mxu1 %vm30534_vm2, %v30535_v34 }
0x224a   :  { %28983 = vmatpush3.bf16.msra.mxu0 %v32829_v13 }
0x224b   :  { %29019 = vmatpush3.bf16.msra.mxu1 %v32827_v17  ;;  %28984 = vmatprep.subr.bf16.mxu0 %v30533_v7 }
0x224c   :  { %29020 = vmatprep.subr.bf16.mxu1 %v30533_v7 }
0x224d   :  { %27150 = vmatmul.mubr.f32.vlgmr.msra.gmra.mrb[38].mxu0 %v33237_v61 }
0x224e   :  { %27216 = vmatmul.mubr.f32.vlgmr.msra.gmra.mrb[46].mxu1 %v33240_v19  ;;  %28986 = vmatpush3.bf16.msra.mxu0 %v32845_v0 }
0x224f   :  { %29022 = vmatpush3.bf16.msra.mxu1 %v32841_v50  ;;  %28987 = vmatprep.subr.bf16.mxu0 %v30533_v7 }
0x2250   :  { %29023 = vmatprep.subr.bf16.mxu1 %v30533_v7  ;;  %27160 = vmatprep.mubr.msk.f32.mxu0 %vm30534_vm2, %v30535_v34 }
0x2251   :  { %27226 = vmatprep.mubr.msk.f32.mxu1 %vm30534_vm2, %v30535_v34 }
0x2252   :  { %28989 = vmatpush3.bf16.msra.mxu0 %v32859_v47 }
0x2253   :  { %29025 = vmatpush3.bf16.msra.mxu1 %v32855_v22  ;;  %28990 = vmatprep.subr.bf16.mxu0 %v30533_v7 }
0x2254   :  { %29026 = vmatprep.subr.bf16.mxu1 %v30533_v7 }
0x2255   :  { %27161 = vmatmul.mubr.f32.vlgmr.msra.gmra.mrb[38].mxu0 %v16873_v26 }
0x2256   :  { %27227 = vmatmul.mubr.f32.vlgmr.msra.gmra.mrb[46].mxu1 %v17390_v46  ;;  %28992 = vmatpush3.bf16.msra.mxu0 %v32747_v11 }
0x2257   :  { %29028 = vmatpush3.bf16.msra.mxu1 %v32745_v62  ;;  %28993 = vmatprep.subr.bf16.mxu0 %v30533_v7 }
0x2258   :  { %29029 = vmatprep.subr.bf16.mxu1 %v30533_v7  ;;  %27171 = vmatprep.mubr.msk.f32.mxu0 %vm30534_vm2, %v30535_v34 }
0x2259   :  { %27237 = vmatprep.mubr.msk.f32.mxu1 %vm30534_vm2, %v30535_v34 }
0x225a   :  { %28995 = vmatpush3.bf16.msra.mxu0 %v32770_v24 }
0x225b   :  { %29031 = vmatpush3.bf16.msra.mxu1 %v32767_v10  ;;  %28996 = vmatprep.subr.bf16.mxu0 %v30533_v7 }
0x225c   :  { %29032 = vmatprep.subr.bf16.mxu1 %v30533_v7 }
0x225d   :  { %27172 = vmatmul.mubr.f32.vlgmr.msra.gmra.mrb[38].mxu0 %v16874_v41 }
0x225e   :  { %27238 = vmatmul.mubr.f32.vlgmr.msra.gmra.mrb[46].mxu1 %v17391_v6  ;;  %28998 = vmatpush3.bf16.msra.mxu0 %v32893_v40 }
0x225f   :  { %29034 = vmatpush3.bf16.msra.mxu1 %v32887_v60  ;;  %28999 = vmatprep.subr.bf16.mxu0 %v30533_v7 }
0x2260   :  { %29035 = vmatprep.subr.bf16.mxu1 %v30533_v7  ;;  %27182 = vmatprep.mubr.msk.f32.mxu0 %vm30534_vm2, %v30535_v34 }
0x2261   :  { %27248 = vmatprep.mubr.msk.f32.mxu1 %vm30534_vm2, %v30535_v34 }
0x2262   :  { %29001 = vmatpush3.bf16.msra.mxu0 %v32911_v39 }
0x2263   :  { %29037 = vmatpush3.bf16.msra.mxu1 %v32905_v12  ;;  %29002 = vmatprep.subr.bf16.mxu0 %v30533_v7 }
0x2264   :  { %29038 = vmatprep.subr.bf16.mxu1 %v30533_v7 }
0x2265   :  { %27183 = vmatmul.mubr.f32.vlgmr.msra.gmra.mrb[38].mxu0 %v33237_v61 }
0x2266   :  { %27249 = vmatmul.mubr.f32.vlgmr.msra.gmra.mrb[46].mxu1 %v33240_v19  ;;  %29004 = vmatpush3.bf16.msra.mxu0 %v32747_v11 }
0x2267   :  { %29040 = vmatpush3.bf16.msra.mxu1 %v32745_v62  ;;  %29005 = vmatprep.subr.bf16.mxu0 %v30533_v7 }
0x2268   :  { %29041 = vmatprep.subr.bf16.mxu1 %v30533_v7  ;;  %27193 = vmatprep.mubr.msk.f32.mxu0 %vm30534_vm2, %v30535_v34 }
0x2269   :  { %27259 = vmatprep.mubr.msk.f32.mxu1 %vm30534_vm2, %v30535_v34 }
0x226a   :  { %29007 = vmatpush3.bf16.msra.mxu0 %v32770_v24 }
0x226b   :  { %29043 = vmatpush3.bf16.msra.mxu1 %v32767_v10  ;;  %29044 = vmatprep.subr.bf16.mxu0 %v30533_v7 }
0x226c   :  { %29080 = vmatprep.subr.bf16.mxu1 %v30533_v7 }
0x226d   :  { %27194 = vmatmul.mubr.f32.vlgmr.msra.gmra.mrb[38].mxu0 %v33237_v61 }
0x226e   :  { %27260 = vmatmul.mubr.f32.vlgmr.msra.gmra.mrb[46].mxu1 %v33240_v19  ;;  %29046 = vmatpush3.bf16.msra.mxu0 %v32747_v11 }
0x226f   :  { %29082 = vmatpush3.bf16.msra.mxu1 %v32745_v62  ;;  %29047 = vmatprep.subr.bf16.mxu0 %v30533_v7 }
0x2270   :  { %29083 = vmatprep.subr.bf16.mxu1 %v30533_v7  ;;  %27270 = vmatprep.mubr.msk.f32.mxu0 %vm30534_vm2, %v30535_v34 }
0x2271   :  { %27336 = vmatprep.mubr.msk.f32.mxu1 %vm30534_vm2, %v30535_v34 }
0x2272   :  { %29049 = vmatpush3.bf16.msra.mxu0 %v32770_v24 }
0x2273   :  { %29085 = vmatpush3.bf16.msra.mxu1 %v32767_v10  ;;  %29050 = vmatprep.subr.bf16.mxu0 %v30533_v7 }
0x2274   :  { %29086 = vmatprep.subr.bf16.mxu1 %v30533_v7 }
0x2340   :  { %v17284_v35 = vpop.f32.mrb[38].mxu0 }
0x2341   :  { %v17295_v53 = vadd.f32 %v17284_v35, %v32970_v28  ;;  %v17801_v49 = vpop.f32.mrb[46].mxu1  ;;  %v27195_v2 = vpop.f32.mrb[39].mxu0  ;;  %v17288_v57 = vadd.f32 %v17284_v35, %v16796_v14 }
0x2342   :  { %v17812_v51 = vadd.f32 %v17801_v49, %v32972_v25  ;;  %v27261_v52 = vpop.f32.mrb[47].mxu1  ;;  %v17805_v55 = vadd.f32 %v17801_v49, %v16797_v44 }
0x2343   :  { %17297 = vrot.lane.b32.xlu0 %v17295_v53, %s30536_s23  ;;  %v23572_v18 = vmul.f32 -1.442695, %v17288_v57 }
0x2344   :  { %17814 = vrot.lane.b32.xlu1 %v17812_v51, %s30536_s23  ;;  %v23573_v32 = vmul.f32 -1.442695, %v17805_v55 }
0x2345   :  { %30203 = vpow2.f32 %v23572_v18 }
0x2346   :  { %30205 = vpow2.f32 %v23573_v32 }
0x234f   :  { %v30204_v56 = vpop.eup %30203 }
0x2350   :  { %v30206_v37 = vpop.eup %30205  ;;  %v17292_v48 = vadd.f32 1.0, %v30204_v56 }
0x2351   :  { %v17809_v45 = vadd.f32 1.0, %v30206_v37 }
0x2352   :  { %30207 = vrcp.f32 %v17292_v48 }
0x2353   :  { %30209 = vrcp.f32 %v17809_v45 }
0x235c   :  { %v30208_v59 = vpop.eup %30207 }
0x235d   :  { %v30210_v38 = vpop.eup %30209  ;;  %v17307_v61 = vsub.f32 1.0, %v30208_v59  ;;  %v17313_v26 = vmul.f32 %v30208_v59, %v33219_v15 }
0x235e   :  { %v17824_v19 = vsub.f32 1.0, %v30210_v38  ;;  %v17830_v6 = vmul.f32 %v30210_v38, %v33230_v42 }
0x23b5   :  { %v17298_v8 = vpop.permute.xlu0 %17297 }
0x23b6   :  { %v17300_v58 = vmul.f32 %v30208_v59, %v17298_v8  ;;  %v17815_v29 = vpop.permute.xlu1 %17814 }
0x23b7   :  { %v17817_v20 = vmul.f32 %v30210_v38, %v17815_v29 }
0x23b8   :  { %17302 = vrot.lane.b32.xlu0 %v17300_v58, %s30536_s23 }
0x23b9   :  { %17819 = vrot.lane.b32.xlu1 %v17817_v20, %s30536_s23  ;;  %v17838_v20 = vld [vmem:[#allocation2 + $0x20] sm:$0xff] }
0x242a   :  { %v17303_v3 = vpop.permute.xlu0 %17302 }
0x242b   :  { %v17305_v31 = vadd.f32 %v17303_v3, %v16796_v14  ;;  %v17820_v9 = vpop.permute.xlu1 %17819 }
0x242c   :  { %v17822_v27 = vadd.f32 %v17820_v9, %v16797_v44 }
0x242d   :  { %30211 = vtanh.f32 %v17305_v31  ;;  %v17839_v31 = vld [vmem:[#allocation3 + $0x18] sm:$0xff] }
0x242e   :  { %30213 = vtanh.f32 %v17822_v27 }
0x2437   :  { %v30212_v16 = vpop.eup %30211 }
0x2438   :  { %v30214_v30 = vpop.eup %30213  ;;  %17309 = vrot.lane.b32.xlu0 %v30212_v16, %s30538_s12 }
0x2439   :  { %17826 = vrot.lane.b32.xlu1 %v30214_v30, %s30538_s12 }
0x24aa   :  { %v17310_v54 = vpop.permute.xlu0 %17309 }
0x24ab   :  { %v17312_v46 = vmul.f32 %v17310_v54, %v17307_v61  ;;  %v17827_v41 = vpop.permute.xlu1 %17826 }
0x24ac   :  { %v17829_v5 = vmul.f32 %v17827_v41, %v17824_v19 }
0x24ad   :  { %v17314_v63 = vadd.f32 %v17313_v26, %v17312_v46 }
0x24ae   :  { %v17831_v33 = vadd.f32 %v17830_v6, %v17829_v5 }
0x24af   :  { %v17834_v21 = vsel %vm5006_vm12, %v17314_v63, 0.0  ;;  %v33337_v35 = vsel %vm5006_vm12, %v17314_v63, %v33219_v15 }
0x24b0   :  { %v33340_v53 = vadd.f32 %v17834_v21, %v33221_v36  ;;  %v17835_v49 = vsel %vm5007_vm11, %v17831_v33, 0.0  ;;  %17841 = vrot.lane.b32.xlu0 %v33337_v35, %s30538_s12  ;;  %v33349_v2 = vsel %vm5007_vm11, %v17831_v33, %v33230_v42 }
0x24b1   :  { %v33352_v51 = vadd.f32 %v17835_v49, %v33232_v43  ;;  %18358 = vrot.lane.b32.xlu1 %v33349_v2, %s30538_s12 }
0x2522   :  { %v17842_v15 = vpop.permute.xlu0 %17841 }
0x2523   :  { %v17843_v36 = vsel %vm1794_vm6, %v17842_v15, 0  ;;  %v18359_v52 = vpop.permute.xlu1 %18358 }
0x2524   :  { %v33357_v14 = vand.u32 4294901760, %v17843_v36  ;;  %v18360_v57 = vsel %vm1794_vm6, %v18359_v52, 0 }
0x2525   :  { %v33360_v44 = vand.u32 4294901760, %v18360_v57 }
0x2526   :  { %v17915_v55 = vsub.f32 %v17843_v36, %v33357_v14 }
0x2527   :  { %v18432_v42 = vsub.f32 %v18360_v57, %v33360_v44 }
0x2528   :  { %v17916_v18 = vand.u32 4294901760, %v17915_v55 }
0x2529   :  { %v18433_v43 = vand.u32 4294901760, %v18432_v42 }
0x252a   :  { %v17917_v32 = vsub.f32 %v17915_v55, %v17916_v18 }
0x252b   :  { %v18434_v56 = vsub.f32 %v18432_v42, %v18433_v43 }
0x252c   :  { %v17918_v37 = vand.u32 4294901760, %v17917_v32 }
0x252d   :  { %v18435_v48 = vand.u32 4294901760, %v18434_v56 }
0x252e   :  { %27271 = vmatmul.mubr.f32.vlgmr.msra.gmra.mrb[40].mxu0 %v17918_v37 }
0x252f   :  { %27337 = vmatmul.mubr.f32.vlgmr.msra.gmra.mrb[48].mxu1 %v18435_v48  ;;  %29052 = vmatpush3.bf16.msra.mxu0 %v32817_v4 }
0x2530   :  { %29088 = vmatpush3.bf16.msra.mxu1 %v32815_v23  ;;  %29053 = vmatprep.subr.bf16.mxu0 %v30533_v7 }
0x2531   :  { %29089 = vmatprep.subr.bf16.mxu1 %v30533_v7  ;;  %27281 = vmatprep.mubr.msk.f32.mxu0 %vm30534_vm2, %v30535_v34 }
0x2532   :  { %27347 = vmatprep.mubr.msk.f32.mxu1 %vm30534_vm2, %v30535_v34 }
0x2533   :  { %29055 = vmatpush3.bf16.msra.mxu0 %v32829_v13 }
0x2534   :  { %29091 = vmatpush3.bf16.msra.mxu1 %v32827_v17  ;;  %29056 = vmatprep.subr.bf16.mxu0 %v30533_v7 }
0x2535   :  { %29092 = vmatprep.subr.bf16.mxu1 %v30533_v7 }
0x2536   :  { %27282 = vmatmul.mubr.f32.vlgmr.msra.gmra.mrb[40].mxu0 %v33357_v14 }
0x2537   :  { %27348 = vmatmul.mubr.f32.vlgmr.msra.gmra.mrb[48].mxu1 %v33360_v44  ;;  %29058 = vmatpush3.bf16.msra.mxu0 %v32845_v0 }
0x2538   :  { %29094 = vmatpush3.bf16.msra.mxu1 %v32841_v50  ;;  %29059 = vmatprep.subr.bf16.mxu0 %v30533_v7 }
0x2539   :  { %29095 = vmatprep.subr.bf16.mxu1 %v30533_v7  ;;  %27292 = vmatprep.mubr.msk.f32.mxu0 %vm30534_vm2, %v30535_v34 }
0x253a   :  { %27358 = vmatprep.mubr.msk.f32.mxu1 %vm30534_vm2, %v30535_v34 }
0x253b   :  { %29061 = vmatpush3.bf16.msra.mxu0 %v32859_v47 }
0x253c   :  { %29097 = vmatpush3.bf16.msra.mxu1 %v32855_v22  ;;  %29062 = vmatprep.subr.bf16.mxu0 %v30533_v7 }
0x253d   :  { %29098 = vmatprep.subr.bf16.mxu1 %v30533_v7 }
0x253e   :  { %27293 = vmatmul.mubr.f32.vlgmr.msra.gmra.mrb[40].mxu0 %v17915_v55 }
0x253f   :  { %27359 = vmatmul.mubr.f32.vlgmr.msra.gmra.mrb[48].mxu1 %v18432_v42  ;;  %29064 = vmatpush3.bf16.msra.mxu0 %v32747_v11 }
0x2540   :  { %29100 = vmatpush3.bf16.msra.mxu1 %v32745_v62  ;;  %29065 = vmatprep.subr.bf16.mxu0 %v30533_v7 }
0x2541   :  { %29101 = vmatprep.subr.bf16.mxu1 %v30533_v7  ;;  %27303 = vmatprep.mubr.msk.f32.mxu0 %vm30534_vm2, %v30535_v34 }
0x2542   :  { %27369 = vmatprep.mubr.msk.f32.mxu1 %vm30534_vm2, %v30535_v34 }
0x2543   :  { %29067 = vmatpush3.bf16.msra.mxu0 %v32770_v24 }
0x2544   :  { %29103 = vmatpush3.bf16.msra.mxu1 %v32767_v10  ;;  %29068 = vmatprep.subr.bf16.mxu0 %v30533_v7 }
0x2545   :  { %29104 = vmatprep.subr.bf16.mxu1 %v30533_v7 }
0x2546   :  { %27304 = vmatmul.mubr.f32.vlgmr.msra.gmra.mrb[40].mxu0 %v17916_v18 }
0x2547   :  { %27370 = vmatmul.mubr.f32.vlgmr.msra.gmra.mrb[48].mxu1 %v18433_v43  ;;  %29070 = vmatpush3.bf16.msra.mxu0 %v32893_v40 }
0x2548   :  { %29106 = vmatpush3.bf16.msra.mxu1 %v32887_v60  ;;  %29071 = vmatprep.subr.bf16.mxu0 %v30533_v7 }
0x2549   :  { %29107 = vmatprep.subr.bf16.mxu1 %v30533_v7  ;;  %27314 = vmatprep.mubr.msk.f32.mxu0 %vm30534_vm2, %v30535_v34 }
0x254a   :  { %27380 = vmatprep.mubr.msk.f32.mxu1 %vm30534_vm2, %v30535_v34 }
0x254b   :  { %29073 = vmatpush3.bf16.msra.mxu0 %v32911_v39 }
0x254c   :  { %29109 = vmatpush3.bf16.msra.mxu1 %v32905_v12  ;;  %29074 = vmatprep.subr.bf16.mxu0 %v30533_v7 }
0x254d   :  { %29110 = vmatprep.subr.bf16.mxu1 %v30533_v7 }
0x254e   :  { %27315 = vmatmul.mubr.f32.vlgmr.msra.gmra.mrb[40].mxu0 %v33357_v14 }
0x254f   :  { %27381 = vmatmul.mubr.f32.vlgmr.msra.gmra.mrb[48].mxu1 %v33360_v44  ;;  %29076 = vmatpush3.bf16.msra.mxu0 %v32747_v11 }
0x2550   :  { %29112 = vmatpush3.bf16.msra.mxu1 %v32745_v62  ;;  %29077 = vmatprep.subr.bf16.mxu0 %v30533_v7 }
0x2551   :  { %29113 = vmatprep.subr.bf16.mxu1 %v30533_v7  ;;  %27325 = vmatprep.mubr.msk.f32.mxu0 %vm30534_vm2, %v30535_v34 }
0x2552   :  { %27391 = vmatprep.mubr.msk.f32.mxu1 %vm30534_vm2, %v30535_v34 }
0x2553   :  { %29079 = vmatpush3.bf16.msra.mxu0 %v32770_v24 }
0x2554   :  { %29115 = vmatpush3.bf16.msra.mxu1 %v32767_v10  ;;  %29116 = vmatprep.subr.bf16.mxu0 %v30533_v7 }
0x2555   :  { %29152 = vmatprep.subr.bf16.mxu1 %v30533_v7 }
0x2556   :  { %27326 = vmatmul.mubr.f32.vlgmr.msra.gmra.mrb[40].mxu0 %v33357_v14 }
0x2557   :  { %27392 = vmatmul.mubr.f32.vlgmr.msra.gmra.mrb[48].mxu1 %v33360_v44  ;;  %29118 = vmatpush3.bf16.msra.mxu0 %v32747_v11 }
0x2558   :  { %29154 = vmatpush3.bf16.msra.mxu1 %v32745_v62  ;;  %29119 = vmatprep.subr.bf16.mxu0 %v30533_v7 }
0x2559   :  { %29155 = vmatprep.subr.bf16.mxu1 %v30533_v7  ;;  %27402 = vmatprep.mubr.msk.f32.mxu0 %vm30534_vm2, %v30535_v34 }
0x255a   :  { %27468 = vmatprep.mubr.msk.f32.mxu1 %vm30534_vm2, %v30535_v34 }
0x255b   :  { %29121 = vmatpush3.bf16.msra.mxu0 %v32770_v24 }
0x255c   :  { %29157 = vmatpush3.bf16.msra.mxu1 %v32767_v10  ;;  %29122 = vmatprep.subr.bf16.mxu0 %v30533_v7 }
0x255d   :  { %29158 = vmatprep.subr.bf16.mxu1 %v30533_v7 }
0x2629   :  { %v18326_v45 = vpop.f32.mrb[40].mxu0 }
0x262a   :  { %v18337_v59 = vadd.f32 %v18326_v45, %v32970_v28  ;;  %v18843_v8 = vpop.f32.mrb[48].mxu1  ;;  %v27327_v38 = vpop.f32.mrb[41].mxu0  ;;  %v18330_v3 = vadd.f32 %v18326_v45, %v17838_v20 }
0x262b   :  { %v18854_v58 = vadd.f32 %v18843_v8, %v32972_v25  ;;  %v27393_v29 = vpop.f32.mrb[49].mxu1  ;;  %v18847_v9 = vadd.f32 %v18843_v8, %v17839_v31 }
0x262c   :  { %18339 = vrot.lane.b32.xlu0 %v18337_v59, %s30536_s23  ;;  %v23574_v27 = vmul.f32 -1.442695, %v18330_v3 }
0x262d   :  { %18856 = vrot.lane.b32.xlu1 %v18854_v58, %s30536_s23  ;;  %v23575_v16 = vmul.f32 -1.442695, %v18847_v9 }
0x262e   :  { %30215 = vpow2.f32 %v23574_v27 }
0x262f   :  { %30217 = vpow2.f32 %v23575_v16 }
0x2638   :  { %v30216_v30 = vpop.eup %30215 }
0x2639   :  { %v30218_v61 = vpop.eup %30217  ;;  %v18334_v54 = vadd.f32 1.0, %v30216_v30 }
0x263a   :  { %v18851_v19 = vadd.f32 1.0, %v30218_v61 }
0x263b   :  { %30219 = vrcp.f32 %v18334_v54 }
0x263c   :  { %30221 = vrcp.f32 %v18851_v19 }
0x2645   :  { %v30220_v26 = vpop.eup %30219 }
0x2646   :  { %v30222_v41 = vpop.eup %30221  ;;  %v18349_v14 = vsub.f32 1.0, %v30220_v26  ;;  %v18355_v55 = vmul.f32 %v30220_v26, %v33337_v35 }
0x2647   :  { %v18866_v44 = vsub.f32 1.0, %v30222_v41  ;;  %v18872_v43 = vmul.f32 %v30222_v41, %v33349_v2 }
0x269e   :  { %v18340_v46 = vpop.permute.xlu0 %18339 }
0x269f   :  { %v18342_v6 = vmul.f32 %v30220_v26, %v18340_v46  ;;  %v18857_v5 = vpop.permute.xlu1 %18856 }
0x26a0   :  { %v18859_v63 = vmul.f32 %v30222_v41, %v18857_v5 }
0x26a1   :  { %18344 = vrot.lane.b32.xlu0 %v18342_v6, %s30536_s23 }
0x26a2   :  { %18861 = vrot.lane.b32.xlu1 %v18859_v63, %s30536_s23  ;;  %v18880_v63 = vld [vmem:[#allocation2 + $0x28] sm:$0xff] }
0x2713   :  { %v18345_v33 = vpop.permute.xlu0 %18344 }
0x2714   :  { %v18347_v21 = vadd.f32 %v18345_v33, %v17838_v20  ;;  %v18862_v49 = vpop.permute.xlu1 %18861 }
0x2715   :  { %v18864_v15 = vadd.f32 %v18862_v49, %v17839_v31 }
0x2716   :  { %30223 = vtanh.f32 %v18347_v21  ;;  %v18881_v21 = vld [vmem:[#allocation3 + $0x10] sm:$0xff] }
0x2717   :  { %30225 = vtanh.f32 %v18864_v15 }
0x2720   :  { %v30224_v36 = vpop.eup %30223 }
0x2721   :  { %v30226_v52 = vpop.eup %30225  ;;  %18351 = vrot.lane.b32.xlu0 %v30224_v36, %s30538_s12 }
0x2722   :  { %18868 = vrot.lane.b32.xlu1 %v30226_v52, %s30538_s12 }
0x2793   :  { %v18352_v57 = vpop.permute.xlu0 %18351 }
0x2794   :  { %v18354_v42 = vmul.f32 %v18352_v57, %v18349_v14  ;;  %v18869_v18 = vpop.permute.xlu1 %18868 }
0x2795   :  { %v18871_v32 = vmul.f32 %v18869_v18, %v18866_v44 }
0x2796   :  { %v18356_v56 = vadd.f32 %v18355_v55, %v18354_v42 }
0x2797   :  { %v18873_v37 = vadd.f32 %v18872_v43, %v18871_v32 }
0x2798   :  { %v18876_v48 = vsel %vm5007_vm11, %v18356_v56, 0.0  ;;  %v33457_v45 = vsel %vm5007_vm11, %v18356_v56, %v33337_v35 }
0x2799   :  { %v33460_v59 = vadd.f32 %v18876_v48, %v33340_v53  ;;  %v18877_v8 = vsel %vm5006_vm12, %v18873_v37, 0.0  ;;  %18883 = vrot.lane.b32.xlu0 %v33457_v45, %s30538_s12  ;;  %v33469_v38 = vsel %vm5006_vm12, %v18873_v37, %v33349_v2 }
0x279a   :  { %v33472_v58 = vadd.f32 %v18877_v8, %v33352_v51  ;;  %19400 = vrot.lane.b32.xlu1 %v33469_v38, %s30538_s12 }
0x280b   :  { %v18884_v35 = vpop.permute.xlu0 %18883 }
0x280c   :  { %v18885_v53 = vsel %vm1794_vm6, %v18884_v35, 0  ;;  %v19401_v29 = vpop.permute.xlu1 %19400 }
0x280d   :  { %v33477_v20 = vand.u32 4294901760, %v18885_v53  ;;  %v19402_v3 = vsel %vm1794_vm6, %v19401_v29, 0 }
0x280e   :  { %v33480_v31 = vand.u32 4294901760, %v19402_v3 }
0x280f   :  { %v18957_v9 = vsub.f32 %v18885_v53, %v33477_v20 }
0x2810   :  { %v19474_v2 = vsub.f32 %v19402_v3, %v33480_v31 }
0x2811   :  { %v18958_v27 = vand.u32 4294901760, %v18957_v9 }
0x2812   :  { %v19475_v51 = vand.u32 4294901760, %v19474_v2 }
0x2813   :  { %v18959_v16 = vsub.f32 %v18957_v9, %v18958_v27 }
0x2814   :  { %v19476_v30 = vsub.f32 %v19474_v2, %v19475_v51 }
0x2815   :  { %v18960_v61 = vand.u32 4294901760, %v18959_v16 }
0x2816   :  { %v19477_v54 = vand.u32 4294901760, %v19476_v30 }
0x2817   :  { %27403 = vmatmul.mubr.f32.vlgmr.msra.gmra.mrb[42].mxu0 %v18960_v61 }
0x2818   :  { %27469 = vmatmul.mubr.f32.vlgmr.msra.gmra.mrb[50].mxu1 %v19477_v54  ;;  %29124 = vmatpush3.bf16.msra.mxu0 %v32817_v4 }
0x2819   :  { %29160 = vmatpush3.bf16.msra.mxu1 %v32815_v23  ;;  %29125 = vmatprep.subr.bf16.mxu0 %v30533_v7 }
0x281a   :  { %29161 = vmatprep.subr.bf16.mxu1 %v30533_v7  ;;  %27413 = vmatprep.mubr.msk.f32.mxu0 %vm30534_vm2, %v30535_v34 }
0x281b   :  { %27479 = vmatprep.mubr.msk.f32.mxu1 %vm30534_vm2, %v30535_v34 }
0x281c   :  { %29127 = vmatpush3.bf16.msra.mxu0 %v32829_v13 }
0x281d   :  { %29163 = vmatpush3.bf16.msra.mxu1 %v32827_v17  ;;  %29128 = vmatprep.subr.bf16.mxu0 %v30533_v7 }
0x281e   :  { %29164 = vmatprep.subr.bf16.mxu1 %v30533_v7 }
0x281f   :  { %27414 = vmatmul.mubr.f32.vlgmr.msra.gmra.mrb[42].mxu0 %v33477_v20 }
0x2820   :  { %27480 = vmatmul.mubr.f32.vlgmr.msra.gmra.mrb[50].mxu1 %v33480_v31  ;;  %29130 = vmatpush3.bf16.msra.mxu0 %v32845_v0 }
0x2821   :  { %29166 = vmatpush3.bf16.msra.mxu1 %v32841_v50  ;;  %29131 = vmatprep.subr.bf16.mxu0 %v30533_v7 }
0x2822   :  { %29167 = vmatprep.subr.bf16.mxu1 %v30533_v7  ;;  %27424 = vmatprep.mubr.msk.f32.mxu0 %vm30534_vm2, %v30535_v34 }
0x2823   :  { %27490 = vmatprep.mubr.msk.f32.mxu1 %vm30534_vm2, %v30535_v34 }
0x2824   :  { %29133 = vmatpush3.bf16.msra.mxu0 %v32859_v47 }
0x2825   :  { %29169 = vmatpush3.bf16.msra.mxu1 %v32855_v22  ;;  %29134 = vmatprep.subr.bf16.mxu0 %v30533_v7 }
0x2826   :  { %29170 = vmatprep.subr.bf16.mxu1 %v30533_v7 }
0x2827   :  { %27425 = vmatmul.mubr.f32.vlgmr.msra.gmra.mrb[42].mxu0 %v18957_v9 }
0x2828   :  { %27491 = vmatmul.mubr.f32.vlgmr.msra.gmra.mrb[50].mxu1 %v19474_v2  ;;  %29136 = vmatpush3.bf16.msra.mxu0 %v32747_v11 }
0x2829   :  { %29172 = vmatpush3.bf16.msra.mxu1 %v32745_v62  ;;  %29137 = vmatprep.subr.bf16.mxu0 %v30533_v7 }
0x282a   :  { %29173 = vmatprep.subr.bf16.mxu1 %v30533_v7  ;;  %27435 = vmatprep.mubr.msk.f32.mxu0 %vm30534_vm2, %v30535_v34 }
0x282b   :  { %27501 = vmatprep.mubr.msk.f32.mxu1 %vm30534_vm2, %v30535_v34 }
0x282c   :  { %29139 = vmatpush3.bf16.msra.mxu0 %v32770_v24 }
0x282d   :  { %29175 = vmatpush3.bf16.msra.mxu1 %v32767_v10  ;;  %29140 = vmatprep.subr.bf16.mxu0 %v30533_v7 }
0x282e   :  { %29176 = vmatprep.subr.bf16.mxu1 %v30533_v7 }
0x282f   :  { %27436 = vmatmul.mubr.f32.vlgmr.msra.gmra.mrb[42].mxu0 %v18958_v27 }
0x2830   :  { %27502 = vmatmul.mubr.f32.vlgmr.msra.gmra.mrb[50].mxu1 %v19475_v51  ;;  %29142 = vmatpush3.bf16.msra.mxu0 %v32893_v40 }
0x2831   :  { %29178 = vmatpush3.bf16.msra.mxu1 %v32887_v60  ;;  %29143 = vmatprep.subr.bf16.mxu0 %v30533_v7 }
0x2832   :  { %29179 = vmatprep.subr.bf16.mxu1 %v30533_v7  ;;  %27446 = vmatprep.mubr.msk.f32.mxu0 %vm30534_vm2, %v30535_v34 }
0x2833   :  { %27512 = vmatprep.mubr.msk.f32.mxu1 %vm30534_vm2, %v30535_v34 }
0x2834   :  { %29145 = vmatpush3.bf16.msra.mxu0 %v32911_v39 }
0x2835   :  { %29181 = vmatpush3.bf16.msra.mxu1 %v32905_v12  ;;  %29146 = vmatprep.subr.bf16.mxu0 %v30533_v7 }
0x2836   :  { %29182 = vmatprep.subr.bf16.mxu1 %v30533_v7 }
0x2837   :  { %27447 = vmatmul.mubr.f32.vlgmr.msra.gmra.mrb[42].mxu0 %v33477_v20 }
0x2838   :  { %27513 = vmatmul.mubr.f32.vlgmr.msra.gmra.mrb[50].mxu1 %v33480_v31  ;;  %29148 = vmatpush3.bf16.msra.mxu0 %v32747_v11 }
0x2839   :  { %29184 = vmatpush3.bf16.msra.mxu1 %v32745_v62  ;;  %29149 = vmatprep.subr.bf16.mxu0 %v30533_v7 }
0x283a   :  { %29185 = vmatprep.subr.bf16.mxu1 %v30533_v7  ;;  %27457 = vmatprep.mubr.msk.f32.mxu0 %vm30534_vm2, %v30535_v34 }
0x283b   :  { %27523 = vmatprep.mubr.msk.f32.mxu1 %vm30534_vm2, %v30535_v34 }
0x283c   :  { %29151 = vmatpush3.bf16.msra.mxu0 %v32770_v24 }
0x283d   :  { %29187 = vmatpush3.bf16.msra.mxu1 %v32767_v10  ;;  %29188 = vmatprep.subr.bf16.mxu0 %v30533_v7 }
0x283e   :  { %29224 = vmatprep.subr.bf16.mxu1 %v30533_v7 }
0x283f   :  { %27458 = vmatmul.mubr.f32.vlgmr.msra.gmra.mrb[42].mxu0 %v33477_v20 }
0x2840   :  { %27524 = vmatmul.mubr.f32.vlgmr.msra.gmra.mrb[50].mxu1 %v33480_v31  ;;  %29190 = vmatpush3.bf16.msra.mxu0 %v32747_v11 }
0x2841   :  { %29226 = vmatpush3.bf16.msra.mxu1 %v32745_v62  ;;  %29191 = vmatprep.subr.bf16.mxu0 %v30533_v7 }
0x2842   :  { %29227 = vmatprep.subr.bf16.mxu1 %v30533_v7  ;;  %27534 = vmatprep.mubr.msk.f32.mxu0 %vm30534_vm2, %v30535_v34 }
0x2843   :  { %27600 = vmatprep.mubr.msk.f32.mxu1 %vm30534_vm2, %v30535_v34 }
0x2844   :  { %29193 = vmatpush3.bf16.msra.mxu0 %v32770_v24 }
0x2845   :  { %29229 = vmatpush3.bf16.msra.mxu1 %v32767_v10  ;;  %29194 = vmatprep.subr.bf16.mxu0 %v30533_v7 }
0x2846   :  { %29230 = vmatprep.subr.bf16.mxu1 %v30533_v7 }
0x2912   :  { %v19368_v19 = vpop.f32.mrb[42].mxu0 }
0x2913   :  { %v19379_v26 = vadd.f32 %v19368_v19, %v32970_v28  ;;  %v19885_v46 = vpop.f32.mrb[50].mxu1  ;;  %v27459_v41 = vpop.f32.mrb[43].mxu0  ;;  %v19372_v33 = vadd.f32 %v19368_v19, %v18880_v63 }
0x2914   :  { %v19896_v6 = vadd.f32 %v19885_v46, %v32972_v25  ;;  %v27525_v5 = vpop.f32.mrb[51].mxu1  ;;  %v19889_v49 = vadd.f32 %v19885_v46, %v18881_v21 }
0x2915   :  { %19381 = vrot.lane.b32.xlu0 %v19379_v26, %s30536_s23  ;;  %v23576_v15 = vmul.f32 -1.442695, %v19372_v33 }
0x2916   :  { %19898 = vrot.lane.b32.xlu1 %v19896_v6, %s30536_s23  ;;  %v23577_v36 = vmul.f32 -1.442695, %v19889_v49 }
0x2917   :  { %30227 = vpow2.f32 %v23576_v15 }
0x2918   :  { %30229 = vpow2.f32 %v23577_v36 }
0x2921   :  { %v30228_v52 = vpop.eup %30227 }
0x2922   :  { %v30230_v14 = vpop.eup %30229  ;;  %v19376_v57 = vadd.f32 1.0, %v30228_v52 }
0x2923   :  { %v19893_v44 = vadd.f32 1.0, %v30230_v14 }
0x2924   :  { %30231 = vrcp.f32 %v19376_v57 }
0x2925   :  { %30233 = vrcp.f32 %v19893_v44 }
0x292e   :  { %v30232_v55 = vpop.eup %30231 }
0x292f   :  { %v30234_v18 = vpop.eup %30233  ;;  %v19391_v20 = vsub.f32 1.0, %v30232_v55  ;;  %v19397_v9 = vmul.f32 %v30232_v55, %v33457_v45 }
0x2930   :  { %v19908_v31 = vsub.f32 1.0, %v30234_v18  ;;  %v19914_v51 = vmul.f32 %v30234_v18, %v33469_v38 }
0x2987   :  { %v19382_v42 = vpop.permute.xlu0 %19381 }
0x2988   :  { %v19384_v43 = vmul.f32 %v30232_v55, %v19382_v42  ;;  %v19899_v32 = vpop.permute.xlu1 %19898 }
0x2989   :  { %v19901_v56 = vmul.f32 %v30234_v18, %v19899_v32 }
0x298a   :  { %19386 = vrot.lane.b32.xlu0 %v19384_v43, %s30536_s23 }
0x298b   :  { %19903 = vrot.lane.b32.xlu1 %v19901_v56, %s30536_s23  ;;  %v19922_v56 = vld [vmem:[#allocation2 + $0x30] sm:$0xff] }
0x29fc   :  { %v19387_v37 = vpop.permute.xlu0 %19386 }
0x29fd   :  { %v19389_v48 = vadd.f32 %v19387_v37, %v18880_v63  ;;  %v19904_v8 = vpop.permute.xlu1 %19903 }
0x29fe   :  { %v19906_v35 = vadd.f32 %v19904_v8, %v18881_v21 }
0x29ff   :  { %30235 = vtanh.f32 %v19389_v48  ;;  %v19923_v48 = vld [vmem:[#allocation3 + $0x8] sm:$0xff] }
0x2a00   :  { %30237 = vtanh.f32 %v19906_v35 }
0x2a09   :  { %v30236_v53 = vpop.eup %30235 }
0x2a0a   :  { %v30238_v29 = vpop.eup %30237  ;;  %19393 = vrot.lane.b32.xlu0 %v30236_v53, %s30538_s12 }
0x2a0b   :  { %19910 = vrot.lane.b32.xlu1 %v30238_v29, %s30538_s12 }
0x2a7c   :  { %v19394_v3 = vpop.permute.xlu0 %19393 }
0x2a7d   :  { %v19396_v2 = vmul.f32 %v19394_v3, %v19391_v20  ;;  %v19911_v27 = vpop.permute.xlu1 %19910 }
0x2a7e   :  { %v19913_v16 = vmul.f32 %v19911_v27, %v19908_v31 }
0x2a7f   :  { %v19398_v30 = vadd.f32 %v19397_v9, %v19396_v2 }
0x2a80   :  { %v19915_v61 = vadd.f32 %v19914_v51, %v19913_v16 }
0x2a81   :  { %v19918_v54 = vsel %vm3929_vm9, %v19398_v30, 0.0  ;;  %v33577_v19 = vsel %vm3929_vm9, %v19398_v30, %v33457_v45 }
0x2a82   :  { %v33580_v26 = vadd.f32 %v19918_v54, %v33460_v59  ;;  %v19919_v46 = vsel %vm3928_vm10, %v19915_v61, 0.0  ;;  %19925 = vrot.lane.b32.xlu0 %v33577_v19, %s30538_s12  ;;  %v33589_v41 = vsel %vm3928_vm10, %v19915_v61, %v33469_v38 }
0x2a83   :  { %v33592_v6 = vadd.f32 %v19919_v46, %v33472_v58  ;;  %20442 = vrot.lane.b32.xlu1 %v33589_v41, %s30538_s12 }
0x2af4   :  { %v19926_v45 = vpop.permute.xlu0 %19925 }
0x2af5   :  { %v19927_v59 = vsel %vm1794_vm6, %v19926_v45, 0  ;;  %v20443_v5 = vpop.permute.xlu1 %20442 }
0x2af6   :  { %v33597_v63 = vand.u32 4294901760, %v19927_v59  ;;  %v20444_v33 = vsel %vm1794_vm6, %v20443_v5, 0 }
0x2af7   :  { %v33600_v21 = vand.u32 4294901760, %v20444_v33 }
0x2af8   :  { %v19999_v49 = vsub.f32 %v19927_v59, %v33597_v63 }
0x2af9   :  { %v20516_v38 = vsub.f32 %v20444_v33, %v33600_v21 }
0x2afa   :  { %v20000_v15 = vand.u32 4294901760, %v19999_v49 }
0x2afb   :  { %v20517_v58 = vand.u32 4294901760, %v20516_v38 }
0x2afc   :  { %v20001_v36 = vsub.f32 %v19999_v49, %v20000_v15 }
0x2afd   :  { %v20518_v52 = vsub.f32 %v20516_v38, %v20517_v58 }
0x2afe   :  { %v20002_v14 = vand.u32 4294901760, %v20001_v36 }
0x2aff   :  { %v20519_v57 = vand.u32 4294901760, %v20518_v52 }
0x2b00   :  { %27535 = vmatmul.mubr.f32.vlgmr.msra.gmra.mrb[44].mxu0 %v20002_v14 }
0x2b01   :  { %27601 = vmatmul.mubr.f32.vlgmr.msra.gmra.mrb[52].mxu1 %v20519_v57  ;;  %29196 = vmatpush3.bf16.msra.mxu0 %v32817_v4 }
0x2b02   :  { %29232 = vmatpush3.bf16.msra.mxu1 %v32815_v23  ;;  %29197 = vmatprep.subr.bf16.mxu0 %v30533_v7 }
0x2b03   :  { %29233 = vmatprep.subr.bf16.mxu1 %v30533_v7  ;;  %27545 = vmatprep.mubr.msk.f32.mxu0 %vm30534_vm2, %v30535_v34 }
0x2b04   :  { %27611 = vmatprep.mubr.msk.f32.mxu1 %vm30534_vm2, %v30535_v34 }
0x2b05   :  { %29199 = vmatpush3.bf16.msra.mxu0 %v32829_v13 }
0x2b06   :  { %29235 = vmatpush3.bf16.msra.mxu1 %v32827_v17  ;;  %29200 = vmatprep.subr.bf16.mxu0 %v30533_v7 }
0x2b07   :  { %29236 = vmatprep.subr.bf16.mxu1 %v30533_v7 }
0x2b08   :  { %27546 = vmatmul.mubr.f32.vlgmr.msra.gmra.mrb[44].mxu0 %v33597_v63 }
0x2b09   :  { %27612 = vmatmul.mubr.f32.vlgmr.msra.gmra.mrb[52].mxu1 %v33600_v21  ;;  %29202 = vmatpush3.bf16.msra.mxu0 %v32845_v0 }
0x2b0a   :  { %29238 = vmatpush3.bf16.msra.mxu1 %v32841_v50  ;;  %29203 = vmatprep.subr.bf16.mxu0 %v30533_v7 }
0x2b0b   :  { %29239 = vmatprep.subr.bf16.mxu1 %v30533_v7  ;;  %27556 = vmatprep.mubr.msk.f32.mxu0 %vm30534_vm2, %v30535_v34 }
0x2b0c   :  { %27622 = vmatprep.mubr.msk.f32.mxu1 %vm30534_vm2, %v30535_v34 }
0x2b0d   :  { %29205 = vmatpush3.bf16.msra.mxu0 %v32859_v47 }
0x2b0e   :  { %29241 = vmatpush3.bf16.msra.mxu1 %v32855_v22  ;;  %29206 = vmatprep.subr.bf16.mxu0 %v30533_v7 }
0x2b0f   :  { %29242 = vmatprep.subr.bf16.mxu1 %v30533_v7 }
0x2b10   :  { %27557 = vmatmul.mubr.f32.vlgmr.msra.gmra.mrb[44].mxu0 %v19999_v49 }
0x2b11   :  { %27623 = vmatmul.mubr.f32.vlgmr.msra.gmra.mrb[52].mxu1 %v20516_v38  ;;  %29208 = vmatpush3.bf16.msra.mxu0 %v32747_v11 }
0x2b12   :  { %29244 = vmatpush3.bf16.msra.mxu1 %v32745_v62  ;;  %29209 = vmatprep.subr.bf16.mxu0 %v30533_v7 }
0x2b13   :  { %29245 = vmatprep.subr.bf16.mxu1 %v30533_v7  ;;  %27567 = vmatprep.mubr.msk.f32.mxu0 %vm30534_vm2, %v30535_v34 }
0x2b14   :  { %27633 = vmatprep.mubr.msk.f32.mxu1 %vm30534_vm2, %v30535_v34 }
0x2b15   :  { %29211 = vmatpush3.bf16.msra.mxu0 %v32770_v24 }
0x2b16   :  { %29247 = vmatpush3.bf16.msra.mxu1 %v32767_v10  ;;  %29212 = vmatprep.subr.bf16.mxu0 %v30533_v7 }
0x2b17   :  { %29248 = vmatprep.subr.bf16.mxu1 %v30533_v7 }
0x2b18   :  { %27568 = vmatmul.mubr.f32.vlgmr.msra.gmra.mrb[44].mxu0 %v20000_v15 }
0x2b19   :  { %27634 = vmatmul.mubr.f32.vlgmr.msra.gmra.mrb[52].mxu1 %v20517_v58  ;;  %29214 = vmatpush3.bf16.msra.mxu0 %v32893_v40 }
0x2b1a   :  { %29250 = vmatpush3.bf16.msra.mxu1 %v32887_v60  ;;  %29215 = vmatprep.subr.bf16.mxu0 %v30533_v7 }
0x2b1b   :  { %29251 = vmatprep.subr.bf16.mxu1 %v30533_v7  ;;  %27578 = vmatprep.mubr.msk.f32.mxu0 %vm30534_vm2, %v30535_v34 }
0x2b1c   :  { %27644 = vmatprep.mubr.msk.f32.mxu1 %vm30534_vm2, %v30535_v34 }
0x2b1d   :  { %29217 = vmatpush3.bf16.msra.mxu0 %v32911_v39 }
0x2b1e   :  { %29253 = vmatpush3.bf16.msra.mxu1 %v32905_v12  ;;  %29218 = vmatprep.subr.bf16.mxu0 %v30533_v7 }
0x2b1f   :  { %29254 = vmatprep.subr.bf16.mxu1 %v30533_v7 }
0x2b20   :  { %27579 = vmatmul.mubr.f32.vlgmr.msra.gmra.mrb[44].mxu0 %v33597_v63 }
0x2b21   :  { %27645 = vmatmul.mubr.f32.vlgmr.msra.gmra.mrb[52].mxu1 %v33600_v21  ;;  %29220 = vmatpush3.bf16.msra.mxu0 %v32747_v11 }
0x2b22   :  { %29256 = vmatpush3.bf16.msra.mxu1 %v32745_v62  ;;  %29221 = vmatprep.subr.bf16.mxu0 %v30533_v7 }
0x2b23   :  { %29257 = vmatprep.subr.bf16.mxu1 %v30533_v7  ;;  %27589 = vmatprep.mubr.msk.f32.mxu0 %vm30534_vm2, %v30535_v34 }
0x2b24   :  { %27655 = vmatprep.mubr.msk.f32.mxu1 %vm30534_vm2, %v30535_v34 }
0x2b25   :  { %29223 = vmatpush3.bf16.msra.mxu0 %v32770_v24 }
0x2b26   :  { %29259 = vmatpush3.bf16.msra.mxu1 %v32767_v10  ;;  %29260 = vmatprep.subr.bf16.mxu0 %v30533_v7 }
0x2b27   :  { %29296 = vmatprep.subr.bf16.mxu1 %v30533_v7 }
0x2b28   :  { %27590 = vmatmul.mubr.f32.vlgmr.msra.gmra.mrb[44].mxu0 %v33597_v63 }
0x2b29   :  { %27656 = vmatmul.mubr.f32.vlgmr.msra.gmra.mrb[52].mxu1 %v33600_v21  ;;  %29262 = vmatpush3.bf16.msra.mxu0 %v32747_v11 }
0x2b2a   :  { %29298 = vmatpush3.bf16.msra.mxu1 %v32745_v62  ;;  %29263 = vmatprep.subr.bf16.mxu0 %v30533_v7 }
0x2b2b   :  { %29299 = vmatprep.subr.bf16.mxu1 %v30533_v7  ;;  %27666 = vmatprep.mubr.msk.f32.mxu0 %vm30534_vm2, %v30535_v34 }
0x2b2c   :  { %27732 = vmatprep.mubr.msk.f32.mxu1 %vm30534_vm2, %v30535_v34 }
0x2b2d   :  { %29265 = vmatpush3.bf16.msra.mxu0 %v32770_v24 }
0x2b2e   :  { %29301 = vmatpush3.bf16.msra.mxu1 %v32767_v10  ;;  %29266 = vmatprep.subr.bf16.mxu0 %v30533_v7 }
0x2b2f   :  { %29302 = vmatprep.subr.bf16.mxu1 %v30533_v7 }
0x2bfb   :  { %v20410_v44 = vpop.f32.mrb[44].mxu0 }
0x2bfc   :  { %v20421_v55 = vadd.f32 %v20410_v44, %v32970_v28  ;;  %v20927_v42 = vpop.f32.mrb[52].mxu1  ;;  %v27591_v18 = vpop.f32.mrb[45].mxu0  ;;  %v20414_v37 = vadd.f32 %v20410_v44, %v19922_v56 }
0x2bfd   :  { %v20938_v43 = vadd.f32 %v20927_v42, %v32972_v25  ;;  %v27657_v32 = vpop.f32.mrb[53].mxu1  ;;  %v20931_v8 = vadd.f32 %v20927_v42, %v19923_v48 }
0x2bfe   :  { %20423 = vrot.lane.b32.xlu0 %v20421_v55, %s30536_s23  ;;  %v23578_v35 = vmul.f32 -1.442695, %v20414_v37 }
0x2bff   :  { %20940 = vrot.lane.b32.xlu1 %v20938_v43, %s30536_s23  ;;  %v23579_v53 = vmul.f32 -1.442695, %v20931_v8 }
0x2c00   :  { %30239 = vpow2.f32 %v23578_v35 }
0x2c01   :  { %30241 = vpow2.f32 %v23579_v53 }
0x2c0a   :  { %v30240_v29 = vpop.eup %30239 }
0x2c0b   :  { %v30242_v20 = vpop.eup %30241  ;;  %v20418_v3 = vadd.f32 1.0, %v30240_v29 }
0x2c0c   :  { %v20935_v31 = vadd.f32 1.0, %v30242_v20 }
0x2c0d   :  { %30243 = vrcp.f32 %v20418_v3 }
0x2c0e   :  { %30245 = vrcp.f32 %v20935_v31 }
0x2c17   :  { %v30244_v9 = vpop.eup %30243 }
0x2c18   :  { %v30246_v27 = vpop.eup %30245  ;;  %v20433_v63 = vsub.f32 1.0, %v30244_v9  ;;  %v20439_v49 = vmul.f32 %v30244_v9, %v33577_v19 }
0x2c19   :  { %v20950_v21 = vsub.f32 1.0, %v30246_v27  ;;  %v20956_v58 = vmul.f32 %v30246_v27, %v33589_v41 }
0x2c70   :  { %v20424_v2 = vpop.permute.xlu0 %20423 }
0x2c71   :  { %v20426_v51 = vmul.f32 %v30244_v9, %v20424_v2  ;;  %v20941_v16 = vpop.permute.xlu1 %20940 }
0x2c72   :  { %v20943_v30 = vmul.f32 %v30246_v27, %v20941_v16 }
0x2c73   :  { %20428 = vrot.lane.b32.xlu0 %v20426_v51, %s30536_s23 }
0x2c74   :  { %20945 = vrot.lane.b32.xlu1 %v20943_v30, %s30536_s23 }
0x2ce5   :  { %v20429_v61 = vpop.permute.xlu0 %20428 }
0x2ce6   :  { %v20431_v54 = vadd.f32 %v20429_v61, %v19922_v56  ;;  %v20946_v46 = vpop.permute.xlu1 %20945 }
0x2ce7   :  { %v20948_v45 = vadd.f32 %v20946_v46, %v19923_v48 }
0x2ce8   :  { %30247 = vtanh.f32 %v20431_v54 }
0x2ce9   :  { %30249 = vtanh.f32 %v20948_v45 }
0x2cf2   :  { %v30248_v59 = vpop.eup %30247 }
0x2cf3   :  { %v30250_v5 = vpop.eup %30249  ;;  %20435 = vrot.lane.b32.xlu0 %v30248_v59, %s30538_s12 }
0x2cf4   :  { %20952 = vrot.lane.b32.xlu1 %v30250_v5, %s30538_s12 }
0x2d65   :  { %v20436_v33 = vpop.permute.xlu0 %20435 }
0x2d66   :  { %v20438_v38 = vmul.f32 %v20436_v33, %v20433_v63  ;;  %v20953_v15 = vpop.permute.xlu1 %20952 }
0x2d67   :  { %v20955_v36 = vmul.f32 %v20953_v15, %v20950_v21 }
0x2d68   :  { %v20440_v52 = vadd.f32 %v20439_v49, %v20438_v38 }
0x2d69   :  { %v20957_v14 = vadd.f32 %v20956_v58, %v20955_v36  ;;  %v22026_v36 = vld [vmem:[#allocation23] sm:$0xff] }
0x2d6a   :  { %v20960_v57 = vsel %vm2857_vm7, %v20440_v52, 0.0  ;;  %v33697_v44 = vsel %vm2857_vm7, %v20440_v52, %v33577_v19  ;;  %v22027_v52 = vld [vmem:[#allocation23 + $0x8] sm:$0xff] }
0x2d6b   :  { %v33700_v55 = vadd.f32 %v20960_v57, %v33580_v26  ;;  %v20961_v42 = vsel %vm2856_vm8, %v20957_v14, 0.0  ;;  %20967 = vrot.lane.b32.xlu0 %v33697_v44, %s30538_s12  ;;  %v33709_v18 = vsel %vm2856_vm8, %v20957_v14, %v33589_v41  ;;  %v22028_v14 = vld [vmem:[#allocation23 + $0x10] sm:$0xff]  ;;  %v22036_v57 = vand.u32 4294901760, %v22026_v36 }
0x2d6c   :  { %21484 = vrot.lane.b32.xlu1 %v33709_v18, %s30538_s12  ;;  %v33714_v19 = vadd.f32 %v20961_v42, %v33592_v6  ;;  %v22039_v42 = vand.u32 4294901760, %v22027_v52 }
0x2ddd   :  { %v20968_v43 = vpop.permute.xlu0 %20967 }
0x2dde   :  { %v20969_v26 = vsel %vm1794_vm6, %v20968_v43, 0  ;;  %v21485_v32 = vpop.permute.xlu1 %21484  ;;  %v22029_v43 = vld [vmem:[#allocation23 + $0x18] sm:$0xff] }
0x2ddf   :  { %v33717_v56 = vand.u32 4294901760, %v20969_v26  ;;  %v21486_v37 = vsel %vm1794_vm6, %v21485_v32, 0  ;;  %v22045_v32 = vand.u32 4294901760, %v22029_v43 }
0x2de0   :  { %v33720_v48 = vand.u32 4294901760, %v21486_v37 }
0x2de1   :  { %v21041_v8 = vsub.f32 %v20969_v26, %v33717_v56  ;;  %v22042_v26 = vand.u32 4294901760, %v22028_v14 }
0x2de2   :  { %v21558_v41 = vsub.f32 %v21486_v37, %v33720_v48  ;;  %v33811_v37 = vsub.f32 %v22026_v36, %v22036_v57 }
0x2de3   :  { %v21042_v35 = vand.u32 4294901760, %v21041_v8 }
0x2de4   :  { %v21559_v53 = vand.u32 4294901760, %v21558_v41 }
0x2de5   :  { %v21043_v29 = vsub.f32 %v21041_v8, %v21042_v35 }
0x2de6   :  { %v21560_v20 = vsub.f32 %v21558_v41, %v21559_v53 }
0x2de7   :  { %v21044_v6 = vand.u32 4294901760, %v21043_v29 }
0x2de8   :  { %v21561_v3 = vand.u32 4294901760, %v21560_v20 }
0x2de9   :  { %27667 = vmatmul.mubr.f32.vlgmr.msra.gmra.mrb[46].mxu0 %v21044_v6 }
0x2dea   :  { %27733 = vmatmul.mubr.f32.vlgmr.msra.gmra.mrb[54].mxu1 %v21561_v3  ;;  %29268 = vmatpush3.bf16.msra.mxu0 %v32817_v4 }
0x2deb   :  { %29304 = vmatpush3.bf16.msra.mxu1 %v32815_v23  ;;  %29269 = vmatprep.subr.bf16.mxu0 %v30533_v7 }
0x2dec   :  { %29305 = vmatprep.subr.bf16.mxu1 %v30533_v7  ;;  %27677 = vmatprep.mubr.msk.f32.mxu0 %vm30534_vm2, %v30535_v34 }
0x2ded   :  { %27743 = vmatprep.mubr.msk.f32.mxu1 %vm30534_vm2, %v30535_v34 }
0x2dee   :  { %29271 = vmatpush3.bf16.msra.mxu0 %v32829_v13 }
0x2def   :  { %29307 = vmatpush3.bf16.msra.mxu1 %v32827_v17  ;;  %29272 = vmatprep.subr.bf16.mxu0 %v30533_v7 }
0x2df0   :  { %29308 = vmatprep.subr.bf16.mxu1 %v30533_v7 }
0x2df1   :  { %27678 = vmatmul.mubr.f32.vlgmr.msra.gmra.mrb[46].mxu0 %v33717_v56 }
0x2df2   :  { %27744 = vmatmul.mubr.f32.vlgmr.msra.gmra.mrb[54].mxu1 %v33720_v48  ;;  %29274 = vmatpush3.bf16.msra.mxu0 %v32845_v0 }
0x2df3   :  { %29310 = vmatpush3.bf16.msra.mxu1 %v32841_v50  ;;  %29275 = vmatprep.subr.bf16.mxu0 %v30533_v7  ;;  %v20965_v50 = vld [vmem:[#allocation3] sm:$0xff] }
0x2df4   :  { %29311 = vmatprep.subr.bf16.mxu1 %v30533_v7  ;;  %27688 = vmatprep.mubr.msk.f32.mxu0 %vm30534_vm2, %v30535_v34 }
0x2df5   :  { %27754 = vmatprep.mubr.msk.f32.mxu1 %vm30534_vm2, %v30535_v34 }
0x2df6   :  { %29277 = vmatpush3.bf16.msra.mxu0 %v32859_v47 }
0x2df7   :  { %29313 = vmatpush3.bf16.msra.mxu1 %v32855_v22  ;;  %29278 = vmatprep.subr.bf16.mxu0 %v30533_v7  ;;  %v20964_v22 = vld [vmem:[#allocation2 + $0x38] sm:$0xff] }
0x2df8   :  { %29314 = vmatprep.subr.bf16.mxu1 %v30533_v7 }
0x2df9   :  { %27689 = vmatmul.mubr.f32.vlgmr.msra.gmra.mrb[46].mxu0 %v21041_v8  ;;  %v33815_v8 = vsub.f32 %v22028_v14, %v22042_v26 }
0x2dfa   :  { %27755 = vmatmul.mubr.f32.vlgmr.msra.gmra.mrb[54].mxu1 %v21558_v41  ;;  %29280 = vmatpush3.bf16.msra.mxu0 %v32747_v11  ;;  %v33818_v41 = vsub.f32 %v22029_v43, %v22045_v32 }
0x2dfb   :  { %29316 = vmatpush3.bf16.msra.mxu1 %v32745_v62  ;;  %29281 = vmatprep.subr.bf16.mxu0 %v30533_v7  ;;  %v22131_v29 = vand.u32 4294901760, %v33815_v8 }
0x2dfc   :  { %29317 = vmatprep.subr.bf16.mxu1 %v30533_v7  ;;  %27699 = vmatprep.mubr.msk.f32.mxu0 %vm30534_vm2, %v30535_v34  ;;  %v22138_v20 = vand.u32 4294901760, %v33818_v41 }
0x2dfd   :  { %27765 = vmatprep.mubr.msk.f32.mxu1 %vm30534_vm2, %v30535_v34 }
0x2dfe   :  { %29283 = vmatpush3.bf16.msra.mxu0 %v32770_v24 }
0x2dff   :  { %29319 = vmatpush3.bf16.msra.mxu1 %v32767_v10  ;;  %29284 = vmatprep.subr.bf16.mxu0 %v30533_v7 }
0x2e00   :  { %29320 = vmatprep.subr.bf16.mxu1 %v30533_v7 }
0x2e01   :  { %27700 = vmatmul.mubr.f32.vlgmr.msra.gmra.mrb[46].mxu0 %v21042_v35  ;;  %v22117_v35 = vand.u32 4294901760, %v33811_v37 }
0x2e02   :  { %27766 = vmatmul.mubr.f32.vlgmr.msra.gmra.mrb[54].mxu1 %v21559_v53  ;;  %29286 = vmatpush3.bf16.msra.mxu0 %v32893_v40 }
0x2e03   :  { %29322 = vmatpush3.bf16.msra.mxu1 %v32887_v60  ;;  %29287 = vmatprep.subr.bf16.mxu0 %v30533_v7  ;;  %v22118_v6 = vsub.f32 %v33811_v37, %v22117_v35 }
0x2e04   :  { %29323 = vmatprep.subr.bf16.mxu1 %v30533_v7  ;;  %27710 = vmatprep.mubr.msk.f32.mxu0 %vm30534_vm2, %v30535_v34 }
0x2e05   :  { %27776 = vmatprep.mubr.msk.f32.mxu1 %vm30534_vm2, %v30535_v34 }
0x2e06   :  { %29289 = vmatpush3.bf16.msra.mxu0 %v32911_v39 }
0x2e07   :  { %29325 = vmatpush3.bf16.msra.mxu1 %v32905_v12  ;;  %29290 = vmatprep.subr.bf16.mxu0 %v30533_v7 }
0x2e08   :  { %29326 = vmatprep.subr.bf16.mxu1 %v30533_v7 }
0x2e09   :  { %27711 = vmatmul.mubr.f32.vlgmr.msra.gmra.mrb[46].mxu0 %v33717_v56 }
0x2e0a   :  { %27777 = vmatmul.mubr.f32.vlgmr.msra.gmra.mrb[54].mxu1 %v33720_v48  ;;  %29292 = vmatpush3.bf16.msra.mxu0 %v32747_v11 }
0x2e0b   :  { %29328 = vmatpush3.bf16.msra.mxu1 %v32745_v62  ;;  %29293 = vmatprep.subr.bf16.mxu0 %v30533_v7  ;;  %v30265_v62 = vld [vmem:[%s34108_s9] sm:$0xff] }
0x2e0c   :  { %29329 = vmatprep.subr.bf16.mxu1 %v30533_v7  ;;  %27721 = vmatprep.mubr.msk.f32.mxu0 %vm30534_vm2, %v30535_v34  ;;  %v22005_v11 = vsel %vm22004_vm13, %v30265_v62, -inf  ;;  %v22132_v62 = vsub.f32 %v33815_v8, %v22131_v29 }
0x2e0d   :  { %27787 = vmatprep.mubr.msk.f32.mxu1 %vm30534_vm2, %v30535_v34  ;;  %22006 = vmax.xlane.f32.xlu1 %v22005_v11  ;;  %v22139_v11 = vsub.f32 %v33818_v41, %v22138_v20 }
0x2e0e   :  { %29295 = vmatpush3.bf16.msra.mxu0 %v32770_v24 }
0x2e0f   :  { %29331 = vmatpush3.bf16.msra.mxu1 %v32767_v10  ;;  %29332 = vmatprep.subr.bf16.mxu0 %v30533_v7 }
0x2e10   :  { %29338 = vmatprep.subr.bf16.mxu1 %v30533_v7 }
0x2e11   :  { %27722 = vmatmul.mubr.f32.vlgmr.msra.gmra.mrb[46].mxu0 %v33717_v56 }
0x2e12   :  { %27788 = vmatmul.mubr.f32.vlgmr.msra.gmra.mrb[54].mxu1 %v33720_v48  ;;  %27798 = vmatprep.mubr.msk.f32.mxu0 %vm30534_vm2, %v30535_v34  ;;  %v33813_v48 = vsub.f32 %v22027_v52, %v22039_v42 }
0x2e13   :  { %27809 = vmatprep.mubr.msk.f32.mxu1 %vm30534_vm2, %v30535_v34 }
0x2e14   :  { %v22124_v53 = vand.u32 4294901760, %v33813_v48 }
0x2e16   :  { %v22125_v3 = vsub.f32 %v33813_v48, %v22124_v53 }
0x2ee4   :  { %v21452_v10 = vpop.f32.mrb[46].mxu0 }
0x2ee5   :  { %v21969_v24 = vpop.f32.mrb[54].mxu1  ;;  %v27723_v23 = vpop.f32.mrb[47].mxu0  ;;  %v21463_v13 = vadd.f32 %v21452_v10, %v32970_v28  ;;  %v21456_v47 = vadd.f32 %v21452_v10, %v20964_v22  ;;  %v22119_v10 = vand.u32 4294901760, %v22118_v6 }
0x2ee6   :  { %v21980_v4 = vadd.f32 %v21969_v24, %v32972_v25  ;;  %v27789_v17 = vpop.f32.mrb[55].mxu1  ;;  %v21973_v0 = vadd.f32 %v21969_v24, %v20965_v50  ;;  %v22007_v25 = vpop.xlane.xlu1 %22006  ;;  %v22126_v24 = vand.u32 4294901760, %v22125_v3  ;;  %v22133_v23 = vand.u32 4294901760, %v22132_v62 }
0x2ee7   :  { %v23580_v40 = vmul.f32 -1.442695, %v21456_v47  ;;  %v22008_v2 = vrot.slane %v22007_v25, 4  ;;  %v29348_v62 = vpack.c.bf16 %v33818_v41, %v33815_v8 }
0x2ee8   :  { %21982 = vrot.lane.b32.xlu0 %v21980_v4, %s30536_s23  ;;  %v23581_v60 = vmul.f32 -1.442695, %v21973_v0  ;;  %v22140_v4 = vand.u32 4294901760, %v22139_v11  ;;  %v29339_v17 = vpack.c.bf16 %v22126_v24, %v22119_v10 }
0x2ee9   :  { %v22009_v27 = vmax.f32 %v22007_v25, %v22008_v2 }
0x2eea   :  { %30251 = vpow2.f32 %v23581_v60  ;;  %29340 = vmatpush3.bf16.msra.mxu1 %v29339_v17  ;;  %v29357_v17 = vpack.c.bf16 %v22124_v53, %v22117_v35 }
0x2eeb   :  { %30253 = vpow2.f32 %v23580_v40  ;;  %v22010_v28 = vrot.slane %v22009_v27, 2  ;;  %29341 = vmatprep.subr.bf16.mxu1 %v30533_v7 }
0x2eec   :  { %21465 = vrot.lane.b32.xlu0 %v21463_v13, %s30536_s23  ;;  %v29342_v13 = vpack.c.bf16 %v22140_v4, %v22133_v23 }
0x2eed   :  { %v22011_v51 = vmax.f32 %v22009_v27, %v22010_v28 }
0x2eee   :  { %29343 = vmatpush3.bf16.msra.mxu1 %v29342_v13 }
0x2eef   :  { %v22012_v54 = vrot.slane %v22011_v51, 1  ;;  %29350 = vmatprep.subr.bf16.mxu1 %v30533_v7 }
0x2ef1   :  { %v22013_v46 = vmax.f32 %v22011_v51, %v22012_v54  ;;  %v33859_v54 = vld [vmem:[#allocation21 + $0x8] sm:$0xff] }
0x2ef3   :  { %30045 = vpush %v22013_v46  ;;  %v22529_v46 = vand.u32 4294901760, %v33859_v54 }
0x2ef4   :  { %v30252_v12 = vpop.eup %30251 }
0x2ef5   :  { %v21977_v39 = vadd.f32 1.0, %v30252_v12  ;;  %v30254_v31 = vpop.eup %30253 }
0x2ef6   :  { %v21460_v9 = vadd.f32 1.0, %v30254_v31 }
0x2ef7   :  { %30255 = vrcp.f32 %v21977_v39  ;;  %v33843_v39 = vpack.c.bf16 %v22045_v32, %v22042_v26 }
0x2ef8   :  { %30257 = vrcp.f32 %v21460_v9 }
0x2f01   :  { %v33802_v16 = vpop.eup %30255 }
0x2f02   :  { %v33806_v45 = vpop.eup %30257  ;;  %v21992_v0 = vsub.f32 1.0, %v33802_v16  ;;  %v21998_v47 = vmul.f32 %v33802_v16, %v33709_v18 }
0x2f03   :  { %v21475_v12 = vsub.f32 1.0, %v33806_v45  ;;  %v21481_v25 = vmul.f32 %v33806_v45, %v33697_v44  ;;  %v33857_v44 = vld [vmem:[#allocation21] sm:$0xff] }
0x2f24   :  { %s30046_s9 = spop %30045 }
0x2f25   :  { %s22015_s29 = smax.f32 %s30539_s19, %s30046_s9 }
0x2f26   :  { %v22016_v63 = vstv %s22015_s29 }
0x2f27   :  { %30259 = vrcp.f32 %v22016_v63  ;;  %v33876_v63 = vsub.f32 %v33859_v54, %v22529_v46 }
0x2f31   :  { %v30260_v33 = vpop.eup %30259 }
0x2f32   :  { %30047 = vpush %v30260_v33 }
0x2f5a   :  { %v21983_v30 = vpop.permute.xlu0 %21982 }
0x2f5b   :  { %v21985_v61 = vmul.f32 %v33802_v16, %v21983_v30 }
0x2f5d   :  { %21987 = vrot.lane.b32.xlu0 %v21985_v61, %s30536_s23 }
0x2f5e   :  { %v21466_v59 = vpop.permute.xlu0 %21465 }
0x2f5f   :  { %v21468_v5 = vmul.f32 %v33806_v45, %v21466_v59  ;;  %v33863_v45 = vld [vmem:[#allocation21 + $0x10] sm:$0xff]  ;;  %v33865_v59 = vld [vmem:[#allocation21 + $0x18] sm:$0xff] }
0x2f60   :  { %v22532_v33 = vand.u32 4294901760, %v33863_v45 }
0x2f61   :  { %21470 = vrot.lane.b32.xlu0 %v21468_v5, %s30536_s23 }
0x2f62   :  { %v33887_v36 = vsub.f32 %v33863_v45, %v22532_v33 }
0x2f63   :  { %s30048_s23 = spop %30047 }
0x2f64   :  { %v22019_v27 = vstv %s30048_s23  ;;  %v22621_v32 = vand.u32 4294901760, %v33887_v36 }
0x2f66   :  { %v22622_v24 = vsub.f32 %v33887_v36, %v22621_v32 }
0x2fcf   :  { %v21988_v21 = vpop.permute.xlu0 %21987 }
0x2fd0   :  { %v21990_v49 = vadd.f32 %v21988_v21, %v20965_v50  ;;  %v29333_v50 = vpack.c.bf16 %v22039_v42, %v22036_v57  ;;  %v22535_v21 = vand.u32 4294901760, %v33865_v59  ;;  %v29345_v42 = vpack.c.bf16 %v33813_v48, %v33811_v37 }
0x2fd1   :  { %v29360_v37 = vpack.c.bf16 %v22138_v20, %v22131_v29 }
0x2fd2   :  { %30261 = vtanh.f32 %v21990_v49  ;;  %29334 = vmatpush3.bf16.msra.mxu0 %v29333_v50  ;;  %v33892_v52 = vsub.f32 %v33865_v59, %v22535_v21  ;;  %v29372_v35 = vpack.c.bf16 %v22535_v21, %v22532_v33 }
0x2fd3   :  { %v21471_v38 = vpop.permute.xlu0 %21470  ;;  %29335 = vmatprep.subr.bf16.mxu0 %v30533_v7 }
0x2fd4   :  { %v21473_v15 = vadd.f32 %v21471_v38, %v20964_v22 }
0x2fd6   :  { %30263 = vtanh.f32 %v21473_v15  ;;  %29337 = vmatpush3.bf16.msra.mxu0 %v33843_v39 }
0x2fd7   :  { %29344 = vmatprep.subr.bf16.mxu0 %v30533_v7 }
0x2fdc   :  { %v30262_v58 = vpop.eup %30261 }
0x2fdd   :  { %21994 = vrot.lane.b32.xlu0 %v30262_v58, %s30538_s12  ;;  %v22614_v58 = vand.u32 4294901760, %v33876_v63 }
0x2fdf   :  { %v22615_v26 = vsub.f32 %v33876_v63, %v22614_v58 }
0x2fe0   :  { %v30264_v56 = vpop.eup %30263 }
0x2fe1   :  { %21477 = vrot.lane.b32.xlu0 %v30264_v56, %s30538_s12  ;;  %v22628_v56 = vand.u32 4294901760, %v33892_v52  ;;  %v22616_v10 = vand.u32 4294901760, %v22615_v26 }
0x2fe3   :  { %v22629_v23 = vsub.f32 %v33892_v52, %v22628_v56 }
0x304f   :  { %v21995_v22 = vpop.permute.xlu0 %21994 }
0x3050   :  { %v21997_v60 = vmul.f32 %v21995_v22, %v21992_v0  ;;  %v22630_v0 = vand.u32 4294901760, %v22629_v23 }
0x3052   :  { %v21999_v40 = vadd.f32 %v21998_v47, %v21997_v60  ;;  %v29384_v60 = vpack.c.bf16 %v33892_v52, %v33887_v36 }
0x3053   :  { %v21478_v31 = vpop.permute.xlu0 %21477 }
0x3054   :  { %v22001_v9 = vsel %vm1786_vm5, %v21999_v40, 0.0  ;;  %v21480_v2 = vmul.f32 %v21478_v31, %v21475_v12  ;;  %v29396_v12 = vpack.c.bf16 %v22628_v56, %v22621_v32  ;;  %v23019_v31 = vld [vmem:[%s34080_s21 + $0x8] sm:$0xff] }
0x3055   :  { %v22003_v18 = vadd.f32 %v22001_v9, %v33714_v19  ;;  %v22526_v19 = vand.u32 4294901760, %v33857_v44 }
0x3056   :  { %v21482_v28 = vadd.f32 %v21481_v25, %v21480_v2  ;;  %v23036_v25 = vand.u32 4294901760, %v23019_v31 }
0x3057   :  { %v22021_v51 = vmul.f32 %v22019_v27, %v22003_v18  ;;  %v29369_v8 = vpack.c.bf16 %v22529_v46, %v22526_v19 }
0x3058   :  { %v22000_v16 = vsel %vm1787_vm4, %v21482_v28, 0.0  ;;  %v23020_v28 = vld [vmem:[%s34080_s21 + $0x10] sm:$0xff] }
0x3059   :  { %v22002_v30 = vadd.f32 %v22000_v16, %v33700_v55  ;;  %22031 = vrot.lane.b32.xlu0 %v22021_v51, %s30538_s12  ;;  %v33870_v55 = vsub.f32 %v33857_v44, %v22526_v19  ;;  %v23021_v51 = vld [vmem:[%s34080_s21 + $0x18] sm:$0xff]  ;;  %v23039_v16 = vand.u32 4294901760, %v23020_v28 }
0x305b   :  { %v22020_v61 = vmul.f32 %v22019_v27, %v22002_v30  ;;  %v22607_v15 = vand.u32 4294901760, %v33870_v55  ;;  %v29381_v29 = vpack.c.bf16 %v33876_v63, %v33870_v55  ;;  %v33992_v27 = vsub.f32 %v23019_v31, %v23036_v25 }
0x305c   :  { %v23042_v30 = vand.u32 4294901760, %v23021_v51  ;;  %v34006_v19 = vsub.f32 %v23020_v28, %v23039_v16 }
0x305d   :  { %22521 = vrot.lane.b32.xlu0 %v22020_v61, %s30538_s12  ;;  %v22608_v43 = vsub.f32 %v33870_v55, %v22607_v15  ;;  %v29393_v40 = vpack.c.bf16 %v22614_v58, %v22607_v15  ;;  %v23121_v44 = vand.u32 4294901760, %v33992_v27 }
0x305e   :  { %v34004_v54 = vpack.c.bf16 %v23042_v30, %v23039_v16  ;;  %v34008_v46 = vsub.f32 %v23021_v51, %v23042_v30  ;;  %v23128_v55 = vand.u32 4294901760, %v34006_v19 }
0x305f   :  { %v22609_v11 = vand.u32 4294901760, %v22608_v43  ;;  %v23122_v59 = vsub.f32 %v33992_v27, %v23121_v44 }
0x3060   :  { %v23129_v33 = vsub.f32 %v34006_v19, %v23128_v55  ;;  %v29420_v52 = vpack.c.bf16 %v34008_v46, %v34006_v19 }
0x3061   :  { %v29375_v13 = vpack.c.bf16 %v22616_v10, %v22609_v11  ;;  %v23123_v63 = vand.u32 4294901760, %v23122_v59 }
0x30cb   :  { %v22032_v1 = vpop.permute.xlu0 %22031 }
0x30cc   :  { %v22033_v5 = vsel %vm1794_vm6, %v22032_v1, 0 }
0x30cd   :  { %v22104_v49 = vand.u32 4294901760, %v22033_v5 }
0x30cf   :  { %v22105_v38 = vsub.f32 %v22033_v5, %v22104_v49  ;;  %27810 = vmatmul.mubr.f32.vlgmr.msra.gmra.mrb[56].mxu1 %v22104_v49  ;;  %v22522_v3 = vpop.permute.xlu0 %22521  ;;  %v23135_v5 = vand.u32 4294901760, %v34008_v46 }
0x30d0   :  { %29352 = vmatpush3.bf16.msra.mxu1 %v29333_v50  ;;  %27831 = vmatprep.mubr.msk.f32.mxu1 %vm30534_vm2, %v30535_v34  ;;  %v22523_v4 = vsel %vm1794_vm6, %v22522_v3, 0 }
0x30d1   :  { %v22106_v14 = vand.u32 4294901760, %v22105_v38  ;;  %29353 = vmatprep.subr.bf16.mxu1 %v30533_v7  ;;  %v22594_v22 = vand.u32 4294901760, %v22523_v4  ;;  %v23136_v21 = vsub.f32 %v34008_v46, %v23135_v5  ;;  %v23583_v46 = vld [vmem:[#allocation6] ss:$0 sm:$0xff] }
0x30d3   :  { %v22107_v57 = vsub.f32 %v22105_v38, %v22106_v14  ;;  %v22595_v48 = vsub.f32 %v22523_v4, %v22594_v22  ;;  %v23137_v15 = vand.u32 4294901760, %v23136_v21 }
0x30d4   :  { %29355 = vmatpush3.bf16.msra.mxu1 %v33843_v39 }
0x30d5   :  { %v22108_v6 = vand.u32 4294901760, %v22107_v57  ;;  %29362 = vmatprep.subr.bf16.mxu1 %v30533_v7  ;;  %v22596_v41 = vand.u32 4294901760, %v22595_v48  ;;  %v34024_v57 = vpack.c.bf16 %v23135_v5, %v23128_v55 }
0x30d7   :  { %27832 = vmatmul.mubr.f32.vlgmr.msra.gmra.mrb[58].mxu1 %v22106_v14  ;;  %27799 = vmatmul.mubr.f32.vlgmr.msra.gmra.mrb[48].mxu0 %v22108_v6  ;;  %v22597_v53 = vsub.f32 %v22595_v48, %v22596_v41 }
0x30d8   :  { %29346 = vmatpush3.bf16.msra.mxu0 %v29345_v42  ;;  %29364 = vmatpush3.bf16.msra.mxu1 %v29333_v50  ;;  %v22623_v50 = vand.u32 4294901760, %v22622_v24 }
0x30d9   :  { %29347 = vmatprep.subr.bf16.mxu0 %v30533_v7  ;;  %29365 = vmatprep.subr.bf16.mxu1 %v30533_v7  ;;  %v22598_v20 = vand.u32 4294901760, %v22597_v53 }
0x30da   :  { %27820 = vmatprep.mubr.msk.f32.mxu0 %vm30534_vm2, %v30535_v34  ;;  %27853 = vmatprep.mubr.msk.f32.mxu1 %vm30534_vm2, %v30535_v34  ;;  %v29378_v47 = vpack.c.bf16 %v22630_v0, %v22623_v50 }
0x30dc   :  { %29349 = vmatpush3.bf16.msra.mxu0 %v29348_v62  ;;  %29367 = vmatpush3.bf16.msra.mxu1 %v33843_v39  ;;  %v23018_v39 = vld [vmem:[%s34080_s21] sm:$0xff] }
0x30dd   :  { %29356 = vmatprep.subr.bf16.mxu0 %v30533_v7  ;;  %29374 = vmatprep.subr.bf16.mxu1 %v30533_v7  ;;  %v23033_v9 = vand.u32 4294901760, %v23018_v39 }
0x30df   :  { %27821 = vmatmul.mubr.f32.vlgmr.msra.gmra.mrb[50].mxu0 %v22105_v38  ;;  %27854 = vmatmul.mubr.f32.vlgmr.msra.gmra.mrb[60].mxu1 %v22104_v49  ;;  %v33988_v2 = vpack.c.bf16 %v23036_v25, %v23033_v9  ;;  %v33990_v18 = vsub.f32 %v23018_v39, %v23033_v9  ;;  %v23130_v38 = vand.u32 4294901760, %v23129_v33 }
0x30e0   :  { %29358 = vmatpush3.bf16.msra.mxu0 %v29357_v17  ;;  %29376 = vmatpush3.bf16.msra.mxu1 %v29375_v13 }
0x30e1   :  { %29359 = vmatprep.subr.bf16.mxu0 %v30533_v7  ;;  %29377 = vmatprep.subr.bf16.mxu1 %v30533_v7  ;;  %v23114_v61 = vand.u32 4294901760, %v33990_v18  ;;  %v29414_v58 = vpack.c.bf16 %v23137_v15, %v23130_v38  ;;  %v29417_v36 = vpack.c.bf16 %v33992_v27, %v33990_v18 }
0x30e2   :  { %27842 = vmatprep.mubr.msk.f32.mxu0 %vm30534_vm2, %v30535_v34  ;;  %27875 = vmatprep.mubr.msk.f32.mxu1 %vm30534_vm2, %v30535_v34 }
0x30e3   :  { %v23115_v45 = vsub.f32 %v33990_v18, %v23114_v61  ;;  %v34022_v14 = vpack.c.bf16 %v23121_v44, %v23114_v61  ;;  %v23582_v18 = vld [vmem:[%s34109_s28] ss:$0 sm:$0xff] }
0x30e4   :  { %29361 = vmatpush3.bf16.msra.mxu0 %v29360_v37  ;;  %29379 = vmatpush3.bf16.msra.mxu1 %v29378_v47 }
0x30e5   :  { %29368 = vmatprep.subr.bf16.mxu0 %v30533_v7  ;;  %29386 = vmatprep.subr.bf16.mxu1 %v30533_v7  ;;  %v23116_v1 = vand.u32 4294901760, %v23115_v45 }
0x30e7   :  { %27843 = vmatmul.mubr.f32.vlgmr.msra.gmra.mrb[52].mxu0 %v22104_v49  ;;  %27876 = vmatmul.mubr.f32.vlgmr.msra.gmra.mrb[62].mxu1 %v22594_v22  ;;  %v29411_v49 = vpack.c.bf16 %v23123_v63, %v23116_v1 }
0x30e8   :  { %29370 = vmatpush3.bf16.msra.mxu0 %v29369_v8  ;;  %29388 = vmatpush3.bf16.msra.mxu1 %v29369_v8 }
0x30e9   :  { %29371 = vmatprep.subr.bf16.mxu0 %v30533_v7  ;;  %29389 = vmatprep.subr.bf16.mxu1 %v30533_v7 }
0x30ea   :  { %27864 = vmatprep.mubr.msk.f32.mxu0 %vm30534_vm2, %v30535_v34  ;;  %27897 = vmatprep.mubr.msk.f32.mxu1 %vm30534_vm2, %v30535_v34 }
0x30ec   :  { %29373 = vmatpush3.bf16.msra.mxu0 %v29372_v35  ;;  %29391 = vmatpush3.bf16.msra.mxu1 %v29372_v35 }
0x30ed   :  { %29380 = vmatprep.subr.bf16.mxu0 %v30533_v7  ;;  %29398 = vmatprep.subr.bf16.mxu1 %v30533_v7 }
0x30ef   :  { %27865 = vmatmul.mubr.f32.vlgmr.msra.gmra.mrb[54].mxu0 %v22598_v20  ;;  %27898 = vmatmul.mubr.f32.vlgmr.msra.gmra.mrb[64].mxu1 %v22596_v41 }
0x30f0   :  { %29382 = vmatpush3.bf16.msra.mxu0 %v29381_v29  ;;  %29400 = vmatpush3.bf16.msra.mxu1 %v29369_v8 }
0x30f1   :  { %29383 = vmatprep.subr.bf16.mxu0 %v30533_v7  ;;  %29401 = vmatprep.subr.bf16.mxu1 %v30533_v7 }
0x30f2   :  { %27886 = vmatprep.mubr.msk.f32.mxu0 %vm30534_vm2, %v30535_v34  ;;  %27919 = vmatprep.mubr.msk.f32.mxu1 %vm30534_vm2, %v30535_v34 }
0x30f4   :  { %29385 = vmatpush3.bf16.msra.mxu0 %v29384_v60  ;;  %29403 = vmatpush3.bf16.msra.mxu1 %v29372_v35 }
0x30f5   :  { %29392 = vmatprep.subr.bf16.mxu0 %v30533_v7 }
0x30f7   :  { %27887 = vmatmul.mubr.f32.vlgmr.msra.gmra.mrb[56].mxu0 %v22595_v48  ;;  %27920 = vmatmul.mubr.f32.vlgmr.msra.gmra.mrb[66].mxu1 %v22594_v22 }
0x30f8   :  { %29394 = vmatpush3.bf16.msra.mxu0 %v29393_v40  ;;  %27908 = vmatprep.mubr.msk.f32.mxu0 %vm30534_vm2, %v30535_v34 }
0x30f9   :  { %29395 = vmatprep.subr.bf16.mxu0 %v30533_v7 }
0x30fc   :  { %29397 = vmatpush3.bf16.msra.mxu0 %v29396_v12 }
0x30fd   :  { %29404 = vmatprep.subr.bf16.mxu0 %v30533_v7 }
0x30ff   :  { %27909 = vmatmul.mubr.f32.vlgmr.msra.gmra.mrb[58].mxu0 %v22594_v22 }
0x3100   :  { %27930 = vmatprep.mubr.msk.f32.mxu0 %vm30534_vm2, %v30535_v34  ;;  %29406 = vmatpush3.bf16.msra.mxu0 %v33988_v2 }
0x3101   :  { %29407 = vmatprep.subr.bf16.mxu0 %v30533_v7 }
0x3104   :  { %29409 = vmatpush3.bf16.msra.mxu0 %v34004_v54 }
0x3105   :  { %29410 = vmatprep.subr.bf16.mxu0 %v30533_v7 }
0x31a2   :  { %v22201_v42 = vpop.f32.mrb[56].mxu1 }
0x31a3   :  { %v27811_v43 = vpop.f32.mrb[57].mxu1 }
0x31aa   :  { %v22358_v26 = vpop.f32.mrb[58].mxu1  ;;  %v22110_v32 = vpop.f32.mrb[48].mxu0 }
0x31ab   :  { %v22202_v56 = vadd.f32 %v22201_v42, %v22110_v32  ;;  %v27833_v6 = vpop.f32.mrb[59].mxu1  ;;  %v27800_v3 = vpop.f32.mrb[49].mxu0 }
0x31b2   :  { %v22281_v62 = vpop.f32.mrb[50].mxu0  ;;  %v22516_v11 = vpop.f32.mrb[60].mxu1 }
0x31b3   :  { %v22282_v10 = vadd.f32 %v22281_v62, %v22202_v56  ;;  %v27822_v24 = vpop.f32.mrb[51].mxu0  ;;  %v27855_v23 = vpop.f32.mrb[61].mxu1 }
0x31b5   :  { %v22359_v4 = vadd.f32 %v22358_v26, %v22282_v10 }
0x31ba   :  { %v22441_v17 = vpop.f32.mrb[52].mxu0  ;;  %v22691_v13 = vpop.f32.mrb[62].mxu1 }
0x31bb   :  { %v22442_v50 = vadd.f32 %v22441_v17, %v22359_v4  ;;  %v27844_v0 = vpop.f32.mrb[53].mxu0  ;;  %v27877_v22 = vpop.f32.mrb[63].mxu1 }
0x31bd   :  { %v22517_v37 = vadd.f32 %v22516_v11, %v22442_v50 }
0x31c2   :  { %v22600_v47 = vpop.f32.mrb[54].mxu0  ;;  %v22848_v48 = vpop.f32.mrb[64].mxu1 }
0x31c3   :  { %v22601_v8 = vadd.f32 %v22600_v47, %v22517_v37  ;;  %v27866_v41 = vpop.f32.mrb[55].mxu0  ;;  %v27899_v35 = vpop.f32.mrb[65].mxu1 }
0x31c5   :  { %v22692_v53 = vadd.f32 %v22691_v13, %v22601_v8 }
0x31ca   :  { %v22771_v29 = vpop.f32.mrb[56].mxu0  ;;  %v23006_v20 = vpop.f32.mrb[66].mxu1 }
0x31cb   :  { %v22772_v60 = vadd.f32 %v22771_v29, %v22692_v53  ;;  %v27888_v40 = vpop.f32.mrb[57].mxu0  ;;  %v27921_v12 = vpop.f32.mrb[67].mxu1 }
0x31cd   :  { %v22849_v39 = vadd.f32 %v22848_v48, %v22772_v60 }
0x31d2   :  { %v22931_v31 = vpop.f32.mrb[58].mxu0 }
0x31d3   :  { %v22932_v9 = vadd.f32 %v22931_v31, %v22849_v39  ;;  %v27910_v25 = vpop.f32.mrb[59].mxu0 }
0x31d5   :  { %v23007_v27 = vadd.f32 %v23006_v20, %v22932_v9 }
0x31d7   :  { %v23017_v28 = vadd.f32 %v23582_v18, %v23007_v27 }
0x31d9   :  { %v23030_v51 = vsel %vm1794_vm6, %v23017_v28, 0 }
0x31da   :  { %v23101_v16 = vand.u32 4294901760, %v23030_v51 }
0x31dc   :  { %v23102_v30 = vsub.f32 %v23030_v51, %v23101_v16 }
0x31de   :  { %v23103_v61 = vand.u32 4294901760, %v23102_v30 }
0x31e0   :  { %v23104_v44 = vsub.f32 %v23102_v30, %v23103_v61 }
0x31e2   :  { %v23105_v19 = vand.u32 4294901760, %v23104_v44 }
0x31e4   :  { %27931 = vmatmul.mubr.f32.vlgmr.msra.gmra.mrb[60].mxu0 %v23105_v19 }
0x31e5   :  { %29412 = vmatpush3.bf16.msra.mxu0 %v29411_v49  ;;  %27941 = vmatprep.mubr.msk.f32.mxu0 %vm30534_vm2, %v30535_v34 }
0x31e6   :  { %29413 = vmatprep.subr.bf16.mxu0 %v30533_v7 }
0x31e9   :  { %29415 = vmatpush3.bf16.msra.mxu0 %v29414_v58 }
0x31ea   :  { %29416 = vmatprep.subr.bf16.mxu0 %v30533_v7 }
0x31ec   :  { %27942 = vmatmul.mubr.f32.vlgmr.msra.gmra.mrb[60].mxu0 %v23101_v16 }
0x31ed   :  { %29418 = vmatpush3.bf16.msra.mxu0 %v29417_v36  ;;  %27952 = vmatprep.mubr.msk.f32.mxu0 %vm30534_vm2, %v30535_v34 }
0x31ee   :  { %29419 = vmatprep.subr.bf16.mxu0 %v30533_v7 }
0x31f1   :  { %29421 = vmatpush3.bf16.msra.mxu0 %v29420_v52 }
0x31f2   :  { %29422 = vmatprep.subr.bf16.mxu0 %v30533_v7 }
0x31f4   :  { %27953 = vmatmul.mubr.f32.vlgmr.msra.gmra.mrb[60].mxu0 %v23102_v30 }
0x31f5   :  { %29424 = vmatpush3.bf16.msra.mxu0 %v33988_v2  ;;  %27963 = vmatprep.mubr.msk.f32.mxu0 %vm30534_vm2, %v30535_v34 }
0x31f6   :  { %29425 = vmatprep.subr.bf16.mxu0 %v30533_v7 }
0x31f9   :  { %29427 = vmatpush3.bf16.msra.mxu0 %v34004_v54 }
0x31fa   :  { %29428 = vmatprep.subr.bf16.mxu0 %v30533_v7 }
0x31fc   :  { %27964 = vmatmul.mubr.f32.vlgmr.msra.gmra.mrb[60].mxu0 %v23103_v61 }
0x31fd   :  { %29430 = vmatpush3.bf16.msra.mxu0 %v34022_v14  ;;  %27974 = vmatprep.mubr.msk.f32.mxu0 %vm30534_vm2, %v30535_v34 }
0x31fe   :  { %29431 = vmatprep.subr.bf16.mxu0 %v30533_v7 }
0x3201   :  { %29433 = vmatpush3.bf16.msra.mxu0 %v34024_v57 }
0x3202   :  { %29434 = vmatprep.subr.bf16.mxu0 %v30533_v7 }
0x3204   :  { %27975 = vmatmul.mubr.f32.vlgmr.msra.gmra.mrb[60].mxu0 %v23101_v16 }
0x3205   :  { %29436 = vmatpush3.bf16.msra.mxu0 %v33988_v2  ;;  %27985 = vmatprep.mubr.msk.f32.mxu0 %vm30534_vm2, %v30535_v34 }
0x3206   :  { %29437 = vmatprep.subr.bf16.mxu0 %v30533_v7 }
0x3209   :  { %29439 = vmatpush3.bf16.msra.mxu0 %v34004_v54 }
0x320c   :  { %27986 = vmatmul.mubr.f32.vlgmr.msra.gmra.mrb[60].mxu0 %v23101_v16 }
0x32df   :  { %v23513_v45 = vpop.f32.mrb[60].mxu0 }
0x32e0   :  { %v29466_v59 = vadd.f32 %v23583_v46, %v23513_v45  ;;  %v27987_v1 = vpop.f32.mrb[61].mxu0 }
0x32e2   :  { %23517 = vst.msk [vmem:[%s34110_s10] sm:$0xff] %vm22004_vm13, %v29466_v59 }
0x32e3   :  { %23522 = vsyncpa [#allocation8], 1 }
0x32e4   :  { %23523 = vsyncpa [#allocation10], 1 }
0x32e5   :  { %23524 = vsyncpa [#allocation13], 1 }
0x32e6   :  { %23525 = vsyncpa [#allocation16], 1 }
0x32e7   :  { %23526 = vsyncpa [#allocation19], 1 }
0x32e8   :  { %23527 = vsyncpa [#allocation22], 1 }

</bundles_post_ra>
